<compile_context>
chip_gen: v5e
topology: v5e:2x2
jax: 0.10.0
libtpu: 0.0.40
codegen_flags: <defaults>
</compile_context>

<pallas_src>
import functools

import jax
import jax.numpy as jnp
from jax import lax
from jax.experimental import pallas as pl
from jax.experimental.pallas import tpu as pltpu


# ---------------------------------------------------------------------------
# Pallas kernel: one grid step == one tile of TB batch elements.
# ---------------------------------------------------------------------------
def neural_ir_encoder_kernel(q_ids_smem, d_ids_smem,   # scalar prefetch (flat 1-D SMEM)
                             emb_ref,                  # (V, 1, D) VMEM-resident table
                             out_ref,                  # (1, 1, TB) lane-dense scores
                             prod_ref,                 # (TB//8, 8, D) VMEM scratch
                             *, lq, ld, tb, vocab):
    dmodel = emb_ref.shape[-1]
    f32 = jnp.float32
    base = pl.program_id(0) * tb        # first batch element of this tile

    def masked_row_sum(ids_smem, off, length):
        # sum_t (tok_t > 0) * E[tok_t]  accumulated in registers, (1, D)
        vec = jnp.zeros((1, dmodel), f32)
        for t in range(length):                          # static unroll (small L)
            tok = ids_smem[off + t]                      # SMEM scalar read
            row = emb_ref[jnp.minimum(tok, vocab - 1)]   # in-VMEM dynamic row load
            vec = vec + row.astype(f32) * (tok > 0).astype(f32)
        return vec

    def group_body(g, carry):
        # one sublane group of 8 batch elements
        q_rows, d_rows = [], []
        for s in range(8):
            bb = base + g * 8 + s
            q_rows.append(masked_row_sum(q_ids_smem, bb * lq, lq))
            d_rows.append(masked_row_sum(d_ids_smem, bb * ld, ld))
        q8 = jnp.concatenate(q_rows, axis=0)             # (8, D)
        d8 = jnp.concatenate(d_rows, axis=0)             # (8, D)
        prod_ref[g] = q8 * d8                            # dynamic leading-dim store
        return carry

    lax.fori_loop(0, tb // 8, group_body, 0, unroll=False)

    # score_b = sum_d q_vec[b,d] * d_vec[b,d]; contract D with a ones row so the
    # result comes out lane-dense (1, TB) with no transpose/diag extraction.
    prod = prod_ref[...].reshape(tb, dmodel)             # (TB, D), layout no-op
    ones = jnp.ones((1, dmodel), f32)
    score = lax.dot_general(ones, prod, (((1,), (1,)), ((), ())),
                            preferred_element_type=f32)  # (1, TB)
    out_ref[...] = score.reshape(1, 1, tb)


# ---------------------------------------------------------------------------
# Wrapper
# ---------------------------------------------------------------------------
def neural_ir_encoder_forward(q_tokens, d_tokens, emb_table, *, tb=128):
    """q_tokens: (B, Lq) int32, d_tokens: (B, Ld) int32,
    emb_table: (V, D) float -> scores (B,) float32."""
    B, Lq = q_tokens.shape
    _, Ld = d_tokens.shape
    V, D = emb_table.shape
    assert B % tb == 0 and tb % 8 == 0, "batch tile must divide B and be x8"
    nb = B // tb

    q_ids_flat = q_tokens.reshape(-1).astype(jnp.int32)   # tight 1-D SMEM padding
    d_ids_flat = d_tokens.reshape(-1).astype(jnp.int32)
    emb3d = emb_table.reshape(V, 1, D)                     # rows on the leading dim

    kernel = functools.partial(neural_ir_encoder_kernel,
                               lq=Lq, ld=Ld, tb=tb, vocab=V)

    grid_spec = pltpu.PrefetchScalarGridSpec(
        num_scalar_prefetch=2,
        grid=(nb,),
        in_specs=[
            # whole table, constant block index -> resident in VMEM, no re-DMA
            pl.BlockSpec((V, 1, D), lambda b, q_ids, d_ids: (0, 0, 0)),
        ],
        out_specs=pl.BlockSpec((1, 1, tb), lambda b, q_ids, d_ids: (b, 0, 0)),
        scratch_shapes=[
            pltpu.VMEM((tb // 8, 8, D), jnp.float32),      # q_vec * d_vec rows
        ],
    )

    itemsize = jnp.dtype(emb_table.dtype).itemsize
    flops = B * (2 * (Lq + Ld) * D + 4 * D)
    bytes_accessed = V * D * itemsize + B * (Lq + Ld) * 4 + B * 4
    cost = pl.CostEstimate(flops=int(flops), transcendentals=0,
                           bytes_accessed=int(bytes_accessed))

    scores = pl.pallas_call(
        kernel,
        out_shape=jax.ShapeDtypeStruct((nb, 1, tb), jnp.float32),
        grid_spec=grid_spec,
        compiler_params=pltpu.CompilerParams(
            dimension_semantics=("parallel",),
            vmem_limit_bytes=32 * 1024 * 1024),            # v7x-safe explicit budget
        cost_estimate=cost,
    )(q_ids_flat, d_ids_flat, emb3d)
    return scores.reshape(B)


# ---------------------------------------------------------------------------
# Pure-JAX reference (mirrors the PyTorch forward semantics)
# ---------------------------------------------------------------------------
def reference_forward(q_tokens, d_tokens, emb_table):
    q_emb = emb_table[q_tokens].astype(jnp.float32)        # (B, Lq, D)
    d_emb = emb_table[d_tokens].astype(jnp.float32)        # (B, Ld, D)
    q_mask = (q_tokens > 0).astype(jnp.float32)            # (B, Lq)
    d_mask = (d_tokens > 0).astype(jnp.float32)            # (B, Ld)
    sim = jnp.einsum("bqd,bkd->bqk", q_emb, d_emb)
    masked = sim * q_mask[:, :, None] * d_mask[:, None, :]
    return jnp.sum(masked, axis=(1, 2))


if __name__ == "__main__":
    key = jax.random.PRNGKey(0)
    k_emb, k_q, k_d = jax.random.split(key, 3)

    # TB=128 -> lane-dense output stores; nb=2 -> both TensorCores get work.
    B, Lq, Ld, D, V, TB = 256, 8, 16, 128, 512, 128

    emb_table = jax.random.normal(k_emb, (V, D), dtype=jnp.float32) * 0.1

    # Token ids with trailing padding (zeros) so masks are non-trivial.
    q_tokens = jax.random.randint(k_q, (B, Lq), 1, V, dtype=jnp.int32)
    d_tokens = jax.random.randint(k_d, (B, Ld), 1, V, dtype=jnp.int32)
    q_tokens = q_tokens.at[:, Lq - 2:].set(0)   # pad last 2 query positions
    d_tokens = d_tokens.at[:, Ld - 4:].set(0)   # pad last 4 doc positions

    out = neural_ir_encoder_forward(q_tokens, d_tokens, emb_table, tb=TB)
    out = jax.block_until_ready(out)

    ref = reference_forward(q_tokens, d_tokens, emb_table)
    assert out.shape == (B,)
    assert jnp.allclose(out, ref, atol=1e-3, rtol=1e-3), (out, ref)

    print("KERNEL_OK")
</pallas_src>

<mosaic_0001>
module attributes {stable_mosaic.version = 11 : i64} {
  func.func @neural_ir_encoder_kernel(%arg0: i32, %arg1: memref<2048xi32, #tpu.memory_space<smem>>, %arg2: memref<4096xi32, #tpu.memory_space<smem>>, %arg3: memref<512x1x128xf32, #tpu.memory_space<vmem>>, %arg4: memref<1x1x128xf32, #tpu.memory_space<vmem>>, %arg5: memref<16x8x128xf32, #tpu.memory_space<vmem>>) attributes {dimension_semantics = [#tpu.dimension_semantics<parallel>], iteration_bounds = array<i64: 2>, scalar_prefetch = 2 : i64, scratch_operands = 1 : i64, tpu.core_type = #tpu.core_type<tc>, window_params = [{pipeline_mode = #tpu.pipeline_mode<synchronous>, transform_indices = @transform_0, window_bounds = array<i64: 512, 1, 128>}, {transform_indices = @transform_1, window_bounds = array<i64: 1, 1, 128>}]} {
    %c128_i32 = arith.constant 128 : i32
    %0 = arith.muli %arg0, %c128_i32 : i32
    %c0_i32 = arith.constant 0 : i32
    %c16_i32 = arith.constant 16 : i32
    %1 = arith.addi %c0_i32, %c16_i32 : i32
    %c1_i32 = arith.constant 1 : i32
    scf.for %arg6 = %c0_i32 to %1 step %c1_i32  : i32 {
      %c8_i32 = arith.constant 8 : i32
      %8 = arith.muli %arg6, %c8_i32 : i32
      %9 = arith.addi %0, %8 : i32
      %c0_i32_7 = arith.constant 0 : i32
      %10 = arith.addi %9, %c0_i32_7 : i32
      %c8_i32_8 = arith.constant 8 : i32
      %11 = arith.muli %10, %c8_i32_8 : i32
      %cst_9 = arith.constant 0.000000e+00 : f32
      %12 = vector.broadcast %cst_9 : f32 to vector<1x128xf32>
      %c0_i32_10 = arith.constant 0 : i32
      %13 = arith.addi %11, %c0_i32_10 : i32
      %14 = arith.index_cast %13 : i32 to index
      %15 = memref.load %arg1[%14] : memref<2048xi32, #tpu.memory_space<smem>>
      %c511_i32 = arith.constant 511 : i32
      %16 = arith.minsi %15, %c511_i32 : i32
      %17 = arith.index_cast %16 : i32 to index
      %c0_11 = arith.constant 0 : index
      %c0_12 = arith.constant 0 : index
      %18 = vector.load %arg3[%17, %c0_11, %c0_12] : memref<512x1x128xf32, #tpu.memory_space<vmem>>, vector<1x1x128xf32>
      %19 = vector.shape_cast %18 : vector<1x1x128xf32> to vector<1x128xf32>
      %c0_i32_13 = arith.constant 0 : i32
      %20 = arith.cmpi sgt, %15, %c0_i32_13 : i32
      %21 = arith.extui %20 : i1 to i32
      %22 = arith.sitofp %21 : i32 to f32
      %23 = vector.broadcast %22 : f32 to vector<1x128xf32>
      %24 = arith.mulf %19, %23 : vector<1x128xf32>
      %25 = arith.addf %12, %24 : vector<1x128xf32>
      %c1_i32_14 = arith.constant 1 : i32
      %26 = arith.addi %11, %c1_i32_14 : i32
      %27 = arith.index_cast %26 : i32 to index
      %28 = memref.load %arg1[%27] : memref<2048xi32, #tpu.memory_space<smem>>
      %c511_i32_15 = arith.constant 511 : i32
      %29 = arith.minsi %28, %c511_i32_15 : i32
      %30 = arith.index_cast %29 : i32 to index
      %c0_16 = arith.constant 0 : index
      %c0_17 = arith.constant 0 : index
      %31 = vector.load %arg3[%30, %c0_16, %c0_17] : memref<512x1x128xf32, #tpu.memory_space<vmem>>, vector<1x1x128xf32>
      %32 = vector.shape_cast %31 : vector<1x1x128xf32> to vector<1x128xf32>
      %c0_i32_18 = arith.constant 0 : i32
      %33 = arith.cmpi sgt, %28, %c0_i32_18 : i32
      %34 = arith.extui %33 : i1 to i32
      %35 = arith.sitofp %34 : i32 to f32
      %36 = vector.broadcast %35 : f32 to vector<1x128xf32>
      %37 = arith.mulf %32, %36 : vector<1x128xf32>
      %38 = arith.addf %25, %37 : vector<1x128xf32>
      %c2_i32 = arith.constant 2 : i32
      %39 = arith.addi %11, %c2_i32 : i32
      %40 = arith.index_cast %39 : i32 to index
      %41 = memref.load %arg1[%40] : memref<2048xi32, #tpu.memory_space<smem>>
      %c511_i32_19 = arith.constant 511 : i32
      %42 = arith.minsi %41, %c511_i32_19 : i32
      %43 = arith.index_cast %42 : i32 to index
      %c0_20 = arith.constant 0 : index
      %c0_21 = arith.constant 0 : index
      %44 = vector.load %arg3[%43, %c0_20, %c0_21] : memref<512x1x128xf32, #tpu.memory_space<vmem>>, vector<1x1x128xf32>
      %45 = vector.shape_cast %44 : vector<1x1x128xf32> to vector<1x128xf32>
      %c0_i32_22 = arith.constant 0 : i32
      %46 = arith.cmpi sgt, %41, %c0_i32_22 : i32
      %47 = arith.extui %46 : i1 to i32
      %48 = arith.sitofp %47 : i32 to f32
      %49 = vector.broadcast %48 : f32 to vector<1x128xf32>
      %50 = arith.mulf %45, %49 : vector<1x128xf32>
      %51 = arith.addf %38, %50 : vector<1x128xf32>
      %c3_i32 = arith.constant 3 : i32
      %52 = arith.addi %11, %c3_i32 : i32
      %53 = arith.index_cast %52 : i32 to index
      %54 = memref.load %arg1[%53] : memref<2048xi32, #tpu.memory_space<smem>>
      %c511_i32_23 = arith.constant 511 : i32
      %55 = arith.minsi %54, %c511_i32_23 : i32
      %56 = arith.index_cast %55 : i32 to index
      %c0_24 = arith.constant 0 : index
      %c0_25 = arith.constant 0 : index
      %57 = vector.load %arg3[%56, %c0_24, %c0_25] : memref<512x1x128xf32, #tpu.memory_space<vmem>>, vector<1x1x128xf32>
      %58 = vector.shape_cast %57 : vector<1x1x128xf32> to vector<1x128xf32>
      %c0_i32_26 = arith.constant 0 : i32
      %59 = arith.cmpi sgt, %54, %c0_i32_26 : i32
      %60 = arith.extui %59 : i1 to i32
      %61 = arith.sitofp %60 : i32 to f32
      %62 = vector.broadcast %61 : f32 to vector<1x128xf32>
      %63 = arith.mulf %58, %62 : vector<1x128xf32>
      %64 = arith.addf %51, %63 : vector<1x128xf32>
      %c4_i32 = arith.constant 4 : i32
      %65 = arith.addi %11, %c4_i32 : i32
      %66 = arith.index_cast %65 : i32 to index
      %67 = memref.load %arg1[%66] : memref<2048xi32, #tpu.memory_space<smem>>
      %c511_i32_27 = arith.constant 511 : i32
      %68 = arith.minsi %67, %c511_i32_27 : i32
      %69 = arith.index_cast %68 : i32 to index
      %c0_28 = arith.constant 0 : index
      %c0_29 = arith.constant 0 : index
      %70 = vector.load %arg3[%69, %c0_28, %c0_29] : memref<512x1x128xf32, #tpu.memory_space<vmem>>, vector<1x1x128xf32>
      %71 = vector.shape_cast %70 : vector<1x1x128xf32> to vector<1x128xf32>
      %c0_i32_30 = arith.constant 0 : i32
      %72 = arith.cmpi sgt, %67, %c0_i32_30 : i32
      %73 = arith.extui %72 : i1 to i32
      %74 = arith.sitofp %73 : i32 to f32
      %75 = vector.broadcast %74 : f32 to vector<1x128xf32>
      %76 = arith.mulf %71, %75 : vector<1x128xf32>
      %77 = arith.addf %64, %76 : vector<1x128xf32>
      %c5_i32 = arith.constant 5 : i32
      %78 = arith.addi %11, %c5_i32 : i32
      %79 = arith.index_cast %78 : i32 to index
      %80 = memref.load %arg1[%79] : memref<2048xi32, #tpu.memory_space<smem>>
      %c511_i32_31 = arith.constant 511 : i32
      %81 = arith.minsi %80, %c511_i32_31 : i32
      %82 = arith.index_cast %81 : i32 to index
      %c0_32 = arith.constant 0 : index
      %c0_33 = arith.constant 0 : index
      %83 = vector.load %arg3[%82, %c0_32, %c0_33] : memref<512x1x128xf32, #tpu.memory_space<vmem>>, vector<1x1x128xf32>
      %84 = vector.shape_cast %83 : vector<1x1x128xf32> to vector<1x128xf32>
      %c0_i32_34 = arith.constant 0 : i32
      %85 = arith.cmpi sgt, %80, %c0_i32_34 : i32
      %86 = arith.extui %85 : i1 to i32
      %87 = arith.sitofp %86 : i32 to f32
      %88 = vector.broadcast %87 : f32 to vector<1x128xf32>
      %89 = arith.mulf %84, %88 : vector<1x128xf32>
      %90 = arith.addf %77, %89 : vector<1x128xf32>
      %c6_i32 = arith.constant 6 : i32
      %91 = arith.addi %11, %c6_i32 : i32
      %92 = arith.index_cast %91 : i32 to index
      %93 = memref.load %arg1[%92] : memref<2048xi32, #tpu.memory_space<smem>>
      %c511_i32_35 = arith.constant 511 : i32
      %94 = arith.minsi %93, %c511_i32_35 : i32
      %95 = arith.index_cast %94 : i32 to index
      %c0_36 = arith.constant 0 : index
      %c0_37 = arith.constant 0 : index
      %96 = vector.load %arg3[%95, %c0_36, %c0_37] : memref<512x1x128xf32, #tpu.memory_space<vmem>>, vector<1x1x128xf32>
      %97 = vector.shape_cast %96 : vector<1x1x128xf32> to vector<1x128xf32>
      %c0_i32_38 = arith.constant 0 : i32
      %98 = arith.cmpi sgt, %93, %c0_i32_38 : i32
      %99 = arith.extui %98 : i1 to i32
      %100 = arith.sitofp %99 : i32 to f32
      %101 = vector.broadcast %100 : f32 to vector<1x128xf32>
      %102 = arith.mulf %97, %101 : vector<1x128xf32>
      %103 = arith.addf %90, %102 : vector<1x128xf32>
      %c7_i32 = arith.constant 7 : i32
      %104 = arith.addi %11, %c7_i32 : i32
      %105 = arith.index_cast %104 : i32 to index
      %106 = memref.load %arg1[%105] : memref<2048xi32, #tpu.memory_space<smem>>
      %c511_i32_39 = arith.constant 511 : i32
      %107 = arith.minsi %106, %c511_i32_39 : i32
      %108 = arith.index_cast %107 : i32 to index
      %c0_40 = arith.constant 0 : index
      %c0_41 = arith.constant 0 : index
      %109 = vector.load %arg3[%108, %c0_40, %c0_41] : memref<512x1x128xf32, #tpu.memory_space<vmem>>, vector<1x1x128xf32>
      %110 = vector.shape_cast %109 : vector<1x1x128xf32> to vector<1x128xf32>
      %c0_i32_42 = arith.constant 0 : i32
      %111 = arith.cmpi sgt, %106, %c0_i32_42 : i32
      %112 = arith.extui %111 : i1 to i32
      %113 = arith.sitofp %112 : i32 to f32
      %114 = vector.broadcast %113 : f32 to vector<1x128xf32>
      %115 = arith.mulf %110, %114 : vector<1x128xf32>
      %116 = arith.addf %103, %115 : vector<1x128xf32>
      %c16_i32_43 = arith.constant 16 : i32
      %117 = arith.muli %10, %c16_i32_43 : i32
      %cst_44 = arith.constant 0.000000e+00 : f32
      %118 = vector.broadcast %cst_44 : f32 to vector<1x128xf32>
      %c0_i32_45 = arith.constant 0 : i32
      %119 = arith.addi %117, %c0_i32_45 : i32
      %120 = arith.index_cast %119 : i32 to index
      %121 = memref.load %arg2[%120] : memref<4096xi32, #tpu.memory_space<smem>>
      %c511_i32_46 = arith.constant 511 : i32
      %122 = arith.minsi %121, %c511_i32_46 : i32
      %123 = arith.index_cast %122 : i32 to index
      %c0_47 = arith.constant 0 : index
      %c0_48 = arith.constant 0 : index
      %124 = vector.load %arg3[%123, %c0_47, %c0_48] : memref<512x1x128xf32, #tpu.memory_space<vmem>>, vector<1x1x128xf32>
      %125 = vector.shape_cast %124 : vector<1x1x128xf32> to vector<1x128xf32>
      %c0_i32_49 = arith.constant 0 : i32
      %126 = arith.cmpi sgt, %121, %c0_i32_49 : i32
      %127 = arith.extui %126 : i1 to i32
      %128 = arith.sitofp %127 : i32 to f32
      %129 = vector.broadcast %128 : f32 to vector<1x128xf32>
      %130 = arith.mulf %125, %129 : vector<1x128xf32>
      %131 = arith.addf %118, %130 : vector<1x128xf32>
      %c1_i32_50 = arith.constant 1 : i32
      %132 = arith.addi %117, %c1_i32_50 : i32
      %133 = arith.index_cast %132 : i32 to index
      %134 = memref.load %arg2[%133] : memref<4096xi32, #tpu.memory_space<smem>>
      %c511_i32_51 = arith.constant 511 : i32
      %135 = arith.minsi %134, %c511_i32_51 : i32
      %136 = arith.index_cast %135 : i32 to index
      %c0_52 = arith.constant 0 : index
      %c0_53 = arith.constant 0 : index
      %137 = vector.load %arg3[%136, %c0_52, %c0_53] : memref<512x1x128xf32, #tpu.memory_space<vmem>>, vector<1x1x128xf32>
      %138 = vector.shape_cast %137 : vector<1x1x128xf32> to vector<1x128xf32>
      %c0_i32_54 = arith.constant 0 : i32
      %139 = arith.cmpi sgt, %134, %c0_i32_54 : i32
      %140 = arith.extui %139 : i1 to i32
      %141 = arith.sitofp %140 : i32 to f32
      %142 = vector.broadcast %141 : f32 to vector<1x128xf32>
      %143 = arith.mulf %138, %142 : vector<1x128xf32>
      %144 = arith.addf %131, %143 : vector<1x128xf32>
      %c2_i32_55 = arith.constant 2 : i32
      %145 = arith.addi %117, %c2_i32_55 : i32
      %146 = arith.index_cast %145 : i32 to index
      %147 = memref.load %arg2[%146] : memref<4096xi32, #tpu.memory_space<smem>>
      %c511_i32_56 = arith.constant 511 : i32
      %148 = arith.minsi %147, %c511_i32_56 : i32
      %149 = arith.index_cast %148 : i32 to index
      %c0_57 = arith.constant 0 : index
      %c0_58 = arith.constant 0 : index
      %150 = vector.load %arg3[%149, %c0_57, %c0_58] : memref<512x1x128xf32, #tpu.memory_space<vmem>>, vector<1x1x128xf32>
      %151 = vector.shape_cast %150 : vector<1x1x128xf32> to vector<1x128xf32>
      %c0_i32_59 = arith.constant 0 : i32
      %152 = arith.cmpi sgt, %147, %c0_i32_59 : i32
      %153 = arith.extui %152 : i1 to i32
      %154 = arith.sitofp %153 : i32 to f32
      %155 = vector.broadcast %154 : f32 to vector<1x128xf32>
      %156 = arith.mulf %151, %155 : vector<1x128xf32>
      %157 = arith.addf %144, %156 : vector<1x128xf32>
      %c3_i32_60 = arith.constant 3 : i32
      %158 = arith.addi %117, %c3_i32_60 : i32
      %159 = arith.index_cast %158 : i32 to index
      %160 = memref.load %arg2[%159] : memref<4096xi32, #tpu.memory_space<smem>>
      %c511_i32_61 = arith.constant 511 : i32
      %161 = arith.minsi %160, %c511_i32_61 : i32
      %162 = arith.index_cast %161 : i32 to index
      %c0_62 = arith.constant 0 : index
      %c0_63 = arith.constant 0 : index
      %163 = vector.load %arg3[%162, %c0_62, %c0_63] : memref<512x1x128xf32, #tpu.memory_space<vmem>>, vector<1x1x128xf32>
      %164 = vector.shape_cast %163 : vector<1x1x128xf32> to vector<1x128xf32>
      %c0_i32_64 = arith.constant 0 : i32
      %165 = arith.cmpi sgt, %160, %c0_i32_64 : i32
      %166 = arith.extui %165 : i1 to i32
      %167 = arith.sitofp %166 : i32 to f32
      %168 = vector.broadcast %167 : f32 to vector<1x128xf32>
      %169 = arith.mulf %164, %168 : vector<1x128xf32>
      %170 = arith.addf %157, %169 : vector<1x128xf32>
      %c4_i32_65 = arith.constant 4 : i32
      %171 = arith.addi %117, %c4_i32_65 : i32
      %172 = arith.index_cast %171 : i32 to index
      %173 = memref.load %arg2[%172] : memref<4096xi32, #tpu.memory_space<smem>>
      %c511_i32_66 = arith.constant 511 : i32
      %174 = arith.minsi %173, %c511_i32_66 : i32
      %175 = arith.index_cast %174 : i32 to index
      %c0_67 = arith.constant 0 : index
      %c0_68 = arith.constant 0 : index
      %176 = vector.load %arg3[%175, %c0_67, %c0_68] : memref<512x1x128xf32, #tpu.memory_space<vmem>>, vector<1x1x128xf32>
      %177 = vector.shape_cast %176 : vector<1x1x128xf32> to vector<1x128xf32>
      %c0_i32_69 = arith.constant 0 : i32
      %178 = arith.cmpi sgt, %173, %c0_i32_69 : i32
      %179 = arith.extui %178 : i1 to i32
      %180 = arith.sitofp %179 : i32 to f32
      %181 = vector.broadcast %180 : f32 to vector<1x128xf32>
      %182 = arith.mulf %177, %181 : vector<1x128xf32>
      %183 = arith.addf %170, %182 : vector<1x128xf32>
      %c5_i32_70 = arith.constant 5 : i32
      %184 = arith.addi %117, %c5_i32_70 : i32
      %185 = arith.index_cast %184 : i32 to index
      %186 = memref.load %arg2[%185] : memref<4096xi32, #tpu.memory_space<smem>>
      %c511_i32_71 = arith.constant 511 : i32
      %187 = arith.minsi %186, %c511_i32_71 : i32
      %188 = arith.index_cast %187 : i32 to index
      %c0_72 = arith.constant 0 : index
      %c0_73 = arith.constant 0 : index
      %189 = vector.load %arg3[%188, %c0_72, %c0_73] : memref<512x1x128xf32, #tpu.memory_space<vmem>>, vector<1x1x128xf32>
      %190 = vector.shape_cast %189 : vector<1x1x128xf32> to vector<1x128xf32>
      %c0_i32_74 = arith.constant 0 : i32
      %191 = arith.cmpi sgt, %186, %c0_i32_74 : i32
      %192 = arith.extui %191 : i1 to i32
      %193 = arith.sitofp %192 : i32 to f32
      %194 = vector.broadcast %193 : f32 to vector<1x128xf32>
      %195 = arith.mulf %190, %194 : vector<1x128xf32>
      %196 = arith.addf %183, %195 : vector<1x128xf32>
      %c6_i32_75 = arith.constant 6 : i32
      %197 = arith.addi %117, %c6_i32_75 : i32
      %198 = arith.index_cast %197 : i32 to index
      %199 = memref.load %arg2[%198] : memref<4096xi32, #tpu.memory_space<smem>>
      %c511_i32_76 = arith.constant 511 : i32
      %200 = arith.minsi %199, %c511_i32_76 : i32
      %201 = arith.index_cast %200 : i32 to index
      %c0_77 = arith.constant 0 : index
      %c0_78 = arith.constant 0 : index
      %202 = vector.load %arg3[%201, %c0_77, %c0_78] : memref<512x1x128xf32, #tpu.memory_space<vmem>>, vector<1x1x128xf32>
      %203 = vector.shape_cast %202 : vector<1x1x128xf32> to vector<1x128xf32>
      %c0_i32_79 = arith.constant 0 : i32
      %204 = arith.cmpi sgt, %199, %c0_i32_79 : i32
      %205 = arith.extui %204 : i1 to i32
      %206 = arith.sitofp %205 : i32 to f32
      %207 = vector.broadcast %206 : f32 to vector<1x128xf32>
      %208 = arith.mulf %203, %207 : vector<1x128xf32>
      %209 = arith.addf %196, %208 : vector<1x128xf32>
      %c7_i32_80 = arith.constant 7 : i32
      %210 = arith.addi %117, %c7_i32_80 : i32
      %211 = arith.index_cast %210 : i32 to index
      %212 = memref.load %arg2[%211] : memref<4096xi32, #tpu.memory_space<smem>>
      %c511_i32_81 = arith.constant 511 : i32
      %213 = arith.minsi %212, %c511_i32_81 : i32
      %214 = arith.index_cast %213 : i32 to index
      %c0_82 = arith.constant 0 : index
      %c0_83 = arith.constant 0 : index
      %215 = vector.load %arg3[%214, %c0_82, %c0_83] : memref<512x1x128xf32, #tpu.memory_space<vmem>>, vector<1x1x128xf32>
      %216 = vector.shape_cast %215 : vector<1x1x128xf32> to vector<1x128xf32>
      %c0_i32_84 = arith.constant 0 : i32
      %217 = arith.cmpi sgt, %212, %c0_i32_84 : i32
      %218 = arith.extui %217 : i1 to i32
      %219 = arith.sitofp %218 : i32 to f32
      %220 = vector.broadcast %219 : f32 to vector<1x128xf32>
      %221 = arith.mulf %216, %220 : vector<1x128xf32>
      %222 = arith.addf %209, %221 : vector<1x128xf32>
      %c8_i32_85 = arith.constant 8 : i32
      %223 = arith.addi %117, %c8_i32_85 : i32
      %224 = arith.index_cast %223 : i32 to index
      %225 = memref.load %arg2[%224] : memref<4096xi32, #tpu.memory_space<smem>>
      %c511_i32_86 = arith.constant 511 : i32
      %226 = arith.minsi %225, %c511_i32_86 : i32
      %227 = arith.index_cast %226 : i32 to index
      %c0_87 = arith.constant 0 : index
      %c0_88 = arith.constant 0 : index
      %228 = vector.load %arg3[%227, %c0_87, %c0_88] : memref<512x1x128xf32, #tpu.memory_space<vmem>>, vector<1x1x128xf32>
      %229 = vector.shape_cast %228 : vector<1x1x128xf32> to vector<1x128xf32>
      %c0_i32_89 = arith.constant 0 : i32
      %230 = arith.cmpi sgt, %225, %c0_i32_89 : i32
      %231 = arith.extui %230 : i1 to i32
      %232 = arith.sitofp %231 : i32 to f32
      %233 = vector.broadcast %232 : f32 to vector<1x128xf32>
      %234 = arith.mulf %229, %233 : vector<1x128xf32>
      %235 = arith.addf %222, %234 : vector<1x128xf32>
      %c9_i32 = arith.constant 9 : i32
      %236 = arith.addi %117, %c9_i32 : i32
      %237 = arith.index_cast %236 : i32 to index
      %238 = memref.load %arg2[%237] : memref<4096xi32, #tpu.memory_space<smem>>
      %c511_i32_90 = arith.constant 511 : i32
      %239 = arith.minsi %238, %c511_i32_90 : i32
      %240 = arith.index_cast %239 : i32 to index
      %c0_91 = arith.constant 0 : index
      %c0_92 = arith.constant 0 : index
      %241 = vector.load %arg3[%240, %c0_91, %c0_92] : memref<512x1x128xf32, #tpu.memory_space<vmem>>, vector<1x1x128xf32>
      %242 = vector.shape_cast %241 : vector<1x1x128xf32> to vector<1x128xf32>
      %c0_i32_93 = arith.constant 0 : i32
      %243 = arith.cmpi sgt, %238, %c0_i32_93 : i32
      %244 = arith.extui %243 : i1 to i32
      %245 = arith.sitofp %244 : i32 to f32
      %246 = vector.broadcast %245 : f32 to vector<1x128xf32>
      %247 = arith.mulf %242, %246 : vector<1x128xf32>
      %248 = arith.addf %235, %247 : vector<1x128xf32>
      %c10_i32 = arith.constant 10 : i32
      %249 = arith.addi %117, %c10_i32 : i32
      %250 = arith.index_cast %249 : i32 to index
      %251 = memref.load %arg2[%250] : memref<4096xi32, #tpu.memory_space<smem>>
      %c511_i32_94 = arith.constant 511 : i32
      %252 = arith.minsi %251, %c511_i32_94 : i32
      %253 = arith.index_cast %252 : i32 to index
      %c0_95 = arith.constant 0 : index
      %c0_96 = arith.constant 0 : index
      %254 = vector.load %arg3[%253, %c0_95, %c0_96] : memref<512x1x128xf32, #tpu.memory_space<vmem>>, vector<1x1x128xf32>
      %255 = vector.shape_cast %254 : vector<1x1x128xf32> to vector<1x128xf32>
      %c0_i32_97 = arith.constant 0 : i32
      %256 = arith.cmpi sgt, %251, %c0_i32_97 : i32
      %257 = arith.extui %256 : i1 to i32
      %258 = arith.sitofp %257 : i32 to f32
      %259 = vector.broadcast %258 : f32 to vector<1x128xf32>
      %260 = arith.mulf %255, %259 : vector<1x128xf32>
      %261 = arith.addf %248, %260 : vector<1x128xf32>
      %c11_i32 = arith.constant 11 : i32
      %262 = arith.addi %117, %c11_i32 : i32
      %263 = arith.index_cast %262 : i32 to index
      %264 = memref.load %arg2[%263] : memref<4096xi32, #tpu.memory_space<smem>>
      %c511_i32_98 = arith.constant 511 : i32
      %265 = arith.minsi %264, %c511_i32_98 : i32
      %266 = arith.index_cast %265 : i32 to index
      %c0_99 = arith.constant 0 : index
      %c0_100 = arith.constant 0 : index
      %267 = vector.load %arg3[%266, %c0_99, %c0_100] : memref<512x1x128xf32, #tpu.memory_space<vmem>>, vector<1x1x128xf32>
      %268 = vector.shape_cast %267 : vector<1x1x128xf32> to vector<1x128xf32>
      %c0_i32_101 = arith.constant 0 : i32
      %269 = arith.cmpi sgt, %264, %c0_i32_101 : i32
      %270 = arith.extui %269 : i1 to i32
      %271 = arith.sitofp %270 : i32 to f32
      %272 = vector.broadcast %271 : f32 to vector<1x128xf32>
      %273 = arith.mulf %268, %272 : vector<1x128xf32>
      %274 = arith.addf %261, %273 : vector<1x128xf32>
      %c12_i32 = arith.constant 12 : i32
      %275 = arith.addi %117, %c12_i32 : i32
      %276 = arith.index_cast %275 : i32 to index
      %277 = memref.load %arg2[%276] : memref<4096xi32, #tpu.memory_space<smem>>
      %c511_i32_102 = arith.constant 511 : i32
      %278 = arith.minsi %277, %c511_i32_102 : i32
      %279 = arith.index_cast %278 : i32 to index
      %c0_103 = arith.constant 0 : index
      %c0_104 = arith.constant 0 : index
      %280 = vector.load %arg3[%279, %c0_103, %c0_104] : memref<512x1x128xf32, #tpu.memory_space<vmem>>, vector<1x1x128xf32>
      %281 = vector.shape_cast %280 : vector<1x1x128xf32> to vector<1x128xf32>
      %c0_i32_105 = arith.constant 0 : i32
      %282 = arith.cmpi sgt, %277, %c0_i32_105 : i32
      %283 = arith.extui %282 : i1 to i32
      %284 = arith.sitofp %283 : i32 to f32
      %285 = vector.broadcast %284 : f32 to vector<1x128xf32>
      %286 = arith.mulf %281, %285 : vector<1x128xf32>
      %287 = arith.addf %274, %286 : vector<1x128xf32>
      %c13_i32 = arith.constant 13 : i32
      %288 = arith.addi %117, %c13_i32 : i32
      %289 = arith.index_cast %288 : i32 to index
      %290 = memref.load %arg2[%289] : memref<4096xi32, #tpu.memory_space<smem>>
      %c511_i32_106 = arith.constant 511 : i32
      %291 = arith.minsi %290, %c511_i32_106 : i32
      %292 = arith.index_cast %291 : i32 to index
      %c0_107 = arith.constant 0 : index
      %c0_108 = arith.constant 0 : index
      %293 = vector.load %arg3[%292, %c0_107, %c0_108] : memref<512x1x128xf32, #tpu.memory_space<vmem>>, vector<1x1x128xf32>
      %294 = vector.shape_cast %293 : vector<1x1x128xf32> to vector<1x128xf32>
      %c0_i32_109 = arith.constant 0 : i32
      %295 = arith.cmpi sgt, %290, %c0_i32_109 : i32
      %296 = arith.extui %295 : i1 to i32
      %297 = arith.sitofp %296 : i32 to f32
      %298 = vector.broadcast %297 : f32 to vector<1x128xf32>
      %299 = arith.mulf %294, %298 : vector<1x128xf32>
      %300 = arith.addf %287, %299 : vector<1x128xf32>
      %c14_i32 = arith.constant 14 : i32
      %301 = arith.addi %117, %c14_i32 : i32
      %302 = arith.index_cast %301 : i32 to index
      %303 = memref.load %arg2[%302] : memref<4096xi32, #tpu.memory_space<smem>>
      %c511_i32_110 = arith.constant 511 : i32
      %304 = arith.minsi %303, %c511_i32_110 : i32
      %305 = arith.index_cast %304 : i32 to index
      %c0_111 = arith.constant 0 : index
      %c0_112 = arith.constant 0 : index
      %306 = vector.load %arg3[%305, %c0_111, %c0_112] : memref<512x1x128xf32, #tpu.memory_space<vmem>>, vector<1x1x128xf32>
      %307 = vector.shape_cast %306 : vector<1x1x128xf32> to vector<1x128xf32>
      %c0_i32_113 = arith.constant 0 : i32
      %308 = arith.cmpi sgt, %303, %c0_i32_113 : i32
      %309 = arith.extui %308 : i1 to i32
      %310 = arith.sitofp %309 : i32 to f32
      %311 = vector.broadcast %310 : f32 to vector<1x128xf32>
      %312 = arith.mulf %307, %311 : vector<1x128xf32>
      %313 = arith.addf %300, %312 : vector<1x128xf32>
      %c15_i32 = arith.constant 15 : i32
      %314 = arith.addi %117, %c15_i32 : i32
      %315 = arith.index_cast %314 : i32 to index
      %316 = memref.load %arg2[%315] : memref<4096xi32, #tpu.memory_space<smem>>
      %c511_i32_114 = arith.constant 511 : i32
      %317 = arith.minsi %316, %c511_i32_114 : i32
      %318 = arith.index_cast %317 : i32 to index
      %c0_115 = arith.constant 0 : index
      %c0_116 = arith.constant 0 : index
      %319 = vector.load %arg3[%318, %c0_115, %c0_116] : memref<512x1x128xf32, #tpu.memory_space<vmem>>, vector<1x1x128xf32>
      %320 = vector.shape_cast %319 : vector<1x1x128xf32> to vector<1x128xf32>
      %c0_i32_117 = arith.constant 0 : i32
      %321 = arith.cmpi sgt, %316, %c0_i32_117 : i32
      %322 = arith.extui %321 : i1 to i32
      %323 = arith.sitofp %322 : i32 to f32
      %324 = vector.broadcast %323 : f32 to vector<1x128xf32>
      %325 = arith.mulf %320, %324 : vector<1x128xf32>
      %326 = arith.addf %313, %325 : vector<1x128xf32>
      %c8_i32_118 = arith.constant 8 : i32
      %327 = arith.muli %arg6, %c8_i32_118 : i32
      %328 = arith.addi %0, %327 : i32
      %c1_i32_119 = arith.constant 1 : i32
      %329 = arith.addi %328, %c1_i32_119 : i32
      %c8_i32_120 = arith.constant 8 : i32
      %330 = arith.muli %329, %c8_i32_120 : i32
      %cst_121 = arith.constant 0.000000e+00 : f32
      %331 = vector.broadcast %cst_121 : f32 to vector<1x128xf32>
      %c0_i32_122 = arith.constant 0 : i32
      %332 = arith.addi %330, %c0_i32_122 : i32
      %333 = arith.index_cast %332 : i32 to index
      %334 = memref.load %arg1[%333] : memref<2048xi32, #tpu.memory_space<smem>>
      %c511_i32_123 = arith.constant 511 : i32
      %335 = arith.minsi %334, %c511_i32_123 : i32
      %336 = arith.index_cast %335 : i32 to index
      %c0_124 = arith.constant 0 : index
      %c0_125 = arith.constant 0 : index
      %337 = vector.load %arg3[%336, %c0_124, %c0_125] : memref<512x1x128xf32, #tpu.memory_space<vmem>>, vector<1x1x128xf32>
      %338 = vector.shape_cast %337 : vector<1x1x128xf32> to vector<1x128xf32>
      %c0_i32_126 = arith.constant 0 : i32
      %339 = arith.cmpi sgt, %334, %c0_i32_126 : i32
      %340 = arith.extui %339 : i1 to i32
      %341 = arith.sitofp %340 : i32 to f32
      %342 = vector.broadcast %341 : f32 to vector<1x128xf32>
      %343 = arith.mulf %338, %342 : vector<1x128xf32>
      %344 = arith.addf %331, %343 : vector<1x128xf32>
      %c1_i32_127 = arith.constant 1 : i32
      %345 = arith.addi %330, %c1_i32_127 : i32
      %346 = arith.index_cast %345 : i32 to index
      %347 = memref.load %arg1[%346] : memref<2048xi32, #tpu.memory_space<smem>>
      %c511_i32_128 = arith.constant 511 : i32
      %348 = arith.minsi %347, %c511_i32_128 : i32
      %349 = arith.index_cast %348 : i32 to index
      %c0_129 = arith.constant 0 : index
      %c0_130 = arith.constant 0 : index
      %350 = vector.load %arg3[%349, %c0_129, %c0_130] : memref<512x1x128xf32, #tpu.memory_space<vmem>>, vector<1x1x128xf32>
      %351 = vector.shape_cast %350 : vector<1x1x128xf32> to vector<1x128xf32>
      %c0_i32_131 = arith.constant 0 : i32
      %352 = arith.cmpi sgt, %347, %c0_i32_131 : i32
      %353 = arith.extui %352 : i1 to i32
      %354 = arith.sitofp %353 : i32 to f32
      %355 = vector.broadcast %354 : f32 to vector<1x128xf32>
      %356 = arith.mulf %351, %355 : vector<1x128xf32>
      %357 = arith.addf %344, %356 : vector<1x128xf32>
      %c2_i32_132 = arith.constant 2 : i32
      %358 = arith.addi %330, %c2_i32_132 : i32
      %359 = arith.index_cast %358 : i32 to index
      %360 = memref.load %arg1[%359] : memref<2048xi32, #tpu.memory_space<smem>>
      %c511_i32_133 = arith.constant 511 : i32
      %361 = arith.minsi %360, %c511_i32_133 : i32
      %362 = arith.index_cast %361 : i32 to index
      %c0_134 = arith.constant 0 : index
      %c0_135 = arith.constant 0 : index
      %363 = vector.load %arg3[%362, %c0_134, %c0_135] : memref<512x1x128xf32, #tpu.memory_space<vmem>>, vector<1x1x128xf32>
      %364 = vector.shape_cast %363 : vector<1x1x128xf32> to vector<1x128xf32>
      %c0_i32_136 = arith.constant 0 : i32
      %365 = arith.cmpi sgt, %360, %c0_i32_136 : i32
      %366 = arith.extui %365 : i1 to i32
      %367 = arith.sitofp %366 : i32 to f32
      %368 = vector.broadcast %367 : f32 to vector<1x128xf32>
      %369 = arith.mulf %364, %368 : vector<1x128xf32>
      %370 = arith.addf %357, %369 : vector<1x128xf32>
      %c3_i32_137 = arith.constant 3 : i32
      %371 = arith.addi %330, %c3_i32_137 : i32
      %372 = arith.index_cast %371 : i32 to index
      %373 = memref.load %arg1[%372] : memref<2048xi32, #tpu.memory_space<smem>>
      %c511_i32_138 = arith.constant 511 : i32
      %374 = arith.minsi %373, %c511_i32_138 : i32
      %375 = arith.index_cast %374 : i32 to index
      %c0_139 = arith.constant 0 : index
      %c0_140 = arith.constant 0 : index
      %376 = vector.load %arg3[%375, %c0_139, %c0_140] : memref<512x1x128xf32, #tpu.memory_space<vmem>>, vector<1x1x128xf32>
      %377 = vector.shape_cast %376 : vector<1x1x128xf32> to vector<1x128xf32>
      %c0_i32_141 = arith.constant 0 : i32
      %378 = arith.cmpi sgt, %373, %c0_i32_141 : i32
      %379 = arith.extui %378 : i1 to i32
      %380 = arith.sitofp %379 : i32 to f32
      %381 = vector.broadcast %380 : f32 to vector<1x128xf32>
      %382 = arith.mulf %377, %381 : vector<1x128xf32>
      %383 = arith.addf %370, %382 : vector<1x128xf32>
      %c4_i32_142 = arith.constant 4 : i32
      %384 = arith.addi %330, %c4_i32_142 : i32
      %385 = arith.index_cast %384 : i32 to index
      %386 = memref.load %arg1[%385] : memref<2048xi32, #tpu.memory_space<smem>>
      %c511_i32_143 = arith.constant 511 : i32
      %387 = arith.minsi %386, %c511_i32_143 : i32
      %388 = arith.index_cast %387 : i32 to index
      %c0_144 = arith.constant 0 : index
      %c0_145 = arith.constant 0 : index
      %389 = vector.load %arg3[%388, %c0_144, %c0_145] : memref<512x1x128xf32, #tpu.memory_space<vmem>>, vector<1x1x128xf32>
      %390 = vector.shape_cast %389 : vector<1x1x128xf32> to vector<1x128xf32>
      %c0_i32_146 = arith.constant 0 : i32
      %391 = arith.cmpi sgt, %386, %c0_i32_146 : i32
      %392 = arith.extui %391 : i1 to i32
      %393 = arith.sitofp %392 : i32 to f32
      %394 = vector.broadcast %393 : f32 to vector<1x128xf32>
      %395 = arith.mulf %390, %394 : vector<1x128xf32>
      %396 = arith.addf %383, %395 : vector<1x128xf32>
      %c5_i32_147 = arith.constant 5 : i32
      %397 = arith.addi %330, %c5_i32_147 : i32
      %398 = arith.index_cast %397 : i32 to index
      %399 = memref.load %arg1[%398] : memref<2048xi32, #tpu.memory_space<smem>>
      %c511_i32_148 = arith.constant 511 : i32
      %400 = arith.minsi %399, %c511_i32_148 : i32
      %401 = arith.index_cast %400 : i32 to index
      %c0_149 = arith.constant 0 : index
      %c0_150 = arith.constant 0 : index
      %402 = vector.load %arg3[%401, %c0_149, %c0_150] : memref<512x1x128xf32, #tpu.memory_space<vmem>>, vector<1x1x128xf32>
      %403 = vector.shape_cast %402 : vector<1x1x128xf32> to vector<1x128xf32>
      %c0_i32_151 = arith.constant 0 : i32
      %404 = arith.cmpi sgt, %399, %c0_i32_151 : i32
      %405 = arith.extui %404 : i1 to i32
      %406 = arith.sitofp %405 : i32 to f32
      %407 = vector.broadcast %406 : f32 to vector<1x128xf32>
      %408 = arith.mulf %403, %407 : vector<1x128xf32>
      %409 = arith.addf %396, %408 : vector<1x128xf32>
      %c6_i32_152 = arith.constant 6 : i32
      %410 = arith.addi %330, %c6_i32_152 : i32
      %411 = arith.index_cast %410 : i32 to index
      %412 = memref.load %arg1[%411] : memref<2048xi32, #tpu.memory_space<smem>>
      %c511_i32_153 = arith.constant 511 : i32
      %413 = arith.minsi %412, %c511_i32_153 : i32
      %414 = arith.index_cast %413 : i32 to index
      %c0_154 = arith.constant 0 : index
      %c0_155 = arith.constant 0 : index
      %415 = vector.load %arg3[%414, %c0_154, %c0_155] : memref<512x1x128xf32, #tpu.memory_space<vmem>>, vector<1x1x128xf32>
      %416 = vector.shape_cast %415 : vector<1x1x128xf32> to vector<1x128xf32>
      %c0_i32_156 = arith.constant 0 : i32
      %417 = arith.cmpi sgt, %412, %c0_i32_156 : i32
      %418 = arith.extui %417 : i1 to i32
      %419 = arith.sitofp %418 : i32 to f32
      %420 = vector.broadcast %419 : f32 to vector<1x128xf32>
      %421 = arith.mulf %416, %420 : vector<1x128xf32>
      %422 = arith.addf %409, %421 : vector<1x128xf32>
      %c7_i32_157 = arith.constant 7 : i32
      %423 = arith.addi %330, %c7_i32_157 : i32
      %424 = arith.index_cast %423 : i32 to index
      %425 = memref.load %arg1[%424] : memref<2048xi32, #tpu.memory_space<smem>>
      %c511_i32_158 = arith.constant 511 : i32
      %426 = arith.minsi %425, %c511_i32_158 : i32
      %427 = arith.index_cast %426 : i32 to index
      %c0_159 = arith.constant 0 : index
      %c0_160 = arith.constant 0 : index
      %428 = vector.load %arg3[%427, %c0_159, %c0_160] : memref<512x1x128xf32, #tpu.memory_space<vmem>>, vector<1x1x128xf32>
      %429 = vector.shape_cast %428 : vector<1x1x128xf32> to vector<1x128xf32>
      %c0_i32_161 = arith.constant 0 : i32
      %430 = arith.cmpi sgt, %425, %c0_i32_161 : i32
      %431 = arith.extui %430 : i1 to i32
      %432 = arith.sitofp %431 : i32 to f32
      %433 = vector.broadcast %432 : f32 to vector<1x128xf32>
      %434 = arith.mulf %429, %433 : vector<1x128xf32>
      %435 = arith.addf %422, %434 : vector<1x128xf32>
      %c16_i32_162 = arith.constant 16 : i32
      %436 = arith.muli %329, %c16_i32_162 : i32
      %cst_163 = arith.constant 0.000000e+00 : f32
      %437 = vector.broadcast %cst_163 : f32 to vector<1x128xf32>
      %c0_i32_164 = arith.constant 0 : i32
      %438 = arith.addi %436, %c0_i32_164 : i32
      %439 = arith.index_cast %438 : i32 to index
      %440 = memref.load %arg2[%439] : memref<4096xi32, #tpu.memory_space<smem>>
      %c511_i32_165 = arith.constant 511 : i32
      %441 = arith.minsi %440, %c511_i32_165 : i32
      %442 = arith.index_cast %441 : i32 to index
      %c0_166 = arith.constant 0 : index
      %c0_167 = arith.constant 0 : index
      %443 = vector.load %arg3[%442, %c0_166, %c0_167] : memref<512x1x128xf32, #tpu.memory_space<vmem>>, vector<1x1x128xf32>
      %444 = vector.shape_cast %443 : vector<1x1x128xf32> to vector<1x128xf32>
      %c0_i32_168 = arith.constant 0 : i32
      %445 = arith.cmpi sgt, %440, %c0_i32_168 : i32
      %446 = arith.extui %445 : i1 to i32
      %447 = arith.sitofp %446 : i32 to f32
      %448 = vector.broadcast %447 : f32 to vector<1x128xf32>
      %449 = arith.mulf %444, %448 : vector<1x128xf32>
      %450 = arith.addf %437, %449 : vector<1x128xf32>
      %c1_i32_169 = arith.constant 1 : i32
      %451 = arith.addi %436, %c1_i32_169 : i32
      %452 = arith.index_cast %451 : i32 to index
      %453 = memref.load %arg2[%452] : memref<4096xi32, #tpu.memory_space<smem>>
      %c511_i32_170 = arith.constant 511 : i32
      %454 = arith.minsi %453, %c511_i32_170 : i32
      %455 = arith.index_cast %454 : i32 to index
      %c0_171 = arith.constant 0 : index
      %c0_172 = arith.constant 0 : index
      %456 = vector.load %arg3[%455, %c0_171, %c0_172] : memref<512x1x128xf32, #tpu.memory_space<vmem>>, vector<1x1x128xf32>
      %457 = vector.shape_cast %456 : vector<1x1x128xf32> to vector<1x128xf32>
      %c0_i32_173 = arith.constant 0 : i32
      %458 = arith.cmpi sgt, %453, %c0_i32_173 : i32
      %459 = arith.extui %458 : i1 to i32
      %460 = arith.sitofp %459 : i32 to f32
      %461 = vector.broadcast %460 : f32 to vector<1x128xf32>
      %462 = arith.mulf %457, %461 : vector<1x128xf32>
      %463 = arith.addf %450, %462 : vector<1x128xf32>
      %c2_i32_174 = arith.constant 2 : i32
      %464 = arith.addi %436, %c2_i32_174 : i32
      %465 = arith.index_cast %464 : i32 to index
      %466 = memref.load %arg2[%465] : memref<4096xi32, #tpu.memory_space<smem>>
      %c511_i32_175 = arith.constant 511 : i32
      %467 = arith.minsi %466, %c511_i32_175 : i32
      %468 = arith.index_cast %467 : i32 to index
      %c0_176 = arith.constant 0 : index
      %c0_177 = arith.constant 0 : index
      %469 = vector.load %arg3[%468, %c0_176, %c0_177] : memref<512x1x128xf32, #tpu.memory_space<vmem>>, vector<1x1x128xf32>
      %470 = vector.shape_cast %469 : vector<1x1x128xf32> to vector<1x128xf32>
      %c0_i32_178 = arith.constant 0 : i32
      %471 = arith.cmpi sgt, %466, %c0_i32_178 : i32
      %472 = arith.extui %471 : i1 to i32
      %473 = arith.sitofp %472 : i32 to f32
      %474 = vector.broadcast %473 : f32 to vector<1x128xf32>
      %475 = arith.mulf %470, %474 : vector<1x128xf32>
      %476 = arith.addf %463, %475 : vector<1x128xf32>
      %c3_i32_179 = arith.constant 3 : i32
      %477 = arith.addi %436, %c3_i32_179 : i32
      %478 = arith.index_cast %477 : i32 to index
      %479 = memref.load %arg2[%478] : memref<4096xi32, #tpu.memory_space<smem>>
      %c511_i32_180 = arith.constant 511 : i32
      %480 = arith.minsi %479, %c511_i32_180 : i32
      %481 = arith.index_cast %480 : i32 to index
      %c0_181 = arith.constant 0 : index
      %c0_182 = arith.constant 0 : index
      %482 = vector.load %arg3[%481, %c0_181, %c0_182] : memref<512x1x128xf32, #tpu.memory_space<vmem>>, vector<1x1x128xf32>
      %483 = vector.shape_cast %482 : vector<1x1x128xf32> to vector<1x128xf32>
      %c0_i32_183 = arith.constant 0 : i32
      %484 = arith.cmpi sgt, %479, %c0_i32_183 : i32
      %485 = arith.extui %484 : i1 to i32
      %486 = arith.sitofp %485 : i32 to f32
      %487 = vector.broadcast %486 : f32 to vector<1x128xf32>
      %488 = arith.mulf %483, %487 : vector<1x128xf32>
      %489 = arith.addf %476, %488 : vector<1x128xf32>
      %c4_i32_184 = arith.constant 4 : i32
      %490 = arith.addi %436, %c4_i32_184 : i32
      %491 = arith.index_cast %490 : i32 to index
      %492 = memref.load %arg2[%491] : memref<4096xi32, #tpu.memory_space<smem>>
      %c511_i32_185 = arith.constant 511 : i32
      %493 = arith.minsi %492, %c511_i32_185 : i32
      %494 = arith.index_cast %493 : i32 to index
      %c0_186 = arith.constant 0 : index
      %c0_187 = arith.constant 0 : index
      %495 = vector.load %arg3[%494, %c0_186, %c0_187] : memref<512x1x128xf32, #tpu.memory_space<vmem>>, vector<1x1x128xf32>
      %496 = vector.shape_cast %495 : vector<1x1x128xf32> to vector<1x128xf32>
      %c0_i32_188 = arith.constant 0 : i32
      %497 = arith.cmpi sgt, %492, %c0_i32_188 : i32
      %498 = arith.extui %497 : i1 to i32
      %499 = arith.sitofp %498 : i32 to f32
      %500 = vector.broadcast %499 : f32 to vector<1x128xf32>
      %501 = arith.mulf %496, %500 : vector<1x128xf32>
      %502 = arith.addf %489, %501 : vector<1x128xf32>
      %c5_i32_189 = arith.constant 5 : i32
      %503 = arith.addi %436, %c5_i32_189 : i32
      %504 = arith.index_cast %503 : i32 to index
      %505 = memref.load %arg2[%504] : memref<4096xi32, #tpu.memory_space<smem>>
      %c511_i32_190 = arith.constant 511 : i32
      %506 = arith.minsi %505, %c511_i32_190 : i32
      %507 = arith.index_cast %506 : i32 to index
      %c0_191 = arith.constant 0 : index
      %c0_192 = arith.constant 0 : index
      %508 = vector.load %arg3[%507, %c0_191, %c0_192] : memref<512x1x128xf32, #tpu.memory_space<vmem>>, vector<1x1x128xf32>
      %509 = vector.shape_cast %508 : vector<1x1x128xf32> to vector<1x128xf32>
      %c0_i32_193 = arith.constant 0 : i32
      %510 = arith.cmpi sgt, %505, %c0_i32_193 : i32
      %511 = arith.extui %510 : i1 to i32
      %512 = arith.sitofp %511 : i32 to f32
      %513 = vector.broadcast %512 : f32 to vector<1x128xf32>
      %514 = arith.mulf %509, %513 : vector<1x128xf32>
      %515 = arith.addf %502, %514 : vector<1x128xf32>
      %c6_i32_194 = arith.constant 6 : i32
      %516 = arith.addi %436, %c6_i32_194 : i32
      %517 = arith.index_cast %516 : i32 to index
      %518 = memref.load %arg2[%517] : memref<4096xi32, #tpu.memory_space<smem>>
      %c511_i32_195 = arith.constant 511 : i32
      %519 = arith.minsi %518, %c511_i32_195 : i32
      %520 = arith.index_cast %519 : i32 to index
      %c0_196 = arith.constant 0 : index
      %c0_197 = arith.constant 0 : index
      %521 = vector.load %arg3[%520, %c0_196, %c0_197] : memref<512x1x128xf32, #tpu.memory_space<vmem>>, vector<1x1x128xf32>
      %522 = vector.shape_cast %521 : vector<1x1x128xf32> to vector<1x128xf32>
      %c0_i32_198 = arith.constant 0 : i32
      %523 = arith.cmpi sgt, %518, %c0_i32_198 : i32
      %524 = arith.extui %523 : i1 to i32
      %525 = arith.sitofp %524 : i32 to f32
      %526 = vector.broadcast %525 : f32 to vector<1x128xf32>
      %527 = arith.mulf %522, %526 : vector<1x128xf32>
      %528 = arith.addf %515, %527 : vector<1x128xf32>
      %c7_i32_199 = arith.constant 7 : i32
      %529 = arith.addi %436, %c7_i32_199 : i32
      %530 = arith.index_cast %529 : i32 to index
      %531 = memref.load %arg2[%530] : memref<4096xi32, #tpu.memory_space<smem>>
      %c511_i32_200 = arith.constant 511 : i32
      %532 = arith.minsi %531, %c511_i32_200 : i32
      %533 = arith.index_cast %532 : i32 to index
      %c0_201 = arith.constant 0 : index
      %c0_202 = arith.constant 0 : index
      %534 = vector.load %arg3[%533, %c0_201, %c0_202] : memref<512x1x128xf32, #tpu.memory_space<vmem>>, vector<1x1x128xf32>
      %535 = vector.shape_cast %534 : vector<1x1x128xf32> to vector<1x128xf32>
      %c0_i32_203 = arith.constant 0 : i32
      %536 = arith.cmpi sgt, %531, %c0_i32_203 : i32
      %537 = arith.extui %536 : i1 to i32
      %538 = arith.sitofp %537 : i32 to f32
      %539 = vector.broadcast %538 : f32 to vector<1x128xf32>
      %540 = arith.mulf %535, %539 : vector<1x128xf32>
      %541 = arith.addf %528, %540 : vector<1x128xf32>
      %c8_i32_204 = arith.constant 8 : i32
      %542 = arith.addi %436, %c8_i32_204 : i32
      %543 = arith.index_cast %542 : i32 to index
      %544 = memref.load %arg2[%543] : memref<4096xi32, #tpu.memory_space<smem>>
      %c511_i32_205 = arith.constant 511 : i32
      %545 = arith.minsi %544, %c511_i32_205 : i32
      %546 = arith.index_cast %545 : i32 to index
      %c0_206 = arith.constant 0 : index
      %c0_207 = arith.constant 0 : index
      %547 = vector.load %arg3[%546, %c0_206, %c0_207] : memref<512x1x128xf32, #tpu.memory_space<vmem>>, vector<1x1x128xf32>
      %548 = vector.shape_cast %547 : vector<1x1x128xf32> to vector<1x128xf32>
      %c0_i32_208 = arith.constant 0 : i32
      %549 = arith.cmpi sgt, %544, %c0_i32_208 : i32
      %550 = arith.extui %549 : i1 to i32
      %551 = arith.sitofp %550 : i32 to f32
      %552 = vector.broadcast %551 : f32 to vector<1x128xf32>
      %553 = arith.mulf %548, %552 : vector<1x128xf32>
      %554 = arith.addf %541, %553 : vector<1x128xf32>
      %c9_i32_209 = arith.constant 9 : i32
      %555 = arith.addi %436, %c9_i32_209 : i32
      %556 = arith.index_cast %555 : i32 to index
      %557 = memref.load %arg2[%556] : memref<4096xi32, #tpu.memory_space<smem>>
      %c511_i32_210 = arith.constant 511 : i32
      %558 = arith.minsi %557, %c511_i32_210 : i32
      %559 = arith.index_cast %558 : i32 to index
      %c0_211 = arith.constant 0 : index
      %c0_212 = arith.constant 0 : index
      %560 = vector.load %arg3[%559, %c0_211, %c0_212] : memref<512x1x128xf32, #tpu.memory_space<vmem>>, vector<1x1x128xf32>
      %561 = vector.shape_cast %560 : vector<1x1x128xf32> to vector<1x128xf32>
      %c0_i32_213 = arith.constant 0 : i32
      %562 = arith.cmpi sgt, %557, %c0_i32_213 : i32
      %563 = arith.extui %562 : i1 to i32
      %564 = arith.sitofp %563 : i32 to f32
      %565 = vector.broadcast %564 : f32 to vector<1x128xf32>
      %566 = arith.mulf %561, %565 : vector<1x128xf32>
      %567 = arith.addf %554, %566 : vector<1x128xf32>
      %c10_i32_214 = arith.constant 10 : i32
      %568 = arith.addi %436, %c10_i32_214 : i32
      %569 = arith.index_cast %568 : i32 to index
      %570 = memref.load %arg2[%569] : memref<4096xi32, #tpu.memory_space<smem>>
      %c511_i32_215 = arith.constant 511 : i32
      %571 = arith.minsi %570, %c511_i32_215 : i32
      %572 = arith.index_cast %571 : i32 to index
      %c0_216 = arith.constant 0 : index
      %c0_217 = arith.constant 0 : index
      %573 = vector.load %arg3[%572, %c0_216, %c0_217] : memref<512x1x128xf32, #tpu.memory_space<vmem>>, vector<1x1x128xf32>
      %574 = vector.shape_cast %573 : vector<1x1x128xf32> to vector<1x128xf32>
      %c0_i32_218 = arith.constant 0 : i32
      %575 = arith.cmpi sgt, %570, %c0_i32_218 : i32
      %576 = arith.extui %575 : i1 to i32
      %577 = arith.sitofp %576 : i32 to f32
      %578 = vector.broadcast %577 : f32 to vector<1x128xf32>
      %579 = arith.mulf %574, %578 : vector<1x128xf32>
      %580 = arith.addf %567, %579 : vector<1x128xf32>
      %c11_i32_219 = arith.constant 11 : i32
      %581 = arith.addi %436, %c11_i32_219 : i32
      %582 = arith.index_cast %581 : i32 to index
      %583 = memref.load %arg2[%582] : memref<4096xi32, #tpu.memory_space<smem>>
      %c511_i32_220 = arith.constant 511 : i32
      %584 = arith.minsi %583, %c511_i32_220 : i32
      %585 = arith.index_cast %584 : i32 to index
      %c0_221 = arith.constant 0 : index
      %c0_222 = arith.constant 0 : index
      %586 = vector.load %arg3[%585, %c0_221, %c0_222] : memref<512x1x128xf32, #tpu.memory_space<vmem>>, vector<1x1x128xf32>
      %587 = vector.shape_cast %586 : vector<1x1x128xf32> to vector<1x128xf32>
      %c0_i32_223 = arith.constant 0 : i32
      %588 = arith.cmpi sgt, %583, %c0_i32_223 : i32
      %589 = arith.extui %588 : i1 to i32
      %590 = arith.sitofp %589 : i32 to f32
      %591 = vector.broadcast %590 : f32 to vector<1x128xf32>
      %592 = arith.mulf %587, %591 : vector<1x128xf32>
      %593 = arith.addf %580, %592 : vector<1x128xf32>
      %c12_i32_224 = arith.constant 12 : i32
      %594 = arith.addi %436, %c12_i32_224 : i32
      %595 = arith.index_cast %594 : i32 to index
      %596 = memref.load %arg2[%595] : memref<4096xi32, #tpu.memory_space<smem>>
      %c511_i32_225 = arith.constant 511 : i32
      %597 = arith.minsi %596, %c511_i32_225 : i32
      %598 = arith.index_cast %597 : i32 to index
      %c0_226 = arith.constant 0 : index
      %c0_227 = arith.constant 0 : index
      %599 = vector.load %arg3[%598, %c0_226, %c0_227] : memref<512x1x128xf32, #tpu.memory_space<vmem>>, vector<1x1x128xf32>
      %600 = vector.shape_cast %599 : vector<1x1x128xf32> to vector<1x128xf32>
      %c0_i32_228 = arith.constant 0 : i32
      %601 = arith.cmpi sgt, %596, %c0_i32_228 : i32
      %602 = arith.extui %601 : i1 to i32
      %603 = arith.sitofp %602 : i32 to f32
      %604 = vector.broadcast %603 : f32 to vector<1x128xf32>
      %605 = arith.mulf %600, %604 : vector<1x128xf32>
      %606 = arith.addf %593, %605 : vector<1x128xf32>
      %c13_i32_229 = arith.constant 13 : i32
      %607 = arith.addi %436, %c13_i32_229 : i32
      %608 = arith.index_cast %607 : i32 to index
      %609 = memref.load %arg2[%608] : memref<4096xi32, #tpu.memory_space<smem>>
      %c511_i32_230 = arith.constant 511 : i32
      %610 = arith.minsi %609, %c511_i32_230 : i32
      %611 = arith.index_cast %610 : i32 to index
      %c0_231 = arith.constant 0 : index
      %c0_232 = arith.constant 0 : index
      %612 = vector.load %arg3[%611, %c0_231, %c0_232] : memref<512x1x128xf32, #tpu.memory_space<vmem>>, vector<1x1x128xf32>
      %613 = vector.shape_cast %612 : vector<1x1x128xf32> to vector<1x128xf32>
      %c0_i32_233 = arith.constant 0 : i32
      %614 = arith.cmpi sgt, %609, %c0_i32_233 : i32
      %615 = arith.extui %614 : i1 to i32
      %616 = arith.sitofp %615 : i32 to f32
      %617 = vector.broadcast %616 : f32 to vector<1x128xf32>
      %618 = arith.mulf %613, %617 : vector<1x128xf32>
      %619 = arith.addf %606, %618 : vector<1x128xf32>
      %c14_i32_234 = arith.constant 14 : i32
      %620 = arith.addi %436, %c14_i32_234 : i32
      %621 = arith.index_cast %620 : i32 to index
      %622 = memref.load %arg2[%621] : memref<4096xi32, #tpu.memory_space<smem>>
      %c511_i32_235 = arith.constant 511 : i32
      %623 = arith.minsi %622, %c511_i32_235 : i32
      %624 = arith.index_cast %623 : i32 to index
      %c0_236 = arith.constant 0 : index
      %c0_237 = arith.constant 0 : index
      %625 = vector.load %arg3[%624, %c0_236, %c0_237] : memref<512x1x128xf32, #tpu.memory_space<vmem>>, vector<1x1x128xf32>
      %626 = vector.shape_cast %625 : vector<1x1x128xf32> to vector<1x128xf32>
      %c0_i32_238 = arith.constant 0 : i32
      %627 = arith.cmpi sgt, %622, %c0_i32_238 : i32
      %628 = arith.extui %627 : i1 to i32
      %629 = arith.sitofp %628 : i32 to f32
      %630 = vector.broadcast %629 : f32 to vector<1x128xf32>
      %631 = arith.mulf %626, %630 : vector<1x128xf32>
      %632 = arith.addf %619, %631 : vector<1x128xf32>
      %c15_i32_239 = arith.constant 15 : i32
      %633 = arith.addi %436, %c15_i32_239 : i32
      %634 = arith.index_cast %633 : i32 to index
      %635 = memref.load %arg2[%634] : memref<4096xi32, #tpu.memory_space<smem>>
      %c511_i32_240 = arith.constant 511 : i32
      %636 = arith.minsi %635, %c511_i32_240 : i32
      %637 = arith.index_cast %636 : i32 to index
      %c0_241 = arith.constant 0 : index
      %c0_242 = arith.constant 0 : index
      %638 = vector.load %arg3[%637, %c0_241, %c0_242] : memref<512x1x128xf32, #tpu.memory_space<vmem>>, vector<1x1x128xf32>
      %639 = vector.shape_cast %638 : vector<1x1x128xf32> to vector<1x128xf32>
      %c0_i32_243 = arith.constant 0 : i32
      %640 = arith.cmpi sgt, %635, %c0_i32_243 : i32
      %641 = arith.extui %640 : i1 to i32
      %642 = arith.sitofp %641 : i32 to f32
      %643 = vector.broadcast %642 : f32 to vector<1x128xf32>
      %644 = arith.mulf %639, %643 : vector<1x128xf32>
      %645 = arith.addf %632, %644 : vector<1x128xf32>
      %c8_i32_244 = arith.constant 8 : i32
      %646 = arith.muli %arg6, %c8_i32_244 : i32
      %647 = arith.addi %0, %646 : i32
      %c2_i32_245 = arith.constant 2 : i32
      %648 = arith.addi %647, %c2_i32_245 : i32
      %c8_i32_246 = arith.constant 8 : i32
      %649 = arith.muli %648, %c8_i32_246 : i32
      %cst_247 = arith.constant 0.000000e+00 : f32
      %650 = vector.broadcast %cst_247 : f32 to vector<1x128xf32>
      %c0_i32_248 = arith.constant 0 : i32
      %651 = arith.addi %649, %c0_i32_248 : i32
      %652 = arith.index_cast %651 : i32 to index
      %653 = memref.load %arg1[%652] : memref<2048xi32, #tpu.memory_space<smem>>
      %c511_i32_249 = arith.constant 511 : i32
      %654 = arith.minsi %653, %c511_i32_249 : i32
      %655 = arith.index_cast %654 : i32 to index
      %c0_250 = arith.constant 0 : index
      %c0_251 = arith.constant 0 : index
      %656 = vector.load %arg3[%655, %c0_250, %c0_251] : memref<512x1x128xf32, #tpu.memory_space<vmem>>, vector<1x1x128xf32>
      %657 = vector.shape_cast %656 : vector<1x1x128xf32> to vector<1x128xf32>
      %c0_i32_252 = arith.constant 0 : i32
      %658 = arith.cmpi sgt, %653, %c0_i32_252 : i32
      %659 = arith.extui %658 : i1 to i32
      %660 = arith.sitofp %659 : i32 to f32
      %661 = vector.broadcast %660 : f32 to vector<1x128xf32>
      %662 = arith.mulf %657, %661 : vector<1x128xf32>
      %663 = arith.addf %650, %662 : vector<1x128xf32>
      %c1_i32_253 = arith.constant 1 : i32
      %664 = arith.addi %649, %c1_i32_253 : i32
      %665 = arith.index_cast %664 : i32 to index
      %666 = memref.load %arg1[%665] : memref<2048xi32, #tpu.memory_space<smem>>
      %c511_i32_254 = arith.constant 511 : i32
      %667 = arith.minsi %666, %c511_i32_254 : i32
      %668 = arith.index_cast %667 : i32 to index
      %c0_255 = arith.constant 0 : index
      %c0_256 = arith.constant 0 : index
      %669 = vector.load %arg3[%668, %c0_255, %c0_256] : memref<512x1x128xf32, #tpu.memory_space<vmem>>, vector<1x1x128xf32>
      %670 = vector.shape_cast %669 : vector<1x1x128xf32> to vector<1x128xf32>
      %c0_i32_257 = arith.constant 0 : i32
      %671 = arith.cmpi sgt, %666, %c0_i32_257 : i32
      %672 = arith.extui %671 : i1 to i32
      %673 = arith.sitofp %672 : i32 to f32
      %674 = vector.broadcast %673 : f32 to vector<1x128xf32>
      %675 = arith.mulf %670, %674 : vector<1x128xf32>
      %676 = arith.addf %663, %675 : vector<1x128xf32>
      %c2_i32_258 = arith.constant 2 : i32
      %677 = arith.addi %649, %c2_i32_258 : i32
      %678 = arith.index_cast %677 : i32 to index
      %679 = memref.load %arg1[%678] : memref<2048xi32, #tpu.memory_space<smem>>
      %c511_i32_259 = arith.constant 511 : i32
      %680 = arith.minsi %679, %c511_i32_259 : i32
      %681 = arith.index_cast %680 : i32 to index
      %c0_260 = arith.constant 0 : index
      %c0_261 = arith.constant 0 : index
      %682 = vector.load %arg3[%681, %c0_260, %c0_261] : memref<512x1x128xf32, #tpu.memory_space<vmem>>, vector<1x1x128xf32>
      %683 = vector.shape_cast %682 : vector<1x1x128xf32> to vector<1x128xf32>
      %c0_i32_262 = arith.constant 0 : i32
      %684 = arith.cmpi sgt, %679, %c0_i32_262 : i32
      %685 = arith.extui %684 : i1 to i32
      %686 = arith.sitofp %685 : i32 to f32
      %687 = vector.broadcast %686 : f32 to vector<1x128xf32>
      %688 = arith.mulf %683, %687 : vector<1x128xf32>
      %689 = arith.addf %676, %688 : vector<1x128xf32>
      %c3_i32_263 = arith.constant 3 : i32
      %690 = arith.addi %649, %c3_i32_263 : i32
      %691 = arith.index_cast %690 : i32 to index
      %692 = memref.load %arg1[%691] : memref<2048xi32, #tpu.memory_space<smem>>
      %c511_i32_264 = arith.constant 511 : i32
      %693 = arith.minsi %692, %c511_i32_264 : i32
      %694 = arith.index_cast %693 : i32 to index
      %c0_265 = arith.constant 0 : index
      %c0_266 = arith.constant 0 : index
      %695 = vector.load %arg3[%694, %c0_265, %c0_266] : memref<512x1x128xf32, #tpu.memory_space<vmem>>, vector<1x1x128xf32>
      %696 = vector.shape_cast %695 : vector<1x1x128xf32> to vector<1x128xf32>
      %c0_i32_267 = arith.constant 0 : i32
      %697 = arith.cmpi sgt, %692, %c0_i32_267 : i32
      %698 = arith.extui %697 : i1 to i32
      %699 = arith.sitofp %698 : i32 to f32
      %700 = vector.broadcast %699 : f32 to vector<1x128xf32>
      %701 = arith.mulf %696, %700 : vector<1x128xf32>
      %702 = arith.addf %689, %701 : vector<1x128xf32>
      %c4_i32_268 = arith.constant 4 : i32
      %703 = arith.addi %649, %c4_i32_268 : i32
      %704 = arith.index_cast %703 : i32 to index
      %705 = memref.load %arg1[%704] : memref<2048xi32, #tpu.memory_space<smem>>
      %c511_i32_269 = arith.constant 511 : i32
      %706 = arith.minsi %705, %c511_i32_269 : i32
      %707 = arith.index_cast %706 : i32 to index
      %c0_270 = arith.constant 0 : index
      %c0_271 = arith.constant 0 : index
      %708 = vector.load %arg3[%707, %c0_270, %c0_271] : memref<512x1x128xf32, #tpu.memory_space<vmem>>, vector<1x1x128xf32>
      %709 = vector.shape_cast %708 : vector<1x1x128xf32> to vector<1x128xf32>
      %c0_i32_272 = arith.constant 0 : i32
      %710 = arith.cmpi sgt, %705, %c0_i32_272 : i32
      %711 = arith.extui %710 : i1 to i32
      %712 = arith.sitofp %711 : i32 to f32
      %713 = vector.broadcast %712 : f32 to vector<1x128xf32>
      %714 = arith.mulf %709, %713 : vector<1x128xf32>
      %715 = arith.addf %702, %714 : vector<1x128xf32>
      %c5_i32_273 = arith.constant 5 : i32
      %716 = arith.addi %649, %c5_i32_273 : i32
      %717 = arith.index_cast %716 : i32 to index
      %718 = memref.load %arg1[%717] : memref<2048xi32, #tpu.memory_space<smem>>
      %c511_i32_274 = arith.constant 511 : i32
      %719 = arith.minsi %718, %c511_i32_274 : i32
      %720 = arith.index_cast %719 : i32 to index
      %c0_275 = arith.constant 0 : index
      %c0_276 = arith.constant 0 : index
      %721 = vector.load %arg3[%720, %c0_275, %c0_276] : memref<512x1x128xf32, #tpu.memory_space<vmem>>, vector<1x1x128xf32>
      %722 = vector.shape_cast %721 : vector<1x1x128xf32> to vector<1x128xf32>
      %c0_i32_277 = arith.constant 0 : i32
      %723 = arith.cmpi sgt, %718, %c0_i32_277 : i32
      %724 = arith.extui %723 : i1 to i32
      %725 = arith.sitofp %724 : i32 to f32
      %726 = vector.broadcast %725 : f32 to vector<1x128xf32>
      %727 = arith.mulf %722, %726 : vector<1x128xf32>
      %728 = arith.addf %715, %727 : vector<1x128xf32>
      %c6_i32_278 = arith.constant 6 : i32
      %729 = arith.addi %649, %c6_i32_278 : i32
      %730 = arith.index_cast %729 : i32 to index
      %731 = memref.load %arg1[%730] : memref<2048xi32, #tpu.memory_space<smem>>
      %c511_i32_279 = arith.constant 511 : i32
      %732 = arith.minsi %731, %c511_i32_279 : i32
      %733 = arith.index_cast %732 : i32 to index
      %c0_280 = arith.constant 0 : index
      %c0_281 = arith.constant 0 : index
      %734 = vector.load %arg3[%733, %c0_280, %c0_281] : memref<512x1x128xf32, #tpu.memory_space<vmem>>, vector<1x1x128xf32>
      %735 = vector.shape_cast %734 : vector<1x1x128xf32> to vector<1x128xf32>
      %c0_i32_282 = arith.constant 0 : i32
      %736 = arith.cmpi sgt, %731, %c0_i32_282 : i32
      %737 = arith.extui %736 : i1 to i32
      %738 = arith.sitofp %737 : i32 to f32
      %739 = vector.broadcast %738 : f32 to vector<1x128xf32>
      %740 = arith.mulf %735, %739 : vector<1x128xf32>
      %741 = arith.addf %728, %740 : vector<1x128xf32>
      %c7_i32_283 = arith.constant 7 : i32
      %742 = arith.addi %649, %c7_i32_283 : i32
      %743 = arith.index_cast %742 : i32 to index
      %744 = memref.load %arg1[%743] : memref<2048xi32, #tpu.memory_space<smem>>
      %c511_i32_284 = arith.constant 511 : i32
      %745 = arith.minsi %744, %c511_i32_284 : i32
      %746 = arith.index_cast %745 : i32 to index
      %c0_285 = arith.constant 0 : index
      %c0_286 = arith.constant 0 : index
      %747 = vector.load %arg3[%746, %c0_285, %c0_286] : memref<512x1x128xf32, #tpu.memory_space<vmem>>, vector<1x1x128xf32>
      %748 = vector.shape_cast %747 : vector<1x1x128xf32> to vector<1x128xf32>
      %c0_i32_287 = arith.constant 0 : i32
      %749 = arith.cmpi sgt, %744, %c0_i32_287 : i32
      %750 = arith.extui %749 : i1 to i32
      %751 = arith.sitofp %750 : i32 to f32
      %752 = vector.broadcast %751 : f32 to vector<1x128xf32>
      %753 = arith.mulf %748, %752 : vector<1x128xf32>
      %754 = arith.addf %741, %753 : vector<1x128xf32>
      %c16_i32_288 = arith.constant 16 : i32
      %755 = arith.muli %648, %c16_i32_288 : i32
      %cst_289 = arith.constant 0.000000e+00 : f32
      %756 = vector.broadcast %cst_289 : f32 to vector<1x128xf32>
      %c0_i32_290 = arith.constant 0 : i32
      %757 = arith.addi %755, %c0_i32_290 : i32
      %758 = arith.index_cast %757 : i32 to index
      %759 = memref.load %arg2[%758] : memref<4096xi32, #tpu.memory_space<smem>>
      %c511_i32_291 = arith.constant 511 : i32
      %760 = arith.minsi %759, %c511_i32_291 : i32
      %761 = arith.index_cast %760 : i32 to index
      %c0_292 = arith.constant 0 : index
      %c0_293 = arith.constant 0 : index
      %762 = vector.load %arg3[%761, %c0_292, %c0_293] : memref<512x1x128xf32, #tpu.memory_space<vmem>>, vector<1x1x128xf32>
      %763 = vector.shape_cast %762 : vector<1x1x128xf32> to vector<1x128xf32>
      %c0_i32_294 = arith.constant 0 : i32
      %764 = arith.cmpi sgt, %759, %c0_i32_294 : i32
      %765 = arith.extui %764 : i1 to i32
      %766 = arith.sitofp %765 : i32 to f32
      %767 = vector.broadcast %766 : f32 to vector<1x128xf32>
      %768 = arith.mulf %763, %767 : vector<1x128xf32>
      %769 = arith.addf %756, %768 : vector<1x128xf32>
      %c1_i32_295 = arith.constant 1 : i32
      %770 = arith.addi %755, %c1_i32_295 : i32
      %771 = arith.index_cast %770 : i32 to index
      %772 = memref.load %arg2[%771] : memref<4096xi32, #tpu.memory_space<smem>>
      %c511_i32_296 = arith.constant 511 : i32
      %773 = arith.minsi %772, %c511_i32_296 : i32
      %774 = arith.index_cast %773 : i32 to index
      %c0_297 = arith.constant 0 : index
      %c0_298 = arith.constant 0 : index
      %775 = vector.load %arg3[%774, %c0_297, %c0_298] : memref<512x1x128xf32, #tpu.memory_space<vmem>>, vector<1x1x128xf32>
      %776 = vector.shape_cast %775 : vector<1x1x128xf32> to vector<1x128xf32>
      %c0_i32_299 = arith.constant 0 : i32
      %777 = arith.cmpi sgt, %772, %c0_i32_299 : i32
      %778 = arith.extui %777 : i1 to i32
      %779 = arith.sitofp %778 : i32 to f32
      %780 = vector.broadcast %779 : f32 to vector<1x128xf32>
      %781 = arith.mulf %776, %780 : vector<1x128xf32>
      %782 = arith.addf %769, %781 : vector<1x128xf32>
      %c2_i32_300 = arith.constant 2 : i32
      %783 = arith.addi %755, %c2_i32_300 : i32
      %784 = arith.index_cast %783 : i32 to index
      %785 = memref.load %arg2[%784] : memref<4096xi32, #tpu.memory_space<smem>>
      %c511_i32_301 = arith.constant 511 : i32
      %786 = arith.minsi %785, %c511_i32_301 : i32
      %787 = arith.index_cast %786 : i32 to index
      %c0_302 = arith.constant 0 : index
      %c0_303 = arith.constant 0 : index
      %788 = vector.load %arg3[%787, %c0_302, %c0_303] : memref<512x1x128xf32, #tpu.memory_space<vmem>>, vector<1x1x128xf32>
      %789 = vector.shape_cast %788 : vector<1x1x128xf32> to vector<1x128xf32>
      %c0_i32_304 = arith.constant 0 : i32
      %790 = arith.cmpi sgt, %785, %c0_i32_304 : i32
      %791 = arith.extui %790 : i1 to i32
      %792 = arith.sitofp %791 : i32 to f32
      %793 = vector.broadcast %792 : f32 to vector<1x128xf32>
      %794 = arith.mulf %789, %793 : vector<1x128xf32>
      %795 = arith.addf %782, %794 : vector<1x128xf32>
      %c3_i32_305 = arith.constant 3 : i32
      %796 = arith.addi %755, %c3_i32_305 : i32
      %797 = arith.index_cast %796 : i32 to index
      %798 = memref.load %arg2[%797] : memref<4096xi32, #tpu.memory_space<smem>>
      %c511_i32_306 = arith.constant 511 : i32
      %799 = arith.minsi %798, %c511_i32_306 : i32
      %800 = arith.index_cast %799 : i32 to index
      %c0_307 = arith.constant 0 : index
      %c0_308 = arith.constant 0 : index
      %801 = vector.load %arg3[%800, %c0_307, %c0_308] : memref<512x1x128xf32, #tpu.memory_space<vmem>>, vector<1x1x128xf32>
      %802 = vector.shape_cast %801 : vector<1x1x128xf32> to vector<1x128xf32>
      %c0_i32_309 = arith.constant 0 : i32
      %803 = arith.cmpi sgt, %798, %c0_i32_309 : i32
      %804 = arith.extui %803 : i1 to i32
      %805 = arith.sitofp %804 : i32 to f32
      %806 = vector.broadcast %805 : f32 to vector<1x128xf32>
      %807 = arith.mulf %802, %806 : vector<1x128xf32>
      %808 = arith.addf %795, %807 : vector<1x128xf32>
      %c4_i32_310 = arith.constant 4 : i32
      %809 = arith.addi %755, %c4_i32_310 : i32
      %810 = arith.index_cast %809 : i32 to index
      %811 = memref.load %arg2[%810] : memref<4096xi32, #tpu.memory_space<smem>>
      %c511_i32_311 = arith.constant 511 : i32
      %812 = arith.minsi %811, %c511_i32_311 : i32
      %813 = arith.index_cast %812 : i32 to index
      %c0_312 = arith.constant 0 : index
      %c0_313 = arith.constant 0 : index
      %814 = vector.load %arg3[%813, %c0_312, %c0_313] : memref<512x1x128xf32, #tpu.memory_space<vmem>>, vector<1x1x128xf32>
      %815 = vector.shape_cast %814 : vector<1x1x128xf32> to vector<1x128xf32>
      %c0_i32_314 = arith.constant 0 : i32
      %816 = arith.cmpi sgt, %811, %c0_i32_314 : i32
      %817 = arith.extui %816 : i1 to i32
      %818 = arith.sitofp %817 : i32 to f32
      %819 = vector.broadcast %818 : f32 to vector<1x128xf32>
      %820 = arith.mulf %815, %819 : vector<1x128xf32>
      %821 = arith.addf %808, %820 : vector<1x128xf32>
      %c5_i32_315 = arith.constant 5 : i32
      %822 = arith.addi %755, %c5_i32_315 : i32
      %823 = arith.index_cast %822 : i32 to index
      %824 = memref.load %arg2[%823] : memref<4096xi32, #tpu.memory_space<smem>>
      %c511_i32_316 = arith.constant 511 : i32
      %825 = arith.minsi %824, %c511_i32_316 : i32
      %826 = arith.index_cast %825 : i32 to index
      %c0_317 = arith.constant 0 : index
      %c0_318 = arith.constant 0 : index
      %827 = vector.load %arg3[%826, %c0_317, %c0_318] : memref<512x1x128xf32, #tpu.memory_space<vmem>>, vector<1x1x128xf32>
      %828 = vector.shape_cast %827 : vector<1x1x128xf32> to vector<1x128xf32>
      %c0_i32_319 = arith.constant 0 : i32
      %829 = arith.cmpi sgt, %824, %c0_i32_319 : i32
      %830 = arith.extui %829 : i1 to i32
      %831 = arith.sitofp %830 : i32 to f32
      %832 = vector.broadcast %831 : f32 to vector<1x128xf32>
      %833 = arith.mulf %828, %832 : vector<1x128xf32>
      %834 = arith.addf %821, %833 : vector<1x128xf32>
      %c6_i32_320 = arith.constant 6 : i32
      %835 = arith.addi %755, %c6_i32_320 : i32
      %836 = arith.index_cast %835 : i32 to index
      %837 = memref.load %arg2[%836] : memref<4096xi32, #tpu.memory_space<smem>>
      %c511_i32_321 = arith.constant 511 : i32
      %838 = arith.minsi %837, %c511_i32_321 : i32
      %839 = arith.index_cast %838 : i32 to index
      %c0_322 = arith.constant 0 : index
      %c0_323 = arith.constant 0 : index
      %840 = vector.load %arg3[%839, %c0_322, %c0_323] : memref<512x1x128xf32, #tpu.memory_space<vmem>>, vector<1x1x128xf32>
      %841 = vector.shape_cast %840 : vector<1x1x128xf32> to vector<1x128xf32>
      %c0_i32_324 = arith.constant 0 : i32
      %842 = arith.cmpi sgt, %837, %c0_i32_324 : i32
      %843 = arith.extui %842 : i1 to i32
      %844 = arith.sitofp %843 : i32 to f32
      %845 = vector.broadcast %844 : f32 to vector<1x128xf32>
      %846 = arith.mulf %841, %845 : vector<1x128xf32>
      %847 = arith.addf %834, %846 : vector<1x128xf32>
      %c7_i32_325 = arith.constant 7 : i32
      %848 = arith.addi %755, %c7_i32_325 : i32
      %849 = arith.index_cast %848 : i32 to index
      %850 = memref.load %arg2[%849] : memref<4096xi32, #tpu.memory_space<smem>>
      %c511_i32_326 = arith.constant 511 : i32
      %851 = arith.minsi %850, %c511_i32_326 : i32
      %852 = arith.index_cast %851 : i32 to index
      %c0_327 = arith.constant 0 : index
      %c0_328 = arith.constant 0 : index
      %853 = vector.load %arg3[%852, %c0_327, %c0_328] : memref<512x1x128xf32, #tpu.memory_space<vmem>>, vector<1x1x128xf32>
      %854 = vector.shape_cast %853 : vector<1x1x128xf32> to vector<1x128xf32>
      %c0_i32_329 = arith.constant 0 : i32
      %855 = arith.cmpi sgt, %850, %c0_i32_329 : i32
      %856 = arith.extui %855 : i1 to i32
      %857 = arith.sitofp %856 : i32 to f32
      %858 = vector.broadcast %857 : f32 to vector<1x128xf32>
      %859 = arith.mulf %854, %858 : vector<1x128xf32>
      %860 = arith.addf %847, %859 : vector<1x128xf32>
      %c8_i32_330 = arith.constant 8 : i32
      %861 = arith.addi %755, %c8_i32_330 : i32
      %862 = arith.index_cast %861 : i32 to index
      %863 = memref.load %arg2[%862] : memref<4096xi32, #tpu.memory_space<smem>>
      %c511_i32_331 = arith.constant 511 : i32
      %864 = arith.minsi %863, %c511_i32_331 : i32
      %865 = arith.index_cast %864 : i32 to index
      %c0_332 = arith.constant 0 : index
      %c0_333 = arith.constant 0 : index
      %866 = vector.load %arg3[%865, %c0_332, %c0_333] : memref<512x1x128xf32, #tpu.memory_space<vmem>>, vector<1x1x128xf32>
      %867 = vector.shape_cast %866 : vector<1x1x128xf32> to vector<1x128xf32>
      %c0_i32_334 = arith.constant 0 : i32
      %868 = arith.cmpi sgt, %863, %c0_i32_334 : i32
      %869 = arith.extui %868 : i1 to i32
      %870 = arith.sitofp %869 : i32 to f32
      %871 = vector.broadcast %870 : f32 to vector<1x128xf32>
      %872 = arith.mulf %867, %871 : vector<1x128xf32>
      %873 = arith.addf %860, %872 : vector<1x128xf32>
      %c9_i32_335 = arith.constant 9 : i32
      %874 = arith.addi %755, %c9_i32_335 : i32
      %875 = arith.index_cast %874 : i32 to index
      %876 = memref.load %arg2[%875] : memref<4096xi32, #tpu.memory_space<smem>>
      %c511_i32_336 = arith.constant 511 : i32
      %877 = arith.minsi %876, %c511_i32_336 : i32
      %878 = arith.index_cast %877 : i32 to index
      %c0_337 = arith.constant 0 : index
      %c0_338 = arith.constant 0 : index
      %879 = vector.load %arg3[%878, %c0_337, %c0_338] : memref<512x1x128xf32, #tpu.memory_space<vmem>>, vector<1x1x128xf32>
      %880 = vector.shape_cast %879 : vector<1x1x128xf32> to vector<1x128xf32>
      %c0_i32_339 = arith.constant 0 : i32
      %881 = arith.cmpi sgt, %876, %c0_i32_339 : i32
      %882 = arith.extui %881 : i1 to i32
      %883 = arith.sitofp %882 : i32 to f32
      %884 = vector.broadcast %883 : f32 to vector<1x128xf32>
      %885 = arith.mulf %880, %884 : vector<1x128xf32>
      %886 = arith.addf %873, %885 : vector<1x128xf32>
      %c10_i32_340 = arith.constant 10 : i32
      %887 = arith.addi %755, %c10_i32_340 : i32
      %888 = arith.index_cast %887 : i32 to index
      %889 = memref.load %arg2[%888] : memref<4096xi32, #tpu.memory_space<smem>>
      %c511_i32_341 = arith.constant 511 : i32
      %890 = arith.minsi %889, %c511_i32_341 : i32
      %891 = arith.index_cast %890 : i32 to index
      %c0_342 = arith.constant 0 : index
      %c0_343 = arith.constant 0 : index
      %892 = vector.load %arg3[%891, %c0_342, %c0_343] : memref<512x1x128xf32, #tpu.memory_space<vmem>>, vector<1x1x128xf32>
      %893 = vector.shape_cast %892 : vector<1x1x128xf32> to vector<1x128xf32>
      %c0_i32_344 = arith.constant 0 : i32
      %894 = arith.cmpi sgt, %889, %c0_i32_344 : i32
      %895 = arith.extui %894 : i1 to i32
      %896 = arith.sitofp %895 : i32 to f32
      %897 = vector.broadcast %896 : f32 to vector<1x128xf32>
      %898 = arith.mulf %893, %897 : vector<1x128xf32>
      %899 = arith.addf %886, %898 : vector<1x128xf32>
      %c11_i32_345 = arith.constant 11 : i32
      %900 = arith.addi %755, %c11_i32_345 : i32
      %901 = arith.index_cast %900 : i32 to index
      %902 = memref.load %arg2[%901] : memref<4096xi32, #tpu.memory_space<smem>>
      %c511_i32_346 = arith.constant 511 : i32
      %903 = arith.minsi %902, %c511_i32_346 : i32
      %904 = arith.index_cast %903 : i32 to index
      %c0_347 = arith.constant 0 : index
      %c0_348 = arith.constant 0 : index
      %905 = vector.load %arg3[%904, %c0_347, %c0_348] : memref<512x1x128xf32, #tpu.memory_space<vmem>>, vector<1x1x128xf32>
      %906 = vector.shape_cast %905 : vector<1x1x128xf32> to vector<1x128xf32>
      %c0_i32_349 = arith.constant 0 : i32
      %907 = arith.cmpi sgt, %902, %c0_i32_349 : i32
      %908 = arith.extui %907 : i1 to i32
      %909 = arith.sitofp %908 : i32 to f32
      %910 = vector.broadcast %909 : f32 to vector<1x128xf32>
      %911 = arith.mulf %906, %910 : vector<1x128xf32>
      %912 = arith.addf %899, %911 : vector<1x128xf32>
      %c12_i32_350 = arith.constant 12 : i32
      %913 = arith.addi %755, %c12_i32_350 : i32
      %914 = arith.index_cast %913 : i32 to index
      %915 = memref.load %arg2[%914] : memref<4096xi32, #tpu.memory_space<smem>>
      %c511_i32_351 = arith.constant 511 : i32
      %916 = arith.minsi %915, %c511_i32_351 : i32
      %917 = arith.index_cast %916 : i32 to index
      %c0_352 = arith.constant 0 : index
      %c0_353 = arith.constant 0 : index
      %918 = vector.load %arg3[%917, %c0_352, %c0_353] : memref<512x1x128xf32, #tpu.memory_space<vmem>>, vector<1x1x128xf32>
      %919 = vector.shape_cast %918 : vector<1x1x128xf32> to vector<1x128xf32>
      %c0_i32_354 = arith.constant 0 : i32
      %920 = arith.cmpi sgt, %915, %c0_i32_354 : i32
      %921 = arith.extui %920 : i1 to i32
      %922 = arith.sitofp %921 : i32 to f32
      %923 = vector.broadcast %922 : f32 to vector<1x128xf32>
      %924 = arith.mulf %919, %923 : vector<1x128xf32>
      %925 = arith.addf %912, %924 : vector<1x128xf32>
      %c13_i32_355 = arith.constant 13 : i32
      %926 = arith.addi %755, %c13_i32_355 : i32
      %927 = arith.index_cast %926 : i32 to index
      %928 = memref.load %arg2[%927] : memref<4096xi32, #tpu.memory_space<smem>>
      %c511_i32_356 = arith.constant 511 : i32
      %929 = arith.minsi %928, %c511_i32_356 : i32
      %930 = arith.index_cast %929 : i32 to index
      %c0_357 = arith.constant 0 : index
      %c0_358 = arith.constant 0 : index
      %931 = vector.load %arg3[%930, %c0_357, %c0_358] : memref<512x1x128xf32, #tpu.memory_space<vmem>>, vector<1x1x128xf32>
      %932 = vector.shape_cast %931 : vector<1x1x128xf32> to vector<1x128xf32>
      %c0_i32_359 = arith.constant 0 : i32
      %933 = arith.cmpi sgt, %928, %c0_i32_359 : i32
      %934 = arith.extui %933 : i1 to i32
      %935 = arith.sitofp %934 : i32 to f32
      %936 = vector.broadcast %935 : f32 to vector<1x128xf32>
      %937 = arith.mulf %932, %936 : vector<1x128xf32>
      %938 = arith.addf %925, %937 : vector<1x128xf32>
      %c14_i32_360 = arith.constant 14 : i32
      %939 = arith.addi %755, %c14_i32_360 : i32
      %940 = arith.index_cast %939 : i32 to index
      %941 = memref.load %arg2[%940] : memref<4096xi32, #tpu.memory_space<smem>>
      %c511_i32_361 = arith.constant 511 : i32
      %942 = arith.minsi %941, %c511_i32_361 : i32
      %943 = arith.index_cast %942 : i32 to index
      %c0_362 = arith.constant 0 : index
      %c0_363 = arith.constant 0 : index
      %944 = vector.load %arg3[%943, %c0_362, %c0_363] : memref<512x1x128xf32, #tpu.memory_space<vmem>>, vector<1x1x128xf32>
      %945 = vector.shape_cast %944 : vector<1x1x128xf32> to vector<1x128xf32>
      %c0_i32_364 = arith.constant 0 : i32
      %946 = arith.cmpi sgt, %941, %c0_i32_364 : i32
      %947 = arith.extui %946 : i1 to i32
      %948 = arith.sitofp %947 : i32 to f32
      %949 = vector.broadcast %948 : f32 to vector<1x128xf32>
      %950 = arith.mulf %945, %949 : vector<1x128xf32>
      %951 = arith.addf %938, %950 : vector<1x128xf32>
      %c15_i32_365 = arith.constant 15 : i32
      %952 = arith.addi %755, %c15_i32_365 : i32
      %953 = arith.index_cast %952 : i32 to index
      %954 = memref.load %arg2[%953] : memref<4096xi32, #tpu.memory_space<smem>>
      %c511_i32_366 = arith.constant 511 : i32
      %955 = arith.minsi %954, %c511_i32_366 : i32
      %956 = arith.index_cast %955 : i32 to index
      %c0_367 = arith.constant 0 : index
      %c0_368 = arith.constant 0 : index
      %957 = vector.load %arg3[%956, %c0_367, %c0_368] : memref<512x1x128xf32, #tpu.memory_space<vmem>>, vector<1x1x128xf32>
      %958 = vector.shape_cast %957 : vector<1x1x128xf32> to vector<1x128xf32>
      %c0_i32_369 = arith.constant 0 : i32
      %959 = arith.cmpi sgt, %954, %c0_i32_369 : i32
      %960 = arith.extui %959 : i1 to i32
      %961 = arith.sitofp %960 : i32 to f32
      %962 = vector.broadcast %961 : f32 to vector<1x128xf32>
      %963 = arith.mulf %958, %962 : vector<1x128xf32>
      %964 = arith.addf %951, %963 : vector<1x128xf32>
      %c8_i32_370 = arith.constant 8 : i32
      %965 = arith.muli %arg6, %c8_i32_370 : i32
      %966 = arith.addi %0, %965 : i32
      %c3_i32_371 = arith.constant 3 : i32
      %967 = arith.addi %966, %c3_i32_371 : i32
      %c8_i32_372 = arith.constant 8 : i32
      %968 = arith.muli %967, %c8_i32_372 : i32
      %cst_373 = arith.constant 0.000000e+00 : f32
      %969 = vector.broadcast %cst_373 : f32 to vector<1x128xf32>
      %c0_i32_374 = arith.constant 0 : i32
      %970 = arith.addi %968, %c0_i32_374 : i32
      %971 = arith.index_cast %970 : i32 to index
      %972 = memref.load %arg1[%971] : memref<2048xi32, #tpu.memory_space<smem>>
      %c511_i32_375 = arith.constant 511 : i32
      %973 = arith.minsi %972, %c511_i32_375 : i32
      %974 = arith.index_cast %973 : i32 to index
      %c0_376 = arith.constant 0 : index
      %c0_377 = arith.constant 0 : index
      %975 = vector.load %arg3[%974, %c0_376, %c0_377] : memref<512x1x128xf32, #tpu.memory_space<vmem>>, vector<1x1x128xf32>
      %976 = vector.shape_cast %975 : vector<1x1x128xf32> to vector<1x128xf32>
      %c0_i32_378 = arith.constant 0 : i32
      %977 = arith.cmpi sgt, %972, %c0_i32_378 : i32
      %978 = arith.extui %977 : i1 to i32
      %979 = arith.sitofp %978 : i32 to f32
      %980 = vector.broadcast %979 : f32 to vector<1x128xf32>
      %981 = arith.mulf %976, %980 : vector<1x128xf32>
      %982 = arith.addf %969, %981 : vector<1x128xf32>
      %c1_i32_379 = arith.constant 1 : i32
      %983 = arith.addi %968, %c1_i32_379 : i32
      %984 = arith.index_cast %983 : i32 to index
      %985 = memref.load %arg1[%984] : memref<2048xi32, #tpu.memory_space<smem>>
      %c511_i32_380 = arith.constant 511 : i32
      %986 = arith.minsi %985, %c511_i32_380 : i32
      %987 = arith.index_cast %986 : i32 to index
      %c0_381 = arith.constant 0 : index
      %c0_382 = arith.constant 0 : index
      %988 = vector.load %arg3[%987, %c0_381, %c0_382] : memref<512x1x128xf32, #tpu.memory_space<vmem>>, vector<1x1x128xf32>
      %989 = vector.shape_cast %988 : vector<1x1x128xf32> to vector<1x128xf32>
      %c0_i32_383 = arith.constant 0 : i32
      %990 = arith.cmpi sgt, %985, %c0_i32_383 : i32
      %991 = arith.extui %990 : i1 to i32
      %992 = arith.sitofp %991 : i32 to f32
      %993 = vector.broadcast %992 : f32 to vector<1x128xf32>
      %994 = arith.mulf %989, %993 : vector<1x128xf32>
      %995 = arith.addf %982, %994 : vector<1x128xf32>
      %c2_i32_384 = arith.constant 2 : i32
      %996 = arith.addi %968, %c2_i32_384 : i32
      %997 = arith.index_cast %996 : i32 to index
      %998 = memref.load %arg1[%997] : memref<2048xi32, #tpu.memory_space<smem>>
      %c511_i32_385 = arith.constant 511 : i32
      %999 = arith.minsi %998, %c511_i32_385 : i32
      %1000 = arith.index_cast %999 : i32 to index
      %c0_386 = arith.constant 0 : index
      %c0_387 = arith.constant 0 : index
      %1001 = vector.load %arg3[%1000, %c0_386, %c0_387] : memref<512x1x128xf32, #tpu.memory_space<vmem>>, vector<1x1x128xf32>
      %1002 = vector.shape_cast %1001 : vector<1x1x128xf32> to vector<1x128xf32>
      %c0_i32_388 = arith.constant 0 : i32
      %1003 = arith.cmpi sgt, %998, %c0_i32_388 : i32
      %1004 = arith.extui %1003 : i1 to i32
      %1005 = arith.sitofp %1004 : i32 to f32
      %1006 = vector.broadcast %1005 : f32 to vector<1x128xf32>
      %1007 = arith.mulf %1002, %1006 : vector<1x128xf32>
      %1008 = arith.addf %995, %1007 : vector<1x128xf32>
      %c3_i32_389 = arith.constant 3 : i32
      %1009 = arith.addi %968, %c3_i32_389 : i32
      %1010 = arith.index_cast %1009 : i32 to index
      %1011 = memref.load %arg1[%1010] : memref<2048xi32, #tpu.memory_space<smem>>
      %c511_i32_390 = arith.constant 511 : i32
      %1012 = arith.minsi %1011, %c511_i32_390 : i32
      %1013 = arith.index_cast %1012 : i32 to index
      %c0_391 = arith.constant 0 : index
      %c0_392 = arith.constant 0 : index
      %1014 = vector.load %arg3[%1013, %c0_391, %c0_392] : memref<512x1x128xf32, #tpu.memory_space<vmem>>, vector<1x1x128xf32>
      %1015 = vector.shape_cast %1014 : vector<1x1x128xf32> to vector<1x128xf32>
      %c0_i32_393 = arith.constant 0 : i32
      %1016 = arith.cmpi sgt, %1011, %c0_i32_393 : i32
      %1017 = arith.extui %1016 : i1 to i32
      %1018 = arith.sitofp %1017 : i32 to f32
      %1019 = vector.broadcast %1018 : f32 to vector<1x128xf32>
      %1020 = arith.mulf %1015, %1019 : vector<1x128xf32>
      %1021 = arith.addf %1008, %1020 : vector<1x128xf32>
      %c4_i32_394 = arith.constant 4 : i32
      %1022 = arith.addi %968, %c4_i32_394 : i32
      %1023 = arith.index_cast %1022 : i32 to index
      %1024 = memref.load %arg1[%1023] : memref<2048xi32, #tpu.memory_space<smem>>
      %c511_i32_395 = arith.constant 511 : i32
      %1025 = arith.minsi %1024, %c511_i32_395 : i32
      %1026 = arith.index_cast %1025 : i32 to index
      %c0_396 = arith.constant 0 : index
      %c0_397 = arith.constant 0 : index
      %1027 = vector.load %arg3[%1026, %c0_396, %c0_397] : memref<512x1x128xf32, #tpu.memory_space<vmem>>, vector<1x1x128xf32>
      %1028 = vector.shape_cast %1027 : vector<1x1x128xf32> to vector<1x128xf32>
      %c0_i32_398 = arith.constant 0 : i32
      %1029 = arith.cmpi sgt, %1024, %c0_i32_398 : i32
      %1030 = arith.extui %1029 : i1 to i32
      %1031 = arith.sitofp %1030 : i32 to f32
      %1032 = vector.broadcast %1031 : f32 to vector<1x128xf32>
      %1033 = arith.mulf %1028, %1032 : vector<1x128xf32>
      %1034 = arith.addf %1021, %1033 : vector<1x128xf32>
      %c5_i32_399 = arith.constant 5 : i32
      %1035 = arith.addi %968, %c5_i32_399 : i32
      %1036 = arith.index_cast %1035 : i32 to index
      %1037 = memref.load %arg1[%1036] : memref<2048xi32, #tpu.memory_space<smem>>
      %c511_i32_400 = arith.constant 511 : i32
      %1038 = arith.minsi %1037, %c511_i32_400 : i32
      %1039 = arith.index_cast %1038 : i32 to index
      %c0_401 = arith.constant 0 : index
      %c0_402 = arith.constant 0 : index
      %1040 = vector.load %arg3[%1039, %c0_401, %c0_402] : memref<512x1x128xf32, #tpu.memory_space<vmem>>, vector<1x1x128xf32>
      %1041 = vector.shape_cast %1040 : vector<1x1x128xf32> to vector<1x128xf32>
      %c0_i32_403 = arith.constant 0 : i32
      %1042 = arith.cmpi sgt, %1037, %c0_i32_403 : i32
      %1043 = arith.extui %1042 : i1 to i32
      %1044 = arith.sitofp %1043 : i32 to f32
      %1045 = vector.broadcast %1044 : f32 to vector<1x128xf32>
      %1046 = arith.mulf %1041, %1045 : vector<1x128xf32>
      %1047 = arith.addf %1034, %1046 : vector<1x128xf32>
      %c6_i32_404 = arith.constant 6 : i32
      %1048 = arith.addi %968, %c6_i32_404 : i32
      %1049 = arith.index_cast %1048 : i32 to index
      %1050 = memref.load %arg1[%1049] : memref<2048xi32, #tpu.memory_space<smem>>
      %c511_i32_405 = arith.constant 511 : i32
      %1051 = arith.minsi %1050, %c511_i32_405 : i32
      %1052 = arith.index_cast %1051 : i32 to index
      %c0_406 = arith.constant 0 : index
      %c0_407 = arith.constant 0 : index
      %1053 = vector.load %arg3[%1052, %c0_406, %c0_407] : memref<512x1x128xf32, #tpu.memory_space<vmem>>, vector<1x1x128xf32>
      %1054 = vector.shape_cast %1053 : vector<1x1x128xf32> to vector<1x128xf32>
      %c0_i32_408 = arith.constant 0 : i32
      %1055 = arith.cmpi sgt, %1050, %c0_i32_408 : i32
      %1056 = arith.extui %1055 : i1 to i32
      %1057 = arith.sitofp %1056 : i32 to f32
      %1058 = vector.broadcast %1057 : f32 to vector<1x128xf32>
      %1059 = arith.mulf %1054, %1058 : vector<1x128xf32>
      %1060 = arith.addf %1047, %1059 : vector<1x128xf32>
      %c7_i32_409 = arith.constant 7 : i32
      %1061 = arith.addi %968, %c7_i32_409 : i32
      %1062 = arith.index_cast %1061 : i32 to index
      %1063 = memref.load %arg1[%1062] : memref<2048xi32, #tpu.memory_space<smem>>
      %c511_i32_410 = arith.constant 511 : i32
      %1064 = arith.minsi %1063, %c511_i32_410 : i32
      %1065 = arith.index_cast %1064 : i32 to index
      %c0_411 = arith.constant 0 : index
      %c0_412 = arith.constant 0 : index
      %1066 = vector.load %arg3[%1065, %c0_411, %c0_412] : memref<512x1x128xf32, #tpu.memory_space<vmem>>, vector<1x1x128xf32>
      %1067 = vector.shape_cast %1066 : vector<1x1x128xf32> to vector<1x128xf32>
      %c0_i32_413 = arith.constant 0 : i32
      %1068 = arith.cmpi sgt, %1063, %c0_i32_413 : i32
      %1069 = arith.extui %1068 : i1 to i32
      %1070 = arith.sitofp %1069 : i32 to f32
      %1071 = vector.broadcast %1070 : f32 to vector<1x128xf32>
      %1072 = arith.mulf %1067, %1071 : vector<1x128xf32>
      %1073 = arith.addf %1060, %1072 : vector<1x128xf32>
      %c16_i32_414 = arith.constant 16 : i32
      %1074 = arith.muli %967, %c16_i32_414 : i32
      %cst_415 = arith.constant 0.000000e+00 : f32
      %1075 = vector.broadcast %cst_415 : f32 to vector<1x128xf32>
      %c0_i32_416 = arith.constant 0 : i32
      %1076 = arith.addi %1074, %c0_i32_416 : i32
      %1077 = arith.index_cast %1076 : i32 to index
      %1078 = memref.load %arg2[%1077] : memref<4096xi32, #tpu.memory_space<smem>>
      %c511_i32_417 = arith.constant 511 : i32
      %1079 = arith.minsi %1078, %c511_i32_417 : i32
      %1080 = arith.index_cast %1079 : i32 to index
      %c0_418 = arith.constant 0 : index
      %c0_419 = arith.constant 0 : index
      %1081 = vector.load %arg3[%1080, %c0_418, %c0_419] : memref<512x1x128xf32, #tpu.memory_space<vmem>>, vector<1x1x128xf32>
      %1082 = vector.shape_cast %1081 : vector<1x1x128xf32> to vector<1x128xf32>
      %c0_i32_420 = arith.constant 0 : i32
      %1083 = arith.cmpi sgt, %1078, %c0_i32_420 : i32
      %1084 = arith.extui %1083 : i1 to i32
      %1085 = arith.sitofp %1084 : i32 to f32
      %1086 = vector.broadcast %1085 : f32 to vector<1x128xf32>
      %1087 = arith.mulf %1082, %1086 : vector<1x128xf32>
      %1088 = arith.addf %1075, %1087 : vector<1x128xf32>
      %c1_i32_421 = arith.constant 1 : i32
      %1089 = arith.addi %1074, %c1_i32_421 : i32
      %1090 = arith.index_cast %1089 : i32 to index
      %1091 = memref.load %arg2[%1090] : memref<4096xi32, #tpu.memory_space<smem>>
      %c511_i32_422 = arith.constant 511 : i32
      %1092 = arith.minsi %1091, %c511_i32_422 : i32
      %1093 = arith.index_cast %1092 : i32 to index
      %c0_423 = arith.constant 0 : index
      %c0_424 = arith.constant 0 : index
      %1094 = vector.load %arg3[%1093, %c0_423, %c0_424] : memref<512x1x128xf32, #tpu.memory_space<vmem>>, vector<1x1x128xf32>
      %1095 = vector.shape_cast %1094 : vector<1x1x128xf32> to vector<1x128xf32>
      %c0_i32_425 = arith.constant 0 : i32
      %1096 = arith.cmpi sgt, %1091, %c0_i32_425 : i32
      %1097 = arith.extui %1096 : i1 to i32
      %1098 = arith.sitofp %1097 : i32 to f32
      %1099 = vector.broadcast %1098 : f32 to vector<1x128xf32>
      %1100 = arith.mulf %1095, %1099 : vector<1x128xf32>
      %1101 = arith.addf %1088, %1100 : vector<1x128xf32>
      %c2_i32_426 = arith.constant 2 : i32
      %1102 = arith.addi %1074, %c2_i32_426 : i32
      %1103 = arith.index_cast %1102 : i32 to index
      %1104 = memref.load %arg2[%1103] : memref<4096xi32, #tpu.memory_space<smem>>
      %c511_i32_427 = arith.constant 511 : i32
      %1105 = arith.minsi %1104, %c511_i32_427 : i32
      %1106 = arith.index_cast %1105 : i32 to index
      %c0_428 = arith.constant 0 : index
      %c0_429 = arith.constant 0 : index
      %1107 = vector.load %arg3[%1106, %c0_428, %c0_429] : memref<512x1x128xf32, #tpu.memory_space<vmem>>, vector<1x1x128xf32>
      %1108 = vector.shape_cast %1107 : vector<1x1x128xf32> to vector<1x128xf32>
      %c0_i32_430 = arith.constant 0 : i32
      %1109 = arith.cmpi sgt, %1104, %c0_i32_430 : i32
      %1110 = arith.extui %1109 : i1 to i32
      %1111 = arith.sitofp %1110 : i32 to f32
      %1112 = vector.broadcast %1111 : f32 to vector<1x128xf32>
      %1113 = arith.mulf %1108, %1112 : vector<1x128xf32>
      %1114 = arith.addf %1101, %1113 : vector<1x128xf32>
      %c3_i32_431 = arith.constant 3 : i32
      %1115 = arith.addi %1074, %c3_i32_431 : i32
      %1116 = arith.index_cast %1115 : i32 to index
      %1117 = memref.load %arg2[%1116] : memref<4096xi32, #tpu.memory_space<smem>>
      %c511_i32_432 = arith.constant 511 : i32
      %1118 = arith.minsi %1117, %c511_i32_432 : i32
      %1119 = arith.index_cast %1118 : i32 to index
      %c0_433 = arith.constant 0 : index
      %c0_434 = arith.constant 0 : index
      %1120 = vector.load %arg3[%1119, %c0_433, %c0_434] : memref<512x1x128xf32, #tpu.memory_space<vmem>>, vector<1x1x128xf32>
      %1121 = vector.shape_cast %1120 : vector<1x1x128xf32> to vector<1x128xf32>
      %c0_i32_435 = arith.constant 0 : i32
      %1122 = arith.cmpi sgt, %1117, %c0_i32_435 : i32
      %1123 = arith.extui %1122 : i1 to i32
      %1124 = arith.sitofp %1123 : i32 to f32
      %1125 = vector.broadcast %1124 : f32 to vector<1x128xf32>
      %1126 = arith.mulf %1121, %1125 : vector<1x128xf32>
      %1127 = arith.addf %1114, %1126 : vector<1x128xf32>
      %c4_i32_436 = arith.constant 4 : i32
      %1128 = arith.addi %1074, %c4_i32_436 : i32
      %1129 = arith.index_cast %1128 : i32 to index
      %1130 = memref.load %arg2[%1129] : memref<4096xi32, #tpu.memory_space<smem>>
      %c511_i32_437 = arith.constant 511 : i32
      %1131 = arith.minsi %1130, %c511_i32_437 : i32
      %1132 = arith.index_cast %1131 : i32 to index
      %c0_438 = arith.constant 0 : index
      %c0_439 = arith.constant 0 : index
      %1133 = vector.load %arg3[%1132, %c0_438, %c0_439] : memref<512x1x128xf32, #tpu.memory_space<vmem>>, vector<1x1x128xf32>
      %1134 = vector.shape_cast %1133 : vector<1x1x128xf32> to vector<1x128xf32>
      %c0_i32_440 = arith.constant 0 : i32
      %1135 = arith.cmpi sgt, %1130, %c0_i32_440 : i32
      %1136 = arith.extui %1135 : i1 to i32
      %1137 = arith.sitofp %1136 : i32 to f32
      %1138 = vector.broadcast %1137 : f32 to vector<1x128xf32>
      %1139 = arith.mulf %1134, %1138 : vector<1x128xf32>
      %1140 = arith.addf %1127, %1139 : vector<1x128xf32>
      %c5_i32_441 = arith.constant 5 : i32
      %1141 = arith.addi %1074, %c5_i32_441 : i32
      %1142 = arith.index_cast %1141 : i32 to index
      %1143 = memref.load %arg2[%1142] : memref<4096xi32, #tpu.memory_space<smem>>
      %c511_i32_442 = arith.constant 511 : i32
      %1144 = arith.minsi %1143, %c511_i32_442 : i32
      %1145 = arith.index_cast %1144 : i32 to index
      %c0_443 = arith.constant 0 : index
      %c0_444 = arith.constant 0 : index
      %1146 = vector.load %arg3[%1145, %c0_443, %c0_444] : memref<512x1x128xf32, #tpu.memory_space<vmem>>, vector<1x1x128xf32>
      %1147 = vector.shape_cast %1146 : vector<1x1x128xf32> to vector<1x128xf32>
      %c0_i32_445 = arith.constant 0 : i32
      %1148 = arith.cmpi sgt, %1143, %c0_i32_445 : i32
      %1149 = arith.extui %1148 : i1 to i32
      %1150 = arith.sitofp %1149 : i32 to f32
      %1151 = vector.broadcast %1150 : f32 to vector<1x128xf32>
      %1152 = arith.mulf %1147, %1151 : vector<1x128xf32>
      %1153 = arith.addf %1140, %1152 : vector<1x128xf32>
      %c6_i32_446 = arith.constant 6 : i32
      %1154 = arith.addi %1074, %c6_i32_446 : i32
      %1155 = arith.index_cast %1154 : i32 to index
      %1156 = memref.load %arg2[%1155] : memref<4096xi32, #tpu.memory_space<smem>>
      %c511_i32_447 = arith.constant 511 : i32
      %1157 = arith.minsi %1156, %c511_i32_447 : i32
      %1158 = arith.index_cast %1157 : i32 to index
      %c0_448 = arith.constant 0 : index
      %c0_449 = arith.constant 0 : index
      %1159 = vector.load %arg3[%1158, %c0_448, %c0_449] : memref<512x1x128xf32, #tpu.memory_space<vmem>>, vector<1x1x128xf32>
      %1160 = vector.shape_cast %1159 : vector<1x1x128xf32> to vector<1x128xf32>
      %c0_i32_450 = arith.constant 0 : i32
      %1161 = arith.cmpi sgt, %1156, %c0_i32_450 : i32
      %1162 = arith.extui %1161 : i1 to i32
      %1163 = arith.sitofp %1162 : i32 to f32
      %1164 = vector.broadcast %1163 : f32 to vector<1x128xf32>
      %1165 = arith.mulf %1160, %1164 : vector<1x128xf32>
      %1166 = arith.addf %1153, %1165 : vector<1x128xf32>
      %c7_i32_451 = arith.constant 7 : i32
      %1167 = arith.addi %1074, %c7_i32_451 : i32
      %1168 = arith.index_cast %1167 : i32 to index
      %1169 = memref.load %arg2[%1168] : memref<4096xi32, #tpu.memory_space<smem>>
      %c511_i32_452 = arith.constant 511 : i32
      %1170 = arith.minsi %1169, %c511_i32_452 : i32
      %1171 = arith.index_cast %1170 : i32 to index
      %c0_453 = arith.constant 0 : index
      %c0_454 = arith.constant 0 : index
      %1172 = vector.load %arg3[%1171, %c0_453, %c0_454] : memref<512x1x128xf32, #tpu.memory_space<vmem>>, vector<1x1x128xf32>
      %1173 = vector.shape_cast %1172 : vector<1x1x128xf32> to vector<1x128xf32>
      %c0_i32_455 = arith.constant 0 : i32
      %1174 = arith.cmpi sgt, %1169, %c0_i32_455 : i32
      %1175 = arith.extui %1174 : i1 to i32
      %1176 = arith.sitofp %1175 : i32 to f32
      %1177 = vector.broadcast %1176 : f32 to vector<1x128xf32>
      %1178 = arith.mulf %1173, %1177 : vector<1x128xf32>
      %1179 = arith.addf %1166, %1178 : vector<1x128xf32>
      %c8_i32_456 = arith.constant 8 : i32
      %1180 = arith.addi %1074, %c8_i32_456 : i32
      %1181 = arith.index_cast %1180 : i32 to index
      %1182 = memref.load %arg2[%1181] : memref<4096xi32, #tpu.memory_space<smem>>
      %c511_i32_457 = arith.constant 511 : i32
      %1183 = arith.minsi %1182, %c511_i32_457 : i32
      %1184 = arith.index_cast %1183 : i32 to index
      %c0_458 = arith.constant 0 : index
      %c0_459 = arith.constant 0 : index
      %1185 = vector.load %arg3[%1184, %c0_458, %c0_459] : memref<512x1x128xf32, #tpu.memory_space<vmem>>, vector<1x1x128xf32>
      %1186 = vector.shape_cast %1185 : vector<1x1x128xf32> to vector<1x128xf32>
      %c0_i32_460 = arith.constant 0 : i32
      %1187 = arith.cmpi sgt, %1182, %c0_i32_460 : i32
      %1188 = arith.extui %1187 : i1 to i32
      %1189 = arith.sitofp %1188 : i32 to f32
      %1190 = vector.broadcast %1189 : f32 to vector<1x128xf32>
      %1191 = arith.mulf %1186, %1190 : vector<1x128xf32>
      %1192 = arith.addf %1179, %1191 : vector<1x128xf32>
      %c9_i32_461 = arith.constant 9 : i32
      %1193 = arith.addi %1074, %c9_i32_461 : i32
      %1194 = arith.index_cast %1193 : i32 to index
      %1195 = memref.load %arg2[%1194] : memref<4096xi32, #tpu.memory_space<smem>>
      %c511_i32_462 = arith.constant 511 : i32
      %1196 = arith.minsi %1195, %c511_i32_462 : i32
      %1197 = arith.index_cast %1196 : i32 to index
      %c0_463 = arith.constant 0 : index
      %c0_464 = arith.constant 0 : index
      %1198 = vector.load %arg3[%1197, %c0_463, %c0_464] : memref<512x1x128xf32, #tpu.memory_space<vmem>>, vector<1x1x128xf32>
      %1199 = vector.shape_cast %1198 : vector<1x1x128xf32> to vector<1x128xf32>
      %c0_i32_465 = arith.constant 0 : i32
      %1200 = arith.cmpi sgt, %1195, %c0_i32_465 : i32
      %1201 = arith.extui %1200 : i1 to i32
      %1202 = arith.sitofp %1201 : i32 to f32
      %1203 = vector.broadcast %1202 : f32 to vector<1x128xf32>
      %1204 = arith.mulf %1199, %1203 : vector<1x128xf32>
      %1205 = arith.addf %1192, %1204 : vector<1x128xf32>
      %c10_i32_466 = arith.constant 10 : i32
      %1206 = arith.addi %1074, %c10_i32_466 : i32
      %1207 = arith.index_cast %1206 : i32 to index
      %1208 = memref.load %arg2[%1207] : memref<4096xi32, #tpu.memory_space<smem>>
      %c511_i32_467 = arith.constant 511 : i32
      %1209 = arith.minsi %1208, %c511_i32_467 : i32
      %1210 = arith.index_cast %1209 : i32 to index
      %c0_468 = arith.constant 0 : index
      %c0_469 = arith.constant 0 : index
      %1211 = vector.load %arg3[%1210, %c0_468, %c0_469] : memref<512x1x128xf32, #tpu.memory_space<vmem>>, vector<1x1x128xf32>
      %1212 = vector.shape_cast %1211 : vector<1x1x128xf32> to vector<1x128xf32>
      %c0_i32_470 = arith.constant 0 : i32
      %1213 = arith.cmpi sgt, %1208, %c0_i32_470 : i32
      %1214 = arith.extui %1213 : i1 to i32
      %1215 = arith.sitofp %1214 : i32 to f32
      %1216 = vector.broadcast %1215 : f32 to vector<1x128xf32>
      %1217 = arith.mulf %1212, %1216 : vector<1x128xf32>
      %1218 = arith.addf %1205, %1217 : vector<1x128xf32>
      %c11_i32_471 = arith.constant 11 : i32
      %1219 = arith.addi %1074, %c11_i32_471 : i32
      %1220 = arith.index_cast %1219 : i32 to index
      %1221 = memref.load %arg2[%1220] : memref<4096xi32, #tpu.memory_space<smem>>
      %c511_i32_472 = arith.constant 511 : i32
      %1222 = arith.minsi %1221, %c511_i32_472 : i32
      %1223 = arith.index_cast %1222 : i32 to index
      %c0_473 = arith.constant 0 : index
      %c0_474 = arith.constant 0 : index
      %1224 = vector.load %arg3[%1223, %c0_473, %c0_474] : memref<512x1x128xf32, #tpu.memory_space<vmem>>, vector<1x1x128xf32>
      %1225 = vector.shape_cast %1224 : vector<1x1x128xf32> to vector<1x128xf32>
      %c0_i32_475 = arith.constant 0 : i32
      %1226 = arith.cmpi sgt, %1221, %c0_i32_475 : i32
      %1227 = arith.extui %1226 : i1 to i32
      %1228 = arith.sitofp %1227 : i32 to f32
      %1229 = vector.broadcast %1228 : f32 to vector<1x128xf32>
      %1230 = arith.mulf %1225, %1229 : vector<1x128xf32>
      %1231 = arith.addf %1218, %1230 : vector<1x128xf32>
      %c12_i32_476 = arith.constant 12 : i32
      %1232 = arith.addi %1074, %c12_i32_476 : i32
      %1233 = arith.index_cast %1232 : i32 to index
      %1234 = memref.load %arg2[%1233] : memref<4096xi32, #tpu.memory_space<smem>>
      %c511_i32_477 = arith.constant 511 : i32
      %1235 = arith.minsi %1234, %c511_i32_477 : i32
      %1236 = arith.index_cast %1235 : i32 to index
      %c0_478 = arith.constant 0 : index
      %c0_479 = arith.constant 0 : index
      %1237 = vector.load %arg3[%1236, %c0_478, %c0_479] : memref<512x1x128xf32, #tpu.memory_space<vmem>>, vector<1x1x128xf32>
      %1238 = vector.shape_cast %1237 : vector<1x1x128xf32> to vector<1x128xf32>
      %c0_i32_480 = arith.constant 0 : i32
      %1239 = arith.cmpi sgt, %1234, %c0_i32_480 : i32
      %1240 = arith.extui %1239 : i1 to i32
      %1241 = arith.sitofp %1240 : i32 to f32
      %1242 = vector.broadcast %1241 : f32 to vector<1x128xf32>
      %1243 = arith.mulf %1238, %1242 : vector<1x128xf32>
      %1244 = arith.addf %1231, %1243 : vector<1x128xf32>
      %c13_i32_481 = arith.constant 13 : i32
      %1245 = arith.addi %1074, %c13_i32_481 : i32
      %1246 = arith.index_cast %1245 : i32 to index
      %1247 = memref.load %arg2[%1246] : memref<4096xi32, #tpu.memory_space<smem>>
      %c511_i32_482 = arith.constant 511 : i32
      %1248 = arith.minsi %1247, %c511_i32_482 : i32
      %1249 = arith.index_cast %1248 : i32 to index
      %c0_483 = arith.constant 0 : index
      %c0_484 = arith.constant 0 : index
      %1250 = vector.load %arg3[%1249, %c0_483, %c0_484] : memref<512x1x128xf32, #tpu.memory_space<vmem>>, vector<1x1x128xf32>
      %1251 = vector.shape_cast %1250 : vector<1x1x128xf32> to vector<1x128xf32>
      %c0_i32_485 = arith.constant 0 : i32
      %1252 = arith.cmpi sgt, %1247, %c0_i32_485 : i32
      %1253 = arith.extui %1252 : i1 to i32
      %1254 = arith.sitofp %1253 : i32 to f32
      %1255 = vector.broadcast %1254 : f32 to vector<1x128xf32>
      %1256 = arith.mulf %1251, %1255 : vector<1x128xf32>
      %1257 = arith.addf %1244, %1256 : vector<1x128xf32>
      %c14_i32_486 = arith.constant 14 : i32
      %1258 = arith.addi %1074, %c14_i32_486 : i32
      %1259 = arith.index_cast %1258 : i32 to index
      %1260 = memref.load %arg2[%1259] : memref<4096xi32, #tpu.memory_space<smem>>
      %c511_i32_487 = arith.constant 511 : i32
      %1261 = arith.minsi %1260, %c511_i32_487 : i32
      %1262 = arith.index_cast %1261 : i32 to index
      %c0_488 = arith.constant 0 : index
      %c0_489 = arith.constant 0 : index
      %1263 = vector.load %arg3[%1262, %c0_488, %c0_489] : memref<512x1x128xf32, #tpu.memory_space<vmem>>, vector<1x1x128xf32>
      %1264 = vector.shape_cast %1263 : vector<1x1x128xf32> to vector<1x128xf32>
      %c0_i32_490 = arith.constant 0 : i32
      %1265 = arith.cmpi sgt, %1260, %c0_i32_490 : i32
      %1266 = arith.extui %1265 : i1 to i32
      %1267 = arith.sitofp %1266 : i32 to f32
      %1268 = vector.broadcast %1267 : f32 to vector<1x128xf32>
      %1269 = arith.mulf %1264, %1268 : vector<1x128xf32>
      %1270 = arith.addf %1257, %1269 : vector<1x128xf32>
      %c15_i32_491 = arith.constant 15 : i32
      %1271 = arith.addi %1074, %c15_i32_491 : i32
      %1272 = arith.index_cast %1271 : i32 to index
      %1273 = memref.load %arg2[%1272] : memref<4096xi32, #tpu.memory_space<smem>>
      %c511_i32_492 = arith.constant 511 : i32
      %1274 = arith.minsi %1273, %c511_i32_492 : i32
      %1275 = arith.index_cast %1274 : i32 to index
      %c0_493 = arith.constant 0 : index
      %c0_494 = arith.constant 0 : index
      %1276 = vector.load %arg3[%1275, %c0_493, %c0_494] : memref<512x1x128xf32, #tpu.memory_space<vmem>>, vector<1x1x128xf32>
      %1277 = vector.shape_cast %1276 : vector<1x1x128xf32> to vector<1x128xf32>
      %c0_i32_495 = arith.constant 0 : i32
      %1278 = arith.cmpi sgt, %1273, %c0_i32_495 : i32
      %1279 = arith.extui %1278 : i1 to i32
      %1280 = arith.sitofp %1279 : i32 to f32
      %1281 = vector.broadcast %1280 : f32 to vector<1x128xf32>
      %1282 = arith.mulf %1277, %1281 : vector<1x128xf32>
      %1283 = arith.addf %1270, %1282 : vector<1x128xf32>
      %c8_i32_496 = arith.constant 8 : i32
      %1284 = arith.muli %arg6, %c8_i32_496 : i32
      %1285 = arith.addi %0, %1284 : i32
      %c4_i32_497 = arith.constant 4 : i32
      %1286 = arith.addi %1285, %c4_i32_497 : i32
      %c8_i32_498 = arith.constant 8 : i32
      %1287 = arith.muli %1286, %c8_i32_498 : i32
      %cst_499 = arith.constant 0.000000e+00 : f32
      %1288 = vector.broadcast %cst_499 : f32 to vector<1x128xf32>
      %c0_i32_500 = arith.constant 0 : i32
      %1289 = arith.addi %1287, %c0_i32_500 : i32
      %1290 = arith.index_cast %1289 : i32 to index
      %1291 = memref.load %arg1[%1290] : memref<2048xi32, #tpu.memory_space<smem>>
      %c511_i32_501 = arith.constant 511 : i32
      %1292 = arith.minsi %1291, %c511_i32_501 : i32
      %1293 = arith.index_cast %1292 : i32 to index
      %c0_502 = arith.constant 0 : index
      %c0_503 = arith.constant 0 : index
      %1294 = vector.load %arg3[%1293, %c0_502, %c0_503] : memref<512x1x128xf32, #tpu.memory_space<vmem>>, vector<1x1x128xf32>
      %1295 = vector.shape_cast %1294 : vector<1x1x128xf32> to vector<1x128xf32>
      %c0_i32_504 = arith.constant 0 : i32
      %1296 = arith.cmpi sgt, %1291, %c0_i32_504 : i32
      %1297 = arith.extui %1296 : i1 to i32
      %1298 = arith.sitofp %1297 : i32 to f32
      %1299 = vector.broadcast %1298 : f32 to vector<1x128xf32>
      %1300 = arith.mulf %1295, %1299 : vector<1x128xf32>
      %1301 = arith.addf %1288, %1300 : vector<1x128xf32>
      %c1_i32_505 = arith.constant 1 : i32
      %1302 = arith.addi %1287, %c1_i32_505 : i32
      %1303 = arith.index_cast %1302 : i32 to index
      %1304 = memref.load %arg1[%1303] : memref<2048xi32, #tpu.memory_space<smem>>
      %c511_i32_506 = arith.constant 511 : i32
      %1305 = arith.minsi %1304, %c511_i32_506 : i32
      %1306 = arith.index_cast %1305 : i32 to index
      %c0_507 = arith.constant 0 : index
      %c0_508 = arith.constant 0 : index
      %1307 = vector.load %arg3[%1306, %c0_507, %c0_508] : memref<512x1x128xf32, #tpu.memory_space<vmem>>, vector<1x1x128xf32>
      %1308 = vector.shape_cast %1307 : vector<1x1x128xf32> to vector<1x128xf32>
      %c0_i32_509 = arith.constant 0 : i32
      %1309 = arith.cmpi sgt, %1304, %c0_i32_509 : i32
      %1310 = arith.extui %1309 : i1 to i32
      %1311 = arith.sitofp %1310 : i32 to f32
      %1312 = vector.broadcast %1311 : f32 to vector<1x128xf32>
      %1313 = arith.mulf %1308, %1312 : vector<1x128xf32>
      %1314 = arith.addf %1301, %1313 : vector<1x128xf32>
      %c2_i32_510 = arith.constant 2 : i32
      %1315 = arith.addi %1287, %c2_i32_510 : i32
      %1316 = arith.index_cast %1315 : i32 to index
      %1317 = memref.load %arg1[%1316] : memref<2048xi32, #tpu.memory_space<smem>>
      %c511_i32_511 = arith.constant 511 : i32
      %1318 = arith.minsi %1317, %c511_i32_511 : i32
      %1319 = arith.index_cast %1318 : i32 to index
      %c0_512 = arith.constant 0 : index
      %c0_513 = arith.constant 0 : index
      %1320 = vector.load %arg3[%1319, %c0_512, %c0_513] : memref<512x1x128xf32, #tpu.memory_space<vmem>>, vector<1x1x128xf32>
      %1321 = vector.shape_cast %1320 : vector<1x1x128xf32> to vector<1x128xf32>
      %c0_i32_514 = arith.constant 0 : i32
      %1322 = arith.cmpi sgt, %1317, %c0_i32_514 : i32
      %1323 = arith.extui %1322 : i1 to i32
      %1324 = arith.sitofp %1323 : i32 to f32
      %1325 = vector.broadcast %1324 : f32 to vector<1x128xf32>
      %1326 = arith.mulf %1321, %1325 : vector<1x128xf32>
      %1327 = arith.addf %1314, %1326 : vector<1x128xf32>
      %c3_i32_515 = arith.constant 3 : i32
      %1328 = arith.addi %1287, %c3_i32_515 : i32
      %1329 = arith.index_cast %1328 : i32 to index
      %1330 = memref.load %arg1[%1329] : memref<2048xi32, #tpu.memory_space<smem>>
      %c511_i32_516 = arith.constant 511 : i32
      %1331 = arith.minsi %1330, %c511_i32_516 : i32
      %1332 = arith.index_cast %1331 : i32 to index
      %c0_517 = arith.constant 0 : index
      %c0_518 = arith.constant 0 : index
      %1333 = vector.load %arg3[%1332, %c0_517, %c0_518] : memref<512x1x128xf32, #tpu.memory_space<vmem>>, vector<1x1x128xf32>
      %1334 = vector.shape_cast %1333 : vector<1x1x128xf32> to vector<1x128xf32>
      %c0_i32_519 = arith.constant 0 : i32
      %1335 = arith.cmpi sgt, %1330, %c0_i32_519 : i32
      %1336 = arith.extui %1335 : i1 to i32
      %1337 = arith.sitofp %1336 : i32 to f32
      %1338 = vector.broadcast %1337 : f32 to vector<1x128xf32>
      %1339 = arith.mulf %1334, %1338 : vector<1x128xf32>
      %1340 = arith.addf %1327, %1339 : vector<1x128xf32>
      %c4_i32_520 = arith.constant 4 : i32
      %1341 = arith.addi %1287, %c4_i32_520 : i32
      %1342 = arith.index_cast %1341 : i32 to index
      %1343 = memref.load %arg1[%1342] : memref<2048xi32, #tpu.memory_space<smem>>
      %c511_i32_521 = arith.constant 511 : i32
      %1344 = arith.minsi %1343, %c511_i32_521 : i32
      %1345 = arith.index_cast %1344 : i32 to index
      %c0_522 = arith.constant 0 : index
      %c0_523 = arith.constant 0 : index
      %1346 = vector.load %arg3[%1345, %c0_522, %c0_523] : memref<512x1x128xf32, #tpu.memory_space<vmem>>, vector<1x1x128xf32>
      %1347 = vector.shape_cast %1346 : vector<1x1x128xf32> to vector<1x128xf32>
      %c0_i32_524 = arith.constant 0 : i32
      %1348 = arith.cmpi sgt, %1343, %c0_i32_524 : i32
      %1349 = arith.extui %1348 : i1 to i32
      %1350 = arith.sitofp %1349 : i32 to f32
      %1351 = vector.broadcast %1350 : f32 to vector<1x128xf32>
      %1352 = arith.mulf %1347, %1351 : vector<1x128xf32>
      %1353 = arith.addf %1340, %1352 : vector<1x128xf32>
      %c5_i32_525 = arith.constant 5 : i32
      %1354 = arith.addi %1287, %c5_i32_525 : i32
      %1355 = arith.index_cast %1354 : i32 to index
      %1356 = memref.load %arg1[%1355] : memref<2048xi32, #tpu.memory_space<smem>>
      %c511_i32_526 = arith.constant 511 : i32
      %1357 = arith.minsi %1356, %c511_i32_526 : i32
      %1358 = arith.index_cast %1357 : i32 to index
      %c0_527 = arith.constant 0 : index
      %c0_528 = arith.constant 0 : index
      %1359 = vector.load %arg3[%1358, %c0_527, %c0_528] : memref<512x1x128xf32, #tpu.memory_space<vmem>>, vector<1x1x128xf32>
      %1360 = vector.shape_cast %1359 : vector<1x1x128xf32> to vector<1x128xf32>
      %c0_i32_529 = arith.constant 0 : i32
      %1361 = arith.cmpi sgt, %1356, %c0_i32_529 : i32
      %1362 = arith.extui %1361 : i1 to i32
      %1363 = arith.sitofp %1362 : i32 to f32
      %1364 = vector.broadcast %1363 : f32 to vector<1x128xf32>
      %1365 = arith.mulf %1360, %1364 : vector<1x128xf32>
      %1366 = arith.addf %1353, %1365 : vector<1x128xf32>
      %c6_i32_530 = arith.constant 6 : i32
      %1367 = arith.addi %1287, %c6_i32_530 : i32
      %1368 = arith.index_cast %1367 : i32 to index
      %1369 = memref.load %arg1[%1368] : memref<2048xi32, #tpu.memory_space<smem>>
      %c511_i32_531 = arith.constant 511 : i32
      %1370 = arith.minsi %1369, %c511_i32_531 : i32
      %1371 = arith.index_cast %1370 : i32 to index
      %c0_532 = arith.constant 0 : index
      %c0_533 = arith.constant 0 : index
      %1372 = vector.load %arg3[%1371, %c0_532, %c0_533] : memref<512x1x128xf32, #tpu.memory_space<vmem>>, vector<1x1x128xf32>
      %1373 = vector.shape_cast %1372 : vector<1x1x128xf32> to vector<1x128xf32>
      %c0_i32_534 = arith.constant 0 : i32
      %1374 = arith.cmpi sgt, %1369, %c0_i32_534 : i32
      %1375 = arith.extui %1374 : i1 to i32
      %1376 = arith.sitofp %1375 : i32 to f32
      %1377 = vector.broadcast %1376 : f32 to vector<1x128xf32>
      %1378 = arith.mulf %1373, %1377 : vector<1x128xf32>
      %1379 = arith.addf %1366, %1378 : vector<1x128xf32>
      %c7_i32_535 = arith.constant 7 : i32
      %1380 = arith.addi %1287, %c7_i32_535 : i32
      %1381 = arith.index_cast %1380 : i32 to index
      %1382 = memref.load %arg1[%1381] : memref<2048xi32, #tpu.memory_space<smem>>
      %c511_i32_536 = arith.constant 511 : i32
      %1383 = arith.minsi %1382, %c511_i32_536 : i32
      %1384 = arith.index_cast %1383 : i32 to index
      %c0_537 = arith.constant 0 : index
      %c0_538 = arith.constant 0 : index
      %1385 = vector.load %arg3[%1384, %c0_537, %c0_538] : memref<512x1x128xf32, #tpu.memory_space<vmem>>, vector<1x1x128xf32>
      %1386 = vector.shape_cast %1385 : vector<1x1x128xf32> to vector<1x128xf32>
      %c0_i32_539 = arith.constant 0 : i32
      %1387 = arith.cmpi sgt, %1382, %c0_i32_539 : i32
      %1388 = arith.extui %1387 : i1 to i32
      %1389 = arith.sitofp %1388 : i32 to f32
      %1390 = vector.broadcast %1389 : f32 to vector<1x128xf32>
      %1391 = arith.mulf %1386, %1390 : vector<1x128xf32>
      %1392 = arith.addf %1379, %1391 : vector<1x128xf32>
      %c16_i32_540 = arith.constant 16 : i32
      %1393 = arith.muli %1286, %c16_i32_540 : i32
      %cst_541 = arith.constant 0.000000e+00 : f32
      %1394 = vector.broadcast %cst_541 : f32 to vector<1x128xf32>
      %c0_i32_542 = arith.constant 0 : i32
      %1395 = arith.addi %1393, %c0_i32_542 : i32
      %1396 = arith.index_cast %1395 : i32 to index
      %1397 = memref.load %arg2[%1396] : memref<4096xi32, #tpu.memory_space<smem>>
      %c511_i32_543 = arith.constant 511 : i32
      %1398 = arith.minsi %1397, %c511_i32_543 : i32
      %1399 = arith.index_cast %1398 : i32 to index
      %c0_544 = arith.constant 0 : index
      %c0_545 = arith.constant 0 : index
      %1400 = vector.load %arg3[%1399, %c0_544, %c0_545] : memref<512x1x128xf32, #tpu.memory_space<vmem>>, vector<1x1x128xf32>
      %1401 = vector.shape_cast %1400 : vector<1x1x128xf32> to vector<1x128xf32>
      %c0_i32_546 = arith.constant 0 : i32
      %1402 = arith.cmpi sgt, %1397, %c0_i32_546 : i32
      %1403 = arith.extui %1402 : i1 to i32
      %1404 = arith.sitofp %1403 : i32 to f32
      %1405 = vector.broadcast %1404 : f32 to vector<1x128xf32>
      %1406 = arith.mulf %1401, %1405 : vector<1x128xf32>
      %1407 = arith.addf %1394, %1406 : vector<1x128xf32>
      %c1_i32_547 = arith.constant 1 : i32
      %1408 = arith.addi %1393, %c1_i32_547 : i32
      %1409 = arith.index_cast %1408 : i32 to index
      %1410 = memref.load %arg2[%1409] : memref<4096xi32, #tpu.memory_space<smem>>
      %c511_i32_548 = arith.constant 511 : i32
      %1411 = arith.minsi %1410, %c511_i32_548 : i32
      %1412 = arith.index_cast %1411 : i32 to index
      %c0_549 = arith.constant 0 : index
      %c0_550 = arith.constant 0 : index
      %1413 = vector.load %arg3[%1412, %c0_549, %c0_550] : memref<512x1x128xf32, #tpu.memory_space<vmem>>, vector<1x1x128xf32>
      %1414 = vector.shape_cast %1413 : vector<1x1x128xf32> to vector<1x128xf32>
      %c0_i32_551 = arith.constant 0 : i32
      %1415 = arith.cmpi sgt, %1410, %c0_i32_551 : i32
      %1416 = arith.extui %1415 : i1 to i32
      %1417 = arith.sitofp %1416 : i32 to f32
      %1418 = vector.broadcast %1417 : f32 to vector<1x128xf32>
      %1419 = arith.mulf %1414, %1418 : vector<1x128xf32>
      %1420 = arith.addf %1407, %1419 : vector<1x128xf32>
      %c2_i32_552 = arith.constant 2 : i32
      %1421 = arith.addi %1393, %c2_i32_552 : i32
      %1422 = arith.index_cast %1421 : i32 to index
      %1423 = memref.load %arg2[%1422] : memref<4096xi32, #tpu.memory_space<smem>>
      %c511_i32_553 = arith.constant 511 : i32
      %1424 = arith.minsi %1423, %c511_i32_553 : i32
      %1425 = arith.index_cast %1424 : i32 to index
      %c0_554 = arith.constant 0 : index
      %c0_555 = arith.constant 0 : index
      %1426 = vector.load %arg3[%1425, %c0_554, %c0_555] : memref<512x1x128xf32, #tpu.memory_space<vmem>>, vector<1x1x128xf32>
      %1427 = vector.shape_cast %1426 : vector<1x1x128xf32> to vector<1x128xf32>
      %c0_i32_556 = arith.constant 0 : i32
      %1428 = arith.cmpi sgt, %1423, %c0_i32_556 : i32
      %1429 = arith.extui %1428 : i1 to i32
      %1430 = arith.sitofp %1429 : i32 to f32
      %1431 = vector.broadcast %1430 : f32 to vector<1x128xf32>
      %1432 = arith.mulf %1427, %1431 : vector<1x128xf32>
      %1433 = arith.addf %1420, %1432 : vector<1x128xf32>
      %c3_i32_557 = arith.constant 3 : i32
      %1434 = arith.addi %1393, %c3_i32_557 : i32
      %1435 = arith.index_cast %1434 : i32 to index
      %1436 = memref.load %arg2[%1435] : memref<4096xi32, #tpu.memory_space<smem>>
      %c511_i32_558 = arith.constant 511 : i32
      %1437 = arith.minsi %1436, %c511_i32_558 : i32
      %1438 = arith.index_cast %1437 : i32 to index
      %c0_559 = arith.constant 0 : index
      %c0_560 = arith.constant 0 : index
      %1439 = vector.load %arg3[%1438, %c0_559, %c0_560] : memref<512x1x128xf32, #tpu.memory_space<vmem>>, vector<1x1x128xf32>
      %1440 = vector.shape_cast %1439 : vector<1x1x128xf32> to vector<1x128xf32>
      %c0_i32_561 = arith.constant 0 : i32
      %1441 = arith.cmpi sgt, %1436, %c0_i32_561 : i32
      %1442 = arith.extui %1441 : i1 to i32
      %1443 = arith.sitofp %1442 : i32 to f32
      %1444 = vector.broadcast %1443 : f32 to vector<1x128xf32>
      %1445 = arith.mulf %1440, %1444 : vector<1x128xf32>
      %1446 = arith.addf %1433, %1445 : vector<1x128xf32>
      %c4_i32_562 = arith.constant 4 : i32
      %1447 = arith.addi %1393, %c4_i32_562 : i32
      %1448 = arith.index_cast %1447 : i32 to index
      %1449 = memref.load %arg2[%1448] : memref<4096xi32, #tpu.memory_space<smem>>
      %c511_i32_563 = arith.constant 511 : i32
      %1450 = arith.minsi %1449, %c511_i32_563 : i32
      %1451 = arith.index_cast %1450 : i32 to index
      %c0_564 = arith.constant 0 : index
      %c0_565 = arith.constant 0 : index
      %1452 = vector.load %arg3[%1451, %c0_564, %c0_565] : memref<512x1x128xf32, #tpu.memory_space<vmem>>, vector<1x1x128xf32>
      %1453 = vector.shape_cast %1452 : vector<1x1x128xf32> to vector<1x128xf32>
      %c0_i32_566 = arith.constant 0 : i32
      %1454 = arith.cmpi sgt, %1449, %c0_i32_566 : i32
      %1455 = arith.extui %1454 : i1 to i32
      %1456 = arith.sitofp %1455 : i32 to f32
      %1457 = vector.broadcast %1456 : f32 to vector<1x128xf32>
      %1458 = arith.mulf %1453, %1457 : vector<1x128xf32>
      %1459 = arith.addf %1446, %1458 : vector<1x128xf32>
      %c5_i32_567 = arith.constant 5 : i32
      %1460 = arith.addi %1393, %c5_i32_567 : i32
      %1461 = arith.index_cast %1460 : i32 to index
      %1462 = memref.load %arg2[%1461] : memref<4096xi32, #tpu.memory_space<smem>>
      %c511_i32_568 = arith.constant 511 : i32
      %1463 = arith.minsi %1462, %c511_i32_568 : i32
      %1464 = arith.index_cast %1463 : i32 to index
      %c0_569 = arith.constant 0 : index
      %c0_570 = arith.constant 0 : index
      %1465 = vector.load %arg3[%1464, %c0_569, %c0_570] : memref<512x1x128xf32, #tpu.memory_space<vmem>>, vector<1x1x128xf32>
      %1466 = vector.shape_cast %1465 : vector<1x1x128xf32> to vector<1x128xf32>
      %c0_i32_571 = arith.constant 0 : i32
      %1467 = arith.cmpi sgt, %1462, %c0_i32_571 : i32
      %1468 = arith.extui %1467 : i1 to i32
      %1469 = arith.sitofp %1468 : i32 to f32
      %1470 = vector.broadcast %1469 : f32 to vector<1x128xf32>
      %1471 = arith.mulf %1466, %1470 : vector<1x128xf32>
      %1472 = arith.addf %1459, %1471 : vector<1x128xf32>
      %c6_i32_572 = arith.constant 6 : i32
      %1473 = arith.addi %1393, %c6_i32_572 : i32
      %1474 = arith.index_cast %1473 : i32 to index
      %1475 = memref.load %arg2[%1474] : memref<4096xi32, #tpu.memory_space<smem>>
      %c511_i32_573 = arith.constant 511 : i32
      %1476 = arith.minsi %1475, %c511_i32_573 : i32
      %1477 = arith.index_cast %1476 : i32 to index
      %c0_574 = arith.constant 0 : index
      %c0_575 = arith.constant 0 : index
      %1478 = vector.load %arg3[%1477, %c0_574, %c0_575] : memref<512x1x128xf32, #tpu.memory_space<vmem>>, vector<1x1x128xf32>
      %1479 = vector.shape_cast %1478 : vector<1x1x128xf32> to vector<1x128xf32>
      %c0_i32_576 = arith.constant 0 : i32
      %1480 = arith.cmpi sgt, %1475, %c0_i32_576 : i32
      %1481 = arith.extui %1480 : i1 to i32
      %1482 = arith.sitofp %1481 : i32 to f32
      %1483 = vector.broadcast %1482 : f32 to vector<1x128xf32>
      %1484 = arith.mulf %1479, %1483 : vector<1x128xf32>
      %1485 = arith.addf %1472, %1484 : vector<1x128xf32>
      %c7_i32_577 = arith.constant 7 : i32
      %1486 = arith.addi %1393, %c7_i32_577 : i32
      %1487 = arith.index_cast %1486 : i32 to index
      %1488 = memref.load %arg2[%1487] : memref<4096xi32, #tpu.memory_space<smem>>
      %c511_i32_578 = arith.constant 511 : i32
      %1489 = arith.minsi %1488, %c511_i32_578 : i32
      %1490 = arith.index_cast %1489 : i32 to index
      %c0_579 = arith.constant 0 : index
      %c0_580 = arith.constant 0 : index
      %1491 = vector.load %arg3[%1490, %c0_579, %c0_580] : memref<512x1x128xf32, #tpu.memory_space<vmem>>, vector<1x1x128xf32>
      %1492 = vector.shape_cast %1491 : vector<1x1x128xf32> to vector<1x128xf32>
      %c0_i32_581 = arith.constant 0 : i32
      %1493 = arith.cmpi sgt, %1488, %c0_i32_581 : i32
      %1494 = arith.extui %1493 : i1 to i32
      %1495 = arith.sitofp %1494 : i32 to f32
      %1496 = vector.broadcast %1495 : f32 to vector<1x128xf32>
      %1497 = arith.mulf %1492, %1496 : vector<1x128xf32>
      %1498 = arith.addf %1485, %1497 : vector<1x128xf32>
      %c8_i32_582 = arith.constant 8 : i32
      %1499 = arith.addi %1393, %c8_i32_582 : i32
      %1500 = arith.index_cast %1499 : i32 to index
      %1501 = memref.load %arg2[%1500] : memref<4096xi32, #tpu.memory_space<smem>>
      %c511_i32_583 = arith.constant 511 : i32
      %1502 = arith.minsi %1501, %c511_i32_583 : i32
      %1503 = arith.index_cast %1502 : i32 to index
      %c0_584 = arith.constant 0 : index
      %c0_585 = arith.constant 0 : index
      %1504 = vector.load %arg3[%1503, %c0_584, %c0_585] : memref<512x1x128xf32, #tpu.memory_space<vmem>>, vector<1x1x128xf32>
      %1505 = vector.shape_cast %1504 : vector<1x1x128xf32> to vector<1x128xf32>
      %c0_i32_586 = arith.constant 0 : i32
      %1506 = arith.cmpi sgt, %1501, %c0_i32_586 : i32
      %1507 = arith.extui %1506 : i1 to i32
      %1508 = arith.sitofp %1507 : i32 to f32
      %1509 = vector.broadcast %1508 : f32 to vector<1x128xf32>
      %1510 = arith.mulf %1505, %1509 : vector<1x128xf32>
      %1511 = arith.addf %1498, %1510 : vector<1x128xf32>
      %c9_i32_587 = arith.constant 9 : i32
      %1512 = arith.addi %1393, %c9_i32_587 : i32
      %1513 = arith.index_cast %1512 : i32 to index
      %1514 = memref.load %arg2[%1513] : memref<4096xi32, #tpu.memory_space<smem>>
      %c511_i32_588 = arith.constant 511 : i32
      %1515 = arith.minsi %1514, %c511_i32_588 : i32
      %1516 = arith.index_cast %1515 : i32 to index
      %c0_589 = arith.constant 0 : index
      %c0_590 = arith.constant 0 : index
      %1517 = vector.load %arg3[%1516, %c0_589, %c0_590] : memref<512x1x128xf32, #tpu.memory_space<vmem>>, vector<1x1x128xf32>
      %1518 = vector.shape_cast %1517 : vector<1x1x128xf32> to vector<1x128xf32>
      %c0_i32_591 = arith.constant 0 : i32
      %1519 = arith.cmpi sgt, %1514, %c0_i32_591 : i32
      %1520 = arith.extui %1519 : i1 to i32
      %1521 = arith.sitofp %1520 : i32 to f32
      %1522 = vector.broadcast %1521 : f32 to vector<1x128xf32>
      %1523 = arith.mulf %1518, %1522 : vector<1x128xf32>
      %1524 = arith.addf %1511, %1523 : vector<1x128xf32>
      %c10_i32_592 = arith.constant 10 : i32
      %1525 = arith.addi %1393, %c10_i32_592 : i32
      %1526 = arith.index_cast %1525 : i32 to index
      %1527 = memref.load %arg2[%1526] : memref<4096xi32, #tpu.memory_space<smem>>
      %c511_i32_593 = arith.constant 511 : i32
      %1528 = arith.minsi %1527, %c511_i32_593 : i32
      %1529 = arith.index_cast %1528 : i32 to index
      %c0_594 = arith.constant 0 : index
      %c0_595 = arith.constant 0 : index
      %1530 = vector.load %arg3[%1529, %c0_594, %c0_595] : memref<512x1x128xf32, #tpu.memory_space<vmem>>, vector<1x1x128xf32>
      %1531 = vector.shape_cast %1530 : vector<1x1x128xf32> to vector<1x128xf32>
      %c0_i32_596 = arith.constant 0 : i32
      %1532 = arith.cmpi sgt, %1527, %c0_i32_596 : i32
      %1533 = arith.extui %1532 : i1 to i32
      %1534 = arith.sitofp %1533 : i32 to f32
      %1535 = vector.broadcast %1534 : f32 to vector<1x128xf32>
      %1536 = arith.mulf %1531, %1535 : vector<1x128xf32>
      %1537 = arith.addf %1524, %1536 : vector<1x128xf32>
      %c11_i32_597 = arith.constant 11 : i32
      %1538 = arith.addi %1393, %c11_i32_597 : i32
      %1539 = arith.index_cast %1538 : i32 to index
      %1540 = memref.load %arg2[%1539] : memref<4096xi32, #tpu.memory_space<smem>>
      %c511_i32_598 = arith.constant 511 : i32
      %1541 = arith.minsi %1540, %c511_i32_598 : i32
      %1542 = arith.index_cast %1541 : i32 to index
      %c0_599 = arith.constant 0 : index
      %c0_600 = arith.constant 0 : index
      %1543 = vector.load %arg3[%1542, %c0_599, %c0_600] : memref<512x1x128xf32, #tpu.memory_space<vmem>>, vector<1x1x128xf32>
      %1544 = vector.shape_cast %1543 : vector<1x1x128xf32> to vector<1x128xf32>
      %c0_i32_601 = arith.constant 0 : i32
      %1545 = arith.cmpi sgt, %1540, %c0_i32_601 : i32
      %1546 = arith.extui %1545 : i1 to i32
      %1547 = arith.sitofp %1546 : i32 to f32
      %1548 = vector.broadcast %1547 : f32 to vector<1x128xf32>
      %1549 = arith.mulf %1544, %1548 : vector<1x128xf32>
      %1550 = arith.addf %1537, %1549 : vector<1x128xf32>
      %c12_i32_602 = arith.constant 12 : i32
      %1551 = arith.addi %1393, %c12_i32_602 : i32
      %1552 = arith.index_cast %1551 : i32 to index
      %1553 = memref.load %arg2[%1552] : memref<4096xi32, #tpu.memory_space<smem>>
      %c511_i32_603 = arith.constant 511 : i32
      %1554 = arith.minsi %1553, %c511_i32_603 : i32
      %1555 = arith.index_cast %1554 : i32 to index
      %c0_604 = arith.constant 0 : index
      %c0_605 = arith.constant 0 : index
      %1556 = vector.load %arg3[%1555, %c0_604, %c0_605] : memref<512x1x128xf32, #tpu.memory_space<vmem>>, vector<1x1x128xf32>
      %1557 = vector.shape_cast %1556 : vector<1x1x128xf32> to vector<1x128xf32>
      %c0_i32_606 = arith.constant 0 : i32
      %1558 = arith.cmpi sgt, %1553, %c0_i32_606 : i32
      %1559 = arith.extui %1558 : i1 to i32
      %1560 = arith.sitofp %1559 : i32 to f32
      %1561 = vector.broadcast %1560 : f32 to vector<1x128xf32>
      %1562 = arith.mulf %1557, %1561 : vector<1x128xf32>
      %1563 = arith.addf %1550, %1562 : vector<1x128xf32>
      %c13_i32_607 = arith.constant 13 : i32
      %1564 = arith.addi %1393, %c13_i32_607 : i32
      %1565 = arith.index_cast %1564 : i32 to index
      %1566 = memref.load %arg2[%1565] : memref<4096xi32, #tpu.memory_space<smem>>
      %c511_i32_608 = arith.constant 511 : i32
      %1567 = arith.minsi %1566, %c511_i32_608 : i32
      %1568 = arith.index_cast %1567 : i32 to index
      %c0_609 = arith.constant 0 : index
      %c0_610 = arith.constant 0 : index
      %1569 = vector.load %arg3[%1568, %c0_609, %c0_610] : memref<512x1x128xf32, #tpu.memory_space<vmem>>, vector<1x1x128xf32>
      %1570 = vector.shape_cast %1569 : vector<1x1x128xf32> to vector<1x128xf32>
      %c0_i32_611 = arith.constant 0 : i32
      %1571 = arith.cmpi sgt, %1566, %c0_i32_611 : i32
      %1572 = arith.extui %1571 : i1 to i32
      %1573 = arith.sitofp %1572 : i32 to f32
      %1574 = vector.broadcast %1573 : f32 to vector<1x128xf32>
      %1575 = arith.mulf %1570, %1574 : vector<1x128xf32>
      %1576 = arith.addf %1563, %1575 : vector<1x128xf32>
      %c14_i32_612 = arith.constant 14 : i32
      %1577 = arith.addi %1393, %c14_i32_612 : i32
      %1578 = arith.index_cast %1577 : i32 to index
      %1579 = memref.load %arg2[%1578] : memref<4096xi32, #tpu.memory_space<smem>>
      %c511_i32_613 = arith.constant 511 : i32
      %1580 = arith.minsi %1579, %c511_i32_613 : i32
      %1581 = arith.index_cast %1580 : i32 to index
      %c0_614 = arith.constant 0 : index
      %c0_615 = arith.constant 0 : index
      %1582 = vector.load %arg3[%1581, %c0_614, %c0_615] : memref<512x1x128xf32, #tpu.memory_space<vmem>>, vector<1x1x128xf32>
      %1583 = vector.shape_cast %1582 : vector<1x1x128xf32> to vector<1x128xf32>
      %c0_i32_616 = arith.constant 0 : i32
      %1584 = arith.cmpi sgt, %1579, %c0_i32_616 : i32
      %1585 = arith.extui %1584 : i1 to i32
      %1586 = arith.sitofp %1585 : i32 to f32
      %1587 = vector.broadcast %1586 : f32 to vector<1x128xf32>
      %1588 = arith.mulf %1583, %1587 : vector<1x128xf32>
      %1589 = arith.addf %1576, %1588 : vector<1x128xf32>
      %c15_i32_617 = arith.constant 15 : i32
      %1590 = arith.addi %1393, %c15_i32_617 : i32
      %1591 = arith.index_cast %1590 : i32 to index
      %1592 = memref.load %arg2[%1591] : memref<4096xi32, #tpu.memory_space<smem>>
      %c511_i32_618 = arith.constant 511 : i32
      %1593 = arith.minsi %1592, %c511_i32_618 : i32
      %1594 = arith.index_cast %1593 : i32 to index
      %c0_619 = arith.constant 0 : index
      %c0_620 = arith.constant 0 : index
      %1595 = vector.load %arg3[%1594, %c0_619, %c0_620] : memref<512x1x128xf32, #tpu.memory_space<vmem>>, vector<1x1x128xf32>
      %1596 = vector.shape_cast %1595 : vector<1x1x128xf32> to vector<1x128xf32>
      %c0_i32_621 = arith.constant 0 : i32
      %1597 = arith.cmpi sgt, %1592, %c0_i32_621 : i32
      %1598 = arith.extui %1597 : i1 to i32
      %1599 = arith.sitofp %1598 : i32 to f32
      %1600 = vector.broadcast %1599 : f32 to vector<1x128xf32>
      %1601 = arith.mulf %1596, %1600 : vector<1x128xf32>
      %1602 = arith.addf %1589, %1601 : vector<1x128xf32>
      %c8_i32_622 = arith.constant 8 : i32
      %1603 = arith.muli %arg6, %c8_i32_622 : i32
      %1604 = arith.addi %0, %1603 : i32
      %c5_i32_623 = arith.constant 5 : i32
      %1605 = arith.addi %1604, %c5_i32_623 : i32
      %c8_i32_624 = arith.constant 8 : i32
      %1606 = arith.muli %1605, %c8_i32_624 : i32
      %cst_625 = arith.constant 0.000000e+00 : f32
      %1607 = vector.broadcast %cst_625 : f32 to vector<1x128xf32>
      %c0_i32_626 = arith.constant 0 : i32
      %1608 = arith.addi %1606, %c0_i32_626 : i32
      %1609 = arith.index_cast %1608 : i32 to index
      %1610 = memref.load %arg1[%1609] : memref<2048xi32, #tpu.memory_space<smem>>
      %c511_i32_627 = arith.constant 511 : i32
      %1611 = arith.minsi %1610, %c511_i32_627 : i32
      %1612 = arith.index_cast %1611 : i32 to index
      %c0_628 = arith.constant 0 : index
      %c0_629 = arith.constant 0 : index
      %1613 = vector.load %arg3[%1612, %c0_628, %c0_629] : memref<512x1x128xf32, #tpu.memory_space<vmem>>, vector<1x1x128xf32>
      %1614 = vector.shape_cast %1613 : vector<1x1x128xf32> to vector<1x128xf32>
      %c0_i32_630 = arith.constant 0 : i32
      %1615 = arith.cmpi sgt, %1610, %c0_i32_630 : i32
      %1616 = arith.extui %1615 : i1 to i32
      %1617 = arith.sitofp %1616 : i32 to f32
      %1618 = vector.broadcast %1617 : f32 to vector<1x128xf32>
      %1619 = arith.mulf %1614, %1618 : vector<1x128xf32>
      %1620 = arith.addf %1607, %1619 : vector<1x128xf32>
      %c1_i32_631 = arith.constant 1 : i32
      %1621 = arith.addi %1606, %c1_i32_631 : i32
      %1622 = arith.index_cast %1621 : i32 to index
      %1623 = memref.load %arg1[%1622] : memref<2048xi32, #tpu.memory_space<smem>>
      %c511_i32_632 = arith.constant 511 : i32
      %1624 = arith.minsi %1623, %c511_i32_632 : i32
      %1625 = arith.index_cast %1624 : i32 to index
      %c0_633 = arith.constant 0 : index
      %c0_634 = arith.constant 0 : index
      %1626 = vector.load %arg3[%1625, %c0_633, %c0_634] : memref<512x1x128xf32, #tpu.memory_space<vmem>>, vector<1x1x128xf32>
      %1627 = vector.shape_cast %1626 : vector<1x1x128xf32> to vector<1x128xf32>
      %c0_i32_635 = arith.constant 0 : i32
      %1628 = arith.cmpi sgt, %1623, %c0_i32_635 : i32
      %1629 = arith.extui %1628 : i1 to i32
      %1630 = arith.sitofp %1629 : i32 to f32
      %1631 = vector.broadcast %1630 : f32 to vector<1x128xf32>
      %1632 = arith.mulf %1627, %1631 : vector<1x128xf32>
      %1633 = arith.addf %1620, %1632 : vector<1x128xf32>
      %c2_i32_636 = arith.constant 2 : i32
      %1634 = arith.addi %1606, %c2_i32_636 : i32
      %1635 = arith.index_cast %1634 : i32 to index
      %1636 = memref.load %arg1[%1635] : memref<2048xi32, #tpu.memory_space<smem>>
      %c511_i32_637 = arith.constant 511 : i32
      %1637 = arith.minsi %1636, %c511_i32_637 : i32
      %1638 = arith.index_cast %1637 : i32 to index
      %c0_638 = arith.constant 0 : index
      %c0_639 = arith.constant 0 : index
      %1639 = vector.load %arg3[%1638, %c0_638, %c0_639] : memref<512x1x128xf32, #tpu.memory_space<vmem>>, vector<1x1x128xf32>
      %1640 = vector.shape_cast %1639 : vector<1x1x128xf32> to vector<1x128xf32>
      %c0_i32_640 = arith.constant 0 : i32
      %1641 = arith.cmpi sgt, %1636, %c0_i32_640 : i32
      %1642 = arith.extui %1641 : i1 to i32
      %1643 = arith.sitofp %1642 : i32 to f32
      %1644 = vector.broadcast %1643 : f32 to vector<1x128xf32>
      %1645 = arith.mulf %1640, %1644 : vector<1x128xf32>
      %1646 = arith.addf %1633, %1645 : vector<1x128xf32>
      %c3_i32_641 = arith.constant 3 : i32
      %1647 = arith.addi %1606, %c3_i32_641 : i32
      %1648 = arith.index_cast %1647 : i32 to index
      %1649 = memref.load %arg1[%1648] : memref<2048xi32, #tpu.memory_space<smem>>
      %c511_i32_642 = arith.constant 511 : i32
      %1650 = arith.minsi %1649, %c511_i32_642 : i32
      %1651 = arith.index_cast %1650 : i32 to index
      %c0_643 = arith.constant 0 : index
      %c0_644 = arith.constant 0 : index
      %1652 = vector.load %arg3[%1651, %c0_643, %c0_644] : memref<512x1x128xf32, #tpu.memory_space<vmem>>, vector<1x1x128xf32>
      %1653 = vector.shape_cast %1652 : vector<1x1x128xf32> to vector<1x128xf32>
      %c0_i32_645 = arith.constant 0 : i32
      %1654 = arith.cmpi sgt, %1649, %c0_i32_645 : i32
      %1655 = arith.extui %1654 : i1 to i32
      %1656 = arith.sitofp %1655 : i32 to f32
      %1657 = vector.broadcast %1656 : f32 to vector<1x128xf32>
      %1658 = arith.mulf %1653, %1657 : vector<1x128xf32>
      %1659 = arith.addf %1646, %1658 : vector<1x128xf32>
      %c4_i32_646 = arith.constant 4 : i32
      %1660 = arith.addi %1606, %c4_i32_646 : i32
      %1661 = arith.index_cast %1660 : i32 to index
      %1662 = memref.load %arg1[%1661] : memref<2048xi32, #tpu.memory_space<smem>>
      %c511_i32_647 = arith.constant 511 : i32
      %1663 = arith.minsi %1662, %c511_i32_647 : i32
      %1664 = arith.index_cast %1663 : i32 to index
      %c0_648 = arith.constant 0 : index
      %c0_649 = arith.constant 0 : index
      %1665 = vector.load %arg3[%1664, %c0_648, %c0_649] : memref<512x1x128xf32, #tpu.memory_space<vmem>>, vector<1x1x128xf32>
      %1666 = vector.shape_cast %1665 : vector<1x1x128xf32> to vector<1x128xf32>
      %c0_i32_650 = arith.constant 0 : i32
      %1667 = arith.cmpi sgt, %1662, %c0_i32_650 : i32
      %1668 = arith.extui %1667 : i1 to i32
      %1669 = arith.sitofp %1668 : i32 to f32
      %1670 = vector.broadcast %1669 : f32 to vector<1x128xf32>
      %1671 = arith.mulf %1666, %1670 : vector<1x128xf32>
      %1672 = arith.addf %1659, %1671 : vector<1x128xf32>
      %c5_i32_651 = arith.constant 5 : i32
      %1673 = arith.addi %1606, %c5_i32_651 : i32
      %1674 = arith.index_cast %1673 : i32 to index
      %1675 = memref.load %arg1[%1674] : memref<2048xi32, #tpu.memory_space<smem>>
      %c511_i32_652 = arith.constant 511 : i32
      %1676 = arith.minsi %1675, %c511_i32_652 : i32
      %1677 = arith.index_cast %1676 : i32 to index
      %c0_653 = arith.constant 0 : index
      %c0_654 = arith.constant 0 : index
      %1678 = vector.load %arg3[%1677, %c0_653, %c0_654] : memref<512x1x128xf32, #tpu.memory_space<vmem>>, vector<1x1x128xf32>
      %1679 = vector.shape_cast %1678 : vector<1x1x128xf32> to vector<1x128xf32>
      %c0_i32_655 = arith.constant 0 : i32
      %1680 = arith.cmpi sgt, %1675, %c0_i32_655 : i32
      %1681 = arith.extui %1680 : i1 to i32
      %1682 = arith.sitofp %1681 : i32 to f32
      %1683 = vector.broadcast %1682 : f32 to vector<1x128xf32>
      %1684 = arith.mulf %1679, %1683 : vector<1x128xf32>
      %1685 = arith.addf %1672, %1684 : vector<1x128xf32>
      %c6_i32_656 = arith.constant 6 : i32
      %1686 = arith.addi %1606, %c6_i32_656 : i32
      %1687 = arith.index_cast %1686 : i32 to index
      %1688 = memref.load %arg1[%1687] : memref<2048xi32, #tpu.memory_space<smem>>
      %c511_i32_657 = arith.constant 511 : i32
      %1689 = arith.minsi %1688, %c511_i32_657 : i32
      %1690 = arith.index_cast %1689 : i32 to index
      %c0_658 = arith.constant 0 : index
      %c0_659 = arith.constant 0 : index
      %1691 = vector.load %arg3[%1690, %c0_658, %c0_659] : memref<512x1x128xf32, #tpu.memory_space<vmem>>, vector<1x1x128xf32>
      %1692 = vector.shape_cast %1691 : vector<1x1x128xf32> to vector<1x128xf32>
      %c0_i32_660 = arith.constant 0 : i32
      %1693 = arith.cmpi sgt, %1688, %c0_i32_660 : i32
      %1694 = arith.extui %1693 : i1 to i32
      %1695 = arith.sitofp %1694 : i32 to f32
      %1696 = vector.broadcast %1695 : f32 to vector<1x128xf32>
      %1697 = arith.mulf %1692, %1696 : vector<1x128xf32>
      %1698 = arith.addf %1685, %1697 : vector<1x128xf32>
      %c7_i32_661 = arith.constant 7 : i32
      %1699 = arith.addi %1606, %c7_i32_661 : i32
      %1700 = arith.index_cast %1699 : i32 to index
      %1701 = memref.load %arg1[%1700] : memref<2048xi32, #tpu.memory_space<smem>>
      %c511_i32_662 = arith.constant 511 : i32
      %1702 = arith.minsi %1701, %c511_i32_662 : i32
      %1703 = arith.index_cast %1702 : i32 to index
      %c0_663 = arith.constant 0 : index
      %c0_664 = arith.constant 0 : index
      %1704 = vector.load %arg3[%1703, %c0_663, %c0_664] : memref<512x1x128xf32, #tpu.memory_space<vmem>>, vector<1x1x128xf32>
      %1705 = vector.shape_cast %1704 : vector<1x1x128xf32> to vector<1x128xf32>
      %c0_i32_665 = arith.constant 0 : i32
      %1706 = arith.cmpi sgt, %1701, %c0_i32_665 : i32
      %1707 = arith.extui %1706 : i1 to i32
      %1708 = arith.sitofp %1707 : i32 to f32
      %1709 = vector.broadcast %1708 : f32 to vector<1x128xf32>
      %1710 = arith.mulf %1705, %1709 : vector<1x128xf32>
      %1711 = arith.addf %1698, %1710 : vector<1x128xf32>
      %c16_i32_666 = arith.constant 16 : i32
      %1712 = arith.muli %1605, %c16_i32_666 : i32
      %cst_667 = arith.constant 0.000000e+00 : f32
      %1713 = vector.broadcast %cst_667 : f32 to vector<1x128xf32>
      %c0_i32_668 = arith.constant 0 : i32
      %1714 = arith.addi %1712, %c0_i32_668 : i32
      %1715 = arith.index_cast %1714 : i32 to index
      %1716 = memref.load %arg2[%1715] : memref<4096xi32, #tpu.memory_space<smem>>
      %c511_i32_669 = arith.constant 511 : i32
      %1717 = arith.minsi %1716, %c511_i32_669 : i32
      %1718 = arith.index_cast %1717 : i32 to index
      %c0_670 = arith.constant 0 : index
      %c0_671 = arith.constant 0 : index
      %1719 = vector.load %arg3[%1718, %c0_670, %c0_671] : memref<512x1x128xf32, #tpu.memory_space<vmem>>, vector<1x1x128xf32>
      %1720 = vector.shape_cast %1719 : vector<1x1x128xf32> to vector<1x128xf32>
      %c0_i32_672 = arith.constant 0 : i32
      %1721 = arith.cmpi sgt, %1716, %c0_i32_672 : i32
      %1722 = arith.extui %1721 : i1 to i32
      %1723 = arith.sitofp %1722 : i32 to f32
      %1724 = vector.broadcast %1723 : f32 to vector<1x128xf32>
      %1725 = arith.mulf %1720, %1724 : vector<1x128xf32>
      %1726 = arith.addf %1713, %1725 : vector<1x128xf32>
      %c1_i32_673 = arith.constant 1 : i32
      %1727 = arith.addi %1712, %c1_i32_673 : i32
      %1728 = arith.index_cast %1727 : i32 to index
      %1729 = memref.load %arg2[%1728] : memref<4096xi32, #tpu.memory_space<smem>>
      %c511_i32_674 = arith.constant 511 : i32
      %1730 = arith.minsi %1729, %c511_i32_674 : i32
      %1731 = arith.index_cast %1730 : i32 to index
      %c0_675 = arith.constant 0 : index
      %c0_676 = arith.constant 0 : index
      %1732 = vector.load %arg3[%1731, %c0_675, %c0_676] : memref<512x1x128xf32, #tpu.memory_space<vmem>>, vector<1x1x128xf32>
      %1733 = vector.shape_cast %1732 : vector<1x1x128xf32> to vector<1x128xf32>
      %c0_i32_677 = arith.constant 0 : i32
      %1734 = arith.cmpi sgt, %1729, %c0_i32_677 : i32
      %1735 = arith.extui %1734 : i1 to i32
      %1736 = arith.sitofp %1735 : i32 to f32
      %1737 = vector.broadcast %1736 : f32 to vector<1x128xf32>
      %1738 = arith.mulf %1733, %1737 : vector<1x128xf32>
      %1739 = arith.addf %1726, %1738 : vector<1x128xf32>
      %c2_i32_678 = arith.constant 2 : i32
      %1740 = arith.addi %1712, %c2_i32_678 : i32
      %1741 = arith.index_cast %1740 : i32 to index
      %1742 = memref.load %arg2[%1741] : memref<4096xi32, #tpu.memory_space<smem>>
      %c511_i32_679 = arith.constant 511 : i32
      %1743 = arith.minsi %1742, %c511_i32_679 : i32
      %1744 = arith.index_cast %1743 : i32 to index
      %c0_680 = arith.constant 0 : index
      %c0_681 = arith.constant 0 : index
      %1745 = vector.load %arg3[%1744, %c0_680, %c0_681] : memref<512x1x128xf32, #tpu.memory_space<vmem>>, vector<1x1x128xf32>
      %1746 = vector.shape_cast %1745 : vector<1x1x128xf32> to vector<1x128xf32>
      %c0_i32_682 = arith.constant 0 : i32
      %1747 = arith.cmpi sgt, %1742, %c0_i32_682 : i32
      %1748 = arith.extui %1747 : i1 to i32
      %1749 = arith.sitofp %1748 : i32 to f32
      %1750 = vector.broadcast %1749 : f32 to vector<1x128xf32>
      %1751 = arith.mulf %1746, %1750 : vector<1x128xf32>
      %1752 = arith.addf %1739, %1751 : vector<1x128xf32>
      %c3_i32_683 = arith.constant 3 : i32
      %1753 = arith.addi %1712, %c3_i32_683 : i32
      %1754 = arith.index_cast %1753 : i32 to index
      %1755 = memref.load %arg2[%1754] : memref<4096xi32, #tpu.memory_space<smem>>
      %c511_i32_684 = arith.constant 511 : i32
      %1756 = arith.minsi %1755, %c511_i32_684 : i32
      %1757 = arith.index_cast %1756 : i32 to index
      %c0_685 = arith.constant 0 : index
      %c0_686 = arith.constant 0 : index
      %1758 = vector.load %arg3[%1757, %c0_685, %c0_686] : memref<512x1x128xf32, #tpu.memory_space<vmem>>, vector<1x1x128xf32>
      %1759 = vector.shape_cast %1758 : vector<1x1x128xf32> to vector<1x128xf32>
      %c0_i32_687 = arith.constant 0 : i32
      %1760 = arith.cmpi sgt, %1755, %c0_i32_687 : i32
      %1761 = arith.extui %1760 : i1 to i32
      %1762 = arith.sitofp %1761 : i32 to f32
      %1763 = vector.broadcast %1762 : f32 to vector<1x128xf32>
      %1764 = arith.mulf %1759, %1763 : vector<1x128xf32>
      %1765 = arith.addf %1752, %1764 : vector<1x128xf32>
      %c4_i32_688 = arith.constant 4 : i32
      %1766 = arith.addi %1712, %c4_i32_688 : i32
      %1767 = arith.index_cast %1766 : i32 to index
      %1768 = memref.load %arg2[%1767] : memref<4096xi32, #tpu.memory_space<smem>>
      %c511_i32_689 = arith.constant 511 : i32
      %1769 = arith.minsi %1768, %c511_i32_689 : i32
      %1770 = arith.index_cast %1769 : i32 to index
      %c0_690 = arith.constant 0 : index
      %c0_691 = arith.constant 0 : index
      %1771 = vector.load %arg3[%1770, %c0_690, %c0_691] : memref<512x1x128xf32, #tpu.memory_space<vmem>>, vector<1x1x128xf32>
      %1772 = vector.shape_cast %1771 : vector<1x1x128xf32> to vector<1x128xf32>
      %c0_i32_692 = arith.constant 0 : i32
      %1773 = arith.cmpi sgt, %1768, %c0_i32_692 : i32
      %1774 = arith.extui %1773 : i1 to i32
      %1775 = arith.sitofp %1774 : i32 to f32
      %1776 = vector.broadcast %1775 : f32 to vector<1x128xf32>
      %1777 = arith.mulf %1772, %1776 : vector<1x128xf32>
      %1778 = arith.addf %1765, %1777 : vector<1x128xf32>
      %c5_i32_693 = arith.constant 5 : i32
      %1779 = arith.addi %1712, %c5_i32_693 : i32
      %1780 = arith.index_cast %1779 : i32 to index
      %1781 = memref.load %arg2[%1780] : memref<4096xi32, #tpu.memory_space<smem>>
      %c511_i32_694 = arith.constant 511 : i32
      %1782 = arith.minsi %1781, %c511_i32_694 : i32
      %1783 = arith.index_cast %1782 : i32 to index
      %c0_695 = arith.constant 0 : index
      %c0_696 = arith.constant 0 : index
      %1784 = vector.load %arg3[%1783, %c0_695, %c0_696] : memref<512x1x128xf32, #tpu.memory_space<vmem>>, vector<1x1x128xf32>
      %1785 = vector.shape_cast %1784 : vector<1x1x128xf32> to vector<1x128xf32>
      %c0_i32_697 = arith.constant 0 : i32
      %1786 = arith.cmpi sgt, %1781, %c0_i32_697 : i32
      %1787 = arith.extui %1786 : i1 to i32
      %1788 = arith.sitofp %1787 : i32 to f32
      %1789 = vector.broadcast %1788 : f32 to vector<1x128xf32>
      %1790 = arith.mulf %1785, %1789 : vector<1x128xf32>
      %1791 = arith.addf %1778, %1790 : vector<1x128xf32>
      %c6_i32_698 = arith.constant 6 : i32
      %1792 = arith.addi %1712, %c6_i32_698 : i32
      %1793 = arith.index_cast %1792 : i32 to index
      %1794 = memref.load %arg2[%1793] : memref<4096xi32, #tpu.memory_space<smem>>
      %c511_i32_699 = arith.constant 511 : i32
      %1795 = arith.minsi %1794, %c511_i32_699 : i32
      %1796 = arith.index_cast %1795 : i32 to index
      %c0_700 = arith.constant 0 : index
      %c0_701 = arith.constant 0 : index
      %1797 = vector.load %arg3[%1796, %c0_700, %c0_701] : memref<512x1x128xf32, #tpu.memory_space<vmem>>, vector<1x1x128xf32>
      %1798 = vector.shape_cast %1797 : vector<1x1x128xf32> to vector<1x128xf32>
      %c0_i32_702 = arith.constant 0 : i32
      %1799 = arith.cmpi sgt, %1794, %c0_i32_702 : i32
      %1800 = arith.extui %1799 : i1 to i32
      %1801 = arith.sitofp %1800 : i32 to f32
      %1802 = vector.broadcast %1801 : f32 to vector<1x128xf32>
      %1803 = arith.mulf %1798, %1802 : vector<1x128xf32>
      %1804 = arith.addf %1791, %1803 : vector<1x128xf32>
      %c7_i32_703 = arith.constant 7 : i32
      %1805 = arith.addi %1712, %c7_i32_703 : i32
      %1806 = arith.index_cast %1805 : i32 to index
      %1807 = memref.load %arg2[%1806] : memref<4096xi32, #tpu.memory_space<smem>>
      %c511_i32_704 = arith.constant 511 : i32
      %1808 = arith.minsi %1807, %c511_i32_704 : i32
      %1809 = arith.index_cast %1808 : i32 to index
      %c0_705 = arith.constant 0 : index
      %c0_706 = arith.constant 0 : index
      %1810 = vector.load %arg3[%1809, %c0_705, %c0_706] : memref<512x1x128xf32, #tpu.memory_space<vmem>>, vector<1x1x128xf32>
      %1811 = vector.shape_cast %1810 : vector<1x1x128xf32> to vector<1x128xf32>
      %c0_i32_707 = arith.constant 0 : i32
      %1812 = arith.cmpi sgt, %1807, %c0_i32_707 : i32
      %1813 = arith.extui %1812 : i1 to i32
      %1814 = arith.sitofp %1813 : i32 to f32
      %1815 = vector.broadcast %1814 : f32 to vector<1x128xf32>
      %1816 = arith.mulf %1811, %1815 : vector<1x128xf32>
      %1817 = arith.addf %1804, %1816 : vector<1x128xf32>
      %c8_i32_708 = arith.constant 8 : i32
      %1818 = arith.addi %1712, %c8_i32_708 : i32
      %1819 = arith.index_cast %1818 : i32 to index
      %1820 = memref.load %arg2[%1819] : memref<4096xi32, #tpu.memory_space<smem>>
      %c511_i32_709 = arith.constant 511 : i32
      %1821 = arith.minsi %1820, %c511_i32_709 : i32
      %1822 = arith.index_cast %1821 : i32 to index
      %c0_710 = arith.constant 0 : index
      %c0_711 = arith.constant 0 : index
      %1823 = vector.load %arg3[%1822, %c0_710, %c0_711] : memref<512x1x128xf32, #tpu.memory_space<vmem>>, vector<1x1x128xf32>
      %1824 = vector.shape_cast %1823 : vector<1x1x128xf32> to vector<1x128xf32>
      %c0_i32_712 = arith.constant 0 : i32
      %1825 = arith.cmpi sgt, %1820, %c0_i32_712 : i32
      %1826 = arith.extui %1825 : i1 to i32
      %1827 = arith.sitofp %1826 : i32 to f32
      %1828 = vector.broadcast %1827 : f32 to vector<1x128xf32>
      %1829 = arith.mulf %1824, %1828 : vector<1x128xf32>
      %1830 = arith.addf %1817, %1829 : vector<1x128xf32>
      %c9_i32_713 = arith.constant 9 : i32
      %1831 = arith.addi %1712, %c9_i32_713 : i32
      %1832 = arith.index_cast %1831 : i32 to index
      %1833 = memref.load %arg2[%1832] : memref<4096xi32, #tpu.memory_space<smem>>
      %c511_i32_714 = arith.constant 511 : i32
      %1834 = arith.minsi %1833, %c511_i32_714 : i32
      %1835 = arith.index_cast %1834 : i32 to index
      %c0_715 = arith.constant 0 : index
      %c0_716 = arith.constant 0 : index
      %1836 = vector.load %arg3[%1835, %c0_715, %c0_716] : memref<512x1x128xf32, #tpu.memory_space<vmem>>, vector<1x1x128xf32>
      %1837 = vector.shape_cast %1836 : vector<1x1x128xf32> to vector<1x128xf32>
      %c0_i32_717 = arith.constant 0 : i32
      %1838 = arith.cmpi sgt, %1833, %c0_i32_717 : i32
      %1839 = arith.extui %1838 : i1 to i32
      %1840 = arith.sitofp %1839 : i32 to f32
      %1841 = vector.broadcast %1840 : f32 to vector<1x128xf32>
      %1842 = arith.mulf %1837, %1841 : vector<1x128xf32>
      %1843 = arith.addf %1830, %1842 : vector<1x128xf32>
      %c10_i32_718 = arith.constant 10 : i32
      %1844 = arith.addi %1712, %c10_i32_718 : i32
      %1845 = arith.index_cast %1844 : i32 to index
      %1846 = memref.load %arg2[%1845] : memref<4096xi32, #tpu.memory_space<smem>>
      %c511_i32_719 = arith.constant 511 : i32
      %1847 = arith.minsi %1846, %c511_i32_719 : i32
      %1848 = arith.index_cast %1847 : i32 to index
      %c0_720 = arith.constant 0 : index
      %c0_721 = arith.constant 0 : index
      %1849 = vector.load %arg3[%1848, %c0_720, %c0_721] : memref<512x1x128xf32, #tpu.memory_space<vmem>>, vector<1x1x128xf32>
      %1850 = vector.shape_cast %1849 : vector<1x1x128xf32> to vector<1x128xf32>
      %c0_i32_722 = arith.constant 0 : i32
      %1851 = arith.cmpi sgt, %1846, %c0_i32_722 : i32
      %1852 = arith.extui %1851 : i1 to i32
      %1853 = arith.sitofp %1852 : i32 to f32
      %1854 = vector.broadcast %1853 : f32 to vector<1x128xf32>
      %1855 = arith.mulf %1850, %1854 : vector<1x128xf32>
      %1856 = arith.addf %1843, %1855 : vector<1x128xf32>
      %c11_i32_723 = arith.constant 11 : i32
      %1857 = arith.addi %1712, %c11_i32_723 : i32
      %1858 = arith.index_cast %1857 : i32 to index
      %1859 = memref.load %arg2[%1858] : memref<4096xi32, #tpu.memory_space<smem>>
      %c511_i32_724 = arith.constant 511 : i32
      %1860 = arith.minsi %1859, %c511_i32_724 : i32
      %1861 = arith.index_cast %1860 : i32 to index
      %c0_725 = arith.constant 0 : index
      %c0_726 = arith.constant 0 : index
      %1862 = vector.load %arg3[%1861, %c0_725, %c0_726] : memref<512x1x128xf32, #tpu.memory_space<vmem>>, vector<1x1x128xf32>
      %1863 = vector.shape_cast %1862 : vector<1x1x128xf32> to vector<1x128xf32>
      %c0_i32_727 = arith.constant 0 : i32
      %1864 = arith.cmpi sgt, %1859, %c0_i32_727 : i32
      %1865 = arith.extui %1864 : i1 to i32
      %1866 = arith.sitofp %1865 : i32 to f32
      %1867 = vector.broadcast %1866 : f32 to vector<1x128xf32>
      %1868 = arith.mulf %1863, %1867 : vector<1x128xf32>
      %1869 = arith.addf %1856, %1868 : vector<1x128xf32>
      %c12_i32_728 = arith.constant 12 : i32
      %1870 = arith.addi %1712, %c12_i32_728 : i32
      %1871 = arith.index_cast %1870 : i32 to index
      %1872 = memref.load %arg2[%1871] : memref<4096xi32, #tpu.memory_space<smem>>
      %c511_i32_729 = arith.constant 511 : i32
      %1873 = arith.minsi %1872, %c511_i32_729 : i32
      %1874 = arith.index_cast %1873 : i32 to index
      %c0_730 = arith.constant 0 : index
      %c0_731 = arith.constant 0 : index
      %1875 = vector.load %arg3[%1874, %c0_730, %c0_731] : memref<512x1x128xf32, #tpu.memory_space<vmem>>, vector<1x1x128xf32>
      %1876 = vector.shape_cast %1875 : vector<1x1x128xf32> to vector<1x128xf32>
      %c0_i32_732 = arith.constant 0 : i32
      %1877 = arith.cmpi sgt, %1872, %c0_i32_732 : i32
      %1878 = arith.extui %1877 : i1 to i32
      %1879 = arith.sitofp %1878 : i32 to f32
      %1880 = vector.broadcast %1879 : f32 to vector<1x128xf32>
      %1881 = arith.mulf %1876, %1880 : vector<1x128xf32>
      %1882 = arith.addf %1869, %1881 : vector<1x128xf32>
      %c13_i32_733 = arith.constant 13 : i32
      %1883 = arith.addi %1712, %c13_i32_733 : i32
      %1884 = arith.index_cast %1883 : i32 to index
      %1885 = memref.load %arg2[%1884] : memref<4096xi32, #tpu.memory_space<smem>>
      %c511_i32_734 = arith.constant 511 : i32
      %1886 = arith.minsi %1885, %c511_i32_734 : i32
      %1887 = arith.index_cast %1886 : i32 to index
      %c0_735 = arith.constant 0 : index
      %c0_736 = arith.constant 0 : index
      %1888 = vector.load %arg3[%1887, %c0_735, %c0_736] : memref<512x1x128xf32, #tpu.memory_space<vmem>>, vector<1x1x128xf32>
      %1889 = vector.shape_cast %1888 : vector<1x1x128xf32> to vector<1x128xf32>
      %c0_i32_737 = arith.constant 0 : i32
      %1890 = arith.cmpi sgt, %1885, %c0_i32_737 : i32
      %1891 = arith.extui %1890 : i1 to i32
      %1892 = arith.sitofp %1891 : i32 to f32
      %1893 = vector.broadcast %1892 : f32 to vector<1x128xf32>
      %1894 = arith.mulf %1889, %1893 : vector<1x128xf32>
      %1895 = arith.addf %1882, %1894 : vector<1x128xf32>
      %c14_i32_738 = arith.constant 14 : i32
      %1896 = arith.addi %1712, %c14_i32_738 : i32
      %1897 = arith.index_cast %1896 : i32 to index
      %1898 = memref.load %arg2[%1897] : memref<4096xi32, #tpu.memory_space<smem>>
      %c511_i32_739 = arith.constant 511 : i32
      %1899 = arith.minsi %1898, %c511_i32_739 : i32
      %1900 = arith.index_cast %1899 : i32 to index
      %c0_740 = arith.constant 0 : index
      %c0_741 = arith.constant 0 : index
      %1901 = vector.load %arg3[%1900, %c0_740, %c0_741] : memref<512x1x128xf32, #tpu.memory_space<vmem>>, vector<1x1x128xf32>
      %1902 = vector.shape_cast %1901 : vector<1x1x128xf32> to vector<1x128xf32>
      %c0_i32_742 = arith.constant 0 : i32
      %1903 = arith.cmpi sgt, %1898, %c0_i32_742 : i32
      %1904 = arith.extui %1903 : i1 to i32
      %1905 = arith.sitofp %1904 : i32 to f32
      %1906 = vector.broadcast %1905 : f32 to vector<1x128xf32>
      %1907 = arith.mulf %1902, %1906 : vector<1x128xf32>
      %1908 = arith.addf %1895, %1907 : vector<1x128xf32>
      %c15_i32_743 = arith.constant 15 : i32
      %1909 = arith.addi %1712, %c15_i32_743 : i32
      %1910 = arith.index_cast %1909 : i32 to index
      %1911 = memref.load %arg2[%1910] : memref<4096xi32, #tpu.memory_space<smem>>
      %c511_i32_744 = arith.constant 511 : i32
      %1912 = arith.minsi %1911, %c511_i32_744 : i32
      %1913 = arith.index_cast %1912 : i32 to index
      %c0_745 = arith.constant 0 : index
      %c0_746 = arith.constant 0 : index
      %1914 = vector.load %arg3[%1913, %c0_745, %c0_746] : memref<512x1x128xf32, #tpu.memory_space<vmem>>, vector<1x1x128xf32>
      %1915 = vector.shape_cast %1914 : vector<1x1x128xf32> to vector<1x128xf32>
      %c0_i32_747 = arith.constant 0 : i32
      %1916 = arith.cmpi sgt, %1911, %c0_i32_747 : i32
      %1917 = arith.extui %1916 : i1 to i32
      %1918 = arith.sitofp %1917 : i32 to f32
      %1919 = vector.broadcast %1918 : f32 to vector<1x128xf32>
      %1920 = arith.mulf %1915, %1919 : vector<1x128xf32>
      %1921 = arith.addf %1908, %1920 : vector<1x128xf32>
      %c8_i32_748 = arith.constant 8 : i32
      %1922 = arith.muli %arg6, %c8_i32_748 : i32
      %1923 = arith.addi %0, %1922 : i32
      %c6_i32_749 = arith.constant 6 : i32
      %1924 = arith.addi %1923, %c6_i32_749 : i32
      %c8_i32_750 = arith.constant 8 : i32
      %1925 = arith.muli %1924, %c8_i32_750 : i32
      %cst_751 = arith.constant 0.000000e+00 : f32
      %1926 = vector.broadcast %cst_751 : f32 to vector<1x128xf32>
      %c0_i32_752 = arith.constant 0 : i32
      %1927 = arith.addi %1925, %c0_i32_752 : i32
      %1928 = arith.index_cast %1927 : i32 to index
      %1929 = memref.load %arg1[%1928] : memref<2048xi32, #tpu.memory_space<smem>>
      %c511_i32_753 = arith.constant 511 : i32
      %1930 = arith.minsi %1929, %c511_i32_753 : i32
      %1931 = arith.index_cast %1930 : i32 to index
      %c0_754 = arith.constant 0 : index
      %c0_755 = arith.constant 0 : index
      %1932 = vector.load %arg3[%1931, %c0_754, %c0_755] : memref<512x1x128xf32, #tpu.memory_space<vmem>>, vector<1x1x128xf32>
      %1933 = vector.shape_cast %1932 : vector<1x1x128xf32> to vector<1x128xf32>
      %c0_i32_756 = arith.constant 0 : i32
      %1934 = arith.cmpi sgt, %1929, %c0_i32_756 : i32
      %1935 = arith.extui %1934 : i1 to i32
      %1936 = arith.sitofp %1935 : i32 to f32
      %1937 = vector.broadcast %1936 : f32 to vector<1x128xf32>
      %1938 = arith.mulf %1933, %1937 : vector<1x128xf32>
      %1939 = arith.addf %1926, %1938 : vector<1x128xf32>
      %c1_i32_757 = arith.constant 1 : i32
      %1940 = arith.addi %1925, %c1_i32_757 : i32
      %1941 = arith.index_cast %1940 : i32 to index
      %1942 = memref.load %arg1[%1941] : memref<2048xi32, #tpu.memory_space<smem>>
      %c511_i32_758 = arith.constant 511 : i32
      %1943 = arith.minsi %1942, %c511_i32_758 : i32
      %1944 = arith.index_cast %1943 : i32 to index
      %c0_759 = arith.constant 0 : index
      %c0_760 = arith.constant 0 : index
      %1945 = vector.load %arg3[%1944, %c0_759, %c0_760] : memref<512x1x128xf32, #tpu.memory_space<vmem>>, vector<1x1x128xf32>
      %1946 = vector.shape_cast %1945 : vector<1x1x128xf32> to vector<1x128xf32>
      %c0_i32_761 = arith.constant 0 : i32
      %1947 = arith.cmpi sgt, %1942, %c0_i32_761 : i32
      %1948 = arith.extui %1947 : i1 to i32
      %1949 = arith.sitofp %1948 : i32 to f32
      %1950 = vector.broadcast %1949 : f32 to vector<1x128xf32>
      %1951 = arith.mulf %1946, %1950 : vector<1x128xf32>
      %1952 = arith.addf %1939, %1951 : vector<1x128xf32>
      %c2_i32_762 = arith.constant 2 : i32
      %1953 = arith.addi %1925, %c2_i32_762 : i32
      %1954 = arith.index_cast %1953 : i32 to index
      %1955 = memref.load %arg1[%1954] : memref<2048xi32, #tpu.memory_space<smem>>
      %c511_i32_763 = arith.constant 511 : i32
      %1956 = arith.minsi %1955, %c511_i32_763 : i32
      %1957 = arith.index_cast %1956 : i32 to index
      %c0_764 = arith.constant 0 : index
      %c0_765 = arith.constant 0 : index
      %1958 = vector.load %arg3[%1957, %c0_764, %c0_765] : memref<512x1x128xf32, #tpu.memory_space<vmem>>, vector<1x1x128xf32>
      %1959 = vector.shape_cast %1958 : vector<1x1x128xf32> to vector<1x128xf32>
      %c0_i32_766 = arith.constant 0 : i32
      %1960 = arith.cmpi sgt, %1955, %c0_i32_766 : i32
      %1961 = arith.extui %1960 : i1 to i32
      %1962 = arith.sitofp %1961 : i32 to f32
      %1963 = vector.broadcast %1962 : f32 to vector<1x128xf32>
      %1964 = arith.mulf %1959, %1963 : vector<1x128xf32>
      %1965 = arith.addf %1952, %1964 : vector<1x128xf32>
      %c3_i32_767 = arith.constant 3 : i32
      %1966 = arith.addi %1925, %c3_i32_767 : i32
      %1967 = arith.index_cast %1966 : i32 to index
      %1968 = memref.load %arg1[%1967] : memref<2048xi32, #tpu.memory_space<smem>>
      %c511_i32_768 = arith.constant 511 : i32
      %1969 = arith.minsi %1968, %c511_i32_768 : i32
      %1970 = arith.index_cast %1969 : i32 to index
      %c0_769 = arith.constant 0 : index
      %c0_770 = arith.constant 0 : index
      %1971 = vector.load %arg3[%1970, %c0_769, %c0_770] : memref<512x1x128xf32, #tpu.memory_space<vmem>>, vector<1x1x128xf32>
      %1972 = vector.shape_cast %1971 : vector<1x1x128xf32> to vector<1x128xf32>
      %c0_i32_771 = arith.constant 0 : i32
      %1973 = arith.cmpi sgt, %1968, %c0_i32_771 : i32
      %1974 = arith.extui %1973 : i1 to i32
      %1975 = arith.sitofp %1974 : i32 to f32
      %1976 = vector.broadcast %1975 : f32 to vector<1x128xf32>
      %1977 = arith.mulf %1972, %1976 : vector<1x128xf32>
      %1978 = arith.addf %1965, %1977 : vector<1x128xf32>
      %c4_i32_772 = arith.constant 4 : i32
      %1979 = arith.addi %1925, %c4_i32_772 : i32
      %1980 = arith.index_cast %1979 : i32 to index
      %1981 = memref.load %arg1[%1980] : memref<2048xi32, #tpu.memory_space<smem>>
      %c511_i32_773 = arith.constant 511 : i32
      %1982 = arith.minsi %1981, %c511_i32_773 : i32
      %1983 = arith.index_cast %1982 : i32 to index
      %c0_774 = arith.constant 0 : index
      %c0_775 = arith.constant 0 : index
      %1984 = vector.load %arg3[%1983, %c0_774, %c0_775] : memref<512x1x128xf32, #tpu.memory_space<vmem>>, vector<1x1x128xf32>
      %1985 = vector.shape_cast %1984 : vector<1x1x128xf32> to vector<1x128xf32>
      %c0_i32_776 = arith.constant 0 : i32
      %1986 = arith.cmpi sgt, %1981, %c0_i32_776 : i32
      %1987 = arith.extui %1986 : i1 to i32
      %1988 = arith.sitofp %1987 : i32 to f32
      %1989 = vector.broadcast %1988 : f32 to vector<1x128xf32>
      %1990 = arith.mulf %1985, %1989 : vector<1x128xf32>
      %1991 = arith.addf %1978, %1990 : vector<1x128xf32>
      %c5_i32_777 = arith.constant 5 : i32
      %1992 = arith.addi %1925, %c5_i32_777 : i32
      %1993 = arith.index_cast %1992 : i32 to index
      %1994 = memref.load %arg1[%1993] : memref<2048xi32, #tpu.memory_space<smem>>
      %c511_i32_778 = arith.constant 511 : i32
      %1995 = arith.minsi %1994, %c511_i32_778 : i32
      %1996 = arith.index_cast %1995 : i32 to index
      %c0_779 = arith.constant 0 : index
      %c0_780 = arith.constant 0 : index
      %1997 = vector.load %arg3[%1996, %c0_779, %c0_780] : memref<512x1x128xf32, #tpu.memory_space<vmem>>, vector<1x1x128xf32>
      %1998 = vector.shape_cast %1997 : vector<1x1x128xf32> to vector<1x128xf32>
      %c0_i32_781 = arith.constant 0 : i32
      %1999 = arith.cmpi sgt, %1994, %c0_i32_781 : i32
      %2000 = arith.extui %1999 : i1 to i32
      %2001 = arith.sitofp %2000 : i32 to f32
      %2002 = vector.broadcast %2001 : f32 to vector<1x128xf32>
      %2003 = arith.mulf %1998, %2002 : vector<1x128xf32>
      %2004 = arith.addf %1991, %2003 : vector<1x128xf32>
      %c6_i32_782 = arith.constant 6 : i32
      %2005 = arith.addi %1925, %c6_i32_782 : i32
      %2006 = arith.index_cast %2005 : i32 to index
      %2007 = memref.load %arg1[%2006] : memref<2048xi32, #tpu.memory_space<smem>>
      %c511_i32_783 = arith.constant 511 : i32
      %2008 = arith.minsi %2007, %c511_i32_783 : i32
      %2009 = arith.index_cast %2008 : i32 to index
      %c0_784 = arith.constant 0 : index
      %c0_785 = arith.constant 0 : index
      %2010 = vector.load %arg3[%2009, %c0_784, %c0_785] : memref<512x1x128xf32, #tpu.memory_space<vmem>>, vector<1x1x128xf32>
      %2011 = vector.shape_cast %2010 : vector<1x1x128xf32> to vector<1x128xf32>
      %c0_i32_786 = arith.constant 0 : i32
      %2012 = arith.cmpi sgt, %2007, %c0_i32_786 : i32
      %2013 = arith.extui %2012 : i1 to i32
      %2014 = arith.sitofp %2013 : i32 to f32
      %2015 = vector.broadcast %2014 : f32 to vector<1x128xf32>
      %2016 = arith.mulf %2011, %2015 : vector<1x128xf32>
      %2017 = arith.addf %2004, %2016 : vector<1x128xf32>
      %c7_i32_787 = arith.constant 7 : i32
      %2018 = arith.addi %1925, %c7_i32_787 : i32
      %2019 = arith.index_cast %2018 : i32 to index
      %2020 = memref.load %arg1[%2019] : memref<2048xi32, #tpu.memory_space<smem>>
      %c511_i32_788 = arith.constant 511 : i32
      %2021 = arith.minsi %2020, %c511_i32_788 : i32
      %2022 = arith.index_cast %2021 : i32 to index
      %c0_789 = arith.constant 0 : index
      %c0_790 = arith.constant 0 : index
      %2023 = vector.load %arg3[%2022, %c0_789, %c0_790] : memref<512x1x128xf32, #tpu.memory_space<vmem>>, vector<1x1x128xf32>
      %2024 = vector.shape_cast %2023 : vector<1x1x128xf32> to vector<1x128xf32>
      %c0_i32_791 = arith.constant 0 : i32
      %2025 = arith.cmpi sgt, %2020, %c0_i32_791 : i32
      %2026 = arith.extui %2025 : i1 to i32
      %2027 = arith.sitofp %2026 : i32 to f32
      %2028 = vector.broadcast %2027 : f32 to vector<1x128xf32>
      %2029 = arith.mulf %2024, %2028 : vector<1x128xf32>
      %2030 = arith.addf %2017, %2029 : vector<1x128xf32>
      %c16_i32_792 = arith.constant 16 : i32
      %2031 = arith.muli %1924, %c16_i32_792 : i32
      %cst_793 = arith.constant 0.000000e+00 : f32
      %2032 = vector.broadcast %cst_793 : f32 to vector<1x128xf32>
      %c0_i32_794 = arith.constant 0 : i32
      %2033 = arith.addi %2031, %c0_i32_794 : i32
      %2034 = arith.index_cast %2033 : i32 to index
      %2035 = memref.load %arg2[%2034] : memref<4096xi32, #tpu.memory_space<smem>>
      %c511_i32_795 = arith.constant 511 : i32
      %2036 = arith.minsi %2035, %c511_i32_795 : i32
      %2037 = arith.index_cast %2036 : i32 to index
      %c0_796 = arith.constant 0 : index
      %c0_797 = arith.constant 0 : index
      %2038 = vector.load %arg3[%2037, %c0_796, %c0_797] : memref<512x1x128xf32, #tpu.memory_space<vmem>>, vector<1x1x128xf32>
      %2039 = vector.shape_cast %2038 : vector<1x1x128xf32> to vector<1x128xf32>
      %c0_i32_798 = arith.constant 0 : i32
      %2040 = arith.cmpi sgt, %2035, %c0_i32_798 : i32
      %2041 = arith.extui %2040 : i1 to i32
      %2042 = arith.sitofp %2041 : i32 to f32
      %2043 = vector.broadcast %2042 : f32 to vector<1x128xf32>
      %2044 = arith.mulf %2039, %2043 : vector<1x128xf32>
      %2045 = arith.addf %2032, %2044 : vector<1x128xf32>
      %c1_i32_799 = arith.constant 1 : i32
      %2046 = arith.addi %2031, %c1_i32_799 : i32
      %2047 = arith.index_cast %2046 : i32 to index
      %2048 = memref.load %arg2[%2047] : memref<4096xi32, #tpu.memory_space<smem>>
      %c511_i32_800 = arith.constant 511 : i32
      %2049 = arith.minsi %2048, %c511_i32_800 : i32
      %2050 = arith.index_cast %2049 : i32 to index
      %c0_801 = arith.constant 0 : index
      %c0_802 = arith.constant 0 : index
      %2051 = vector.load %arg3[%2050, %c0_801, %c0_802] : memref<512x1x128xf32, #tpu.memory_space<vmem>>, vector<1x1x128xf32>
      %2052 = vector.shape_cast %2051 : vector<1x1x128xf32> to vector<1x128xf32>
      %c0_i32_803 = arith.constant 0 : i32
      %2053 = arith.cmpi sgt, %2048, %c0_i32_803 : i32
      %2054 = arith.extui %2053 : i1 to i32
      %2055 = arith.sitofp %2054 : i32 to f32
      %2056 = vector.broadcast %2055 : f32 to vector<1x128xf32>
      %2057 = arith.mulf %2052, %2056 : vector<1x128xf32>
      %2058 = arith.addf %2045, %2057 : vector<1x128xf32>
      %c2_i32_804 = arith.constant 2 : i32
      %2059 = arith.addi %2031, %c2_i32_804 : i32
      %2060 = arith.index_cast %2059 : i32 to index
      %2061 = memref.load %arg2[%2060] : memref<4096xi32, #tpu.memory_space<smem>>
      %c511_i32_805 = arith.constant 511 : i32
      %2062 = arith.minsi %2061, %c511_i32_805 : i32
      %2063 = arith.index_cast %2062 : i32 to index
      %c0_806 = arith.constant 0 : index
      %c0_807 = arith.constant 0 : index
      %2064 = vector.load %arg3[%2063, %c0_806, %c0_807] : memref<512x1x128xf32, #tpu.memory_space<vmem>>, vector<1x1x128xf32>
      %2065 = vector.shape_cast %2064 : vector<1x1x128xf32> to vector<1x128xf32>
      %c0_i32_808 = arith.constant 0 : i32
      %2066 = arith.cmpi sgt, %2061, %c0_i32_808 : i32
      %2067 = arith.extui %2066 : i1 to i32
      %2068 = arith.sitofp %2067 : i32 to f32
      %2069 = vector.broadcast %2068 : f32 to vector<1x128xf32>
      %2070 = arith.mulf %2065, %2069 : vector<1x128xf32>
      %2071 = arith.addf %2058, %2070 : vector<1x128xf32>
      %c3_i32_809 = arith.constant 3 : i32
      %2072 = arith.addi %2031, %c3_i32_809 : i32
      %2073 = arith.index_cast %2072 : i32 to index
      %2074 = memref.load %arg2[%2073] : memref<4096xi32, #tpu.memory_space<smem>>
      %c511_i32_810 = arith.constant 511 : i32
      %2075 = arith.minsi %2074, %c511_i32_810 : i32
      %2076 = arith.index_cast %2075 : i32 to index
      %c0_811 = arith.constant 0 : index
      %c0_812 = arith.constant 0 : index
      %2077 = vector.load %arg3[%2076, %c0_811, %c0_812] : memref<512x1x128xf32, #tpu.memory_space<vmem>>, vector<1x1x128xf32>
      %2078 = vector.shape_cast %2077 : vector<1x1x128xf32> to vector<1x128xf32>
      %c0_i32_813 = arith.constant 0 : i32
      %2079 = arith.cmpi sgt, %2074, %c0_i32_813 : i32
      %2080 = arith.extui %2079 : i1 to i32
      %2081 = arith.sitofp %2080 : i32 to f32
      %2082 = vector.broadcast %2081 : f32 to vector<1x128xf32>
      %2083 = arith.mulf %2078, %2082 : vector<1x128xf32>
      %2084 = arith.addf %2071, %2083 : vector<1x128xf32>
      %c4_i32_814 = arith.constant 4 : i32
      %2085 = arith.addi %2031, %c4_i32_814 : i32
      %2086 = arith.index_cast %2085 : i32 to index
      %2087 = memref.load %arg2[%2086] : memref<4096xi32, #tpu.memory_space<smem>>
      %c511_i32_815 = arith.constant 511 : i32
      %2088 = arith.minsi %2087, %c511_i32_815 : i32
      %2089 = arith.index_cast %2088 : i32 to index
      %c0_816 = arith.constant 0 : index
      %c0_817 = arith.constant 0 : index
      %2090 = vector.load %arg3[%2089, %c0_816, %c0_817] : memref<512x1x128xf32, #tpu.memory_space<vmem>>, vector<1x1x128xf32>
      %2091 = vector.shape_cast %2090 : vector<1x1x128xf32> to vector<1x128xf32>
      %c0_i32_818 = arith.constant 0 : i32
      %2092 = arith.cmpi sgt, %2087, %c0_i32_818 : i32
      %2093 = arith.extui %2092 : i1 to i32
      %2094 = arith.sitofp %2093 : i32 to f32
      %2095 = vector.broadcast %2094 : f32 to vector<1x128xf32>
      %2096 = arith.mulf %2091, %2095 : vector<1x128xf32>
      %2097 = arith.addf %2084, %2096 : vector<1x128xf32>
      %c5_i32_819 = arith.constant 5 : i32
      %2098 = arith.addi %2031, %c5_i32_819 : i32
      %2099 = arith.index_cast %2098 : i32 to index
      %2100 = memref.load %arg2[%2099] : memref<4096xi32, #tpu.memory_space<smem>>
      %c511_i32_820 = arith.constant 511 : i32
      %2101 = arith.minsi %2100, %c511_i32_820 : i32
      %2102 = arith.index_cast %2101 : i32 to index
      %c0_821 = arith.constant 0 : index
      %c0_822 = arith.constant 0 : index
      %2103 = vector.load %arg3[%2102, %c0_821, %c0_822] : memref<512x1x128xf32, #tpu.memory_space<vmem>>, vector<1x1x128xf32>
      %2104 = vector.shape_cast %2103 : vector<1x1x128xf32> to vector<1x128xf32>
      %c0_i32_823 = arith.constant 0 : i32
      %2105 = arith.cmpi sgt, %2100, %c0_i32_823 : i32
      %2106 = arith.extui %2105 : i1 to i32
      %2107 = arith.sitofp %2106 : i32 to f32
      %2108 = vector.broadcast %2107 : f32 to vector<1x128xf32>
      %2109 = arith.mulf %2104, %2108 : vector<1x128xf32>
      %2110 = arith.addf %2097, %2109 : vector<1x128xf32>
      %c6_i32_824 = arith.constant 6 : i32
      %2111 = arith.addi %2031, %c6_i32_824 : i32
      %2112 = arith.index_cast %2111 : i32 to index
      %2113 = memref.load %arg2[%2112] : memref<4096xi32, #tpu.memory_space<smem>>
      %c511_i32_825 = arith.constant 511 : i32
      %2114 = arith.minsi %2113, %c511_i32_825 : i32
      %2115 = arith.index_cast %2114 : i32 to index
      %c0_826 = arith.constant 0 : index
      %c0_827 = arith.constant 0 : index
      %2116 = vector.load %arg3[%2115, %c0_826, %c0_827] : memref<512x1x128xf32, #tpu.memory_space<vmem>>, vector<1x1x128xf32>
      %2117 = vector.shape_cast %2116 : vector<1x1x128xf32> to vector<1x128xf32>
      %c0_i32_828 = arith.constant 0 : i32
      %2118 = arith.cmpi sgt, %2113, %c0_i32_828 : i32
      %2119 = arith.extui %2118 : i1 to i32
      %2120 = arith.sitofp %2119 : i32 to f32
      %2121 = vector.broadcast %2120 : f32 to vector<1x128xf32>
      %2122 = arith.mulf %2117, %2121 : vector<1x128xf32>
      %2123 = arith.addf %2110, %2122 : vector<1x128xf32>
      %c7_i32_829 = arith.constant 7 : i32
      %2124 = arith.addi %2031, %c7_i32_829 : i32
      %2125 = arith.index_cast %2124 : i32 to index
      %2126 = memref.load %arg2[%2125] : memref<4096xi32, #tpu.memory_space<smem>>
      %c511_i32_830 = arith.constant 511 : i32
      %2127 = arith.minsi %2126, %c511_i32_830 : i32
      %2128 = arith.index_cast %2127 : i32 to index
      %c0_831 = arith.constant 0 : index
      %c0_832 = arith.constant 0 : index
      %2129 = vector.load %arg3[%2128, %c0_831, %c0_832] : memref<512x1x128xf32, #tpu.memory_space<vmem>>, vector<1x1x128xf32>
      %2130 = vector.shape_cast %2129 : vector<1x1x128xf32> to vector<1x128xf32>
      %c0_i32_833 = arith.constant 0 : i32
      %2131 = arith.cmpi sgt, %2126, %c0_i32_833 : i32
      %2132 = arith.extui %2131 : i1 to i32
      %2133 = arith.sitofp %2132 : i32 to f32
      %2134 = vector.broadcast %2133 : f32 to vector<1x128xf32>
      %2135 = arith.mulf %2130, %2134 : vector<1x128xf32>
      %2136 = arith.addf %2123, %2135 : vector<1x128xf32>
      %c8_i32_834 = arith.constant 8 : i32
      %2137 = arith.addi %2031, %c8_i32_834 : i32
      %2138 = arith.index_cast %2137 : i32 to index
      %2139 = memref.load %arg2[%2138] : memref<4096xi32, #tpu.memory_space<smem>>
      %c511_i32_835 = arith.constant 511 : i32
      %2140 = arith.minsi %2139, %c511_i32_835 : i32
      %2141 = arith.index_cast %2140 : i32 to index
      %c0_836 = arith.constant 0 : index
      %c0_837 = arith.constant 0 : index
      %2142 = vector.load %arg3[%2141, %c0_836, %c0_837] : memref<512x1x128xf32, #tpu.memory_space<vmem>>, vector<1x1x128xf32>
      %2143 = vector.shape_cast %2142 : vector<1x1x128xf32> to vector<1x128xf32>
      %c0_i32_838 = arith.constant 0 : i32
      %2144 = arith.cmpi sgt, %2139, %c0_i32_838 : i32
      %2145 = arith.extui %2144 : i1 to i32
      %2146 = arith.sitofp %2145 : i32 to f32
      %2147 = vector.broadcast %2146 : f32 to vector<1x128xf32>
      %2148 = arith.mulf %2143, %2147 : vector<1x128xf32>
      %2149 = arith.addf %2136, %2148 : vector<1x128xf32>
      %c9_i32_839 = arith.constant 9 : i32
      %2150 = arith.addi %2031, %c9_i32_839 : i32
      %2151 = arith.index_cast %2150 : i32 to index
      %2152 = memref.load %arg2[%2151] : memref<4096xi32, #tpu.memory_space<smem>>
      %c511_i32_840 = arith.constant 511 : i32
      %2153 = arith.minsi %2152, %c511_i32_840 : i32
      %2154 = arith.index_cast %2153 : i32 to index
      %c0_841 = arith.constant 0 : index
      %c0_842 = arith.constant 0 : index
      %2155 = vector.load %arg3[%2154, %c0_841, %c0_842] : memref<512x1x128xf32, #tpu.memory_space<vmem>>, vector<1x1x128xf32>
      %2156 = vector.shape_cast %2155 : vector<1x1x128xf32> to vector<1x128xf32>
      %c0_i32_843 = arith.constant 0 : i32
      %2157 = arith.cmpi sgt, %2152, %c0_i32_843 : i32
      %2158 = arith.extui %2157 : i1 to i32
      %2159 = arith.sitofp %2158 : i32 to f32
      %2160 = vector.broadcast %2159 : f32 to vector<1x128xf32>
      %2161 = arith.mulf %2156, %2160 : vector<1x128xf32>
      %2162 = arith.addf %2149, %2161 : vector<1x128xf32>
      %c10_i32_844 = arith.constant 10 : i32
      %2163 = arith.addi %2031, %c10_i32_844 : i32
      %2164 = arith.index_cast %2163 : i32 to index
      %2165 = memref.load %arg2[%2164] : memref<4096xi32, #tpu.memory_space<smem>>
      %c511_i32_845 = arith.constant 511 : i32
      %2166 = arith.minsi %2165, %c511_i32_845 : i32
      %2167 = arith.index_cast %2166 : i32 to index
      %c0_846 = arith.constant 0 : index
      %c0_847 = arith.constant 0 : index
      %2168 = vector.load %arg3[%2167, %c0_846, %c0_847] : memref<512x1x128xf32, #tpu.memory_space<vmem>>, vector<1x1x128xf32>
      %2169 = vector.shape_cast %2168 : vector<1x1x128xf32> to vector<1x128xf32>
      %c0_i32_848 = arith.constant 0 : i32
      %2170 = arith.cmpi sgt, %2165, %c0_i32_848 : i32
      %2171 = arith.extui %2170 : i1 to i32
      %2172 = arith.sitofp %2171 : i32 to f32
      %2173 = vector.broadcast %2172 : f32 to vector<1x128xf32>
      %2174 = arith.mulf %2169, %2173 : vector<1x128xf32>
      %2175 = arith.addf %2162, %2174 : vector<1x128xf32>
      %c11_i32_849 = arith.constant 11 : i32
      %2176 = arith.addi %2031, %c11_i32_849 : i32
      %2177 = arith.index_cast %2176 : i32 to index
      %2178 = memref.load %arg2[%2177] : memref<4096xi32, #tpu.memory_space<smem>>
      %c511_i32_850 = arith.constant 511 : i32
      %2179 = arith.minsi %2178, %c511_i32_850 : i32
      %2180 = arith.index_cast %2179 : i32 to index
      %c0_851 = arith.constant 0 : index
      %c0_852 = arith.constant 0 : index
      %2181 = vector.load %arg3[%2180, %c0_851, %c0_852] : memref<512x1x128xf32, #tpu.memory_space<vmem>>, vector<1x1x128xf32>
      %2182 = vector.shape_cast %2181 : vector<1x1x128xf32> to vector<1x128xf32>
      %c0_i32_853 = arith.constant 0 : i32
      %2183 = arith.cmpi sgt, %2178, %c0_i32_853 : i32
      %2184 = arith.extui %2183 : i1 to i32
      %2185 = arith.sitofp %2184 : i32 to f32
      %2186 = vector.broadcast %2185 : f32 to vector<1x128xf32>
      %2187 = arith.mulf %2182, %2186 : vector<1x128xf32>
      %2188 = arith.addf %2175, %2187 : vector<1x128xf32>
      %c12_i32_854 = arith.constant 12 : i32
      %2189 = arith.addi %2031, %c12_i32_854 : i32
      %2190 = arith.index_cast %2189 : i32 to index
      %2191 = memref.load %arg2[%2190] : memref<4096xi32, #tpu.memory_space<smem>>
      %c511_i32_855 = arith.constant 511 : i32
      %2192 = arith.minsi %2191, %c511_i32_855 : i32
      %2193 = arith.index_cast %2192 : i32 to index
      %c0_856 = arith.constant 0 : index
      %c0_857 = arith.constant 0 : index
      %2194 = vector.load %arg3[%2193, %c0_856, %c0_857] : memref<512x1x128xf32, #tpu.memory_space<vmem>>, vector<1x1x128xf32>
      %2195 = vector.shape_cast %2194 : vector<1x1x128xf32> to vector<1x128xf32>
      %c0_i32_858 = arith.constant 0 : i32
      %2196 = arith.cmpi sgt, %2191, %c0_i32_858 : i32
      %2197 = arith.extui %2196 : i1 to i32
      %2198 = arith.sitofp %2197 : i32 to f32
      %2199 = vector.broadcast %2198 : f32 to vector<1x128xf32>
      %2200 = arith.mulf %2195, %2199 : vector<1x128xf32>
      %2201 = arith.addf %2188, %2200 : vector<1x128xf32>
      %c13_i32_859 = arith.constant 13 : i32
      %2202 = arith.addi %2031, %c13_i32_859 : i32
      %2203 = arith.index_cast %2202 : i32 to index
      %2204 = memref.load %arg2[%2203] : memref<4096xi32, #tpu.memory_space<smem>>
      %c511_i32_860 = arith.constant 511 : i32
      %2205 = arith.minsi %2204, %c511_i32_860 : i32
      %2206 = arith.index_cast %2205 : i32 to index
      %c0_861 = arith.constant 0 : index
      %c0_862 = arith.constant 0 : index
      %2207 = vector.load %arg3[%2206, %c0_861, %c0_862] : memref<512x1x128xf32, #tpu.memory_space<vmem>>, vector<1x1x128xf32>
      %2208 = vector.shape_cast %2207 : vector<1x1x128xf32> to vector<1x128xf32>
      %c0_i32_863 = arith.constant 0 : i32
      %2209 = arith.cmpi sgt, %2204, %c0_i32_863 : i32
      %2210 = arith.extui %2209 : i1 to i32
      %2211 = arith.sitofp %2210 : i32 to f32
      %2212 = vector.broadcast %2211 : f32 to vector<1x128xf32>
      %2213 = arith.mulf %2208, %2212 : vector<1x128xf32>
      %2214 = arith.addf %2201, %2213 : vector<1x128xf32>
      %c14_i32_864 = arith.constant 14 : i32
      %2215 = arith.addi %2031, %c14_i32_864 : i32
      %2216 = arith.index_cast %2215 : i32 to index
      %2217 = memref.load %arg2[%2216] : memref<4096xi32, #tpu.memory_space<smem>>
      %c511_i32_865 = arith.constant 511 : i32
      %2218 = arith.minsi %2217, %c511_i32_865 : i32
      %2219 = arith.index_cast %2218 : i32 to index
      %c0_866 = arith.constant 0 : index
      %c0_867 = arith.constant 0 : index
      %2220 = vector.load %arg3[%2219, %c0_866, %c0_867] : memref<512x1x128xf32, #tpu.memory_space<vmem>>, vector<1x1x128xf32>
      %2221 = vector.shape_cast %2220 : vector<1x1x128xf32> to vector<1x128xf32>
      %c0_i32_868 = arith.constant 0 : i32
      %2222 = arith.cmpi sgt, %2217, %c0_i32_868 : i32
      %2223 = arith.extui %2222 : i1 to i32
      %2224 = arith.sitofp %2223 : i32 to f32
      %2225 = vector.broadcast %2224 : f32 to vector<1x128xf32>
      %2226 = arith.mulf %2221, %2225 : vector<1x128xf32>
      %2227 = arith.addf %2214, %2226 : vector<1x128xf32>
      %c15_i32_869 = arith.constant 15 : i32
      %2228 = arith.addi %2031, %c15_i32_869 : i32
      %2229 = arith.index_cast %2228 : i32 to index
      %2230 = memref.load %arg2[%2229] : memref<4096xi32, #tpu.memory_space<smem>>
      %c511_i32_870 = arith.constant 511 : i32
      %2231 = arith.minsi %2230, %c511_i32_870 : i32
      %2232 = arith.index_cast %2231 : i32 to index
      %c0_871 = arith.constant 0 : index
      %c0_872 = arith.constant 0 : index
      %2233 = vector.load %arg3[%2232, %c0_871, %c0_872] : memref<512x1x128xf32, #tpu.memory_space<vmem>>, vector<1x1x128xf32>
      %2234 = vector.shape_cast %2233 : vector<1x1x128xf32> to vector<1x128xf32>
      %c0_i32_873 = arith.constant 0 : i32
      %2235 = arith.cmpi sgt, %2230, %c0_i32_873 : i32
      %2236 = arith.extui %2235 : i1 to i32
      %2237 = arith.sitofp %2236 : i32 to f32
      %2238 = vector.broadcast %2237 : f32 to vector<1x128xf32>
      %2239 = arith.mulf %2234, %2238 : vector<1x128xf32>
      %2240 = arith.addf %2227, %2239 : vector<1x128xf32>
      %c8_i32_874 = arith.constant 8 : i32
      %2241 = arith.muli %arg6, %c8_i32_874 : i32
      %2242 = arith.addi %0, %2241 : i32
      %c7_i32_875 = arith.constant 7 : i32
      %2243 = arith.addi %2242, %c7_i32_875 : i32
      %c8_i32_876 = arith.constant 8 : i32
      %2244 = arith.muli %2243, %c8_i32_876 : i32
      %cst_877 = arith.constant 0.000000e+00 : f32
      %2245 = vector.broadcast %cst_877 : f32 to vector<1x128xf32>
      %c0_i32_878 = arith.constant 0 : i32
      %2246 = arith.addi %2244, %c0_i32_878 : i32
      %2247 = arith.index_cast %2246 : i32 to index
      %2248 = memref.load %arg1[%2247] : memref<2048xi32, #tpu.memory_space<smem>>
      %c511_i32_879 = arith.constant 511 : i32
      %2249 = arith.minsi %2248, %c511_i32_879 : i32
      %2250 = arith.index_cast %2249 : i32 to index
      %c0_880 = arith.constant 0 : index
      %c0_881 = arith.constant 0 : index
      %2251 = vector.load %arg3[%2250, %c0_880, %c0_881] : memref<512x1x128xf32, #tpu.memory_space<vmem>>, vector<1x1x128xf32>
      %2252 = vector.shape_cast %2251 : vector<1x1x128xf32> to vector<1x128xf32>
      %c0_i32_882 = arith.constant 0 : i32
      %2253 = arith.cmpi sgt, %2248, %c0_i32_882 : i32
      %2254 = arith.extui %2253 : i1 to i32
      %2255 = arith.sitofp %2254 : i32 to f32
      %2256 = vector.broadcast %2255 : f32 to vector<1x128xf32>
      %2257 = arith.mulf %2252, %2256 : vector<1x128xf32>
      %2258 = arith.addf %2245, %2257 : vector<1x128xf32>
      %c1_i32_883 = arith.constant 1 : i32
      %2259 = arith.addi %2244, %c1_i32_883 : i32
      %2260 = arith.index_cast %2259 : i32 to index
      %2261 = memref.load %arg1[%2260] : memref<2048xi32, #tpu.memory_space<smem>>
      %c511_i32_884 = arith.constant 511 : i32
      %2262 = arith.minsi %2261, %c511_i32_884 : i32
      %2263 = arith.index_cast %2262 : i32 to index
      %c0_885 = arith.constant 0 : index
      %c0_886 = arith.constant 0 : index
      %2264 = vector.load %arg3[%2263, %c0_885, %c0_886] : memref<512x1x128xf32, #tpu.memory_space<vmem>>, vector<1x1x128xf32>
      %2265 = vector.shape_cast %2264 : vector<1x1x128xf32> to vector<1x128xf32>
      %c0_i32_887 = arith.constant 0 : i32
      %2266 = arith.cmpi sgt, %2261, %c0_i32_887 : i32
      %2267 = arith.extui %2266 : i1 to i32
      %2268 = arith.sitofp %2267 : i32 to f32
      %2269 = vector.broadcast %2268 : f32 to vector<1x128xf32>
      %2270 = arith.mulf %2265, %2269 : vector<1x128xf32>
      %2271 = arith.addf %2258, %2270 : vector<1x128xf32>
      %c2_i32_888 = arith.constant 2 : i32
      %2272 = arith.addi %2244, %c2_i32_888 : i32
      %2273 = arith.index_cast %2272 : i32 to index
      %2274 = memref.load %arg1[%2273] : memref<2048xi32, #tpu.memory_space<smem>>
      %c511_i32_889 = arith.constant 511 : i32
      %2275 = arith.minsi %2274, %c511_i32_889 : i32
      %2276 = arith.index_cast %2275 : i32 to index
      %c0_890 = arith.constant 0 : index
      %c0_891 = arith.constant 0 : index
      %2277 = vector.load %arg3[%2276, %c0_890, %c0_891] : memref<512x1x128xf32, #tpu.memory_space<vmem>>, vector<1x1x128xf32>
      %2278 = vector.shape_cast %2277 : vector<1x1x128xf32> to vector<1x128xf32>
      %c0_i32_892 = arith.constant 0 : i32
      %2279 = arith.cmpi sgt, %2274, %c0_i32_892 : i32
      %2280 = arith.extui %2279 : i1 to i32
      %2281 = arith.sitofp %2280 : i32 to f32
      %2282 = vector.broadcast %2281 : f32 to vector<1x128xf32>
      %2283 = arith.mulf %2278, %2282 : vector<1x128xf32>
      %2284 = arith.addf %2271, %2283 : vector<1x128xf32>
      %c3_i32_893 = arith.constant 3 : i32
      %2285 = arith.addi %2244, %c3_i32_893 : i32
      %2286 = arith.index_cast %2285 : i32 to index
      %2287 = memref.load %arg1[%2286] : memref<2048xi32, #tpu.memory_space<smem>>
      %c511_i32_894 = arith.constant 511 : i32
      %2288 = arith.minsi %2287, %c511_i32_894 : i32
      %2289 = arith.index_cast %2288 : i32 to index
      %c0_895 = arith.constant 0 : index
      %c0_896 = arith.constant 0 : index
      %2290 = vector.load %arg3[%2289, %c0_895, %c0_896] : memref<512x1x128xf32, #tpu.memory_space<vmem>>, vector<1x1x128xf32>
      %2291 = vector.shape_cast %2290 : vector<1x1x128xf32> to vector<1x128xf32>
      %c0_i32_897 = arith.constant 0 : i32
      %2292 = arith.cmpi sgt, %2287, %c0_i32_897 : i32
      %2293 = arith.extui %2292 : i1 to i32
      %2294 = arith.sitofp %2293 : i32 to f32
      %2295 = vector.broadcast %2294 : f32 to vector<1x128xf32>
      %2296 = arith.mulf %2291, %2295 : vector<1x128xf32>
      %2297 = arith.addf %2284, %2296 : vector<1x128xf32>
      %c4_i32_898 = arith.constant 4 : i32
      %2298 = arith.addi %2244, %c4_i32_898 : i32
      %2299 = arith.index_cast %2298 : i32 to index
      %2300 = memref.load %arg1[%2299] : memref<2048xi32, #tpu.memory_space<smem>>
      %c511_i32_899 = arith.constant 511 : i32
      %2301 = arith.minsi %2300, %c511_i32_899 : i32
      %2302 = arith.index_cast %2301 : i32 to index
      %c0_900 = arith.constant 0 : index
      %c0_901 = arith.constant 0 : index
      %2303 = vector.load %arg3[%2302, %c0_900, %c0_901] : memref<512x1x128xf32, #tpu.memory_space<vmem>>, vector<1x1x128xf32>
      %2304 = vector.shape_cast %2303 : vector<1x1x128xf32> to vector<1x128xf32>
      %c0_i32_902 = arith.constant 0 : i32
      %2305 = arith.cmpi sgt, %2300, %c0_i32_902 : i32
      %2306 = arith.extui %2305 : i1 to i32
      %2307 = arith.sitofp %2306 : i32 to f32
      %2308 = vector.broadcast %2307 : f32 to vector<1x128xf32>
      %2309 = arith.mulf %2304, %2308 : vector<1x128xf32>
      %2310 = arith.addf %2297, %2309 : vector<1x128xf32>
      %c5_i32_903 = arith.constant 5 : i32
      %2311 = arith.addi %2244, %c5_i32_903 : i32
      %2312 = arith.index_cast %2311 : i32 to index
      %2313 = memref.load %arg1[%2312] : memref<2048xi32, #tpu.memory_space<smem>>
      %c511_i32_904 = arith.constant 511 : i32
      %2314 = arith.minsi %2313, %c511_i32_904 : i32
      %2315 = arith.index_cast %2314 : i32 to index
      %c0_905 = arith.constant 0 : index
      %c0_906 = arith.constant 0 : index
      %2316 = vector.load %arg3[%2315, %c0_905, %c0_906] : memref<512x1x128xf32, #tpu.memory_space<vmem>>, vector<1x1x128xf32>
      %2317 = vector.shape_cast %2316 : vector<1x1x128xf32> to vector<1x128xf32>
      %c0_i32_907 = arith.constant 0 : i32
      %2318 = arith.cmpi sgt, %2313, %c0_i32_907 : i32
      %2319 = arith.extui %2318 : i1 to i32
      %2320 = arith.sitofp %2319 : i32 to f32
      %2321 = vector.broadcast %2320 : f32 to vector<1x128xf32>
      %2322 = arith.mulf %2317, %2321 : vector<1x128xf32>
      %2323 = arith.addf %2310, %2322 : vector<1x128xf32>
      %c6_i32_908 = arith.constant 6 : i32
      %2324 = arith.addi %2244, %c6_i32_908 : i32
      %2325 = arith.index_cast %2324 : i32 to index
      %2326 = memref.load %arg1[%2325] : memref<2048xi32, #tpu.memory_space<smem>>
      %c511_i32_909 = arith.constant 511 : i32
      %2327 = arith.minsi %2326, %c511_i32_909 : i32
      %2328 = arith.index_cast %2327 : i32 to index
      %c0_910 = arith.constant 0 : index
      %c0_911 = arith.constant 0 : index
      %2329 = vector.load %arg3[%2328, %c0_910, %c0_911] : memref<512x1x128xf32, #tpu.memory_space<vmem>>, vector<1x1x128xf32>
      %2330 = vector.shape_cast %2329 : vector<1x1x128xf32> to vector<1x128xf32>
      %c0_i32_912 = arith.constant 0 : i32
      %2331 = arith.cmpi sgt, %2326, %c0_i32_912 : i32
      %2332 = arith.extui %2331 : i1 to i32
      %2333 = arith.sitofp %2332 : i32 to f32
      %2334 = vector.broadcast %2333 : f32 to vector<1x128xf32>
      %2335 = arith.mulf %2330, %2334 : vector<1x128xf32>
      %2336 = arith.addf %2323, %2335 : vector<1x128xf32>
      %c7_i32_913 = arith.constant 7 : i32
      %2337 = arith.addi %2244, %c7_i32_913 : i32
      %2338 = arith.index_cast %2337 : i32 to index
      %2339 = memref.load %arg1[%2338] : memref<2048xi32, #tpu.memory_space<smem>>
      %c511_i32_914 = arith.constant 511 : i32
      %2340 = arith.minsi %2339, %c511_i32_914 : i32
      %2341 = arith.index_cast %2340 : i32 to index
      %c0_915 = arith.constant 0 : index
      %c0_916 = arith.constant 0 : index
      %2342 = vector.load %arg3[%2341, %c0_915, %c0_916] : memref<512x1x128xf32, #tpu.memory_space<vmem>>, vector<1x1x128xf32>
      %2343 = vector.shape_cast %2342 : vector<1x1x128xf32> to vector<1x128xf32>
      %c0_i32_917 = arith.constant 0 : i32
      %2344 = arith.cmpi sgt, %2339, %c0_i32_917 : i32
      %2345 = arith.extui %2344 : i1 to i32
      %2346 = arith.sitofp %2345 : i32 to f32
      %2347 = vector.broadcast %2346 : f32 to vector<1x128xf32>
      %2348 = arith.mulf %2343, %2347 : vector<1x128xf32>
      %2349 = arith.addf %2336, %2348 : vector<1x128xf32>
      %c16_i32_918 = arith.constant 16 : i32
      %2350 = arith.muli %2243, %c16_i32_918 : i32
      %cst_919 = arith.constant 0.000000e+00 : f32
      %2351 = vector.broadcast %cst_919 : f32 to vector<1x128xf32>
      %c0_i32_920 = arith.constant 0 : i32
      %2352 = arith.addi %2350, %c0_i32_920 : i32
      %2353 = arith.index_cast %2352 : i32 to index
      %2354 = memref.load %arg2[%2353] : memref<4096xi32, #tpu.memory_space<smem>>
      %c511_i32_921 = arith.constant 511 : i32
      %2355 = arith.minsi %2354, %c511_i32_921 : i32
      %2356 = arith.index_cast %2355 : i32 to index
      %c0_922 = arith.constant 0 : index
      %c0_923 = arith.constant 0 : index
      %2357 = vector.load %arg3[%2356, %c0_922, %c0_923] : memref<512x1x128xf32, #tpu.memory_space<vmem>>, vector<1x1x128xf32>
      %2358 = vector.shape_cast %2357 : vector<1x1x128xf32> to vector<1x128xf32>
      %c0_i32_924 = arith.constant 0 : i32
      %2359 = arith.cmpi sgt, %2354, %c0_i32_924 : i32
      %2360 = arith.extui %2359 : i1 to i32
      %2361 = arith.sitofp %2360 : i32 to f32
      %2362 = vector.broadcast %2361 : f32 to vector<1x128xf32>
      %2363 = arith.mulf %2358, %2362 : vector<1x128xf32>
      %2364 = arith.addf %2351, %2363 : vector<1x128xf32>
      %c1_i32_925 = arith.constant 1 : i32
      %2365 = arith.addi %2350, %c1_i32_925 : i32
      %2366 = arith.index_cast %2365 : i32 to index
      %2367 = memref.load %arg2[%2366] : memref<4096xi32, #tpu.memory_space<smem>>
      %c511_i32_926 = arith.constant 511 : i32
      %2368 = arith.minsi %2367, %c511_i32_926 : i32
      %2369 = arith.index_cast %2368 : i32 to index
      %c0_927 = arith.constant 0 : index
      %c0_928 = arith.constant 0 : index
      %2370 = vector.load %arg3[%2369, %c0_927, %c0_928] : memref<512x1x128xf32, #tpu.memory_space<vmem>>, vector<1x1x128xf32>
      %2371 = vector.shape_cast %2370 : vector<1x1x128xf32> to vector<1x128xf32>
      %c0_i32_929 = arith.constant 0 : i32
      %2372 = arith.cmpi sgt, %2367, %c0_i32_929 : i32
      %2373 = arith.extui %2372 : i1 to i32
      %2374 = arith.sitofp %2373 : i32 to f32
      %2375 = vector.broadcast %2374 : f32 to vector<1x128xf32>
      %2376 = arith.mulf %2371, %2375 : vector<1x128xf32>
      %2377 = arith.addf %2364, %2376 : vector<1x128xf32>
      %c2_i32_930 = arith.constant 2 : i32
      %2378 = arith.addi %2350, %c2_i32_930 : i32
      %2379 = arith.index_cast %2378 : i32 to index
      %2380 = memref.load %arg2[%2379] : memref<4096xi32, #tpu.memory_space<smem>>
      %c511_i32_931 = arith.constant 511 : i32
      %2381 = arith.minsi %2380, %c511_i32_931 : i32
      %2382 = arith.index_cast %2381 : i32 to index
      %c0_932 = arith.constant 0 : index
      %c0_933 = arith.constant 0 : index
      %2383 = vector.load %arg3[%2382, %c0_932, %c0_933] : memref<512x1x128xf32, #tpu.memory_space<vmem>>, vector<1x1x128xf32>
      %2384 = vector.shape_cast %2383 : vector<1x1x128xf32> to vector<1x128xf32>
      %c0_i32_934 = arith.constant 0 : i32
      %2385 = arith.cmpi sgt, %2380, %c0_i32_934 : i32
      %2386 = arith.extui %2385 : i1 to i32
      %2387 = arith.sitofp %2386 : i32 to f32
      %2388 = vector.broadcast %2387 : f32 to vector<1x128xf32>
      %2389 = arith.mulf %2384, %2388 : vector<1x128xf32>
      %2390 = arith.addf %2377, %2389 : vector<1x128xf32>
      %c3_i32_935 = arith.constant 3 : i32
      %2391 = arith.addi %2350, %c3_i32_935 : i32
      %2392 = arith.index_cast %2391 : i32 to index
      %2393 = memref.load %arg2[%2392] : memref<4096xi32, #tpu.memory_space<smem>>
      %c511_i32_936 = arith.constant 511 : i32
      %2394 = arith.minsi %2393, %c511_i32_936 : i32
      %2395 = arith.index_cast %2394 : i32 to index
      %c0_937 = arith.constant 0 : index
      %c0_938 = arith.constant 0 : index
      %2396 = vector.load %arg3[%2395, %c0_937, %c0_938] : memref<512x1x128xf32, #tpu.memory_space<vmem>>, vector<1x1x128xf32>
      %2397 = vector.shape_cast %2396 : vector<1x1x128xf32> to vector<1x128xf32>
      %c0_i32_939 = arith.constant 0 : i32
      %2398 = arith.cmpi sgt, %2393, %c0_i32_939 : i32
      %2399 = arith.extui %2398 : i1 to i32
      %2400 = arith.sitofp %2399 : i32 to f32
      %2401 = vector.broadcast %2400 : f32 to vector<1x128xf32>
      %2402 = arith.mulf %2397, %2401 : vector<1x128xf32>
      %2403 = arith.addf %2390, %2402 : vector<1x128xf32>
      %c4_i32_940 = arith.constant 4 : i32
      %2404 = arith.addi %2350, %c4_i32_940 : i32
      %2405 = arith.index_cast %2404 : i32 to index
      %2406 = memref.load %arg2[%2405] : memref<4096xi32, #tpu.memory_space<smem>>
      %c511_i32_941 = arith.constant 511 : i32
      %2407 = arith.minsi %2406, %c511_i32_941 : i32
      %2408 = arith.index_cast %2407 : i32 to index
      %c0_942 = arith.constant 0 : index
      %c0_943 = arith.constant 0 : index
      %2409 = vector.load %arg3[%2408, %c0_942, %c0_943] : memref<512x1x128xf32, #tpu.memory_space<vmem>>, vector<1x1x128xf32>
      %2410 = vector.shape_cast %2409 : vector<1x1x128xf32> to vector<1x128xf32>
      %c0_i32_944 = arith.constant 0 : i32
      %2411 = arith.cmpi sgt, %2406, %c0_i32_944 : i32
      %2412 = arith.extui %2411 : i1 to i32
      %2413 = arith.sitofp %2412 : i32 to f32
      %2414 = vector.broadcast %2413 : f32 to vector<1x128xf32>
      %2415 = arith.mulf %2410, %2414 : vector<1x128xf32>
      %2416 = arith.addf %2403, %2415 : vector<1x128xf32>
      %c5_i32_945 = arith.constant 5 : i32
      %2417 = arith.addi %2350, %c5_i32_945 : i32
      %2418 = arith.index_cast %2417 : i32 to index
      %2419 = memref.load %arg2[%2418] : memref<4096xi32, #tpu.memory_space<smem>>
      %c511_i32_946 = arith.constant 511 : i32
      %2420 = arith.minsi %2419, %c511_i32_946 : i32
      %2421 = arith.index_cast %2420 : i32 to index
      %c0_947 = arith.constant 0 : index
      %c0_948 = arith.constant 0 : index
      %2422 = vector.load %arg3[%2421, %c0_947, %c0_948] : memref<512x1x128xf32, #tpu.memory_space<vmem>>, vector<1x1x128xf32>
      %2423 = vector.shape_cast %2422 : vector<1x1x128xf32> to vector<1x128xf32>
      %c0_i32_949 = arith.constant 0 : i32
      %2424 = arith.cmpi sgt, %2419, %c0_i32_949 : i32
      %2425 = arith.extui %2424 : i1 to i32
      %2426 = arith.sitofp %2425 : i32 to f32
      %2427 = vector.broadcast %2426 : f32 to vector<1x128xf32>
      %2428 = arith.mulf %2423, %2427 : vector<1x128xf32>
      %2429 = arith.addf %2416, %2428 : vector<1x128xf32>
      %c6_i32_950 = arith.constant 6 : i32
      %2430 = arith.addi %2350, %c6_i32_950 : i32
      %2431 = arith.index_cast %2430 : i32 to index
      %2432 = memref.load %arg2[%2431] : memref<4096xi32, #tpu.memory_space<smem>>
      %c511_i32_951 = arith.constant 511 : i32
      %2433 = arith.minsi %2432, %c511_i32_951 : i32
      %2434 = arith.index_cast %2433 : i32 to index
      %c0_952 = arith.constant 0 : index
      %c0_953 = arith.constant 0 : index
      %2435 = vector.load %arg3[%2434, %c0_952, %c0_953] : memref<512x1x128xf32, #tpu.memory_space<vmem>>, vector<1x1x128xf32>
      %2436 = vector.shape_cast %2435 : vector<1x1x128xf32> to vector<1x128xf32>
      %c0_i32_954 = arith.constant 0 : i32
      %2437 = arith.cmpi sgt, %2432, %c0_i32_954 : i32
      %2438 = arith.extui %2437 : i1 to i32
      %2439 = arith.sitofp %2438 : i32 to f32
      %2440 = vector.broadcast %2439 : f32 to vector<1x128xf32>
      %2441 = arith.mulf %2436, %2440 : vector<1x128xf32>
      %2442 = arith.addf %2429, %2441 : vector<1x128xf32>
      %c7_i32_955 = arith.constant 7 : i32
      %2443 = arith.addi %2350, %c7_i32_955 : i32
      %2444 = arith.index_cast %2443 : i32 to index
      %2445 = memref.load %arg2[%2444] : memref<4096xi32, #tpu.memory_space<smem>>
      %c511_i32_956 = arith.constant 511 : i32
      %2446 = arith.minsi %2445, %c511_i32_956 : i32
      %2447 = arith.index_cast %2446 : i32 to index
      %c0_957 = arith.constant 0 : index
      %c0_958 = arith.constant 0 : index
      %2448 = vector.load %arg3[%2447, %c0_957, %c0_958] : memref<512x1x128xf32, #tpu.memory_space<vmem>>, vector<1x1x128xf32>
      %2449 = vector.shape_cast %2448 : vector<1x1x128xf32> to vector<1x128xf32>
      %c0_i32_959 = arith.constant 0 : i32
      %2450 = arith.cmpi sgt, %2445, %c0_i32_959 : i32
      %2451 = arith.extui %2450 : i1 to i32
      %2452 = arith.sitofp %2451 : i32 to f32
      %2453 = vector.broadcast %2452 : f32 to vector<1x128xf32>
      %2454 = arith.mulf %2449, %2453 : vector<1x128xf32>
      %2455 = arith.addf %2442, %2454 : vector<1x128xf32>
      %c8_i32_960 = arith.constant 8 : i32
      %2456 = arith.addi %2350, %c8_i32_960 : i32
      %2457 = arith.index_cast %2456 : i32 to index
      %2458 = memref.load %arg2[%2457] : memref<4096xi32, #tpu.memory_space<smem>>
      %c511_i32_961 = arith.constant 511 : i32
      %2459 = arith.minsi %2458, %c511_i32_961 : i32
      %2460 = arith.index_cast %2459 : i32 to index
      %c0_962 = arith.constant 0 : index
      %c0_963 = arith.constant 0 : index
      %2461 = vector.load %arg3[%2460, %c0_962, %c0_963] : memref<512x1x128xf32, #tpu.memory_space<vmem>>, vector<1x1x128xf32>
      %2462 = vector.shape_cast %2461 : vector<1x1x128xf32> to vector<1x128xf32>
      %c0_i32_964 = arith.constant 0 : i32
      %2463 = arith.cmpi sgt, %2458, %c0_i32_964 : i32
      %2464 = arith.extui %2463 : i1 to i32
      %2465 = arith.sitofp %2464 : i32 to f32
      %2466 = vector.broadcast %2465 : f32 to vector<1x128xf32>
      %2467 = arith.mulf %2462, %2466 : vector<1x128xf32>
      %2468 = arith.addf %2455, %2467 : vector<1x128xf32>
      %c9_i32_965 = arith.constant 9 : i32
      %2469 = arith.addi %2350, %c9_i32_965 : i32
      %2470 = arith.index_cast %2469 : i32 to index
      %2471 = memref.load %arg2[%2470] : memref<4096xi32, #tpu.memory_space<smem>>
      %c511_i32_966 = arith.constant 511 : i32
      %2472 = arith.minsi %2471, %c511_i32_966 : i32
      %2473 = arith.index_cast %2472 : i32 to index
      %c0_967 = arith.constant 0 : index
      %c0_968 = arith.constant 0 : index
      %2474 = vector.load %arg3[%2473, %c0_967, %c0_968] : memref<512x1x128xf32, #tpu.memory_space<vmem>>, vector<1x1x128xf32>
      %2475 = vector.shape_cast %2474 : vector<1x1x128xf32> to vector<1x128xf32>
      %c0_i32_969 = arith.constant 0 : i32
      %2476 = arith.cmpi sgt, %2471, %c0_i32_969 : i32
      %2477 = arith.extui %2476 : i1 to i32
      %2478 = arith.sitofp %2477 : i32 to f32
      %2479 = vector.broadcast %2478 : f32 to vector<1x128xf32>
      %2480 = arith.mulf %2475, %2479 : vector<1x128xf32>
      %2481 = arith.addf %2468, %2480 : vector<1x128xf32>
      %c10_i32_970 = arith.constant 10 : i32
      %2482 = arith.addi %2350, %c10_i32_970 : i32
      %2483 = arith.index_cast %2482 : i32 to index
      %2484 = memref.load %arg2[%2483] : memref<4096xi32, #tpu.memory_space<smem>>
      %c511_i32_971 = arith.constant 511 : i32
      %2485 = arith.minsi %2484, %c511_i32_971 : i32
      %2486 = arith.index_cast %2485 : i32 to index
      %c0_972 = arith.constant 0 : index
      %c0_973 = arith.constant 0 : index
      %2487 = vector.load %arg3[%2486, %c0_972, %c0_973] : memref<512x1x128xf32, #tpu.memory_space<vmem>>, vector<1x1x128xf32>
      %2488 = vector.shape_cast %2487 : vector<1x1x128xf32> to vector<1x128xf32>
      %c0_i32_974 = arith.constant 0 : i32
      %2489 = arith.cmpi sgt, %2484, %c0_i32_974 : i32
      %2490 = arith.extui %2489 : i1 to i32
      %2491 = arith.sitofp %2490 : i32 to f32
      %2492 = vector.broadcast %2491 : f32 to vector<1x128xf32>
      %2493 = arith.mulf %2488, %2492 : vector<1x128xf32>
      %2494 = arith.addf %2481, %2493 : vector<1x128xf32>
      %c11_i32_975 = arith.constant 11 : i32
      %2495 = arith.addi %2350, %c11_i32_975 : i32
      %2496 = arith.index_cast %2495 : i32 to index
      %2497 = memref.load %arg2[%2496] : memref<4096xi32, #tpu.memory_space<smem>>
      %c511_i32_976 = arith.constant 511 : i32
      %2498 = arith.minsi %2497, %c511_i32_976 : i32
      %2499 = arith.index_cast %2498 : i32 to index
      %c0_977 = arith.constant 0 : index
      %c0_978 = arith.constant 0 : index
      %2500 = vector.load %arg3[%2499, %c0_977, %c0_978] : memref<512x1x128xf32, #tpu.memory_space<vmem>>, vector<1x1x128xf32>
      %2501 = vector.shape_cast %2500 : vector<1x1x128xf32> to vector<1x128xf32>
      %c0_i32_979 = arith.constant 0 : i32
      %2502 = arith.cmpi sgt, %2497, %c0_i32_979 : i32
      %2503 = arith.extui %2502 : i1 to i32
      %2504 = arith.sitofp %2503 : i32 to f32
      %2505 = vector.broadcast %2504 : f32 to vector<1x128xf32>
      %2506 = arith.mulf %2501, %2505 : vector<1x128xf32>
      %2507 = arith.addf %2494, %2506 : vector<1x128xf32>
      %c12_i32_980 = arith.constant 12 : i32
      %2508 = arith.addi %2350, %c12_i32_980 : i32
      %2509 = arith.index_cast %2508 : i32 to index
      %2510 = memref.load %arg2[%2509] : memref<4096xi32, #tpu.memory_space<smem>>
      %c511_i32_981 = arith.constant 511 : i32
      %2511 = arith.minsi %2510, %c511_i32_981 : i32
      %2512 = arith.index_cast %2511 : i32 to index
      %c0_982 = arith.constant 0 : index
      %c0_983 = arith.constant 0 : index
      %2513 = vector.load %arg3[%2512, %c0_982, %c0_983] : memref<512x1x128xf32, #tpu.memory_space<vmem>>, vector<1x1x128xf32>
      %2514 = vector.shape_cast %2513 : vector<1x1x128xf32> to vector<1x128xf32>
      %c0_i32_984 = arith.constant 0 : i32
      %2515 = arith.cmpi sgt, %2510, %c0_i32_984 : i32
      %2516 = arith.extui %2515 : i1 to i32
      %2517 = arith.sitofp %2516 : i32 to f32
      %2518 = vector.broadcast %2517 : f32 to vector<1x128xf32>
      %2519 = arith.mulf %2514, %2518 : vector<1x128xf32>
      %2520 = arith.addf %2507, %2519 : vector<1x128xf32>
      %c13_i32_985 = arith.constant 13 : i32
      %2521 = arith.addi %2350, %c13_i32_985 : i32
      %2522 = arith.index_cast %2521 : i32 to index
      %2523 = memref.load %arg2[%2522] : memref<4096xi32, #tpu.memory_space<smem>>
      %c511_i32_986 = arith.constant 511 : i32
      %2524 = arith.minsi %2523, %c511_i32_986 : i32
      %2525 = arith.index_cast %2524 : i32 to index
      %c0_987 = arith.constant 0 : index
      %c0_988 = arith.constant 0 : index
      %2526 = vector.load %arg3[%2525, %c0_987, %c0_988] : memref<512x1x128xf32, #tpu.memory_space<vmem>>, vector<1x1x128xf32>
      %2527 = vector.shape_cast %2526 : vector<1x1x128xf32> to vector<1x128xf32>
      %c0_i32_989 = arith.constant 0 : i32
      %2528 = arith.cmpi sgt, %2523, %c0_i32_989 : i32
      %2529 = arith.extui %2528 : i1 to i32
      %2530 = arith.sitofp %2529 : i32 to f32
      %2531 = vector.broadcast %2530 : f32 to vector<1x128xf32>
      %2532 = arith.mulf %2527, %2531 : vector<1x128xf32>
      %2533 = arith.addf %2520, %2532 : vector<1x128xf32>
      %c14_i32_990 = arith.constant 14 : i32
      %2534 = arith.addi %2350, %c14_i32_990 : i32
      %2535 = arith.index_cast %2534 : i32 to index
      %2536 = memref.load %arg2[%2535] : memref<4096xi32, #tpu.memory_space<smem>>
      %c511_i32_991 = arith.constant 511 : i32
      %2537 = arith.minsi %2536, %c511_i32_991 : i32
      %2538 = arith.index_cast %2537 : i32 to index
      %c0_992 = arith.constant 0 : index
      %c0_993 = arith.constant 0 : index
      %2539 = vector.load %arg3[%2538, %c0_992, %c0_993] : memref<512x1x128xf32, #tpu.memory_space<vmem>>, vector<1x1x128xf32>
      %2540 = vector.shape_cast %2539 : vector<1x1x128xf32> to vector<1x128xf32>
      %c0_i32_994 = arith.constant 0 : i32
      %2541 = arith.cmpi sgt, %2536, %c0_i32_994 : i32
      %2542 = arith.extui %2541 : i1 to i32
      %2543 = arith.sitofp %2542 : i32 to f32
      %2544 = vector.broadcast %2543 : f32 to vector<1x128xf32>
      %2545 = arith.mulf %2540, %2544 : vector<1x128xf32>
      %2546 = arith.addf %2533, %2545 : vector<1x128xf32>
      %c15_i32_995 = arith.constant 15 : i32
      %2547 = arith.addi %2350, %c15_i32_995 : i32
      %2548 = arith.index_cast %2547 : i32 to index
      %2549 = memref.load %arg2[%2548] : memref<4096xi32, #tpu.memory_space<smem>>
      %c511_i32_996 = arith.constant 511 : i32
      %2550 = arith.minsi %2549, %c511_i32_996 : i32
      %2551 = arith.index_cast %2550 : i32 to index
      %c0_997 = arith.constant 0 : index
      %c0_998 = arith.constant 0 : index
      %2552 = vector.load %arg3[%2551, %c0_997, %c0_998] : memref<512x1x128xf32, #tpu.memory_space<vmem>>, vector<1x1x128xf32>
      %2553 = vector.shape_cast %2552 : vector<1x1x128xf32> to vector<1x128xf32>
      %c0_i32_999 = arith.constant 0 : i32
      %2554 = arith.cmpi sgt, %2549, %c0_i32_999 : i32
      %2555 = arith.extui %2554 : i1 to i32
      %2556 = arith.sitofp %2555 : i32 to f32
      %2557 = vector.broadcast %2556 : f32 to vector<1x128xf32>
      %2558 = arith.mulf %2553, %2557 : vector<1x128xf32>
      %2559 = arith.addf %2546, %2558 : vector<1x128xf32>
      %2560 = tpu.concatenate %116, %435, %754, %1073, %1392, %1711, %2030, %2349 in 0 : vector<1x128xf32>, vector<1x128xf32>, vector<1x128xf32>, vector<1x128xf32>, vector<1x128xf32>, vector<1x128xf32>, vector<1x128xf32>, vector<1x128xf32> -> vector<8x128xf32>
      %2561 = tpu.concatenate %326, %645, %964, %1283, %1602, %1921, %2240, %2559 in 0 : vector<1x128xf32>, vector<1x128xf32>, vector<1x128xf32>, vector<1x128xf32>, vector<1x128xf32>, vector<1x128xf32>, vector<1x128xf32>, vector<1x128xf32> -> vector<8x128xf32>
      %2562 = arith.mulf %2560, %2561 : vector<8x128xf32>
      %2563 = arith.index_cast %arg6 : i32 to index
      %c0_1000 = arith.constant 0 : index
      %c0_1001 = arith.constant 0 : index
      %2564 = vector.load %arg5[%2563, %c0_1000, %c0_1001] : memref<16x8x128xf32, #tpu.memory_space<vmem>>, vector<1x8x128xf32>
      %2565 = vector.shape_cast %2564 : vector<1x8x128xf32> to vector<8x128xf32>
      %2566 = vector.shape_cast %2562 : vector<8x128xf32> to vector<1x8x128xf32>
      tpu.vector_store %arg5[%2563, %c0_1000, %c0_1001], %2566 {strides = array<i32>} : memref<16x8x128xf32, #tpu.memory_space<vmem>>, vector<1x8x128xf32>,
    }
    %c16_i32_0 = arith.constant 16 : i32
    %c0 = arith.constant 0 : index
    %c0_1 = arith.constant 0 : index
    %c0_2 = arith.constant 0 : index
    %2 = vector.load %arg5[%c0, %c0_1, %c0_2] : memref<16x8x128xf32, #tpu.memory_space<vmem>>, vector<16x8x128xf32>
    %3 = vector.shape_cast %2 : vector<16x8x128xf32> to vector<128x128xf32>
    %cst = arith.constant 1.000000e+00 : f32
    %4 = vector.broadcast %cst : f32 to vector<1x128xf32>
    %cst_3 = arith.constant dense<0.000000e+00> : vector<1x128xf32>
    %5 = tpu.matmul %4, %3, %cst_3 {dimension_numbers = #tpu.dot_dimension_numbers<[1], [1], [0], [0], [0, 0, 1, 0], [], []>} : vector<1x128xf32>, vector<128x128xf32>, vector<1x128xf32> -> vector<1x128xf32>
    %6 = vector.shape_cast %5 : vector<1x128xf32> to vector<1x1x128xf32>
    %c0_4 = arith.constant 0 : index
    %c0_5 = arith.constant 0 : index
    %c0_6 = arith.constant 0 : index
    %7 = vector.load %arg4[%c0_4, %c0_5, %c0_6] : memref<1x1x128xf32, #tpu.memory_space<vmem>>, vector<1x1x128xf32>
    tpu.vector_store %arg4[%c0_4, %c0_5, %c0_6], %6 {strides = array<i32>} : memref<1x1x128xf32, #tpu.memory_space<vmem>>, vector<1x1x128xf32>,
    return
  }
  func.func @transform_0(%arg0: i32, %arg1: memref<2048xi32, #tpu.memory_space<smem>>, %arg2: memref<4096xi32, #tpu.memory_space<smem>>) -> (i32, i32, i32) {
    %c0_i32 = arith.constant 0 : i32
    %c0_i32_0 = arith.constant 0 : i32
    %c0_i32_1 = arith.constant 0 : i32
    %c0_i32_2 = arith.constant 0 : i32
    return %c0_i32, %c0_i32_0, %c0_i32_1 : i32, i32, i32
  }
  func.func @transform_1(%arg0: i32, %arg1: memref<2048xi32, #tpu.memory_space<smem>>, %arg2: memref<4096xi32, #tpu.memory_space<smem>>) -> (i32, i32, i32) {
    %c0_i32 = arith.constant 0 : i32
    %c0_i32_0 = arith.constant 0 : i32
    %c0_i32_1 = arith.constant 0 : i32
    return %arg0, %c0_i32, %c0_i32_0 : i32, i32, i32
  }
}

</mosaic_0001>

<bundles_post_ra>
// kernel: tpu_custom_call.1
= control target key start
LH: loop header
LB: loop body
LE: loop exit
PB: predicated region body
PF: predicated region fallthrough
CT: control target
= control target key end

     0   :  { %s3064_s18 = smov [#allocation4]   ;;  %s3065_s19 = smov [#allocation5]   ;;  %s5331_s0 = inlined_call_operand.hbm [shape: s32[2048], index: 0, kind: input, shape index: {}]   ;;  %s5332_s2 = inlined_call_operand.hbm [shape: f32[512,1,128], index: 2, kind: input, shape index: {}]   ;;  %s5333_s3 = inlined_call_operand.hbm [shape: f32[2,1,128], index: 3, kind: output, shape index: {}]   ;;  %s5334_s1 = inlined_call_operand.hbm [shape: s32[4096], index: 1, kind: input, shape index: {}]  }
   0x1   :  { %5518 = sst [smem:[#allocation326_spill]] %s5332_s2  ;;  %s9_s14 = sshll.u32 %s5331_s0, 4  ;;  %s10_s14 = int_to_ptr.hbm [resolvable:$true] %s9_s14 }
   0x2   :  { %5519 = sst [smem:[#allocation327_spill]] %s5333_s3  ;;  %s14_s17 = sshll.u32 %s5334_s1, 4  ;;  %s15_s17 = int_to_ptr.hbm [resolvable:$true] %s14_s17 }
   0x3   :  { %12 = dma.hbm_to_smem %s10_s14, 256, %s3064_s18, [#allocation3] }
   0x4   :  { %17 = dma.hbm_to_smem %s15_s17, 512, %s3065_s19, [#allocation3] }
   0x5   :  { %3034 = dma.done.wait [#allocation3], 768 }
   0x6   :  { %3035 = vsyncadd [#allocation3], 4294966528 }
   0x7   :  { %20 = sfence }
   0x8   :  { %21 = vsyncpa [#allocation7], 0 }
   0x9   :  { %22 = vsyncpa [#allocation8], 0 }
   0xa   :  { %24 = vsyncpa [#allocation8 + $0x1], 0  ;;  %s3096_s20 = smov 0   ;;  %s3098_s21 = smov 0  }
   0xb   :  { %s3100_s0 = smov 0   ;;  %s3102_s22 = smov 0  }
   0xc LB: > { %5520 = sst [smem:[#allocation13_spill]] %s3046_s20  ;;  %s3117_s1 = sadd.s32 4294967295, %s3058_s22   ;;  %s3058_s22 = sphi %s3102_s22, %s6400_s22   ;;  %s3054_s0 = sphi %s3100_s0, %s6403_s0   ;;  %s3050_s21 = sphi %s3098_s21, %s6402_s21   ;;  %s3046_s20 = sphi %s3096_s20, %s6401_s20  }
   0xd   : > { %5521 = sst [smem:[#allocation14_spill]] %s3050_s21  ;;  %s2816_s23 = sadd.s32 4294967294, %s3058_s22  }
   0xe   : > { %5522 = sst [smem:[#allocation15_spill]] %s3054_s0  ;;  %s3121_s24 = sadd.s32 1, %s3058_s22  }
   0xf   : > { %5523 = sst [smem:[#allocation16_spill]] %s3058_s22  ;;  %s58_s25 = sadd.s32 1, %s3054_s0 }
  0x10   : > { %5524 = sst [smem:[#allocation17_spill]] %s3117_s1  ;;  %s55_s26 = ssub.s32 %s3058_s22, %s3121_s24 }
  0x11   : > { %5525 = sst [smem:[#allocation18_spill]] %s3121_s24  ;;  %p68_p0 = scmp.ne.s32.totalorder %s3054_s0, %s3050_s21 }
  0x12   : > { %p56_p1 = scmp.eq.s32.totalorder %s55_s26, 0  ;;  %p69_p2 = scmp.eq.s32.totalorder %s3117_s1, 1 }
  0x13   : > { %p74_p3 = scmp.ne.s32.totalorder %s3050_s21, %s3046_s20  ;;  %p75_p4 = scmp.eq.s32.totalorder %s2816_s23, 1 }
  0x14   : > { %s3132_s27 = scalar_select %p56_p1, %s3054_s0, %s58_s25  }
  0x15   : > { %p3134_p5 = por %p69_p2, %p68_p0  ;;  %p3138_p6 = por %p75_p4, %p74_p3 }
  0x16   : > { %5526 = sst [smem:[#allocation19_spill]] %s3132_s27  ;;  %p2817_p7 = scmp.ge.s32.totalorder %s3058_s22, 1 }
  0x17   : > { %s5527_s28 = scalar_select %p3134_p5, 1, 0 }
  0x18   : > { %s5529_s29 = scalar_select %p3138_p6, 1, 0 }
  0x19   : > { %5528 = sst [smem:[#allocation20_spill]] %s5527_s28  ;;  %p82_p8 = scmp.lt.s32.totalorder %s3058_s22, 3 }
  0x1a   : > { %5530 = sst [smem:[#allocation21_spill]] %s5529_s29  ;;  %p2883_p9 = scmp.eq.s32.totalorder %s3117_s1, 0 }
  0x1b   : > { %p83_p10 = pnand %p2817_p7, %p82_p8  ;;  %s5531_s2 = sld [smem:[#allocation326_spill]] }
  0x1c   : > { %s3066_s6 = smov [#allocation6]   ;;  %s3067_s8 = smov 16  }
  0x1d   : > { %p2875_p11 = pneg %p83_p10  ;;  %s95_s7 = sshll.u32 %s3066_s6, 4  ;;  %s96_s7 = int_to_ptr.vmem [resolvable:$true] %s95_s7 }
  0x1e   : > { %s3068_s9 = smov 1   ;;  %111 = sbr.rel (%p83_p10) target bundleno = 1491 (0x5d3), region = 24 }
  0x1f   : > { %p2876_p12 = pnand %p2883_p9, %p2875_p11 }
  0x21   : > { %s93_s5 = sshll.u32 %s5531_s2, 4  ;;  %s94_s5 = int_to_ptr.hbm [resolvable:$true] %s93_s5 }
  0x22   : > { %2878 = dma.hbm_to_vmem [thread:$0]  (!%p2876_p12), %s94_s5, 8192, %s96_s7, [#allocation7], %s3067_s8, %s3067_s8, %s3068_s9  }
  0x23   : > { %3037 = dma.done.wait (%p2883_p9), [#allocation7], 8192  }
  0x24   : > { %3039 = vsyncadd (%p2883_p9), [#allocation7], 4294959104  ;;  %s5335_s10 = sand.u32 1, %s3050_s21   ;;  %s3160_s13 = smov 0  }
  0x25   : > { %s3158_s12 = scalar_lea.vmem [#allocation9], %s5335_s10 }
  0x26   : > { %5532 = sst [smem:[#allocation22_spill]] %s3158_s12 }
  0x27 LB: >> { %s5533_s1 = sld [smem:[#allocation17_spill]]  ;;  %s5336_s14 = sshll.u32 %s3062_s13, 3  ;;  %vm2467_vm0 = vcmask 1040384   ;;  %vm2469_vm1 = vcmask 1041408   ;;  %vm2471_vm2 = vcmask 1042432   ;;  %vm2473_vm3 = vcmask 1043456   ;;  %s3062_s13 = sphi %s3160_s13, %s132_s13  }
  0x28   : >> { %5534 = sst [smem:[#allocation23_spill]] %s3062_s13  ;;  %vm2475_vm4 = vcmask 1044480   ;;  %vm2477_vm5 = vcmask 1045504   ;;  %vm2479_vm6 = vcmask 1046528  }
  0x2d   : >> { %s5535_s11 = sshll.u32 %s5533_s1, 7 }
  0x2e   : >> { %s134_s15 = sadd.s32 %s5336_s14, %s5535_s11 }
  0x2f   : >> { %s3170_s16 = sshll.u32 %s134_s15, 3  ;;  %s3180_s8 = sshll.u32 %s134_s15, 4 }
  0x30   : >> { %s136_s17 = sld [smem:[#allocation4 + %s3170_s16]]  ;;  %s147_s18 = sadd.s32 1, %s3170_s16 }
  0x31   : >> { %s148_s19 = sld [smem:[#allocation4 + %s147_s18]]  ;;  %s159_s23 = sadd.s32 2, %s3170_s16 }
  0x32   : >> { %s160_s25 = sld [smem:[#allocation4 + %s159_s23]]  ;;  %s171_s26 = sadd.s32 3, %s3170_s16 }
  0x33   : >> { %s172_s30 = sld [smem:[#allocation4 + %s171_s26]]  ;;  %s183_s4 = sadd.s32 4, %s3170_s16 }
  0x34   : >> { %s184_s5 = sld [smem:[#allocation4 + %s183_s4]]  ;;  %s195_s6 = sadd.s32 5, %s3170_s16 }
  0x35   : >> { %s3178_s7 = sld [smem:[#allocation4 + %s195_s6]]  ;;  %s207_s18 = sadd.s32 6, %s3170_s16 }
  0x36   : >> { %p137_p13 = scmp.lt.s32.totalorder %s136_s17, 511  ;;  %p141_p0 = scmp.gt.s32.totalorder %s136_s17, 0 }
  0x37   : >> { %p149_p1 = scmp.lt.s32.totalorder %s148_s19, 511  ;;  %p153_p2 = scmp.gt.s32.totalorder %s148_s19, 0 }
  0x38   : >> { %s6405_s17 = smov (!%p137_p13, %s136_s17), 511  ;;  %p161_p3 = scmp.lt.s32.totalorder %s160_s25, 511 }
  0x39   : >> { %5536 = sst [smem:[#allocation24_spill]] %s6405_s17  ;;  %p165_p4 = scmp.gt.s32.totalorder %s160_s25, 0 }
  0x3a   : >> { %s3184_s9 = scalar_select %p141_p0, 1, 0 }
  0x3b   : >> { %s6407_s19 = smov (!%p149_p1, %s148_s19), 511  ;;  %p173_p7 = scmp.lt.s32.totalorder %s172_s30, 511 }
  0x3c   : >> { %5537 = sst [smem:[#allocation25_spill]] %s3184_s9  ;;  %p177_p8 = scmp.gt.s32.totalorder %s172_s30, 0 }
  0x3d   : >> { %5538 = sst [smem:[#allocation26_spill]] %s6407_s19  ;;  %s6409_s25 = smov (!%p161_p3, %s160_s25), 511 }
  0x3e   : >> { %s3189_s23 = scalar_select %p153_p2, 1, 0 }
  0x3f   : >> { %5540 = sst [smem:[#allocation28_spill]] %s6409_s25  ;;  %p185_p9 = scmp.lt.s32.totalorder %s184_s5, 511 }
  0x40   : >> { %5539 = sst [smem:[#allocation27_spill]] %s3189_s23  ;;  %p189_p10 = scmp.gt.s32.totalorder %s184_s5, 0 }
  0x41   : >> { %s3194_s26 = scalar_select %p165_p4, 1, 0 }
  0x42   : >> { %s6411_s30 = smov (!%p173_p7, %s172_s30), 511  ;;  %p197_p11 = scmp.lt.s32.totalorder %s3178_s7, 511 }
  0x43   : >> { %5541 = sst [smem:[#allocation29_spill]] %s3194_s26  ;;  %p201_p12 = scmp.gt.s32.totalorder %s3178_s7, 0 }
  0x44   : >> { %5542 = sst [smem:[#allocation30_spill]] %s6411_s30  ;;  %s6413_s5 = smov (!%p185_p9, %s184_s5), 511 }
  0x45   : >> { %s3199_s6 = scalar_select %p177_p8, 1, 0 }
  0x46   : >> { %5544 = sst [smem:[#allocation32_spill]] %s6413_s5  ;;  %s219_s15 = sadd.s32 7, %s3170_s16 }
  0x47   : >> { %5543 = sst [smem:[#allocation31_spill]] %s3199_s6  ;;  %s6415_s7 = smov (!%p197_p11, %s3178_s7), 511 }
  0x48   : >> { %s3206_s10 = scalar_select %p189_p10, 1, 0 }
  0x49   : >> { %s208_s4 = sld [smem:[#allocation4 + %s207_s18]]  ;;  %s243_s29 = sadd.s32 1, %s3180_s8 }
  0x4a   : >> { %5545 = sst [smem:[#allocation33_spill]] %s3206_s10  ;;  %s255_s18 = sadd.s32 2, %s3180_s8 }
  0x4b   : >> { %5546 = sst [smem:[#allocation34_spill]] %s6415_s7  ;;  %s267_s28 = sadd.s32 3, %s3180_s8 }
  0x4c   : >> { %s3213_s2 = scalar_select %p201_p12, 1, 0 }
  0x4d   : >> { %s220_s0 = sld [smem:[#allocation4 + %s219_s15]]  ;;  %s279_s21 = sadd.s32 4, %s3180_s8 }
  0x4e   : >> { %5547 = sst [smem:[#allocation35_spill]] %s3213_s2  ;;  %s291_s1 = sadd.s32 5, %s3180_s8 }
  0x4f   : >> { %s232_s11 = sld [smem:[#allocation5 + %s3180_s8]]  ;;  %p209_p13 = scmp.lt.s32.totalorder %s208_s4, 511 }
  0x50   : >> { %p213_p0 = scmp.gt.s32.totalorder %s208_s4, 0  ;;  %s244_s22 = sld [smem:[#allocation5 + %s243_s29]] }
  0x51   : >> { %s6417_s4 = smov (!%p209_p13, %s208_s4), 511  ;;  %s256_s3 = sld [smem:[#allocation5 + %s255_s18]] }
  0x52   : >> { %5548 = sst [smem:[#allocation36_spill]] %s6417_s4  ;;  %s303_s2 = sadd.s32 6, %s3180_s8 }
  0x53   : >> { %s3221_s20 = scalar_select %p213_p0, 1, 0 }
  0x54   : >> { %p221_p1 = scmp.lt.s32.totalorder %s220_s0, 511  ;;  %p225_p2 = scmp.gt.s32.totalorder %s220_s0, 0 }
  0x55   : >> { %5549 = sst [smem:[#allocation37_spill]] %s3221_s20  ;;  %p233_p3 = scmp.lt.s32.totalorder %s232_s11, 511 }
  0x56   : >> { %s6419_s0 = smov (!%p221_p1, %s220_s0), 511  ;;  %p237_p4 = scmp.gt.s32.totalorder %s232_s11, 0 }
  0x57   : >> { %5550 = sst [smem:[#allocation38_spill]] %s6419_s0  ;;  %s6421_s11 = smov (!%p233_p3, %s232_s11), 511 }
  0x58   : >> { %s3226_s27 = scalar_select %p225_p2, 1, 0 }
  0x59   : >> { %s3231_s24 = scalar_select %p237_p4, 1, 0 }
  0x5a   : >> { %5551 = sst [smem:[#allocation39_spill]] %s3226_s27  ;;  %p245_p7 = scmp.lt.s32.totalorder %s244_s22, 511 }
  0x5b   : >> { %s268_s12 = sld [smem:[#allocation5 + %s267_s28]]  ;;  %p249_p8 = scmp.gt.s32.totalorder %s244_s22, 0 }
  0x5c   : >> { %s280_s0 = sld [smem:[#allocation5 + %s279_s21]]  ;;  %p257_p9 = scmp.lt.s32.totalorder %s256_s3, 511 }
  0x5d   : >> { %s292_s4 = sld [smem:[#allocation5 + %s291_s1]]  ;;  %p261_p10 = scmp.gt.s32.totalorder %s256_s3, 0 }
  0x5e   : >> { %s6423_s22 = smov (!%p245_p7, %s244_s22), 511  ;;  %s315_s29 = sadd.s32 7, %s3180_s8 }
  0x5f   : >> { %s3241_s15 = scalar_select %p249_p8, 1, 0 }
  0x60   : >> { %s6425_s3 = smov (!%p257_p9, %s256_s3), 511  ;;  %s304_s27 = sld [smem:[#allocation5 + %s303_s2]] }
  0x61   : >> { %p269_p11 = scmp.lt.s32.totalorder %s268_s12, 511  ;;  %p273_p12 = scmp.gt.s32.totalorder %s268_s12, 0 }
  0x62   : >> { %s3246_s28 = scalar_select %p261_p10, 1, 0 }
  0x63   : >> { %p281_p13 = scmp.lt.s32.totalorder %s280_s0, 511  ;;  %p285_p0 = scmp.gt.s32.totalorder %s280_s0, 0 }
  0x64   : >> { %s6427_s12 = smov (!%p269_p11, %s268_s12), 511  ;;  %p293_p1 = scmp.lt.s32.totalorder %s292_s4, 511 }
  0x65   : >> { %s3251_s1 = scalar_select %p273_p12, 1, 0 }
  0x66   : >> { %p297_p2 = scmp.gt.s32.totalorder %s292_s4, 0  ;;  %s6429_s0 = smov (!%p281_p13, %s280_s0), 511 }
  0x67   : >> { %s3256_s14 = scalar_select %p285_p0, 1, 0 }
  0x68   : >> { %s316_s21 = sld [smem:[#allocation5 + %s315_s29]]  ;;  %s6431_s4 = smov (!%p293_p1, %s292_s4), 511 }
  0x69   : >> { %5552 = sst [smem:[#allocation40_spill]] %s6431_s4  ;;  %s327_s10 = sadd.s32 8, %s3180_s8 }
  0x6a   : >> { %s3261_s20 = scalar_select %p297_p2, 1, 0 }
  0x6b   : >> { %s328_s5 = sld [smem:[#allocation5 + %s327_s10]]  ;;  %p305_p3 = scmp.lt.s32.totalorder %s304_s27, 511 }
  0x6c   : >> { %5553 = sst [smem:[#allocation41_spill]] %s3261_s20  ;;  %p309_p4 = scmp.gt.s32.totalorder %s304_s27, 0 }
  0x6d   : >> { %s6433_s27 = smov (!%p305_p3, %s304_s27), 511  ;;  %s339_s29 = sadd.s32 9, %s3180_s8 }
  0x6e   : >> { %p317_p7 = scmp.lt.s32.totalorder %s316_s21, 511  ;;  %p321_p8 = scmp.gt.s32.totalorder %s316_s21, 0 }
  0x6f   : >> { %5554 = sst [smem:[#allocation42_spill]] %s6433_s27  ;;  %s351_s26 = sadd.s32 10, %s3180_s8 }
  0x70   : >> { %s3267_s13 = scalar_select %p309_p4, 1, 0 }
  0x71   : >> { %p329_p9 = scmp.lt.s32.totalorder %s328_s5, 511  ;;  %s6435_s21 = smov (!%p317_p7, %s316_s21), 511 }
  0x72   : >> { %5555 = sst [smem:[#allocation43_spill]] %s3267_s13  ;;  %p333_p10 = scmp.gt.s32.totalorder %s328_s5, 0 }
  0x73   : >> { %5556 = sst [smem:[#allocation44_spill]] %s6435_s21  ;;  %s6437_s5 = smov (!%p329_p9, %s328_s5), 511 }
  0x74   : >> { %s3273_s7 = scalar_select %p321_p8, 1, 0 }
  0x75   : >> { %s340_s18 = sld [smem:[#allocation5 + %s339_s29]]  ;;  %s363_s23 = sadd.s32 11, %s3180_s8 }
  0x76   : >> { %5557 = sst [smem:[#allocation45_spill]] %s3273_s7  ;;  %s375_s19 = sadd.s32 12, %s3180_s8 }
  0x77   : >> { %5558 = sst [smem:[#allocation46_spill]] %s6437_s5  ;;  %s387_s29 = sadd.s32 13, %s3180_s8 }
  0x78   : >> { %s3278_s6 = scalar_select %p333_p10, 1, 0 }
  0x79   : >> { %s352_s2 = sld [smem:[#allocation5 + %s351_s26]]  ;;  %s399_s5 = sadd.s32 14, %s3180_s8 }
  0x7a   : >> { %5559 = sst [smem:[#allocation47_spill]] %s3278_s6  ;;  %s411_s7 = sadd.s32 15, %s3180_s8 }
  0x7b   : >> { %p341_p11 = scmp.lt.s32.totalorder %s340_s18, 511  ;;  %p345_p12 = scmp.gt.s32.totalorder %s340_s18, 0 }
  0x7c   : >> { %s364_s21 = sld [smem:[#allocation5 + %s363_s23]]  ;;  %s3303_s17 = sadd.s32 8, %s3170_s16 }
  0x7d   : >> { %s6439_s18 = smov (!%p341_p11, %s340_s18), 511  ;;  %s388_s6 = sld [smem:[#allocation5 + %s387_s29]] }
  0x7e   : >> { %5560 = sst [smem:[#allocation48_spill]] %s6439_s18  ;;  %s436_s13 = sadd.s32 1, %s3303_s17 }
  0x7f   : >> { %s3287_s10 = scalar_select %p345_p12, 1, 0 }
  0x80   : >> { %p353_p13 = scmp.lt.s32.totalorder %s352_s2, 511  ;;  %p357_p0 = scmp.gt.s32.totalorder %s352_s2, 0 }
  0x81   : >> { %5561 = sst [smem:[#allocation49_spill]] %s3287_s10  ;;  %s448_s29 = sadd.s32 2, %s3303_s17 }
  0x82   : >> { %s6441_s2 = smov (!%p353_p13, %s352_s2), 511  ;;  %p365_p1 = scmp.lt.s32.totalorder %s364_s21, 511 }
  0x83   : >> { %5562 = sst [smem:[#allocation50_spill]] %s6441_s2  ;;  %p369_p2 = scmp.gt.s32.totalorder %s364_s21, 0 }
  0x84   : >> { %s3292_s26 = scalar_select %p357_p0, 1, 0 }
  0x85   : >> { %s6443_s21 = smov (!%p365_p1, %s364_s21), 511  ;;  %s376_s18 = sld [smem:[#allocation5 + %s375_s19]] }
  0x86   : >> { %5563 = sst [smem:[#allocation51_spill]] %s3292_s26  ;;  %p389_p7 = scmp.lt.s32.totalorder %s388_s6, 511 }
  0x87   : >> { %5564 = sst [smem:[#allocation52_spill]] %s6443_s21  ;;  %p393_p8 = scmp.gt.s32.totalorder %s388_s6, 0 }
  0x88   : >> { %s3297_s23 = scalar_select %p369_p2, 1, 0 }
  0x89   : >> { %s400_s9 = sld [smem:[#allocation5 + %s399_s5]]  ;;  %s6447_s6 = smov (!%p389_p7, %s388_s6), 511 }
  0x8a   : >> { %5565 = sst [smem:[#allocation53_spill]] %s3297_s23  ;;  %s460_s21 = sadd.s32 3, %s3303_s17 }
  0x8b   : >> { %s412_s25 = sld [smem:[#allocation5 + %s411_s7]]  ;;  %p377_p3 = scmp.lt.s32.totalorder %s376_s18, 511 }
  0x8c   : >> { %s425_s10 = sld [smem:[#allocation4 + %s3303_s17]]  ;;  %p381_p4 = scmp.gt.s32.totalorder %s376_s18, 0 }
  0x8d   : >> { %s6445_s18 = smov (!%p377_p3, %s376_s18), 511  ;;  %5568 = sst [smem:[#allocation56_spill]] %s6447_s6 }
  0x8e   : >> { %5566 = sst [smem:[#allocation54_spill]] %s6445_s18 }
  0x8f   : >> { %s3310_s19 = scalar_select %p381_p4, 1, 0 }
  0x90   : >> { %p401_p9 = scmp.lt.s32.totalorder %s400_s9, 511  ;;  %p405_p10 = scmp.gt.s32.totalorder %s400_s9, 0 }
  0x91   : >> { %5567 = sst [smem:[#allocation55_spill]] %s3310_s19  ;;  %p413_p11 = scmp.lt.s32.totalorder %s412_s25, 511 }
  0x92   : >> { %s3315_s5 = scalar_select %p393_p8, 1, 0 }
  0x93   : >> { %p417_p12 = scmp.gt.s32.totalorder %s412_s25, 0  ;;  %s6449_s9 = smov (!%p401_p9, %s400_s9), 511 }
  0x94   : >> { %5569 = sst [smem:[#allocation57_spill]] %s3315_s5  ;;  %p426_p13 = scmp.lt.s32.totalorder %s425_s10, 511 }
  0x95   : >> { %5570 = sst [smem:[#allocation58_spill]] %s6449_s9  ;;  %p430_p0 = scmp.gt.s32.totalorder %s425_s10, 0 }
  0x96   : >> { %s3320_s2 = scalar_select %p405_p10, 1, 0 }
  0x97   : >> { %s6451_s25 = smov (!%p413_p11, %s412_s25), 511  ;;  %s437_s23 = sld [smem:[#allocation4 + %s436_s13]] }
  0x98   : >> { %5571 = sst [smem:[#allocation59_spill]] %s3320_s2  ;;  %s6453_s10 = smov (!%p426_p13, %s425_s10), 511 }
  0x99   : >> { %5572 = sst [smem:[#allocation60_spill]] %s6451_s25  ;;  %s484_s2 = sadd.s32 5, %s3303_s17 }
  0x9a   : >> { %s3325_s18 = scalar_select %p417_p12, 1, 0 }
  0x9b   : >> { %s449_s7 = sld [smem:[#allocation4 + %s448_s29]]  ;;  %s472_s29 = sadd.s32 4, %s3303_s17 }
  0x9c   : >> { %5573 = sst [smem:[#allocation61_spill]] %s3325_s18 }
  0x9d   : >> { %5574 = sst [smem:[#allocation62_spill]] %s6453_s10  ;;  %p438_p1 = scmp.lt.s32.totalorder %s437_s23, 511 }
  0x9e   : >> { %s3330_s19 = scalar_select %p430_p0, 1, 0 }
  0x9f   : >> { %s461_s26 = sld [smem:[#allocation4 + %s460_s21]]  ;;  %p442_p2 = scmp.gt.s32.totalorder %s437_s23, 0 }
  0xa0   : >> { %5575 = sst [smem:[#allocation63_spill]] %s3330_s19  ;;  %s6455_s23 = smov (!%p438_p1, %s437_s23), 511 }
  0xa1   : >> { %p450_p3 = scmp.lt.s32.totalorder %s449_s7, 511  ;;  %p454_p4 = scmp.gt.s32.totalorder %s449_s7, 0 }
  0xa2   : >> { %5576 = sst [smem:[#allocation64_spill]] %s6455_s23  ;;  %s496_s23 = sadd.s32 6, %s3303_s17 }
  0xa3   : >> { %s3336_s6 = scalar_select %p442_p2, 1, 0 }
  0xa4   : >> { %s6457_s7 = smov (!%p450_p3, %s449_s7), 511  ;;  %s473_s30 = sld [smem:[#allocation4 + %s472_s29]] }
  0xa5   : >> { %5577 = sst [smem:[#allocation65_spill]] %s3336_s6  ;;  %p462_p7 = scmp.lt.s32.totalorder %s461_s26, 511 }
  0xa6   : >> { %5578 = sst [smem:[#allocation66_spill]] %s6457_s7  ;;  %p466_p8 = scmp.gt.s32.totalorder %s461_s26, 0 }
  0xa7   : >> { %s3342_s9 = scalar_select %p454_p4, 1, 0 }
  0xa8   : >> { %s6459_s26 = smov (!%p462_p7, %s461_s26), 511  ;;  %s485_s13 = sld [smem:[#allocation4 + %s484_s2]] }
  0xa9   : >> { %5579 = sst [smem:[#allocation67_spill]] %s3342_s9  ;;  %s508_s19 = sadd.s32 7, %s3303_s17 }
  0xaa   : >> { %5580 = sst [smem:[#allocation68_spill]] %s6459_s26  ;;  %p474_p9 = scmp.lt.s32.totalorder %s473_s30, 511 }
  0xab   : >> { %s3347_s25 = scalar_select %p466_p8, 1, 0 }
  0xac   : >> { %p478_p10 = scmp.gt.s32.totalorder %s473_s30, 0  ;;  %s497_s7 = sld [smem:[#allocation4 + %s496_s23]] }
  0xad   : >> { %5581 = sst [smem:[#allocation69_spill]] %s3347_s25  ;;  %s6461_s30 = smov (!%p474_p9, %s473_s30), 511 }
  0xae   : >> { %5582 = sst [smem:[#allocation70_spill]] %s6461_s30  ;;  %p486_p11 = scmp.lt.s32.totalorder %s485_s13, 511 }
  0xaf   : >> { %s3356_s21 = scalar_select %p478_p10, 1, 0 }
  0xb0   : >> { %s3359_s29 = sadd.s32 16, %s3180_s8  ;;  %p490_p12 = scmp.gt.s32.totalorder %s485_s13, 0 }
  0xb1   : >> { %5583 = sst [smem:[#allocation71_spill]] %s3356_s21  ;;  %s6463_s13 = smov (!%p486_p11, %s485_s13), 511 }
  0xb2   : >> { %5584 = sst [smem:[#allocation72_spill]] %s6463_s13  ;;  %p498_p13 = scmp.lt.s32.totalorder %s497_s7, 511 }
  0xb3   : >> { %s3363_s2 = scalar_select %p490_p12, 1, 0 }
  0xb4   : >> { %p502_p0 = scmp.gt.s32.totalorder %s497_s7, 0  ;;  %s6465_s7 = smov (!%p498_p13, %s497_s7), 511 }
  0xb5   : >> { %5585 = sst [smem:[#allocation73_spill]] %s3363_s2  ;;  %s532_s25 = sadd.s32 1, %s3359_s29 }
  0xb6   : >> { %5586 = sst [smem:[#allocation74_spill]] %s6465_s7  ;;  %s544_s26 = sadd.s32 2, %s3359_s29 }
  0xb7   : >> { %s3368_s23 = scalar_select %p502_p0, 1, 0 }
  0xb8   : >> { %s509_s18 = sld [smem:[#allocation4 + %s508_s19]]  ;;  %s556_s13 = sadd.s32 3, %s3359_s29 }
  0xb9   : >> { %5587 = sst [smem:[#allocation75_spill]] %s3368_s23  ;;  %s568_s20 = sadd.s32 4, %s3359_s29 }
  0xba   : >> { %s521_s30 = sld [smem:[#allocation5 + %s3359_s29]]  ;;  %s580_s19 = sadd.s32 5, %s3359_s29 }
  0xbb   : >> { %s533_s9 = sld [smem:[#allocation5 + %s532_s25]]  ;;  %s592_s2 = sadd.s32 6, %s3359_s29 }
  0xbc   : >> { %s545_s10 = sld [smem:[#allocation5 + %s544_s26]]  ;;  %s700_s4 = sadd.s32 15, %s3359_s29 }
  0xbd   : >> { %s557_s27 = sld [smem:[#allocation5 + %s556_s13]] }
  0xbe   : >> { %p510_p1 = scmp.lt.s32.totalorder %s509_s18, 511  ;;  %p514_p2 = scmp.gt.s32.totalorder %s509_s18, 0 }
  0xbf   : >> { %s569_s23 = sld [smem:[#allocation5 + %s568_s20]] }
  0xc0   : >> { %p522_p3 = scmp.lt.s32.totalorder %s521_s30, 511  ;;  %p526_p4 = scmp.gt.s32.totalorder %s521_s30, 0 }
  0xc1   : >> { %s6467_s18 = smov (!%p510_p1, %s509_s18), 511  ;;  %p534_p7 = scmp.lt.s32.totalorder %s533_s9, 511 }
  0xc2   : >> { %5588 = sst [smem:[#allocation76_spill]] %s6467_s18  ;;  %p538_p8 = scmp.gt.s32.totalorder %s533_s9, 0 }
  0xc3   : >> { %s3379_s17 = scalar_select %p514_p2, 1, 0 }
  0xc4   : >> { %s6469_s30 = smov (!%p522_p3, %s521_s30), 511  ;;  %p546_p9 = scmp.lt.s32.totalorder %s545_s10, 511 }
  0xc5   : >> { %5589 = sst [smem:[#allocation77_spill]] %s3379_s17  ;;  %p550_p10 = scmp.gt.s32.totalorder %s545_s10, 0 }
  0xc6   : >> { %5590 = sst [smem:[#allocation78_spill]] %s6469_s30  ;;  %s6471_s9 = smov (!%p534_p7, %s533_s9), 511 }
  0xc7   : >> { %s3384_s25 = scalar_select %p526_p4, 1, 0 }
  0xc8   : >> { %5592 = sst [smem:[#allocation80_spill]] %s6471_s9  ;;  %p558_p11 = scmp.lt.s32.totalorder %s557_s27, 511 }
  0xc9   : >> { %5591 = sst [smem:[#allocation79_spill]] %s3384_s25  ;;  %p562_p12 = scmp.gt.s32.totalorder %s557_s27, 0 }
  0xca   : >> { %s3389_s13 = scalar_select %p538_p8, 1, 0 }
  0xcb   : >> { %s6473_s10 = smov (!%p546_p9, %s545_s10), 511  ;;  %s581_s26 = sld [smem:[#allocation5 + %s580_s19]] }
  0xcc   : >> { %5593 = sst [smem:[#allocation81_spill]] %s3389_s13  ;;  %s6475_s27 = smov (!%p558_p11, %s557_s27), 511 }
  0xcd   : >> { %5594 = sst [smem:[#allocation82_spill]] %s6473_s10  ;;  %p570_p13 = scmp.lt.s32.totalorder %s569_s23, 511 }
  0xce   : >> { %s3394_s5 = scalar_select %p550_p10, 1, 0 }
  0xcf   : >> { %5596 = sst [smem:[#allocation84_spill]] %s6475_s27  ;;  %p574_p0 = scmp.gt.s32.totalorder %s569_s23, 0 }
  0xd0   : >> { %5595 = sst [smem:[#allocation83_spill]] %s3394_s5  ;;  %s6477_s23 = smov (!%p570_p13, %s569_s23), 511 }
  0xd1   : >> { %s3399_s17 = scalar_select %p562_p12, 1, 0 }
  0xd2   : >> { %s593_s21 = sld [smem:[#allocation5 + %s592_s2]]  ;;  %p582_p1 = scmp.lt.s32.totalorder %s581_s26, 511 }
  0xd3   : >> { %5597 = sst [smem:[#allocation85_spill]] %s3399_s17  ;;  %p586_p2 = scmp.gt.s32.totalorder %s581_s26, 0 }
  0xd4   : >> { %5598 = sst [smem:[#allocation86_spill]] %s6477_s23  ;;  %s604_s19 = sadd.s32 7, %s3359_s29 }
  0xd5   : >> { %s3405_s18 = scalar_select %p574_p0, 1, 0 }
  0xd6   : >> { %s6479_s26 = smov (!%p582_p1, %s581_s26), 511  ;;  %s605_s6 = sld [smem:[#allocation5 + %s604_s19]] }
  0xd7   : >> { %5599 = sst [smem:[#allocation87_spill]] %s3405_s18  ;;  %s616_s5 = sadd.s32 8, %s3359_s29 }
  0xd8   : >> { %p594_p3 = scmp.lt.s32.totalorder %s593_s21, 511  ;;  %5600 = sst [smem:[#allocation88_spill]] %s6479_s26 }
  0xd9   : >> { %s3411_s7 = scalar_select %p586_p2, 1, 0 }
  0xda   : >> { %p598_p4 = scmp.gt.s32.totalorder %s593_s21, 0  ;;  %s6481_s21 = smov (!%p594_p3, %s593_s21), 511 }
  0xdb   : >> { %5601 = sst [smem:[#allocation89_spill]] %s3411_s7  ;;  %s628_s10 = sadd.s32 9, %s3359_s29 }
  0xdc   : >> { %5602 = sst [smem:[#allocation90_spill]] %s6481_s21  ;;  %p606_p7 = scmp.lt.s32.totalorder %s605_s6, 511 }
  0xdd   : >> { %s3416_s23 = scalar_select %p598_p4, 1, 0 }
  0xde   : >> { %s617_s20 = sld [smem:[#allocation5 + %s616_s5]]  ;;  %p610_p8 = scmp.gt.s32.totalorder %s605_s6, 0 }
  0xdf   : >> { %5603 = sst [smem:[#allocation91_spill]] %s3416_s23  ;;  %s640_s13 = sadd.s32 10, %s3359_s29 }
  0xe0   : >> { %s629_s26 = sld [smem:[#allocation5 + %s628_s10]]  ;;  %s6483_s6 = smov (!%p606_p7, %s605_s6), 511 }
  0xe1   : >> { %5604 = sst [smem:[#allocation92_spill]] %s6483_s6  ;;  %s652_s19 = sadd.s32 11, %s3359_s29 }
  0xe2   : >> { %s3425_s2 = scalar_select %p610_p8, 1, 0 }
  0xe3   : >> { %s641_s6 = sld [smem:[#allocation5 + %s640_s13]]  ;;  %s664_s21 = sadd.s32 12, %s3359_s29 }
  0xe4   : >> { %5605 = sst [smem:[#allocation93_spill]] %s3425_s2  ;;  %p618_p9 = scmp.lt.s32.totalorder %s617_s20, 511 }
  0xe5   : >> { %p622_p10 = scmp.gt.s32.totalorder %s617_s20, 0  ;;  %s653_s23 = sld [smem:[#allocation5 + %s652_s19]] }
  0xe6   : >> { %s6485_s20 = smov (!%p618_p9, %s617_s20), 511  ;;  %p630_p11 = scmp.lt.s32.totalorder %s629_s26, 511 }
  0xe7   : >> { %5606 = sst [smem:[#allocation94_spill]] %s6485_s20  ;;  %p634_p12 = scmp.gt.s32.totalorder %s629_s26, 0 }
  0xe8   : >> { %s3430_s5 = scalar_select %p622_p10, 1, 0 }
  0xe9   : >> { %s6487_s26 = smov (!%p630_p11, %s629_s26), 511  ;;  %s676_s7 = sadd.s32 13, %s3359_s29 }
  0xea   : >> { %5607 = sst [smem:[#allocation95_spill]] %s3430_s5  ;;  %s688_s20 = sadd.s32 14, %s3359_s29 }
  0xeb   : >> { %5608 = sst [smem:[#allocation96_spill]] %s6487_s26  ;;  %p642_p13 = scmp.lt.s32.totalorder %s641_s6, 511 }
  0xec   : >> { %s3435_s10 = scalar_select %p634_p12, 1, 0 }
  0xed   : >> { %s665_s18 = sld [smem:[#allocation5 + %s664_s21]]  ;;  %p646_p0 = scmp.gt.s32.totalorder %s641_s6, 0 }
  0xee   : >> { %5609 = sst [smem:[#allocation97_spill]] %s3435_s10  ;;  %p654_p1 = scmp.lt.s32.totalorder %s653_s23, 511 }
  0xef   : >> { %s677_s25 = sld [smem:[#allocation5 + %s676_s7]]  ;;  %p658_p2 = scmp.gt.s32.totalorder %s653_s23, 0 }
  0xf0   : >> { %s689_s30 = sld [smem:[#allocation5 + %s688_s20]]  ;;  %s6489_s6 = smov (!%p642_p13, %s641_s6), 511 }
  0xf1   : >> { %5610 = sst [smem:[#allocation98_spill]] %s6489_s6  ;;  %s3448_s13 = sadd.s32 16, %s3170_s16 }
  0xf2   : >> { %s3445_s17 = scalar_select %p646_p0, 1, 0 }
  0xf3   : >> { %p666_p3 = scmp.lt.s32.totalorder %s665_s18, 511  ;;  %p670_p4 = scmp.gt.s32.totalorder %s665_s18, 0 }
  0xf4   : >> { %5611 = sst [smem:[#allocation99_spill]] %s3445_s17  ;;  %s6491_s23 = smov (!%p654_p1, %s653_s23), 511 }
  0xf5   : >> { %5612 = sst [smem:[#allocation100_spill]] %s6491_s23  ;;  %p678_p7 = scmp.lt.s32.totalorder %s677_s25, 511 }
  0xf6   : >> { %s3452_s21 = scalar_select %p658_p2, 1, 0 }
  0xf7   : >> { %p682_p8 = scmp.gt.s32.totalorder %s677_s25, 0  ;;  %s6493_s18 = smov (!%p666_p3, %s665_s18), 511 }
  0xf8   : >> { %5613 = sst [smem:[#allocation101_spill]] %s3452_s21  ;;  %p690_p9 = scmp.lt.s32.totalorder %s689_s30, 511 }
  0xf9   : >> { %5614 = sst [smem:[#allocation102_spill]] %s6493_s18  ;;  %p694_p10 = scmp.gt.s32.totalorder %s689_s30, 0 }
  0xfa   : >> { %s3457_s29 = scalar_select %p670_p4, 1, 0 }
  0xfb   : >> { %s6495_s25 = smov (!%p678_p7, %s677_s25), 511  ;;  %s701_s27 = sld [smem:[#allocation5 + %s700_s4]] }
  0xfc   : >> { %5615 = sst [smem:[#allocation103_spill]] %s3457_s29  ;;  %s6497_s30 = smov (!%p690_p9, %s689_s30), 511 }
  0xfd   : >> { %5616 = sst [smem:[#allocation104_spill]] %s6495_s25  ;;  %s725_s17 = sadd.s32 1, %s3448_s13 }
  0xfe   : >> { %s3462_s19 = scalar_select %p682_p8, 1, 0 }
  0xff   : >> { %s714_s7 = sld [smem:[#allocation4 + %s3448_s13]]  ;;  %s737_s20 = sadd.s32 2, %s3448_s13 }
 0x100   : >> { %5617 = sst [smem:[#allocation105_spill]] %s3462_s19  ;;  %s749_s25 = sadd.s32 3, %s3448_s13 }
 0x101   : >> { %5618 = sst [smem:[#allocation106_spill]] %s6497_s30  ;;  %p702_p11 = scmp.lt.s32.totalorder %s701_s27, 511 }
 0x102   : >> { %s3468_s23 = scalar_select %p694_p10, 1, 0 }
 0x103   : >> { %s726_s6 = sld [smem:[#allocation4 + %s725_s17]]  ;;  %p706_p12 = scmp.gt.s32.totalorder %s701_s27, 0 }
 0x104   : >> { %5619 = sst [smem:[#allocation107_spill]] %s3468_s23  ;;  %s6499_s27 = smov (!%p702_p11, %s701_s27), 511 }
 0x105   : >> { %p715_p13 = scmp.lt.s32.totalorder %s714_s7, 511  ;;  %p719_p0 = scmp.gt.s32.totalorder %s714_s7, 0 }
 0x106   : >> { %5620 = sst [smem:[#allocation108_spill]] %s6499_s27  ;;  %s761_s29 = sadd.s32 4, %s3448_s13 }
 0x107   : >> { %s3474_s9 = scalar_select %p706_p12, 1, 0 }
 0x108   : >> { %s6501_s7 = smov (!%p715_p13, %s714_s7), 511  ;;  %s738_s30 = sld [smem:[#allocation4 + %s737_s20]] }
 0x109   : >> { %5621 = sst [smem:[#allocation109_spill]] %s3474_s9  ;;  %p727_p1 = scmp.lt.s32.totalorder %s726_s6, 511 }
 0x10a   : >> { %5622 = sst [smem:[#allocation110_spill]] %s6501_s7  ;;  %p731_p2 = scmp.gt.s32.totalorder %s726_s6, 0 }
 0x10b   : >> { %s3480_s18 = scalar_select %p719_p0, 1, 0 }
 0x10c   : >> { %s6503_s6 = smov (!%p727_p1, %s726_s6), 511  ;;  %s750_s4 = sld [smem:[#allocation4 + %s749_s25]] }
 0x10d   : >> { %5623 = sst [smem:[#allocation111_spill]] %s3480_s18  ;;  %s773_s7 = sadd.s32 5, %s3448_s13 }
 0x10e   : >> { %5624 = sst [smem:[#allocation112_spill]] %s6503_s6  ;;  %p739_p3 = scmp.lt.s32.totalorder %s738_s30, 511 }
 0x10f   : >> { %s3485_s27 = scalar_select %p731_p2, 1, 0 }
 0x110   : >> { %p743_p4 = scmp.gt.s32.totalorder %s738_s30, 0  ;;  %s762_s21 = sld [smem:[#allocation4 + %s761_s29]] }
 0x111   : >> { %5625 = sst [smem:[#allocation113_spill]] %s3485_s27  ;;  %s6505_s30 = smov (!%p739_p3, %s738_s30), 511 }
 0x112   : >> { %5626 = sst [smem:[#allocation114_spill]] %s6505_s30  ;;  %p751_p7 = scmp.lt.s32.totalorder %s750_s4, 511 }
 0x113   : >> { %s3494_s17 = scalar_select %p743_p4, 1, 0 }
 0x114   : >> { %s785_s20 = sadd.s32 6, %s3448_s13  ;;  %p755_p8 = scmp.gt.s32.totalorder %s750_s4, 0 }
 0x115   : >> { %5627 = sst [smem:[#allocation115_spill]] %s3494_s17  ;;  %s6507_s4 = smov (!%p751_p7, %s750_s4), 511 }
 0x116   : >> { %5628 = sst [smem:[#allocation116_spill]] %s6507_s4  ;;  %p763_p9 = scmp.lt.s32.totalorder %s762_s21, 511 }
 0x117   : >> { %s3499_s19 = scalar_select %p755_p8, 1, 0 }
 0x118   : >> { %p767_p10 = scmp.gt.s32.totalorder %s762_s21, 0  ;;  %s6509_s21 = smov (!%p763_p9, %s762_s21), 511 }
 0x119   : >> { %5629 = sst [smem:[#allocation117_spill]] %s3499_s19  ;;  %s797_s27 = sadd.s32 7, %s3448_s13 }
 0x11a   : >> { %5630 = sst [smem:[#allocation118_spill]] %s6509_s21  ;;  %s3509_s6 = sadd.s32 32, %s3180_s8 }
 0x11b   : >> { %s3504_s29 = scalar_select %p767_p10, 1, 0 }
 0x11c   : >> { %s774_s9 = sld [smem:[#allocation4 + %s773_s7]]  ;;  %s821_s18 = sadd.s32 1, %s3509_s6 }
 0x11d   : >> { %5631 = sst [smem:[#allocation119_spill]] %s3504_s29  ;;  %s833_s26 = sadd.s32 2, %s3509_s6 }
 0x11e   : >> { %s786_s30 = sld [smem:[#allocation4 + %s785_s20]]  ;;  %s845_s13 = sadd.s32 3, %s3509_s6 }
 0x11f   : >> { %s798_s4 = sld [smem:[#allocation4 + %s797_s27]]  ;;  %s857_s29 = sadd.s32 4, %s3509_s6 }
 0x120   : >> { %s810_s17 = sld [smem:[#allocation5 + %s3509_s6]]  ;;  %s881_s19 = sadd.s32 6, %s3509_s6 }
 0x121   : >> { %s822_s10 = sld [smem:[#allocation5 + %s821_s18]]  ;;  %s893_s2 = sadd.s32 7, %s3509_s6 }
 0x122   : >> { %p775_p11 = scmp.lt.s32.totalorder %s774_s9, 511  ;;  %p779_p12 = scmp.gt.s32.totalorder %s774_s9, 0 }
 0x123   : >> { %s846_s20 = sld [smem:[#allocation5 + %s845_s13]]  ;;  %s869_s13 = sadd.s32 5, %s3509_s6 }
 0x124   : >> { %p787_p13 = scmp.lt.s32.totalorder %s786_s30, 511  ;;  %p791_p0 = scmp.gt.s32.totalorder %s786_s30, 0 }
 0x125   : >> { %s6511_s9 = smov (!%p775_p11, %s774_s9), 511  ;;  %p799_p1 = scmp.lt.s32.totalorder %s798_s4, 511 }
 0x126   : >> { %5632 = sst [smem:[#allocation120_spill]] %s6511_s9  ;;  %p803_p2 = scmp.gt.s32.totalorder %s798_s4, 0 }
 0x127   : >> { %s3517_s7 = scalar_select %p779_p12, 1, 0 }
 0x128   : >> { %s6513_s30 = smov (!%p787_p13, %s786_s30), 511  ;;  %p811_p3 = scmp.lt.s32.totalorder %s810_s17, 511 }
 0x129   : >> { %5633 = sst [smem:[#allocation121_spill]] %s3517_s7  ;;  %p815_p4 = scmp.gt.s32.totalorder %s810_s17, 0 }
 0x12a   : >> { %5634 = sst [smem:[#allocation122_spill]] %s6513_s30  ;;  %s6515_s4 = smov (!%p799_p1, %s798_s4), 511 }
 0x12b   : >> { %s3522_s27 = scalar_select %p791_p0, 1, 0 }
 0x12c   : >> { %5636 = sst [smem:[#allocation124_spill]] %s6515_s4  ;;  %p823_p7 = scmp.lt.s32.totalorder %s822_s10, 511 }
 0x12d   : >> { %5635 = sst [smem:[#allocation123_spill]] %s3522_s27  ;;  %p827_p8 = scmp.gt.s32.totalorder %s822_s10, 0 }
 0x12e   : >> { %s3527_s18 = scalar_select %p803_p2, 1, 0 }
 0x12f   : >> { %s6517_s17 = smov (!%p811_p3, %s810_s17), 511  ;;  %s834_s9 = sld [smem:[#allocation5 + %s833_s26]] }
 0x130   : >> { %5637 = sst [smem:[#allocation125_spill]] %s3527_s18  ;;  %s6519_s10 = smov (!%p823_p7, %s822_s10), 511 }
 0x131   : >> { %5638 = sst [smem:[#allocation126_spill]] %s6517_s17  ;;  %p847_p11 = scmp.lt.s32.totalorder %s846_s20, 511 }
 0x132   : >> { %s3532_s23 = scalar_select %p815_p4, 1, 0 }
 0x133   : >> { %5640 = sst [smem:[#allocation128_spill]] %s6519_s10  ;;  %p851_p12 = scmp.gt.s32.totalorder %s846_s20, 0 }
 0x134   : >> { %5639 = sst [smem:[#allocation127_spill]] %s3532_s23  ;;  %s6523_s20 = smov (!%p847_p11, %s846_s20), 511 }
 0x135   : >> { %s3537_s7 = scalar_select %p827_p8, 1, 0 }
 0x136   : >> { %s858_s21 = sld [smem:[#allocation5 + %s857_s29]]  ;;  %p835_p9 = scmp.lt.s32.totalorder %s834_s9, 511 }
 0x137   : >> { %5641 = sst [smem:[#allocation129_spill]] %s3537_s7  ;;  %p839_p10 = scmp.gt.s32.totalorder %s834_s9, 0 }
 0x138   : >> { %s6521_s9 = smov (!%p835_p9, %s834_s9), 511  ;;  %5644 = sst [smem:[#allocation132_spill]] %s6523_s20 }
 0x139   : >> { %5642 = sst [smem:[#allocation130_spill]] %s6521_s9  ;;  %s905_s9 = sadd.s32 8, %s3509_s6 }
 0x13a   : >> { %s3543_s30 = scalar_select %p839_p10, 1, 0 }
 0x13b   : >> { %s3549_s25 = scalar_select %p851_p12, 1, 0 }
 0x13c   : >> { %5643 = sst [smem:[#allocation131_spill]] %s3543_s30  ;;  %p859_p13 = scmp.lt.s32.totalorder %s858_s21, 511 }
 0x13d   : >> { %5645 = sst [smem:[#allocation133_spill]] %s3549_s25  ;;  %p863_p0 = scmp.gt.s32.totalorder %s858_s21, 0 }
 0x13e   : >> { %s870_s4 = sld [smem:[#allocation5 + %s869_s13]]  ;;  %s6525_s21 = smov (!%p859_p13, %s858_s21), 511 }
 0x13f   : >> { %5646 = sst [smem:[#allocation134_spill]] %s6525_s21  ;;  %s917_s13 = sadd.s32 9, %s3509_s6 }
 0x140   : >> { %s3554_s18 = scalar_select %p863_p0, 1, 0 }
 0x141   : >> { %s882_s26 = sld [smem:[#allocation5 + %s881_s19]]  ;;  %s929_s21 = sadd.s32 10, %s3509_s6 }
 0x142   : >> { %5647 = sst [smem:[#allocation135_spill]] %s3554_s18  ;;  %s941_s25 = sadd.s32 11, %s3509_s6 }
 0x143   : >> { %s894_s20 = sld [smem:[#allocation5 + %s893_s2]]  ;;  %s965_s17 = sadd.s32 13, %s3509_s6 }
 0x144   : >> { %p871_p1 = scmp.lt.s32.totalorder %s870_s4, 511  ;;  %p875_p2 = scmp.gt.s32.totalorder %s870_s4, 0 }
 0x145   : >> { %s918_s18 = sld [smem:[#allocation5 + %s917_s13]] }
 0x146   : >> { %s6527_s4 = smov (!%p871_p1, %s870_s4), 511  ;;  %s930_s30 = sld [smem:[#allocation5 + %s929_s21]] }
 0x147   : >> { %5648 = sst [smem:[#allocation136_spill]] %s6527_s4  ;;  %p883_p3 = scmp.lt.s32.totalorder %s882_s26, 511 }
 0x148   : >> { %s3563_s29 = scalar_select %p875_p2, 1, 0 }
 0x149   : >> { %p887_p4 = scmp.gt.s32.totalorder %s882_s26, 0  ;;  %s6529_s26 = smov (!%p883_p3, %s882_s26), 511 }
 0x14a   : >> { %5649 = sst [smem:[#allocation137_spill]] %s3563_s29  ;;  %p895_p7 = scmp.lt.s32.totalorder %s894_s20, 511 }
 0x14b   : >> { %5650 = sst [smem:[#allocation138_spill]] %s6529_s26  ;;  %p899_p8 = scmp.gt.s32.totalorder %s894_s20, 0 }
 0x14c   : >> { %s3568_s19 = scalar_select %p887_p4, 1, 0 }
 0x14d   : >> { %s6531_s20 = smov (!%p895_p7, %s894_s20), 511  ;;  %s906_s4 = sld [smem:[#allocation5 + %s905_s9]] }
 0x14e   : >> { %5651 = sst [smem:[#allocation139_spill]] %s3568_s19  ;;  %s953_s26 = sadd.s32 12, %s3509_s6 }
 0x14f   : >> { %5652 = sst [smem:[#allocation140_spill]] %s6531_s20  ;;  %p919_p11 = scmp.lt.s32.totalorder %s918_s18, 511 }
 0x150   : >> { %s3573_s2 = scalar_select %p899_p8, 1, 0 }
 0x151   : >> { %s942_s10 = sld [smem:[#allocation5 + %s941_s25]]  ;;  %p923_p12 = scmp.gt.s32.totalorder %s918_s18, 0 }
 0x152   : >> { %5653 = sst [smem:[#allocation141_spill]] %s3573_s2  ;;  %s977_s9 = sadd.s32 14, %s3509_s6 }
 0x153   : >> { %s954_s23 = sld [smem:[#allocation5 + %s953_s26]]  ;;  %p907_p9 = scmp.lt.s32.totalorder %s906_s4, 511 }
 0x154   : >> { %p911_p10 = scmp.gt.s32.totalorder %s906_s4, 0  ;;  %p931_p13 = scmp.lt.s32.totalorder %s930_s30, 511 }
 0x155   : >> { %s6533_s4 = smov (!%p907_p9, %s906_s4), 511  ;;  %p935_p0 = scmp.gt.s32.totalorder %s930_s30, 0 }
 0x156   : >> { %5654 = sst [smem:[#allocation142_spill]] %s6533_s4  ;;  %s6535_s18 = smov (!%p919_p11, %s918_s18), 511 }
 0x157   : >> { %s3583_s5 = scalar_select %p911_p10, 1, 0 }
 0x158   : >> { %5656 = sst [smem:[#allocation144_spill]] %s6535_s18  ;;  %p943_p1 = scmp.lt.s32.totalorder %s942_s10, 511 }
 0x159   : >> { %5655 = sst [smem:[#allocation143_spill]] %s3583_s5  ;;  %p947_p2 = scmp.gt.s32.totalorder %s942_s10, 0 }
 0x15a   : >> { %s3588_s21 = scalar_select %p923_p12, 1, 0 }
 0x15b   : >> { %s6537_s30 = smov (!%p931_p13, %s930_s30), 511  ;;  %p955_p3 = scmp.lt.s32.totalorder %s954_s23, 511 }
 0x15c   : >> { %5657 = sst [smem:[#allocation145_spill]] %s3588_s21  ;;  %p959_p4 = scmp.gt.s32.totalorder %s954_s23, 0 }
 0x15d   : >> { %5658 = sst [smem:[#allocation146_spill]] %s6537_s30  ;;  %s6539_s10 = smov (!%p943_p1, %s942_s10), 511 }
 0x15e   : >> { %s3593_s26 = scalar_select %p935_p0, 1, 0 }
 0x15f   : >> { %5660 = sst [smem:[#allocation148_spill]] %s6539_s10  ;;  %s6541_s23 = smov (!%p955_p3, %s954_s23), 511 }
 0x160   : >> { %5659 = sst [smem:[#allocation147_spill]] %s3593_s26  ;;  %s989_s4 = sadd.s32 15, %s3509_s6 }
 0x161   : >> { %s3598_s7 = scalar_select %p947_p2, 1, 0 }
 0x162   : >> { %s966_s18 = sld [smem:[#allocation5 + %s965_s17]]  ;;  %s3613_s17 = sadd.s32 24, %s3170_s16 }
 0x163   : >> { %5661 = sst [smem:[#allocation149_spill]] %s3598_s7  ;;  %s1026_s7 = sadd.s32 2, %s3613_s17 }
 0x164   : >> { %s978_s25 = sld [smem:[#allocation5 + %s977_s9]]  ;;  %s1038_s10 = sadd.s32 3, %s3613_s17 }
 0x165   : >> { %5662 = sst [smem:[#allocation150_spill]] %s6541_s23  ;;  %s1086_s21 = sadd.s32 7, %s3613_s17 }
 0x166   : >> { %s3603_s5 = scalar_select %p959_p4, 1, 0 }
 0x167   : >> { %s990_s2 = sld [smem:[#allocation5 + %s989_s4]]  ;;  %s3650_s29 = sadd.s32 48, %s3180_s8 }
 0x168   : >> { %5663 = sst [smem:[#allocation151_spill]] %s3603_s5  ;;  %p967_p7 = scmp.lt.s32.totalorder %s966_s18, 511 }
 0x169   : >> { %p971_p8 = scmp.gt.s32.totalorder %s966_s18, 0  ;;  %s1003_s9 = sld [smem:[#allocation4 + %s3613_s17]] }
 0x16a   : >> { %p979_p9 = scmp.lt.s32.totalorder %s978_s25, 511  ;;  %p983_p10 = scmp.gt.s32.totalorder %s978_s25, 0 }
 0x16b   : >> { %s6543_s18 = smov (!%p967_p7, %s966_s18), 511  ;;  %s1087_s19 = sld [smem:[#allocation4 + %s1086_s21]] }
 0x16c   : >> { %5664 = sst [smem:[#allocation152_spill]] %s6543_s18  ;;  %s6545_s25 = smov (!%p979_p9, %s978_s25), 511 }
 0x16d   : >> { %s3609_s13 = scalar_select %p971_p8, 1, 0 }
 0x16e   : >> { %p991_p11 = scmp.lt.s32.totalorder %s990_s2, 511  ;;  %5666 = sst [smem:[#allocation154_spill]] %s6545_s25 }
 0x16f   : >> { %5665 = sst [smem:[#allocation153_spill]] %s3609_s13  ;;  %p995_p12 = scmp.gt.s32.totalorder %s990_s2, 0 }
 0x170   : >> { %s3617_s6 = scalar_select %p983_p10, 1, 0 }
 0x171   : >> { %s6547_s2 = smov (!%p991_p11, %s990_s2), 511  ;;  %s1014_s18 = sadd.s32 1, %s3613_s17 }
 0x172   : >> { %5667 = sst [smem:[#allocation155_spill]] %s3617_s6  ;;  %p1004_p13 = scmp.lt.s32.totalorder %s1003_s9, 511 }
 0x173   : >> { %5668 = sst [smem:[#allocation156_spill]] %s6547_s2  ;;  %p1008_p0 = scmp.gt.s32.totalorder %s1003_s9, 0 }
 0x174   : >> { %s3623_s30 = scalar_select %p995_p12, 1, 0 }
 0x175   : >> { %s1015_s5 = sld [smem:[#allocation4 + %s1014_s18]]  ;;  %s6549_s9 = smov (!%p1004_p13, %s1003_s9), 511 }
 0x176   : >> { %5669 = sst [smem:[#allocation157_spill]] %s3623_s30  ;;  %s1050_s2 = sadd.s32 4, %s3613_s17 }
 0x177   : >> { %s1027_s25 = sld [smem:[#allocation4 + %s1026_s7]]  ;;  %s1062_s13 = sadd.s32 5, %s3613_s17 }
 0x178   : >> { %5670 = sst [smem:[#allocation158_spill]] %s6549_s9  ;;  %s1074_s9 = sadd.s32 6, %s3613_s17 }
 0x179   : >> { %s3632_s4 = scalar_select %p1008_p0, 1, 0 }
 0x17a   : >> { %s1039_s30 = sld [smem:[#allocation4 + %s1038_s10]]  ;;  %s1110_s10 = sadd.s32 1, %s3650_s29 }
 0x17b   : >> { %5671 = sst [smem:[#allocation159_spill]] %s3632_s4  ;;  %p1016_p1 = scmp.lt.s32.totalorder %s1015_s5, 511 }
 0x17c   : >> { %p1020_p2 = scmp.gt.s32.totalorder %s1015_s5, 0  ;;  %s1051_s6 = sld [smem:[#allocation4 + %s1050_s2]] }
 0x17d   : >> { %s6551_s5 = smov (!%p1016_p1, %s1015_s5), 511  ;;  %p1028_p3 = scmp.lt.s32.totalorder %s1027_s25, 511 }
 0x17e   : >> { %5672 = sst [smem:[#allocation160_spill]] %s6551_s5  ;;  %p1032_p4 = scmp.gt.s32.totalorder %s1027_s25, 0 }
 0x17f   : >> { %s3637_s18 = scalar_select %p1020_p2, 1, 0 }
 0x180   : >> { %s6553_s25 = smov (!%p1028_p3, %s1027_s25), 511  ;;  %s1063_s26 = sld [smem:[#allocation4 + %s1062_s13]] }
 0x181   : >> { %5673 = sst [smem:[#allocation161_spill]] %s3637_s18  ;;  %p1040_p7 = scmp.lt.s32.totalorder %s1039_s30, 511 }
 0x182   : >> { %5674 = sst [smem:[#allocation162_spill]] %s6553_s25  ;;  %p1044_p8 = scmp.gt.s32.totalorder %s1039_s30, 0 }
 0x183   : >> { %s3642_s7 = scalar_select %p1032_p4, 1, 0 }
 0x184   : >> { %s1075_s20 = sld [smem:[#allocation4 + %s1074_s9]]  ;;  %p1052_p9 = scmp.lt.s32.totalorder %s1051_s6, 511 }
 0x185   : >> { %5675 = sst [smem:[#allocation163_spill]] %s3642_s7  ;;  %p1056_p10 = scmp.gt.s32.totalorder %s1051_s6, 0 }
 0x186   : >> { %s6555_s30 = smov (!%p1040_p7, %s1039_s30), 511  ;;  %p1064_p11 = scmp.lt.s32.totalorder %s1063_s26, 511 }
 0x187   : >> { %5676 = sst [smem:[#allocation164_spill]] %s6555_s30  ;;  %p1068_p12 = scmp.gt.s32.totalorder %s1063_s26, 0 }
 0x188   : >> { %s3654_s23 = scalar_select %p1044_p8, 1, 0 }
 0x189   : >> { %s6557_s6 = smov (!%p1052_p9, %s1051_s6), 511  ;;  %s6559_s26 = smov (!%p1064_p11, %s1063_s26), 511 }
 0x18a   : >> { %5677 = sst [smem:[#allocation165_spill]] %s3654_s23  ;;  %p1076_p13 = scmp.lt.s32.totalorder %s1075_s20, 511 }
 0x18b   : >> { %5678 = sst [smem:[#allocation166_spill]] %s6557_s6  ;;  %p1080_p0 = scmp.gt.s32.totalorder %s1075_s20, 0 }
 0x18c   : >> { %s3659_s2 = scalar_select %p1056_p10, 1, 0 }
 0x18d   : >> { %5680 = sst [smem:[#allocation168_spill]] %s6559_s26  ;;  %p1088_p1 = scmp.lt.s32.totalorder %s1087_s19, 511 }
 0x18e   : >> { %5679 = sst [smem:[#allocation167_spill]] %s3659_s2  ;;  %p1092_p2 = scmp.gt.s32.totalorder %s1087_s19, 0 }
 0x18f   : >> { %s3664_s13 = scalar_select %p1068_p12, 1, 0 }
 0x190   : >> { %s6561_s20 = smov (!%p1076_p13, %s1075_s20), 511  ;;  %s1099_s27 = sld [smem:[#allocation5 + %s3650_s29]] }
 0x191   : >> { %5681 = sst [smem:[#allocation169_spill]] %s3664_s13  ;;  %s6563_s19 = smov (!%p1088_p1, %s1087_s19), 511 }
 0x192   : >> { %5682 = sst [smem:[#allocation170_spill]] %s6561_s20  ;;  %s1122_s23 = sadd.s32 2, %s3650_s29 }
 0x193   : >> { %s3669_s9 = scalar_select %p1080_p0, 1, 0 }
 0x194   : >> { %s1111_s21 = sld [smem:[#allocation5 + %s1110_s10]]  ;;  %s1134_s17 = sadd.s32 3, %s3650_s29 }
 0x195   : >> { %5683 = sst [smem:[#allocation171_spill]] %s3669_s9  ;;  %s1146_s13 = sadd.s32 4, %s3650_s29 }
 0x196   : >> { %5684 = sst [smem:[#allocation172_spill]] %s6563_s19  ;;  %p1100_p3 = scmp.lt.s32.totalorder %s1099_s27, 511 }
 0x197   : >> { %s3675_s6 = scalar_select %p1092_p2, 1, 0 }
 0x198   : >> { %s1123_s30 = sld [smem:[#allocation5 + %s1122_s23]]  ;;  %p1104_p4 = scmp.gt.s32.totalorder %s1099_s27, 0 }
 0x199   : >> { %5685 = sst [smem:[#allocation173_spill]] %s3675_s6  ;;  %s6565_s27 = smov (!%p1100_p3, %s1099_s27), 511 }
 0x19a   : >> { %p1112_p7 = scmp.lt.s32.totalorder %s1111_s21, 511  ;;  %p1116_p8 = scmp.gt.s32.totalorder %s1111_s21, 0 }
 0x19b   : >> { %5686 = sst [smem:[#allocation174_spill]] %s6565_s27  ;;  %s1158_s2 = sadd.s32 5, %s3650_s29 }
 0x19c   : >> { %s3681_s5 = scalar_select %p1104_p4, 1, 0 }
 0x19d   : >> { %s6567_s21 = smov (!%p1112_p7, %s1111_s21), 511  ;;  %s1135_s19 = sld [smem:[#allocation5 + %s1134_s17]] }
 0x19e   : >> { %5687 = sst [smem:[#allocation175_spill]] %s3681_s5  ;;  %p1124_p9 = scmp.lt.s32.totalorder %s1123_s30, 511 }
 0x19f   : >> { %5688 = sst [smem:[#allocation176_spill]] %s6567_s21  ;;  %p1128_p10 = scmp.gt.s32.totalorder %s1123_s30, 0 }
 0x1a0   : >> { %s3687_s26 = scalar_select %p1116_p8, 1, 0 }
 0x1a1   : >> { %s6569_s30 = smov (!%p1124_p9, %s1123_s30), 511  ;;  %s1147_s10 = sld [smem:[#allocation5 + %s1146_s13]] }
 0x1a2   : >> { %5689 = sst [smem:[#allocation177_spill]] %s3687_s26  ;;  %s1170_s25 = sadd.s32 6, %s3650_s29 }
 0x1a3   : >> { %5690 = sst [smem:[#allocation178_spill]] %s6569_s30  ;;  %p1136_p11 = scmp.lt.s32.totalorder %s1135_s19, 511 }
 0x1a4   : >> { %s3692_s9 = scalar_select %p1128_p10, 1, 0 }
 0x1a5   : >> { %p1140_p12 = scmp.gt.s32.totalorder %s1135_s19, 0  ;;  %s1159_s7 = sld [smem:[#allocation5 + %s1158_s2]] }
 0x1a6   : >> { %5691 = sst [smem:[#allocation179_spill]] %s3692_s9  ;;  %s6571_s19 = smov (!%p1136_p11, %s1135_s19), 511 }
 0x1a7   : >> { %5692 = sst [smem:[#allocation180_spill]] %s6571_s19  ;;  %p1148_p13 = scmp.lt.s32.totalorder %s1147_s10, 511 }
 0x1a8   : >> { %s3701_s23 = scalar_select %p1140_p12, 1, 0 }
 0x1a9   : >> { %s1182_s17 = sadd.s32 7, %s3650_s29  ;;  %p1152_p0 = scmp.gt.s32.totalorder %s1147_s10, 0 }
 0x1aa   : >> { %5693 = sst [smem:[#allocation181_spill]] %s3701_s23  ;;  %s6573_s10 = smov (!%p1148_p13, %s1147_s10), 511 }
 0x1ab   : >> { %5694 = sst [smem:[#allocation182_spill]] %s6573_s10  ;;  %p1160_p1 = scmp.lt.s32.totalorder %s1159_s7, 511 }
 0x1ac   : >> { %s3706_s13 = scalar_select %p1152_p0, 1, 0 }
 0x1ad   : >> { %p1164_p2 = scmp.gt.s32.totalorder %s1159_s7, 0  ;;  %s6575_s7 = smov (!%p1160_p1, %s1159_s7), 511 }
 0x1ae   : >> { %5695 = sst [smem:[#allocation183_spill]] %s3706_s13  ;;  %s1194_s19 = sadd.s32 8, %s3650_s29 }
 0x1af   : >> { %5696 = sst [smem:[#allocation184_spill]] %s6575_s7  ;;  %s1206_s9 = sadd.s32 9, %s3650_s29 }
 0x1b0   : >> { %s3711_s2 = scalar_select %p1164_p2, 1, 0 }
 0x1b1   : >> { %s1171_s18 = sld [smem:[#allocation5 + %s1170_s25]]  ;;  %s1218_s10 = sadd.s32 10, %s3650_s29 }
 0x1b2   : >> { %5697 = sst [smem:[#allocation185_spill]] %s3711_s2  ;;  %s1230_s27 = sadd.s32 11, %s3650_s29 }
 0x1b3   : >> { %s1183_s4 = sld [smem:[#allocation5 + %s1182_s17]]  ;;  %s1242_s25 = sadd.s32 12, %s3650_s29 }
 0x1b4   : >> { %s1195_s30 = sld [smem:[#allocation5 + %s1194_s19]] }
 0x1b5   : >> { %s1207_s21 = sld [smem:[#allocation5 + %s1206_s9]] }
 0x1b6   : >> { %s1219_s5 = sld [smem:[#allocation5 + %s1218_s10]] }
 0x1b7   : >> { %p1172_p3 = scmp.lt.s32.totalorder %s1171_s18, 511  ;;  %p1176_p4 = scmp.gt.s32.totalorder %s1171_s18, 0 }
 0x1b8   : >> { %s1243_s9 = sld [smem:[#allocation5 + %s1242_s25]]  ;;  %s1266_s25 = sadd.s32 14, %s3650_s29 }
 0x1b9   : >> { %p1184_p7 = scmp.lt.s32.totalorder %s1183_s4, 511  ;;  %p1188_p8 = scmp.gt.s32.totalorder %s1183_s4, 0 }
 0x1ba   : >> { %s6577_s18 = smov (!%p1172_p3, %s1171_s18), 511  ;;  %p1196_p9 = scmp.lt.s32.totalorder %s1195_s30, 511 }
 0x1bb   : >> { %5698 = sst [smem:[#allocation186_spill]] %s6577_s18  ;;  %p1200_p10 = scmp.gt.s32.totalorder %s1195_s30, 0 }
 0x1bc   : >> { %s3721_s6 = scalar_select %p1176_p4, 1, 0 }
 0x1bd   : >> { %s6579_s4 = smov (!%p1184_p7, %s1183_s4), 511  ;;  %p1208_p11 = scmp.lt.s32.totalorder %s1207_s21, 511 }
 0x1be   : >> { %5699 = sst [smem:[#allocation187_spill]] %s3721_s6  ;;  %p1212_p12 = scmp.gt.s32.totalorder %s1207_s21, 0 }
 0x1bf   : >> { %5700 = sst [smem:[#allocation188_spill]] %s6579_s4  ;;  %s6581_s30 = smov (!%p1196_p9, %s1195_s30), 511 }
 0x1c0   : >> { %s3726_s19 = scalar_select %p1188_p8, 1, 0 }
 0x1c1   : >> { %5702 = sst [smem:[#allocation190_spill]] %s6581_s30  ;;  %p1220_p13 = scmp.lt.s32.totalorder %s1219_s5, 511 }
 0x1c2   : >> { %5701 = sst [smem:[#allocation189_spill]] %s3726_s19  ;;  %p1224_p0 = scmp.gt.s32.totalorder %s1219_s5, 0 }
 0x1c3   : >> { %s3731_s10 = scalar_select %p1200_p10, 1, 0 }
 0x1c4   : >> { %s6583_s21 = smov (!%p1208_p11, %s1207_s21), 511  ;;  %s1231_s4 = sld [smem:[#allocation5 + %s1230_s27]] }
 0x1c5   : >> { %5703 = sst [smem:[#allocation191_spill]] %s3731_s10  ;;  %s6585_s5 = smov (!%p1220_p13, %s1219_s5), 511 }
 0x1c6   : >> { %5704 = sst [smem:[#allocation192_spill]] %s6583_s21  ;;  %s1254_s18 = sadd.s32 13, %s3650_s29 }
 0x1c7   : >> { %s3736_s26 = scalar_select %p1212_p12, 1, 0 }
 0x1c8   : >> { %5706 = sst [smem:[#allocation194_spill]] %s6585_s5  ;;  %p1244_p3 = scmp.lt.s32.totalorder %s1243_s9, 511 }
 0x1c9   : >> { %5705 = sst [smem:[#allocation193_spill]] %s3736_s26  ;;  %p1248_p4 = scmp.gt.s32.totalorder %s1243_s9, 0 }
 0x1ca   : >> { %s3741_s6 = scalar_select %p1224_p0, 1, 0 }
 0x1cb   : >> { %s1255_s2 = sld [smem:[#allocation5 + %s1254_s18]]  ;;  %p1232_p1 = scmp.lt.s32.totalorder %s1231_s4, 511 }
 0x1cc   : >> { %5707 = sst [smem:[#allocation195_spill]] %s3741_s6  ;;  %p1236_p2 = scmp.gt.s32.totalorder %s1231_s4, 0 }
 0x1cd   : >> { %s6587_s4 = smov (!%p1232_p1, %s1231_s4), 511  ;;  %s6589_s9 = smov (!%p1244_p3, %s1243_s9), 511 }
 0x1ce   : >> { %5708 = sst [smem:[#allocation196_spill]] %s6587_s4  ;;  %s1278_s26 = sadd.s32 15, %s3650_s29 }
 0x1cf   : >> { %s3747_s20 = scalar_select %p1236_p2, 1, 0 }
 0x1d0   : >> { %5710 = sst [smem:[#allocation198_spill]] %s6589_s9  ;;  %s3764_s6 = sadd.s32 32, %s3170_s16 }
 0x1d1   : >> { %5709 = sst [smem:[#allocation197_spill]] %s3747_s20  ;;  %p1256_p7 = scmp.lt.s32.totalorder %s1255_s2, 511 }
 0x1d2   : >> { %s3753_s30 = scalar_select %p1248_p4, 1, 0 }
 0x1d3   : >> { %p1260_p8 = scmp.gt.s32.totalorder %s1255_s2, 0  ;;  %s1267_s17 = sld [smem:[#allocation5 + %s1266_s25]] }
 0x1d4   : >> { %5711 = sst [smem:[#allocation199_spill]] %s3753_s30  ;;  %s6591_s2 = smov (!%p1256_p7, %s1255_s2), 511 }
 0x1d5   : >> { %5712 = sst [smem:[#allocation200_spill]] %s6591_s2  ;;  %s3768_s18 = sadd.s32 64, %s3180_s8 }
 0x1d6   : >> { %s3758_s5 = scalar_select %p1260_p8, 1, 0 }
 0x1d7   : >> { %s1279_s21 = sld [smem:[#allocation5 + %s1278_s26]]  ;;  %s1303_s29 = sadd.s32 1, %s3764_s6 }
 0x1d8   : >> { %5713 = sst [smem:[#allocation201_spill]] %s3758_s5  ;;  %s1315_s2 = sadd.s32 2, %s3764_s6 }
 0x1d9   : >> { %p1268_p9 = scmp.lt.s32.totalorder %s1267_s17, 511  ;;  %p1272_p10 = scmp.gt.s32.totalorder %s1267_s17, 0 }
 0x1da   : >> { %s1292_s9 = sld [smem:[#allocation4 + %s3764_s6]]  ;;  %s1327_s20 = sadd.s32 3, %s3764_s6 }
 0x1db   : >> { %s6593_s17 = smov (!%p1268_p9, %s1267_s17), 511  ;;  %s1304_s5 = sld [smem:[#allocation4 + %s1303_s29]] }
 0x1dc   : >> { %5714 = sst [smem:[#allocation202_spill]] %s6593_s17  ;;  %s1351_s7 = sadd.s32 5, %s3764_s6 }
 0x1dd   : >> { %s3772_s25 = scalar_select %p1272_p10, 1, 0 }
 0x1de   : >> { %p1280_p11 = scmp.lt.s32.totalorder %s1279_s21, 511  ;;  %p1284_p12 = scmp.gt.s32.totalorder %s1279_s21, 0 }
 0x1df   : >> { %5715 = sst [smem:[#allocation203_spill]] %s3772_s25  ;;  %s1363_s23 = sadd.s32 6, %s3764_s6 }
 0x1e0   : >> { %s6595_s21 = smov (!%p1280_p11, %s1279_s21), 511  ;;  %p1293_p13 = scmp.lt.s32.totalorder %s1292_s9, 511 }
 0x1e1   : >> { %5716 = sst [smem:[#allocation204_spill]] %s6595_s21  ;;  %p1297_p0 = scmp.gt.s32.totalorder %s1292_s9, 0 }
 0x1e2   : >> { %s3777_s26 = scalar_select %p1284_p12, 1, 0 }
 0x1e3   : >> { %s6597_s9 = smov (!%p1293_p13, %s1292_s9), 511  ;;  %s1316_s30 = sld [smem:[#allocation4 + %s1315_s2]] }
 0x1e4   : >> { %5717 = sst [smem:[#allocation205_spill]] %s3777_s26  ;;  %s1339_s21 = sadd.s32 4, %s3764_s6 }
 0x1e5   : >> { %5718 = sst [smem:[#allocation206_spill]] %s6597_s9  ;;  %p1305_p1 = scmp.lt.s32.totalorder %s1304_s5, 511 }
 0x1e6   : >> { %s3782_s4 = scalar_select %p1297_p0, 1, 0 }
 0x1e7   : >> { %s1328_s10 = sld [smem:[#allocation4 + %s1327_s20]]  ;;  %p1309_p2 = scmp.gt.s32.totalorder %s1304_s5, 0 }
 0x1e8   : >> { %5719 = sst [smem:[#allocation207_spill]] %s3782_s4  ;;  %s6599_s5 = smov (!%p1305_p1, %s1304_s5), 511 }
 0x1e9   : >> { %s1340_s19 = sld [smem:[#allocation4 + %s1339_s21]]  ;;  %p1317_p3 = scmp.lt.s32.totalorder %s1316_s30, 511 }
 0x1ea   : >> { %s1352_s13 = sld [smem:[#allocation4 + %s1351_s7]]  ;;  %s1375_s29 = sadd.s32 7, %s3764_s6 }
 0x1eb   : >> { %s1364_s25 = sld [smem:[#allocation4 + %s1363_s23]]  ;;  %p1321_p4 = scmp.gt.s32.totalorder %s1316_s30, 0 }
 0x1ec   : >> { %5720 = sst [smem:[#allocation208_spill]] %s6599_s5  ;;  %s6601_s30 = smov (!%p1317_p3, %s1316_s30), 511 }
 0x1ed   : >> { %s3793_s9 = scalar_select %p1309_p2, 1, 0 }
 0x1ee   : >> { %5722 = sst [smem:[#allocation210_spill]] %s6601_s30  ;;  %p1329_p7 = scmp.lt.s32.totalorder %s1328_s10, 511 }
 0x1ef   : >> { %5721 = sst [smem:[#allocation209_spill]] %s3793_s9  ;;  %p1333_p8 = scmp.gt.s32.totalorder %s1328_s10, 0 }
 0x1f0   : >> { %s3798_s20 = scalar_select %p1321_p4, 1, 0 }
 0x1f1   : >> { %s6603_s10 = smov (!%p1329_p7, %s1328_s10), 511  ;;  %p1341_p9 = scmp.lt.s32.totalorder %s1340_s19, 511 }
 0x1f2   : >> { %5723 = sst [smem:[#allocation211_spill]] %s3798_s20  ;;  %p1345_p10 = scmp.gt.s32.totalorder %s1340_s19, 0 }
 0x1f3   : >> { %5724 = sst [smem:[#allocation212_spill]] %s6603_s10  ;;  %s6605_s19 = smov (!%p1341_p9, %s1340_s19), 511 }
 0x1f4   : >> { %s3803_s7 = scalar_select %p1333_p8, 1, 0 }
 0x1f5   : >> { %5726 = sst [smem:[#allocation214_spill]] %s6605_s19  ;;  %p1353_p11 = scmp.lt.s32.totalorder %s1352_s13, 511 }
 0x1f6   : >> { %5725 = sst [smem:[#allocation213_spill]] %s3803_s7  ;;  %p1357_p12 = scmp.gt.s32.totalorder %s1352_s13, 0 }
 0x1f7   : >> { %s3808_s6 = scalar_select %p1345_p10, 1, 0 }
 0x1f8   : >> { %s6607_s13 = smov (!%p1353_p11, %s1352_s13), 511  ;;  %p1365_p13 = scmp.lt.s32.totalorder %s1364_s25, 511 }
 0x1f9   : >> { %5727 = sst [smem:[#allocation215_spill]] %s3808_s6  ;;  %p1369_p0 = scmp.gt.s32.totalorder %s1364_s25, 0 }
 0x1fa   : >> { %5728 = sst [smem:[#allocation216_spill]] %s6607_s13  ;;  %s6609_s25 = smov (!%p1365_p13, %s1364_s25), 511 }
 0x1fb   : >> { %s3813_s17 = scalar_select %p1357_p12, 1, 0 }
 0x1fc   : >> { %5730 = sst [smem:[#allocation218_spill]] %s6609_s25  ;;  %s1399_s19 = sadd.s32 1, %s3768_s18 }
 0x1fd   : >> { %5729 = sst [smem:[#allocation217_spill]] %s3813_s17  ;;  %s1411_s7 = sadd.s32 2, %s3768_s18 }
 0x1fe   : >> { %s3818_s21 = scalar_select %p1369_p0, 1, 0 }
 0x1ff   : >> { %s1376_s26 = sld [smem:[#allocation4 + %s1375_s29]]  ;;  %s1423_s13 = sadd.s32 3, %s3768_s18 }
 0x200   : >> { %5731 = sst [smem:[#allocation219_spill]] %s3818_s21  ;;  %s1435_s5 = sadd.s32 4, %s3768_s18 }
 0x201   : >> { %s1388_s2 = sld [smem:[#allocation5 + %s3768_s18]]  ;;  %s1447_s29 = sadd.s32 5, %s3768_s18 }
 0x202   : >> { %s1400_s10 = sld [smem:[#allocation5 + %s1399_s19]]  ;;  %s1459_s17 = sadd.s32 6, %s3768_s18 }
 0x203   : >> { %s1412_s30 = sld [smem:[#allocation5 + %s1411_s7]] }
 0x204   : >> { %s1424_s9 = sld [smem:[#allocation5 + %s1423_s13]] }
 0x205   : >> { %p1377_p1 = scmp.lt.s32.totalorder %s1376_s26, 511  ;;  %p1381_p2 = scmp.gt.s32.totalorder %s1376_s26, 0 }
 0x206   : >> { %s1436_s21 = sld [smem:[#allocation5 + %s1435_s5]] }
 0x207   : >> { %p1389_p3 = scmp.lt.s32.totalorder %s1388_s2, 511  ;;  %p1393_p4 = scmp.gt.s32.totalorder %s1388_s2, 0 }
 0x208   : >> { %s6611_s26 = smov (!%p1377_p1, %s1376_s26), 511  ;;  %p1401_p7 = scmp.lt.s32.totalorder %s1400_s10, 511 }
 0x209   : >> { %5732 = sst [smem:[#allocation220_spill]] %s6611_s26  ;;  %p1405_p8 = scmp.gt.s32.totalorder %s1400_s10, 0 }
 0x20a   : >> { %s3829_s23 = scalar_select %p1381_p2, 1, 0 }
 0x20b   : >> { %s6613_s2 = smov (!%p1389_p3, %s1388_s2), 511  ;;  %p1413_p9 = scmp.lt.s32.totalorder %s1412_s30, 511 }
 0x20c   : >> { %5733 = sst [smem:[#allocation221_spill]] %s3829_s23  ;;  %p1417_p10 = scmp.gt.s32.totalorder %s1412_s30, 0 }
 0x20d   : >> { %5734 = sst [smem:[#allocation222_spill]] %s6613_s2  ;;  %s6615_s10 = smov (!%p1401_p7, %s1400_s10), 511 }
 0x20e   : >> { %s3834_s19 = scalar_select %p1393_p4, 1, 0 }
 0x20f   : >> { %5736 = sst [smem:[#allocation224_spill]] %s6615_s10  ;;  %p1425_p11 = scmp.lt.s32.totalorder %s1424_s9, 511 }
 0x210   : >> { %5735 = sst [smem:[#allocation223_spill]] %s3834_s19  ;;  %p1429_p12 = scmp.gt.s32.totalorder %s1424_s9, 0 }
 0x211   : >> { %s3839_s13 = scalar_select %p1405_p8, 1, 0 }
 0x212   : >> { %s6617_s30 = smov (!%p1413_p9, %s1412_s30), 511  ;;  %s1448_s7 = sld [smem:[#allocation5 + %s1447_s29]] }
 0x213   : >> { %5737 = sst [smem:[#allocation225_spill]] %s3839_s13  ;;  %s6619_s9 = smov (!%p1425_p11, %s1424_s9), 511 }
 0x214   : >> { %5738 = sst [smem:[#allocation226_spill]] %s6617_s30  ;;  %p1437_p13 = scmp.lt.s32.totalorder %s1436_s21, 511 }
 0x215   : >> { %s3844_s27 = scalar_select %p1417_p10, 1, 0 }
 0x216   : >> { %5740 = sst [smem:[#allocation228_spill]] %s6619_s9  ;;  %p1441_p0 = scmp.gt.s32.totalorder %s1436_s21, 0 }
 0x217   : >> { %5739 = sst [smem:[#allocation227_spill]] %s3844_s27  ;;  %s6621_s21 = smov (!%p1437_p13, %s1436_s21), 511 }
 0x218   : >> { %s3849_s23 = scalar_select %p1429_p12, 1, 0 }
 0x219   : >> { %s1460_s6 = sld [smem:[#allocation5 + %s1459_s17]]  ;;  %p1449_p1 = scmp.lt.s32.totalorder %s1448_s7, 511 }
 0x21a   : >> { %5741 = sst [smem:[#allocation229_spill]] %s3849_s23  ;;  %p1453_p2 = scmp.gt.s32.totalorder %s1448_s7, 0 }
 0x21b   : >> { %5742 = sst [smem:[#allocation230_spill]] %s6621_s21  ;;  %s1471_s29 = sadd.s32 7, %s3768_s18 }
 0x21c   : >> { %s3855_s26 = scalar_select %p1441_p0, 1, 0 }
 0x21d   : >> { %s6623_s7 = smov (!%p1449_p1, %s1448_s7), 511  ;;  %s1472_s20 = sld [smem:[#allocation5 + %s1471_s29]] }
 0x21e   : >> { %5743 = sst [smem:[#allocation231_spill]] %s3855_s26  ;;  %s1483_s9 = sadd.s32 8, %s3768_s18 }
 0x21f   : >> { %p1461_p3 = scmp.lt.s32.totalorder %s1460_s6, 511  ;;  %5744 = sst [smem:[#allocation232_spill]] %s6623_s7 }
 0x220   : >> { %s3861_s25 = scalar_select %p1453_p2, 1, 0 }
 0x221   : >> { %p1465_p4 = scmp.gt.s32.totalorder %s1460_s6, 0  ;;  %s6625_s6 = smov (!%p1461_p3, %s1460_s6), 511 }
 0x222   : >> { %5745 = sst [smem:[#allocation233_spill]] %s3861_s25  ;;  %s1495_s27 = sadd.s32 9, %s3768_s18 }
 0x223   : >> { %5746 = sst [smem:[#allocation234_spill]] %s6625_s6  ;;  %p1473_p7 = scmp.lt.s32.totalorder %s1472_s20, 511 }
 0x224   : >> { %s3866_s4 = scalar_select %p1465_p4, 1, 0 }
 0x225   : >> { %s1484_s5 = sld [smem:[#allocation5 + %s1483_s9]]  ;;  %p1477_p8 = scmp.gt.s32.totalorder %s1472_s20, 0 }
 0x226   : >> { %5747 = sst [smem:[#allocation235_spill]] %s3866_s4  ;;  %s1507_s30 = sadd.s32 10, %s3768_s18 }
 0x227   : >> { %s1496_s7 = sld [smem:[#allocation5 + %s1495_s27]]  ;;  %s6627_s20 = smov (!%p1473_p7, %s1472_s20), 511 }
 0x228   : >> { %5748 = sst [smem:[#allocation236_spill]] %s6627_s20  ;;  %s1519_s29 = sadd.s32 11, %s3768_s18 }
 0x229   : >> { %s3875_s17 = scalar_select %p1477_p8, 1, 0 }
 0x22a   : >> { %s1508_s20 = sld [smem:[#allocation5 + %s1507_s30]]  ;;  %s1531_s6 = sadd.s32 12, %s3768_s18 }
 0x22b   : >> { %5749 = sst [smem:[#allocation237_spill]] %s3875_s17  ;;  %p1485_p9 = scmp.lt.s32.totalorder %s1484_s5, 511 }
 0x22c   : >> { %p1489_p10 = scmp.gt.s32.totalorder %s1484_s5, 0  ;;  %s1520_s4 = sld [smem:[#allocation5 + %s1519_s29]] }
 0x22d   : >> { %s6629_s5 = smov (!%p1485_p9, %s1484_s5), 511  ;;  %p1497_p11 = scmp.lt.s32.totalorder %s1496_s7, 511 }
 0x22e   : >> { %5750 = sst [smem:[#allocation238_spill]] %s6629_s5  ;;  %p1501_p12 = scmp.gt.s32.totalorder %s1496_s7, 0 }
 0x22f   : >> { %s3880_s9 = scalar_select %p1489_p10, 1, 0 }
 0x230   : >> { %s6631_s7 = smov (!%p1497_p11, %s1496_s7), 511  ;;  %s1543_s25 = sadd.s32 13, %s3768_s18 }
 0x231   : >> { %5751 = sst [smem:[#allocation239_spill]] %s3880_s9  ;;  %s1555_s5 = sadd.s32 14, %s3768_s18 }
 0x232   : >> { %5752 = sst [smem:[#allocation240_spill]] %s6631_s7  ;;  %s1567_s2 = sadd.s32 15, %s3768_s18 }
 0x233   : >> { %s3885_s27 = scalar_select %p1501_p12, 1, 0 }
 0x234   : >> { %s1532_s26 = sld [smem:[#allocation5 + %s1531_s6]]  ;;  %p1509_p13 = scmp.lt.s32.totalorder %s1508_s20, 511 }
 0x235   : >> { %5753 = sst [smem:[#allocation241_spill]] %s3885_s27  ;;  %p1513_p0 = scmp.gt.s32.totalorder %s1508_s20, 0 }
 0x236   : >> { %s1544_s10 = sld [smem:[#allocation5 + %s1543_s25]]  ;;  %p1521_p1 = scmp.lt.s32.totalorder %s1520_s4, 511 }
 0x237   : >> { %s1556_s19 = sld [smem:[#allocation5 + %s1555_s5]]  ;;  %p1525_p2 = scmp.gt.s32.totalorder %s1520_s4, 0 }
 0x238   : >> { %s6633_s20 = smov (!%p1509_p13, %s1508_s20), 511  ;;  %s3898_s30 = sadd.s32 40, %s3170_s16 }
 0x239   : >> { %5754 = sst [smem:[#allocation242_spill]] %s6633_s20  ;;  %s6635_s4 = smov (!%p1521_p1, %s1520_s4), 511 }
 0x23a   : >> { %s3895_s23 = scalar_select %p1513_p0, 1, 0 }
 0x23b   : >> { %p1533_p3 = scmp.lt.s32.totalorder %s1532_s26, 511  ;;  %p1537_p4 = scmp.gt.s32.totalorder %s1532_s26, 0 }
 0x23c   : >> { %5755 = sst [smem:[#allocation243_spill]] %s3895_s23  ;;  %p1545_p7 = scmp.lt.s32.totalorder %s1544_s10, 511 }
 0x23d   : >> { %5756 = sst [smem:[#allocation244_spill]] %s6635_s4  ;;  %p1549_p8 = scmp.gt.s32.totalorder %s1544_s10, 0 }
 0x23e   : >> { %s3902_s6 = scalar_select %p1525_p2, 1, 0 }
 0x23f   : >> { %s6637_s26 = smov (!%p1533_p3, %s1532_s26), 511  ;;  %p1557_p9 = scmp.lt.s32.totalorder %s1556_s19, 511 }
 0x240   : >> { %5757 = sst [smem:[#allocation245_spill]] %s3902_s6  ;;  %p1561_p10 = scmp.gt.s32.totalorder %s1556_s19, 0 }
 0x241   : >> { %5758 = sst [smem:[#allocation246_spill]] %s6637_s26  ;;  %s6639_s10 = smov (!%p1545_p7, %s1544_s10), 511 }
 0x242   : >> { %s3907_s25 = scalar_select %p1537_p4, 1, 0 }
 0x243   : >> { %5760 = sst [smem:[#allocation248_spill]] %s6639_s10  ;;  %s6641_s19 = smov (!%p1557_p9, %s1556_s19), 511 }
 0x244   : >> { %5759 = sst [smem:[#allocation247_spill]] %s3907_s25  ;;  %s1592_s23 = sadd.s32 1, %s3898_s30 }
 0x245   : >> { %s3912_s29 = scalar_select %p1549_p8, 1, 0 }
 0x246   : >> { %s1568_s21 = sld [smem:[#allocation5 + %s1567_s2]]  ;;  %s1604_s5 = sadd.s32 2, %s3898_s30 }
 0x247   : >> { %5761 = sst [smem:[#allocation249_spill]] %s3912_s29  ;;  %s1616_s10 = sadd.s32 3, %s3898_s30 }
 0x248   : >> { %s1581_s18 = sld [smem:[#allocation4 + %s3898_s30]]  ;;  %s1628_s25 = sadd.s32 4, %s3898_s30 }
 0x249   : >> { %5762 = sst [smem:[#allocation250_spill]] %s6641_s19  ;;  %s1640_s6 = sadd.s32 5, %s3898_s30 }
 0x24a   : >> { %s3918_s4 = scalar_select %p1561_p10, 1, 0 }
 0x24b   : >> { %s1593_s20 = sld [smem:[#allocation4 + %s1592_s23]] }
 0x24c   : >> { %5763 = sst [smem:[#allocation251_spill]] %s3918_s4  ;;  %p1569_p11 = scmp.lt.s32.totalorder %s1568_s21, 511 }
 0x24d   : >> { %p1573_p12 = scmp.gt.s32.totalorder %s1568_s21, 0  ;;  %s1605_s19 = sld [smem:[#allocation4 + %s1604_s5]] }
 0x24e   : >> { %p1582_p13 = scmp.lt.s32.totalorder %s1581_s18, 511  ;;  %p1586_p0 = scmp.gt.s32.totalorder %s1581_s18, 0 }
 0x24f   : >> { %s6643_s21 = smov (!%p1569_p11, %s1568_s21), 511  ;;  %s1617_s2 = sld [smem:[#allocation4 + %s1616_s10]] }
 0x250   : >> { %5764 = sst [smem:[#allocation252_spill]] %s6643_s21  ;;  %s6645_s18 = smov (!%p1582_p13, %s1581_s18), 511 }
 0x251   : >> { %s3924_s13 = scalar_select %p1573_p12, 1, 0 }
 0x252   : >> { %p1594_p1 = scmp.lt.s32.totalorder %s1593_s20, 511  ;;  %5766 = sst [smem:[#allocation254_spill]] %s6645_s18 }
 0x253   : >> { %5765 = sst [smem:[#allocation253_spill]] %s3924_s13  ;;  %p1598_p2 = scmp.gt.s32.totalorder %s1593_s20, 0 }
 0x254   : >> { %s3930_s26 = scalar_select %p1586_p0, 1, 0 }
 0x255   : >> { %s6647_s20 = smov (!%p1594_p1, %s1593_s20), 511  ;;  %p1606_p3 = scmp.lt.s32.totalorder %s1605_s19, 511 }
 0x256   : >> { %5767 = sst [smem:[#allocation255_spill]] %s3930_s26  ;;  %p1610_p4 = scmp.gt.s32.totalorder %s1605_s19, 0 }
 0x257   : >> { %5768 = sst [smem:[#allocation256_spill]] %s6647_s20  ;;  %s6649_s19 = smov (!%p1606_p3, %s1605_s19), 511 }
 0x258   : >> { %s3935_s21 = scalar_select %p1598_p2, 1, 0 }
 0x259   : >> { %s1629_s18 = sld [smem:[#allocation4 + %s1628_s25]]  ;;  %p1618_p7 = scmp.lt.s32.totalorder %s1617_s2, 511 }
 0x25a   : >> { %5769 = sst [smem:[#allocation257_spill]] %s3935_s21  ;;  %s1652_s5 = sadd.s32 6, %s3898_s30 }
 0x25b   : >> { %5770 = sst [smem:[#allocation258_spill]] %s6649_s19  ;;  %p1622_p8 = scmp.gt.s32.totalorder %s1617_s2, 0 }
 0x25c   : >> { %s3944_s23 = scalar_select %p1610_p4, 1, 0 }
 0x25d   : >> { %s6651_s2 = smov (!%p1618_p7, %s1617_s2), 511  ;;  %s1641_s13 = sld [smem:[#allocation4 + %s1640_s6]] }
 0x25e   : >> { %5771 = sst [smem:[#allocation259_spill]] %s3944_s23  ;;  %s1664_s21 = sadd.s32 7, %s3898_s30 }
 0x25f   : >> { %5772 = sst [smem:[#allocation260_spill]] %s6651_s2  ;;  %p1630_p9 = scmp.lt.s32.totalorder %s1629_s18, 511 }
 0x260   : >> { %s3949_s29 = scalar_select %p1622_p8, 1, 0 }
 0x261   : >> { %p1634_p10 = scmp.gt.s32.totalorder %s1629_s18, 0  ;;  %s6653_s18 = smov (!%p1630_p9, %s1629_s18), 511 }
 0x262   : >> { %5773 = sst [smem:[#allocation261_spill]] %s3949_s29  ;;  %s3959_s20 = sadd.s32 80, %s3180_s8 }
 0x263   : >> { %5774 = sst [smem:[#allocation262_spill]] %s6653_s18  ;;  %s1688_s26 = sadd.s32 1, %s3959_s20 }
 0x264   : >> { %s3954_s25 = scalar_select %p1634_p10, 1, 0 }
 0x265   : >> { %s1653_s19 = sld [smem:[#allocation4 + %s1652_s5]]  ;;  %s1700_s7 = sadd.s32 2, %s3959_s20 }
 0x266   : >> { %5775 = sst [smem:[#allocation263_spill]] %s3954_s25  ;;  %p1642_p11 = scmp.lt.s32.totalorder %s1641_s13, 511 }
 0x267   : >> { %s1665_s2 = sld [smem:[#allocation4 + %s1664_s21]]  ;;  %p1646_p12 = scmp.gt.s32.totalorder %s1641_s13, 0 }
 0x268   : >> { %s1677_s23 = sld [smem:[#allocation5 + %s3959_s20]]  ;;  %s6655_s13 = smov (!%p1642_p11, %s1641_s13), 511 }
 0x269   : >> { %s1689_s27 = sld [smem:[#allocation5 + %s1688_s26]]  ;;  %s1712_s30 = sadd.s32 3, %s3959_s20 }
 0x26a   : >> { %5776 = sst [smem:[#allocation264_spill]] %s6655_s13  ;;  %s1724_s25 = sadd.s32 4, %s3959_s20 }
 0x26b   : >> { %p1654_p13 = scmp.lt.s32.totalorder %s1653_s19, 511  ;;  %p1658_p0 = scmp.gt.s32.totalorder %s1653_s19, 0 }
 0x26c   : >> { %s3967_s6 = scalar_select %p1646_p12, 1, 0 }
 0x26d   : >> { %p1666_p1 = scmp.lt.s32.totalorder %s1665_s2, 511  ;;  %p1670_p2 = scmp.gt.s32.totalorder %s1665_s2, 0 }
 0x26e   : >> { %5777 = sst [smem:[#allocation265_spill]] %s3967_s6  ;;  %s6657_s19 = smov (!%p1654_p13, %s1653_s19), 511 }
 0x26f   : >> { %5778 = sst [smem:[#allocation266_spill]] %s6657_s19  ;;  %p1678_p3 = scmp.lt.s32.totalorder %s1677_s23, 511 }
 0x270   : >> { %s3972_s21 = scalar_select %p1658_p0, 1, 0 }
 0x271   : >> { %p1682_p4 = scmp.gt.s32.totalorder %s1677_s23, 0  ;;  %s6659_s2 = smov (!%p1666_p1, %s1665_s2), 511 }
 0x272   : >> { %5779 = sst [smem:[#allocation267_spill]] %s3972_s21  ;;  %p1690_p7 = scmp.lt.s32.totalorder %s1689_s27, 511 }
 0x273   : >> { %5780 = sst [smem:[#allocation268_spill]] %s6659_s2  ;;  %p1694_p8 = scmp.gt.s32.totalorder %s1689_s27, 0 }
 0x274   : >> { %s3977_s26 = scalar_select %p1670_p2, 1, 0 }
 0x275   : >> { %s6661_s23 = smov (!%p1678_p3, %s1677_s23), 511  ;;  %s1701_s13 = sld [smem:[#allocation5 + %s1700_s7]] }
 0x276   : >> { %5781 = sst [smem:[#allocation269_spill]] %s3977_s26  ;;  %s6663_s27 = smov (!%p1690_p7, %s1689_s27), 511 }
 0x277   : >> { %5782 = sst [smem:[#allocation270_spill]] %s6661_s23  ;;  %s1748_s29 = sadd.s32 6, %s3959_s20 }
 0x278   : >> { %s3982_s4 = scalar_select %p1682_p4, 1, 0 }
 0x279   : >> { %s1713_s5 = sld [smem:[#allocation5 + %s1712_s30]]  ;;  %s1736_s30 = sadd.s32 5, %s3959_s20 }
 0x27a   : >> { %5783 = sst [smem:[#allocation271_spill]] %s3982_s4  ;;  %s1760_s9 = sadd.s32 7, %s3959_s20 }
 0x27b   : >> { %5784 = sst [smem:[#allocation272_spill]] %s6663_s27  ;;  %p1702_p9 = scmp.lt.s32.totalorder %s1701_s13, 511 }
 0x27c   : >> { %s3987_s6 = scalar_select %p1694_p8, 1, 0 }
 0x27d   : >> { %s1725_s18 = sld [smem:[#allocation5 + %s1724_s25]]  ;;  %p1706_p10 = scmp.gt.s32.totalorder %s1701_s13, 0 }
 0x27e   : >> { %5785 = sst [smem:[#allocation273_spill]] %s3987_s6  ;;  %s6665_s13 = smov (!%p1702_p9, %s1701_s13), 511 }
 0x27f   : >> { %p1714_p11 = scmp.lt.s32.totalorder %s1713_s5, 511  ;;  %p1718_p12 = scmp.gt.s32.totalorder %s1713_s5, 0 }
 0x280   : >> { %5786 = sst [smem:[#allocation274_spill]] %s6665_s13  ;;  %s1772_s6 = sadd.s32 8, %s3959_s20 }
 0x281   : >> { %s3993_s19 = scalar_select %p1706_p10, 1, 0 }
 0x282   : >> { %s6667_s5 = smov (!%p1714_p11, %s1713_s5), 511  ;;  %s1737_s2 = sld [smem:[#allocation5 + %s1736_s30]] }
 0x283   : >> { %5787 = sst [smem:[#allocation275_spill]] %s3993_s19  ;;  %p1726_p13 = scmp.lt.s32.totalorder %s1725_s18, 511 }
 0x284   : >> { %5788 = sst [smem:[#allocation276_spill]] %s6667_s5  ;;  %p1730_p0 = scmp.gt.s32.totalorder %s1725_s18, 0 }
 0x285   : >> { %s3999_s10 = scalar_select %p1718_p12, 1, 0 }
 0x286   : >> { %s6669_s18 = smov (!%p1726_p13, %s1725_s18), 511  ;;  %s1749_s7 = sld [smem:[#allocation5 + %s1748_s29]] }
 0x287   : >> { %5789 = sst [smem:[#allocation277_spill]] %s3999_s10  ;;  %s1784_s30 = sadd.s32 9, %s3959_s20 }
 0x288   : >> { %5790 = sst [smem:[#allocation278_spill]] %s6669_s18  ;;  %p1738_p1 = scmp.lt.s32.totalorder %s1737_s2, 511 }
 0x289   : >> { %s4004_s26 = scalar_select %p1730_p0, 1, 0 }
 0x28a   : >> { %p1742_p2 = scmp.gt.s32.totalorder %s1737_s2, 0  ;;  %s1761_s5 = sld [smem:[#allocation5 + %s1760_s9]] }
 0x28b   : >> { %5791 = sst [smem:[#allocation279_spill]] %s4004_s26  ;;  %s6671_s2 = smov (!%p1738_p1, %s1737_s2), 511 }
 0x28c   : >> { %5792 = sst [smem:[#allocation280_spill]] %s6671_s2  ;;  %p1750_p3 = scmp.lt.s32.totalorder %s1749_s7, 511 }
 0x28d   : >> { %s4013_s25 = scalar_select %p1742_p2, 1, 0 }
 0x28e   : >> { %p1754_p4 = scmp.gt.s32.totalorder %s1749_s7, 0  ;;  %s6673_s7 = smov (!%p1750_p3, %s1749_s7), 511 }
 0x28f   : >> { %5793 = sst [smem:[#allocation281_spill]] %s4013_s25  ;;  %s1796_s18 = sadd.s32 10, %s3959_s20 }
 0x290   : >> { %5794 = sst [smem:[#allocation282_spill]] %s6673_s7  ;;  %p1762_p7 = scmp.lt.s32.totalorder %s1761_s5, 511 }
 0x291   : >> { %s4018_s29 = scalar_select %p1754_p4, 1, 0 }
 0x292   : >> { %p1766_p8 = scmp.gt.s32.totalorder %s1761_s5, 0  ;;  %s6675_s5 = smov (!%p1762_p7, %s1761_s5), 511 }
 0x293   : >> { %5795 = sst [smem:[#allocation283_spill]] %s4018_s29  ;;  %s1808_s10 = sadd.s32 11, %s3959_s20 }
 0x294   : >> { %5796 = sst [smem:[#allocation284_spill]] %s6675_s5  ;;  %s1820_s7 = sadd.s32 12, %s3959_s20 }
 0x295   : >> { %s4023_s9 = scalar_select %p1766_p8, 1, 0 }
 0x296   : >> { %s1773_s2 = sld [smem:[#allocation5 + %s1772_s6]]  ;;  %s1832_s17 = sadd.s32 13, %s3959_s20 }
 0x297   : >> { %5797 = sst [smem:[#allocation285_spill]] %s4023_s9  ;;  %s1844_s6 = sadd.s32 14, %s3959_s20 }
 0x298   : >> { %s1785_s26 = sld [smem:[#allocation5 + %s1784_s30]]  ;;  %s4100_s25 = sadd.s32 96, %s3180_s8 }
 0x299   : >> { %s1797_s19 = sld [smem:[#allocation5 + %s1796_s18]] }
 0x29a   : >> { %s1809_s4 = sld [smem:[#allocation5 + %s1808_s10]] }
 0x29b   : >> { %s1821_s23 = sld [smem:[#allocation5 + %s1820_s7]] }
 0x29c   : >> { %p1774_p9 = scmp.lt.s32.totalorder %s1773_s2, 511  ;;  %p1778_p10 = scmp.gt.s32.totalorder %s1773_s2, 0 }
 0x29d   : >> { %s1845_s10 = sld [smem:[#allocation5 + %s1844_s6]] }
 0x29e   : >> { %p1786_p11 = scmp.lt.s32.totalorder %s1785_s26, 511  ;;  %p1790_p12 = scmp.gt.s32.totalorder %s1785_s26, 0 }
 0x29f   : >> { %s6677_s2 = smov (!%p1774_p9, %s1773_s2), 511  ;;  %p1798_p13 = scmp.lt.s32.totalorder %s1797_s19, 511 }
 0x2a0   : >> { %5798 = sst [smem:[#allocation286_spill]] %s6677_s2  ;;  %p1802_p0 = scmp.gt.s32.totalorder %s1797_s19, 0 }
 0x2a1   : >> { %s4033_s13 = scalar_select %p1778_p10, 1, 0 }
 0x2a2   : >> { %s6679_s26 = smov (!%p1786_p11, %s1785_s26), 511  ;;  %p1810_p1 = scmp.lt.s32.totalorder %s1809_s4, 511 }
 0x2a3   : >> { %5799 = sst [smem:[#allocation287_spill]] %s4033_s13  ;;  %p1814_p2 = scmp.gt.s32.totalorder %s1809_s4, 0 }
 0x2a4   : >> { %5800 = sst [smem:[#allocation288_spill]] %s6679_s26  ;;  %s6681_s19 = smov (!%p1798_p13, %s1797_s19), 511 }
 0x2a5   : >> { %s4038_s18 = scalar_select %p1790_p12, 1, 0 }
 0x2a6   : >> { %5802 = sst [smem:[#allocation290_spill]] %s6681_s19  ;;  %p1822_p3 = scmp.lt.s32.totalorder %s1821_s23, 511 }
 0x2a7   : >> { %5801 = sst [smem:[#allocation289_spill]] %s4038_s18  ;;  %p1826_p4 = scmp.gt.s32.totalorder %s1821_s23, 0 }
 0x2a8   : >> { %s4043_s7 = scalar_select %p1802_p0, 1, 0 }
 0x2a9   : >> { %s6683_s4 = smov (!%p1810_p1, %s1809_s4), 511  ;;  %s1833_s26 = sld [smem:[#allocation5 + %s1832_s17]] }
 0x2aa   : >> { %5803 = sst [smem:[#allocation291_spill]] %s4043_s7  ;;  %s6685_s23 = smov (!%p1822_p3, %s1821_s23), 511 }
 0x2ab   : >> { %5804 = sst [smem:[#allocation292_spill]] %s6683_s4  ;;  %s1856_s2 = sadd.s32 15, %s3959_s20 }
 0x2ac   : >> { %s4048_s27 = scalar_select %p1814_p2, 1, 0 }
 0x2ad   : >> { %5806 = sst [smem:[#allocation294_spill]] %s6685_s23  ;;  %p1846_p9 = scmp.lt.s32.totalorder %s1845_s10, 511 }
 0x2ae   : >> { %5805 = sst [smem:[#allocation293_spill]] %s4048_s27  ;;  %p1850_p10 = scmp.gt.s32.totalorder %s1845_s10, 0 }
 0x2af   : >> { %s4053_s13 = scalar_select %p1826_p4, 1, 0 }
 0x2b0   : >> { %s1857_s9 = sld [smem:[#allocation5 + %s1856_s2]]  ;;  %p1834_p7 = scmp.lt.s32.totalorder %s1833_s26, 511 }
 0x2b1   : >> { %5807 = sst [smem:[#allocation295_spill]] %s4053_s13  ;;  %p1838_p8 = scmp.gt.s32.totalorder %s1833_s26, 0 }
 0x2b2   : >> { %s6687_s26 = smov (!%p1834_p7, %s1833_s26), 511  ;;  %s4063_s17 = sadd.s32 48, %s3170_s16 }
 0x2b3   : >> { %5808 = sst [smem:[#allocation296_spill]] %s6687_s26  ;;  %s6689_s10 = smov (!%p1846_p9, %s1845_s10), 511 }
 0x2b4   : >> { %s4059_s30 = scalar_select %p1838_p8, 1, 0 }
 0x2b5   : >> { %5810 = sst [smem:[#allocation298_spill]] %s6689_s10  ;;  %s1881_s26 = sadd.s32 1, %s4063_s17 }
 0x2b6   : >> { %5809 = sst [smem:[#allocation297_spill]] %s4059_s30  ;;  %p1858_p11 = scmp.lt.s32.totalorder %s1857_s9, 511 }
 0x2b7   : >> { %s4067_s20 = scalar_select %p1850_p10, 1, 0 }
 0x2b8   : >> { %p1862_p12 = scmp.gt.s32.totalorder %s1857_s9, 0  ;;  %s1870_s6 = sld [smem:[#allocation4 + %s4063_s17]] }
 0x2b9   : >> { %5811 = sst [smem:[#allocation299_spill]] %s4067_s20  ;;  %s6691_s9 = smov (!%p1858_p11, %s1857_s9), 511 }
 0x2ba   : >> { %5812 = sst [smem:[#allocation300_spill]] %s6691_s9  ;;  %s1893_s4 = sadd.s32 2, %s4063_s17 }
 0x2bb   : >> { %s4073_s19 = scalar_select %p1862_p12, 1, 0 }
 0x2bc   : >> { %s1882_s23 = sld [smem:[#allocation4 + %s1881_s26]]  ;;  %s1905_s27 = sadd.s32 3, %s4063_s17 }
 0x2bd   : >> { %5813 = sst [smem:[#allocation301_spill]] %s4073_s19  ;;  %s1917_s9 = sadd.s32 4, %s4063_s17 }
 0x2be   : >> { %p1871_p13 = scmp.lt.s32.totalorder %s1870_s6, 511  ;;  %p1875_p0 = scmp.gt.s32.totalorder %s1870_s6, 0 }
 0x2bf   : >> { %s1894_s10 = sld [smem:[#allocation4 + %s1893_s4]]  ;;  %s1929_s30 = sadd.s32 5, %s4063_s17 }
 0x2c0   : >> { %s6693_s6 = smov (!%p1871_p13, %s1870_s6), 511  ;;  %s1906_s19 = sld [smem:[#allocation4 + %s1905_s27]] }
 0x2c1   : >> { %5814 = sst [smem:[#allocation302_spill]] %s6693_s6  ;;  %s1941_s7 = sadd.s32 6, %s4063_s17 }
 0x2c2   : >> { %s4082_s2 = scalar_select %p1875_p0, 1, 0 }
 0x2c3   : >> { %p1883_p1 = scmp.lt.s32.totalorder %s1882_s23, 511  ;;  %p1887_p2 = scmp.gt.s32.totalorder %s1882_s23, 0 }
 0x2c4   : >> { %5815 = sst [smem:[#allocation303_spill]] %s4082_s2  ;;  %s1953_s18 = sadd.s32 7, %s4063_s17 }
 0x2c5   : >> { %s6695_s23 = smov (!%p1883_p1, %s1882_s23), 511  ;;  %p1895_p3 = scmp.lt.s32.totalorder %s1894_s10, 511 }
 0x2c6   : >> { %5816 = sst [smem:[#allocation304_spill]] %s6695_s23  ;;  %p1899_p4 = scmp.gt.s32.totalorder %s1894_s10, 0 }
 0x2c7   : >> { %s4087_s26 = scalar_select %p1887_p2, 1, 0 }
 0x2c8   : >> { %s6697_s10 = smov (!%p1895_p3, %s1894_s10), 511  ;;  %s1918_s20 = sld [smem:[#allocation4 + %s1917_s9]] }
 0x2c9   : >> { %5817 = sst [smem:[#allocation305_spill]] %s4087_s26  ;;  %p1907_p7 = scmp.lt.s32.totalorder %s1906_s19, 511 }
 0x2ca   : >> { %5818 = sst [smem:[#allocation306_spill]] %s6697_s10  ;;  %p1911_p8 = scmp.gt.s32.totalorder %s1906_s19, 0 }
 0x2cb   : >> { %s4092_s4 = scalar_select %p1899_p4, 1, 0 }
 0x2cc   : >> { %s1930_s6 = sld [smem:[#allocation4 + %s1929_s30]]  ;;  %s6699_s19 = smov (!%p1907_p7, %s1906_s19), 511 }
 0x2cd   : >> { %5819 = sst [smem:[#allocation307_spill]] %s4092_s4  ;;  %s1977_s27 = sadd.s32 1, %s4100_s25 }
 0x2ce   : >> { %s1942_s5 = sld [smem:[#allocation4 + %s1941_s7]]  ;;  %p1919_p9 = scmp.lt.s32.totalorder %s1918_s20, 511 }
 0x2cf   : >> { %s1954_s29 = sld [smem:[#allocation4 + %s1953_s18]]  ;;  %p1923_p10 = scmp.gt.s32.totalorder %s1918_s20, 0 }
 0x2d0   : >> { %5820 = sst [smem:[#allocation308_spill]] %s6699_s19  ;;  %s6701_s20 = smov (!%p1919_p9, %s1918_s20), 511 }
 0x2d1   : >> { %s4104_s13 = scalar_select %p1911_p8, 1, 0 }
 0x2d2   : >> { %p1931_p11 = scmp.lt.s32.totalorder %s1930_s6, 511  ;;  %p1935_p12 = scmp.gt.s32.totalorder %s1930_s6, 0 }
 0x2d3   : >> { %5821 = sst [smem:[#allocation309_spill]] %s4104_s13  ;;  %s1989_s13 = sadd.s32 2, %s4100_s25 }
 0x2d4   : >> { %5822 = sst [smem:[#allocation310_spill]] %s6701_s20  ;;  %p1943_p13 = scmp.lt.s32.totalorder %s1942_s5, 511 }
 0x2d5   : >> { %s4109_s9 = scalar_select %p1923_p10, 1, 0 }
 0x2d6   : >> { %p1947_p0 = scmp.gt.s32.totalorder %s1942_s5, 0  ;;  %s6703_s6 = smov (!%p1931_p11, %s1930_s6), 511 }
 0x2d7   : >> { %5823 = sst [smem:[#allocation311_spill]] %s4109_s9  ;;  %p1955_p1 = scmp.lt.s32.totalorder %s1954_s29, 511 }
 0x2d8   : >> { %5824 = sst [smem:[#allocation312_spill]] %s6703_s6  ;;  %p1959_p2 = scmp.gt.s32.totalorder %s1954_s29, 0 }
 0x2d9   : >> { %s4114_s7 = scalar_select %p1935_p12, 1, 0 }
 0x2da   : >> { %s6705_s5 = smov (!%p1943_p13, %s1942_s5), 511  ;;  %s1966_s21 = sld [smem:[#allocation5 + %s4100_s25]] }
 0x2db   : >> { %5825 = sst [smem:[#allocation313_spill]] %s4114_s7  ;;  %s6707_s29 = smov (!%p1955_p1, %s1954_s29), 511 }
 0x2dc   : >> { %5826 = sst [smem:[#allocation314_spill]] %s6705_s5  ;;  %s2001_s30 = sadd.s32 3, %s4100_s25 }
 0x2dd   : >> { %s4119_s17 = scalar_select %p1947_p0, 1, 0 }
 0x2de   : >> { %s1978_s18 = sld [smem:[#allocation5 + %s1977_s27]]  ;;  %s2013_s7 = sadd.s32 4, %s4100_s25 }
 0x2df   : >> { %5827 = sst [smem:[#allocation315_spill]] %s4119_s17  ;;  %s2025_s9 = sadd.s32 5, %s4100_s25 }
 0x2e0   : >> { %5828 = sst [smem:[#allocation316_spill]] %s6707_s29  ;;  %p1967_p3 = scmp.lt.s32.totalorder %s1966_s21, 511 }
 0x2e1   : >> { %s4125_s20 = scalar_select %p1959_p2, 1, 0 }
 0x2e2   : >> { %s1990_s19 = sld [smem:[#allocation5 + %s1989_s13]]  ;;  %p1971_p4 = scmp.gt.s32.totalorder %s1966_s21, 0 }
 0x2e3   : >> { %5829 = sst [smem:[#allocation317_spill]] %s4125_s20  ;;  %s6709_s21 = smov (!%p1967_p3, %s1966_s21), 511 }
 0x2e4   : >> { %p1979_p7 = scmp.lt.s32.totalorder %s1978_s18, 511  ;;  %p1983_p8 = scmp.gt.s32.totalorder %s1978_s18, 0 }
 0x2e5   : >> { %s4131_s23 = scalar_select %p1971_p4, 1, 0 }
 0x2e6   : >> { %s6711_s18 = smov (!%p1979_p7, %s1978_s18), 511  ;;  %s2002_s29 = sld [smem:[#allocation5 + %s2001_s30]] }
 0x2e7   : >> { %s4137_s6 = scalar_select %p1983_p8, 1, 0 }
 0x2e8   : >> { %p1991_p9 = scmp.lt.s32.totalorder %s1990_s19, 511  ;;  %p1995_p10 = scmp.gt.s32.totalorder %s1990_s19, 0 }
 0x2e9   : >> { %s2014_s27 = sld [smem:[#allocation5 + %s2013_s7]]  ;;  %s2037_s10 = sadd.s32 6, %s4100_s25 }
 0x2ea   : >> { %s6713_s19 = smov (!%p1991_p9, %s1990_s19), 511  ;;  %s2026_s4 = sld [smem:[#allocation5 + %s2025_s9]] }
 0x2eb   : >> { %s4142_s17 = scalar_select %p1995_p10, 1, 0 }
 0x2ec   : >> { %p2003_p11 = scmp.lt.s32.totalorder %s2002_s29, 511  ;;  %p2007_p12 = scmp.gt.s32.totalorder %s2002_s29, 0 }
 0x2ed   : >> { %5830 = sst [smem:[#allocation318_spill]] %s4142_s17  ;;  %s2049_s13 = sadd.s32 7, %s4100_s25 }
 0x2ee   : >> { %s6715_s29 = smov (!%p2003_p11, %s2002_s29), 511  ;;  %s235_s5 = scalar_lea.vmem [#allocation6], %s6421_s11 }
 0x2ef   : >> { %5831 = sst [smem:[#allocation319_spill]] %s6715_s29  ;;  %p2015_p13 = scmp.lt.s32.totalorder %s2014_s27, 511  ;;  %v236_v0 = vld [vmem:[%s235_s5] sm:$0x1] }
 0x2f0   : >> { %s4151_s30 = scalar_select %p2007_p12, 1, 0 }
 0x2f1   : >> { %p2019_p0 = scmp.gt.s32.totalorder %s2014_s27, 0  ;;  %s6717_s27 = smov (!%p2015_p13, %s2014_s27), 511 }
 0x2f2   : >> { %5832 = sst [smem:[#allocation320_spill]] %s4151_s30  ;;  %p2027_p1 = scmp.lt.s32.totalorder %s2026_s4, 511 }
 0x2f3   : >> { %5833 = sst [smem:[#allocation321_spill]] %s6717_s27  ;;  %p2031_p2 = scmp.gt.s32.totalorder %s2026_s4, 0 }
 0x2f4   : >> { %s4156_s7 = scalar_select %p2019_p0, 1, 0 }
 0x2f5   : >> { %s6719_s4 = smov (!%p2027_p1, %s2026_s4), 511  ;;  %s5836_s26 = scvt.s32.f32 %s3231_s24 }
 0x2f6   : >> { %5834 = sst [smem:[#allocation322_spill]] %s6719_s4  ;;  %s247_s2 = scalar_lea.vmem [#allocation6], %s6423_s22 }
 0x2f7   : >> { %s4161_s20 = scalar_select %p2031_p2, 1, 0  ;;  %v240_v1 = vstv %s5836_s26  ;;  %v248_v2 = vld [vmem:[%s247_s2] sm:$0x1] }
 0x2f8   : >> { %s5837_s27 = scvt.s32.f32 %s3241_s15  ;;  %s2038_s30 = sld [smem:[#allocation5 + %s2037_s10]]  ;;  %v241_v4 = vmul.f32 %v240_v1, %v236_v0 }
 0x2f9   : >> { %5835 = sst [smem:[#allocation323_spill]] %s4161_s20  ;;  %s2061_s4 = sadd.s32 8, %s4100_s25 }
 0x2fa   : >> { %v252_v3 = vstv %s5837_s27  ;;  %s4170_s29 = sld [smem:[#allocation5 + %s2049_s13]]  ;;  %s2073_s17 = sadd.s32 9, %s4100_s25 }
 0x2fb   : >> { %v253_v5 = vmul.f32 %v252_v3, %v248_v2  ;;  %s4174_s24 = sld [smem:[#allocation5 + %s2061_s4]]  ;;  %s2085_s11 = sadd.s32 10, %s4100_s25 }
 0x2fc   : >> { %s259_s22 = scalar_lea.vmem [#allocation6], %s6425_s3  ;;  %s5838_s15 = scvt.s32.f32 %s3246_s28 }
 0x2fd   : >> { %v260_v6 = vld [vmem:[%s259_s22] sm:$0x1]  ;;  %s4181_s10 = sld [smem:[#allocation5 + %s2073_s17]]  ;;  %v254_v8 = vadd.f32 %v253_v5, %v241_v4  ;;  %s271_s3 = scalar_lea.vmem [#allocation6], %s6427_s12 }
 0x2fe   : >> { %v264_v7 = vstv %s5838_s15  ;;  %s4183_s2 = sld [smem:[#allocation5 + %s2085_s11]]  ;;  %p2039_p3 = scmp.lt.s32.totalorder %s2038_s30, 511  ;;  %v272_v10 = vld [vmem:[%s271_s3] sm:$0x1] }
 0x2ff   : >> { %p2043_p4 = scmp.gt.s32.totalorder %s2038_s30, 0  ;;  %v265_v9 = vmul.f32 %v264_v7, %v260_v6  ;;  %s5839_s28 = scvt.s32.f32 %s3251_s1 }
 0x300   : >> { %p2051_p7 = scmp.lt.s32.totalorder %s4170_s29, 511  ;;  %p2055_p8 = scmp.gt.s32.totalorder %s4170_s29, 0 }
 0x301   : >> { %v276_v11 = vstv %s5839_s28  ;;  %s6721_s30 = smov (!%p2039_p3, %s2038_s30), 511  ;;  %s5842_s17 = sld [smem:[#allocation40_spill]]  ;;  %v266_v12 = vadd.f32 %v265_v9, %v254_v8 }
 0x302   : >> { %5840 = sst [smem:[#allocation324_spill]] %s6721_s30  ;;  %v277_v13 = vmul.f32 %v276_v11, %v272_v10  ;;  %p2063_p9 = scmp.lt.s32.totalorder %s4174_s24, 511 }
 0x303   : >> { %s4193_s4 = scalar_select %p2043_p4, 1, 0 }
 0x304   : >> { %s5843_s13 = sld [smem:[#allocation41_spill]]  ;;  %p2067_p10 = scmp.gt.s32.totalorder %s4174_s24, 0  ;;  %v278_v16 = vadd.f32 %v277_v13, %v266_v12 }
 0x305   : >> { %5841 = sst [smem:[#allocation325_spill]] %s4193_s4  ;;  %s283_s12 = scalar_lea.vmem [#allocation6], %s6429_s0 }
 0x306   : >> { %v284_v14 = vld [vmem:[%s283_s12] sm:$0x1]  ;;  %s5844_s1 = scvt.s32.f32 %s3256_s14  ;;  %s5847_s15 = sld [smem:[#allocation42_spill]] }
 0x307   : >> { %s4204_s11 = scalar_select %p2051_p7, %s4170_s29, 511 }
 0x308   : >> { %v288_v15 = vstv %s5844_s1  ;;  %s4208_s22 = scalar_select %p2055_p8, 1, 0 }
 0x309   : >> { %5845 = sst [smem:[#allocation40_spill]] %s4204_s11  ;;  %v289_v17 = vmul.f32 %v288_v15, %v284_v14  ;;  %p2075_p11 = scmp.lt.s32.totalorder %s4181_s10, 511 }
 0x30a   : >> { %5846 = sst [smem:[#allocation41_spill]] %s4208_s22  ;;  %p2079_p12 = scmp.gt.s32.totalorder %s4181_s10, 0 }
 0x30b   : >> { %s5848_s28 = sld [smem:[#allocation43_spill]]  ;;  %s295_s14 = scalar_lea.vmem [#allocation6], %s5842_s17  ;;  %v290_v20 = vadd.f32 %v289_v17, %v278_v16 }
 0x30c   : >> { %s5849_s0 = sld [smem:[#allocation78_spill]]  ;;  %v296_v18 = vld [vmem:[%s295_s14] sm:$0x1]  ;;  %s5850_s12 = scvt.s32.f32 %s5843_s13 }
 0x30d   : >> { %s5851_s1 = sld [smem:[#allocation79_spill]]  ;;  %p2087_p13 = scmp.lt.s32.totalorder %s4183_s2, 511 }
 0x30e   : >> { %v300_v19 = vstv %s5850_s12  ;;  %s5852_s29 = sld [smem:[#allocation80_spill]]  ;;  %p2091_p0 = scmp.gt.s32.totalorder %s4183_s2, 0 }
 0x30f   : >> { %s4219_s5 = scalar_select %p2063_p9, %s4174_s24, 511  ;;  %v301_v21 = vmul.f32 %v300_v19, %v296_v18 }
 0x310   : >> { %s4223_s3 = scalar_select %p2067_p10, 1, 0 }
 0x311   : >> { %5853 = sst [smem:[#allocation42_spill]] %s4219_s5  ;;  %s307_s13 = scalar_lea.vmem [#allocation6], %s5847_s15  ;;  %v302_v32 = vadd.f32 %v301_v21, %v290_v20 }
 0x312   : >> { %5854 = sst [smem:[#allocation43_spill]] %s4223_s3  ;;  %v308_v22 = vld [vmem:[%s307_s13] sm:$0x1]  ;;  %s5859_s12 = scvt.s32.f32 %s5848_s28 }
 0x313   : >> { %s5855_s9 = sld [smem:[#allocation81_spill]]  ;;  %s524_s27 = scalar_lea.vmem [#allocation6], %s5849_s0 }
 0x314   : >> { %s5856_s26 = sld [smem:[#allocation24_spill]]  ;;  %v312_v23 = vstv %s5859_s12  ;;  %v525_v24 = vld [vmem:[%s524_s27] sm:$0x1]  ;;  %s5863_s22 = scvt.s32.f32 %s5851_s1 }
 0x315   : >> { %s5857_s17 = sld [smem:[#allocation25_spill]]  ;;  %s536_s30 = scalar_lea.vmem [#allocation6], %s5852_s29  ;;  %v313_v33 = vmul.f32 %v312_v23, %v308_v22 }
 0x316   : >> { %s5858_s14 = sld [smem:[#allocation26_spill]]  ;;  %v529_v25 = vstv %s5863_s22  ;;  %v537_v26 = vld [vmem:[%s536_s30] sm:$0x1]  ;;  %s5867_s13 = sadd.s32 11, %s4100_s25 }
 0x317   : >> { %s5860_s5 = sld [smem:[#allocation27_spill]]  ;;  %s5872_s30 = sadd.s32 12, %s4100_s25  ;;  %v530_v36 = vmul.f32 %v529_v25, %v525_v24  ;;  %v314_v44 = vadd.f32 %v313_v33, %v302_v32 }
 0x318   : >> { %s4234_s24 = scalar_select %p2075_p11, %s4181_s10, 511 }
 0x319   : >> { %s4238_s11 = scalar_select %p2079_p12, 1, 0 }
 0x31a   : >> { %5861 = sst [smem:[#allocation78_spill]] %s4234_s24  ;;  %s5866_s15 = scvt.s32.f32 %s5855_s9 }
 0x31b   : >> { %5862 = sst [smem:[#allocation79_spill]] %s4238_s11  ;;  %s139_s10 = scalar_lea.vmem [#allocation6], %s5856_s26 }
 0x31c   : >> { %s5864_s4 = sld [smem:[#allocation44_spill]]  ;;  %v541_v27 = vstv %s5866_s15  ;;  %v140_v28 = vld [vmem:[%s139_s10] sm:$0x1]  ;;  %s5868_s0 = scvt.s32.f32 %s5857_s17 }
 0x31d   : >> { %s5865_s20 = sld [smem:[#allocation45_spill]]  ;;  %s151_s1 = scalar_lea.vmem [#allocation6], %s5858_s14  ;;  %v542_v37 = vmul.f32 %v541_v27, %v537_v26 }
 0x31e   : >> { %s4249_s12 = sld [smem:[#allocation5 + %s5867_s13]]  ;;  %v144_v29 = vstv %s5868_s0  ;;  %v152_v30 = vld [vmem:[%s151_s1] sm:$0x1]  ;;  %s5870_s22 = scvt.s32.f32 %s5860_s5 }
 0x31f   : >> { %s5869_s27 = sld [smem:[#allocation82_spill]]  ;;  %v145_v38 = vmul.f32 %v144_v29, %v140_v28  ;;  %s2121_s1 = sadd.s32 13, %s4100_s25  ;;  %v543_v48 = vadd.f32 %v542_v37, %v530_v36 }
 0x320   : >> { %s5871_s29 = sld [smem:[#allocation83_spill]]  ;;  %v156_v31 = vstv %s5870_s22 }
 0x321   : >> { %s5873_s9 = sld [smem:[#allocation28_spill]]  ;;  %v157_v39 = vmul.f32 %v156_v31, %v152_v30 }
 0x322   : >> { %s4259_s15 = sld [smem:[#allocation5 + %s5872_s30]]  ;;  %s319_s13 = scalar_lea.vmem [#allocation6], %s5864_s4 }
 0x323   : >> { %s5874_s28 = sld [smem:[#allocation29_spill]]  ;;  %v320_v34 = vld [vmem:[%s319_s13] sm:$0x1]  ;;  %s5875_s26 = scvt.s32.f32 %s5865_s20  ;;  %v158_v50 = vadd.f32 %v157_v39, %v145_v38 }
 0x324   : >> { %s4267_s17 = scalar_select %p2087_p13, %s4183_s2, 511 }
 0x325   : >> { %v324_v35 = vstv %s5875_s26  ;;  %s5877_s5 = sld [smem:[#allocation46_spill]]  ;;  %s548_s0 = scalar_lea.vmem [#allocation6], %s5869_s27 }
 0x326   : >> { %5876 = sst [smem:[#allocation80_spill]] %s4267_s17  ;;  %v549_v40 = vld [vmem:[%s548_s0] sm:$0x1]  ;;  %s5880_s4 = scvt.s32.f32 %s5871_s29  ;;  %v325_v45 = vmul.f32 %v324_v35, %v320_v34 }
 0x327   : >> { %s4271_s14 = scalar_select %p2091_p0, 1, 0 }
 0x328   : >> { %s5879_s10 = sld [smem:[#allocation47_spill]]  ;;  %v553_v41 = vstv %s5880_s4  ;;  %s163_s22 = scalar_lea.vmem [#allocation6], %s5873_s9  ;;  %v326_v56 = vadd.f32 %v325_v45, %v314_v44 }
 0x329   : >> { %5878 = sst [smem:[#allocation81_spill]] %s4271_s14  ;;  %v164_v42 = vld [vmem:[%s163_s22] sm:$0x1]  ;;  %s5881_s30 = scvt.s32.f32 %s5874_s28  ;;  %v554_v49 = vmul.f32 %v553_v41, %v549_v40 }
 0x32a   : >> { %s5882_s13 = sld [smem:[#allocation84_spill]]  ;;  %p2099_p1 = scmp.lt.s32.totalorder %s4249_s12, 511 }
 0x32b   : >> { %v168_v43 = vstv %s5881_s30  ;;  %s5883_s2 = sld [smem:[#allocation85_spill]]  ;;  %s331_s27 = scalar_lea.vmem [#allocation6], %s5877_s5  ;;  %v555_v60 = vadd.f32 %v554_v49, %v543_v48 }
 0x32c   : >> { %s4281_s26 = sld [smem:[#allocation5 + %s2121_s1]]  ;;  %v332_v46 = vld [vmem:[%s331_s27] sm:$0x1]  ;;  %p2103_p2 = scmp.gt.s32.totalorder %s4249_s12, 0  ;;  %v169_v51 = vmul.f32 %v168_v43, %v164_v42 }
 0x32d   : >> { %s5884_s17 = sld [smem:[#allocation30_spill]]  ;;  %p2111_p3 = scmp.lt.s32.totalorder %s4259_s15, 511 }
 0x32e   : >> { %s5885_s29 = scvt.s32.f32 %s5879_s10  ;;  %s5886_s0 = sld [smem:[#allocation31_spill]]  ;;  %v170_v62 = vadd.f32 %v169_v51, %v158_v50 }
 0x32f   : >> { %s5887_s9 = sld [smem:[#allocation48_spill]]  ;;  %p2115_p4 = scmp.gt.s32.totalorder %s4259_s15, 0 }
 0x330   : >> { %v336_v47 = vstv %s5885_s29  ;;  %s5888_s28 = sld [smem:[#allocation49_spill]]  ;;  %s560_s4 = scalar_lea.vmem [#allocation6], %s5882_s13 }
 0x331   : >> { %v561_v52 = vld [vmem:[%s560_s4] sm:$0x1]  ;;  %s5889_s5 = scvt.s32.f32 %s5883_s2  ;;  %s5891_s22 = sld [smem:[#allocation86_spill]]  ;;  %v337_v57 = vmul.f32 %v336_v47, %v332_v46 }
 0x332   : >> { %s4294_s10 = scalar_select %p2099_p1, %s4249_s12, 511 }
 0x333   : >> { %v565_v53 = vstv %s5889_s5  ;;  %s175_s1 = scalar_lea.vmem [#allocation6], %s5884_s17  ;;  %s5893_s27 = sld [smem:[#allocation87_spill]]  ;;  %v338_v4 = vadd.f32 %v337_v57, %v326_v56 }
 0x334   : >> { %5890 = sst [smem:[#allocation24_spill]] %s4294_s10  ;;  %v176_v54 = vld [vmem:[%s175_s1] sm:$0x1]  ;;  %s5892_s30 = scvt.s32.f32 %s5886_s0  ;;  %v566_v61 = vmul.f32 %v565_v53, %v561_v52 }
 0x335   : >> { %s5894_s29 = sld [smem:[#allocation32_spill]]  ;;  %s343_s4 = scalar_lea.vmem [#allocation6], %s5887_s9 }
 0x336   : >> { %v180_v55 = vstv %s5892_s30  ;;  %s4301_s13 = scalar_select %p2103_p2, 1, 0  ;;  %v344_v58 = vld [vmem:[%s343_s4] sm:$0x1]  ;;  %v567_v8 = vadd.f32 %v566_v61, %v555_v60 }
 0x337   : >> { %s5896_s2 = sld [smem:[#allocation33_spill]]  ;;  %s5897_s5 = scvt.s32.f32 %s5888_s28  ;;  %v181_v63 = vmul.f32 %v180_v55, %v176_v54 }
 0x338   : >> { %5895 = sst [smem:[#allocation25_spill]] %s4301_s13  ;;  %p2123_p7 = scmp.lt.s32.totalorder %s4281_s26, 511 }
 0x339   : >> { %v348_v59 = vstv %s5897_s5  ;;  %s5898_s17 = sld [smem:[#allocation50_spill]]  ;;  %s2133_s1 = sadd.s32 14, %s4100_s25  ;;  %v182_v10 = vadd.f32 %v181_v63, %v170_v62 }
 0x33a   : >> { %s5899_s0 = sld [smem:[#allocation51_spill]]  ;;  %s572_s12 = scalar_lea.vmem [#allocation6], %s5891_s22  ;;  %v349_v5 = vmul.f32 %v348_v59, %v344_v58 }
 0x33b   : >> { %v573_v0 = vld [vmem:[%s572_s12] sm:$0x1]  ;;  %s5900_s30 = scvt.s32.f32 %s5893_s27  ;;  %s187_s28 = scalar_lea.vmem [#allocation6], %s5894_s29 }
 0x33c   : >> { %s4315_s9 = scalar_select %p2111_p3, %s4259_s15, 511  ;;  %v188_v2 = vld [vmem:[%s187_s28] sm:$0x1]  ;;  %v350_v14 = vadd.f32 %v349_v5, %v338_v4 }
 0x33d   : >> { %v577_v1 = vstv %s5900_s30  ;;  %s5902_s4 = sld [smem:[#allocation88_spill]]  ;;  %s5903_s5 = scvt.s32.f32 %s5896_s2 }
 0x33e   : >> { %5901 = sst [smem:[#allocation26_spill]] %s4315_s9  ;;  %p2127_p8 = scmp.gt.s32.totalorder %s4281_s26, 0  ;;  %v578_v9 = vmul.f32 %v577_v1, %v573_v0 }
 0x33f   : >> { %v192_v3 = vstv %s5903_s5  ;;  %s5904_s20 = sld [smem:[#allocation89_spill]]  ;;  %s355_s22 = scalar_lea.vmem [#allocation6], %s5898_s17 }
 0x340   : >> { %s4322_s10 = scalar_select %p2115_p4, 1, 0  ;;  %v356_v6 = vld [vmem:[%s355_s22] sm:$0x1]  ;;  %v193_v11 = vmul.f32 %v192_v3, %v188_v2  ;;  %v579_v20 = vadd.f32 %v578_v9, %v567_v8 }
 0x341   : >> { %s5906_s27 = scvt.s32.f32 %s5899_s0  ;;  %s5907_s12 = sld [smem:[#allocation34_spill]] }
 0x342   : >> { %5905 = sst [smem:[#allocation27_spill]] %s4322_s10  ;;  %s6723_s26 = smov (!%p2123_p7, %s4281_s26), 511  ;;  %v194_v26 = vadd.f32 %v193_v11, %v182_v10 }
 0x343   : >> { %v360_v7 = vstv %s5906_s27  ;;  %s5908_s9 = sld [smem:[#allocation35_spill]]  ;;  %s584_s15 = scalar_lea.vmem [#allocation6], %s5902_s4 }
 0x344   : >> { %s5909_s29 = sld [smem:[#allocation52_spill]]  ;;  %v585_v12 = vld [vmem:[%s584_s15] sm:$0x1]  ;;  %v361_v15 = vmul.f32 %v360_v7, %v356_v6 }
 0x345   : >> { %s5910_s2 = sld [smem:[#allocation53_spill]]  ;;  %s5911_s17 = scvt.s32.f32 %s5904_s20 }
 0x346   : >> { %s4329_s28 = sld [smem:[#allocation5 + %s2133_s1]]  ;;  %v362_v29 = vadd.f32 %v361_v15, %v350_v14 }
 0x347   : >> { %s5912_s5 = sld [smem:[#allocation126_spill]]  ;;  %v589_v13 = vstv %s5911_s17  ;;  %s199_s30 = scalar_lea.vmem [#allocation6], %s5907_s12 }
 0x348   : >> { %5913 = sst [smem:[#allocation44_spill]] %s6723_s26  ;;  %v200_v16 = vld [vmem:[%s199_s30] sm:$0x1]  ;;  %s2145_s26 = sadd.s32 15, %s4100_s25  ;;  %v590_v21 = vmul.f32 %v589_v13, %v585_v12 }
 0x349   : >> { %s5914_s0 = sld [smem:[#allocation127_spill]]  ;;  %s5918_s13 = scvt.s32.f32 %s5908_s9 }
 0x34a   : >> { %s5915_s22 = sld [smem:[#allocation128_spill]]  ;;  %s367_s4 = scalar_lea.vmem [#allocation6], %s5909_s29  ;;  %v591_v40 = vadd.f32 %v590_v21, %v579_v20 }
 0x34b   : >> { %s4339_s27 = scalar_select %p2127_p8, 1, 0  ;;  %v204_v17 = vstv %s5918_s13  ;;  %v368_v18 = vld [vmem:[%s367_s4] sm:$0x1] }
 0x34c   : >> { %s5917_s1 = sld [smem:[#allocation129_spill]]  ;;  %s5920_s20 = scvt.s32.f32 %s5910_s2  ;;  %v205_v35 = vmul.f32 %v204_v17, %v200_v16 }
 0x34d   : >> { %5916 = sst [smem:[#allocation45_spill]] %s4339_s27  ;;  %s813_s24 = scalar_lea.vmem [#allocation6], %s5912_s5 }
 0x34e   : >> { %s5919_s14 = sld [smem:[#allocation90_spill]]  ;;  %v372_v19 = vstv %s5920_s20  ;;  %v814_v22 = vld [vmem:[%s813_s24] sm:$0x1]  ;;  %p2135_p9 = scmp.lt.s32.totalorder %s4329_s28, 511  ;;  %v206_v54 = vadd.f32 %v205_v35, %v194_v26 }
 0x34f   : >> { %s5921_s15 = sld [smem:[#allocation91_spill]]  ;;  %s5923_s3 = scvt.s32.f32 %s5914_s0  ;;  %v373_v30 = vmul.f32 %v372_v19, %v368_v18 }
 0x350   : >> { %s5922_s11 = sld [smem:[#allocation62_spill]]  ;;  %s825_s13 = scalar_lea.vmem [#allocation6], %s5915_s22 }
 0x351   : >> { %s5924_s12 = sld [smem:[#allocation63_spill]]  ;;  %v818_v23 = vstv %s5923_s3  ;;  %v826_v24 = vld [vmem:[%s825_s13] sm:$0x1]  ;;  %s4362_s0 = sadd.s32 56, %s3170_s16  ;;  %v374_v50 = vadd.f32 %v373_v30, %v362_v29 }
 0x352   : >> { %s5925_s9 = sld [smem:[#allocation64_spill]]  ;;  %s5926_s30 = scvt.s32.f32 %s5917_s1  ;;  %v819_v38 = vmul.f32 %v818_v23, %v814_v22 }
 0x353   : >> { %s5927_s29 = sld [smem:[#allocation65_spill]]  ;;  %p2139_p10 = scmp.gt.s32.totalorder %s4329_s28, 0 }
 0x354   : >> { %v830_v25 = vstv %s5926_s30  ;;  %s4355_s2 = sld [smem:[#allocation5 + %s2145_s26]]  ;;  %s596_s25 = scalar_lea.vmem [#allocation6], %s5919_s14 }
 0x355   : >> { %s5928_s4 = sld [smem:[#allocation54_spill]]  ;;  %v597_v27 = vld [vmem:[%s596_s25] sm:$0x1]  ;;  %s5929_s20 = scvt.s32.f32 %s5921_s15  ;;  %v831_v39 = vmul.f32 %v830_v25, %v826_v24 }
 0x356   : >> { %s5930_s24 = sld [smem:[#allocation55_spill]]  ;;  %s428_s3 = scalar_lea.vmem [#allocation6], %s5922_s11 }
 0x357   : >> { %v601_v28 = vstv %s5929_s20  ;;  %v429_v31 = vld [vmem:[%s428_s3] sm:$0x1]  ;;  %s5931_s22 = scvt.s32.f32 %s5924_s12  ;;  %s5932_s26 = sld [smem:[#allocation130_spill]]  ;;  %v832_v55 = vadd.f32 %v831_v39, %v819_v38 }
 0x358   : >> { %s440_s1 = scalar_lea.vmem [#allocation6], %s5925_s9  ;;  %s5934_s13 = sld [smem:[#allocation131_spill]]  ;;  %v602_v41 = vmul.f32 %v601_v28, %v597_v27 }
 0x359   : >> { %v433_v32 = vstv %s5931_s22  ;;  %v441_v33 = vld [vmem:[%s440_s1] sm:$0x1]  ;;  %s5933_s14 = scvt.s32.f32 %s5927_s29  ;;  %s5935_s15 = sld [smem:[#allocation36_spill]] }
 0x35a   : >> { %s5936_s16 = sld [smem:[#allocation37_spill]]  ;;  %s4379_s29 = sadd.s32 112, %s3180_s8  ;;  %v434_v46 = vmul.f32 %v433_v32, %v429_v31  ;;  %v603_v58 = vadd.f32 %v602_v41, %v591_v40 }
 0x35b   : >> { %v445_v34 = vstv %s5933_s14  ;;  %s379_s30 = scalar_lea.vmem [#allocation6], %s5928_s4  ;;  %s5938_s11 = sld [smem:[#allocation92_spill]] }
 0x35c   : >> { %v380_v36 = vld [vmem:[%s379_s30] sm:$0x1]  ;;  %s5937_s25 = scvt.s32.f32 %s5930_s24  ;;  %s5939_s12 = sld [smem:[#allocation93_spill]]  ;;  %v446_v47 = vmul.f32 %v445_v34, %v441_v33 }
 0x35d   : >> { %s4376_s9 = sld [smem:[#allocation4 + %s4362_s0]]  ;;  %s837_s3 = scalar_lea.vmem [#allocation6], %s5932_s26 }
 0x35e   : >> { %v384_v37 = vstv %s5937_s25  ;;  %s5940_s20 = sld [smem:[#allocation66_spill]]  ;;  %v838_v42 = vld [vmem:[%s837_s3] sm:$0x1]  ;;  %s5941_s22 = scvt.s32.f32 %s5934_s13  ;;  %v447_v0 = vadd.f32 %v446_v47, %v434_v46 }
 0x35f   : >> { %s5942_s1 = sld [smem:[#allocation67_spill]]  ;;  %s211_s24 = scalar_lea.vmem [#allocation6], %s5935_s15  ;;  %v385_v51 = vmul.f32 %v384_v37, %v380_v36 }
 0x360   : >> { %v842_v43 = vstv %s5941_s22  ;;  %s4387_s4 = scalar_select %p2135_p9, %s4329_s28, 511  ;;  %v212_v44 = vld [vmem:[%s211_s24] sm:$0x1] }
 0x361   : >> { %s5944_s14 = scvt.s32.f32 %s5936_s16  ;;  %s608_s8 = scalar_lea.vmem [#allocation6], %s5938_s11  ;;  %v843_v56 = vmul.f32 %v842_v43, %v838_v42  ;;  %v386_v5 = vadd.f32 %v385_v51, %v374_v50 }
 0x362   : >> { %5943 = sst [smem:[#allocation82_spill]] %s4387_s4  ;;  %v609_v48 = vld [vmem:[%s608_s8] sm:$0x1]  ;;  %s5945_s30 = scvt.s32.f32 %s5939_s12 }
 0x363   : >> { %v216_v45 = vstv %s5944_s14  ;;  %s5946_s26 = sld [smem:[#allocation132_spill]]  ;;  %p2147_p11 = scmp.lt.s32.totalorder %s4355_s2, 511  ;;  %v844_v8 = vadd.f32 %v843_v56, %v832_v55 }
 0x364   : >> { %v613_v49 = vstv %s5945_s30  ;;  %s4397_s13 = scalar_select %p2139_p10, 1, 0  ;;  %v217_v57 = vmul.f32 %v216_v45, %v212_v44 }
 0x365   : >> { %s5948_s25 = sld [smem:[#allocation133_spill]]  ;;  %s452_s3 = scalar_lea.vmem [#allocation6], %s5940_s20  ;;  %v614_v59 = vmul.f32 %v613_v49, %v609_v48 }
 0x366   : >> { %5947 = sst [smem:[#allocation83_spill]] %s4397_s13  ;;  %v453_v52 = vld [vmem:[%s452_s3] sm:$0x1]  ;;  %s5950_s16 = scvt.s32.f32 %s5942_s1  ;;  %v4444_v20 = vadd.f32 %v217_v57, %v206_v54 }
 0x367   : >> { %s5949_s15 = sld [smem:[#allocation56_spill]]  ;;  %p2151_p12 = scmp.gt.s32.totalorder %s4355_s2, 0  ;;  %v615_v16 = vadd.f32 %v614_v59, %v603_v58 }
 0x368   : >> { %v457_v53 = vstv %s5950_s16  ;;  %s5951_s22 = sld [smem:[#allocation57_spill]]  ;;  %p2160_p13 = scmp.lt.s32.totalorder %s4376_s9, 511 }
 0x369   : >> { %s5952_s11 = sld [smem:[#allocation94_spill]]  ;;  %s849_s20 = scalar_lea.vmem [#allocation6], %s5946_s26  ;;  %v458_v1 = vmul.f32 %v457_v53, %v453_v52 }
 0x36a   : >> { %s5953_s28 = sld [smem:[#allocation95_spill]]  ;;  %v850_v60 = vld [vmem:[%s849_s20] sm:$0x1]  ;;  %p2164_p0 = scmp.gt.s32.totalorder %s4376_s9, 0 }
 0x36b   : >> { %s5954_s12 = sld [smem:[#allocation39_spill]]  ;;  %s5956_s8 = scvt.s32.f32 %s5948_s25  ;;  %v459_v21 = vadd.f32 %v458_v1, %v447_v0 }
 0x36c   : >> { %s5955_s14 = sld [smem:[#allocation68_spill]] }
 0x36d   : >> { %s5957_s1 = sld [smem:[#allocation69_spill]]  ;;  %v854_v61 = vstv %s5956_s8  ;;  %s391_s3 = scalar_lea.vmem [#allocation6], %s5949_s15 }
 0x36e   : >> { %s4409_s30 = scalar_select %p2147_p11, %s4355_s2, 511  ;;  %v392_v62 = vld [vmem:[%s391_s3] sm:$0x1]  ;;  %v855_v9 = vmul.f32 %v854_v61, %v850_v60 }
 0x36f   : >> { %s5959_s16 = scvt.s32.f32 %s5951_s22  ;;  %s5960_s5 = sld [smem:[#allocation174_spill]] }
 0x370   : >> { %5958 = sst [smem:[#allocation28_spill]] %s4409_s30  ;;  %s620_s24 = scalar_lea.vmem [#allocation6], %s5952_s11  ;;  %v856_v32 = vadd.f32 %v855_v9, %v844_v8 }
 0x371   : >> { %v396_v63 = vstv %s5959_s16  ;;  %s5961_s17 = sld [smem:[#allocation175_spill]]  ;;  %v621_v2 = vld [vmem:[%s620_s24] sm:$0x1]  ;;  %s5963_s26 = scvt.s32.f32 %s5953_s28 }
 0x372   : >> { %s5962_s4 = sld [smem:[#allocation176_spill]]  ;;  %s5966_s8 = scvt.s32.f32 %s5954_s12  ;;  %v397_v15 = vmul.f32 %v396_v63, %v392_v62 }
 0x373   : >> { %v625_v3 = vstv %s5963_s26  ;;  %s5964_s25 = sld [smem:[#allocation177_spill]]  ;;  %s464_s22 = scalar_lea.vmem [#allocation6], %s5955_s14 }
 0x374   : >> { %s4419_s20 = scalar_select %p2151_p12, 1, 0  ;;  %v228_v4 = vstv %s5966_s8  ;;  %v465_v6 = vld [vmem:[%s464_s22] sm:$0x1]  ;;  %v626_v17 = vmul.f32 %v625_v3, %v621_v2  ;;  %v398_v36 = vadd.f32 %v397_v15, %v386_v5 }
 0x375   : >> { %s5967_s15 = sld [smem:[#allocation38_spill]]  ;;  %s5968_s3 = scvt.s32.f32 %s5957_s1 }
 0x376   : >> { %5965 = sst [smem:[#allocation29_spill]] %s4419_s20  ;;  %s1102_s2 = scalar_lea.vmem [#allocation6], %s5960_s5  ;;  %v627_v37 = vadd.f32 %v626_v17, %v615_v16 }
 0x377   : >> { %v469_v7 = vstv %s5968_s3  ;;  %s5969_s30 = sld [smem:[#allocation134_spill]]  ;;  %v1103_v10 = vld [vmem:[%s1102_s2] sm:$0x1]  ;;  %s5971_s11 = scvt.s32.f32 %s5961_s17 }
 0x378   : >> { %s5970_s24 = sld [smem:[#allocation135_spill]]  ;;  %s1114_s28 = scalar_lea.vmem [#allocation6], %s5962_s4  ;;  %v470_v22 = vmul.f32 %v469_v7, %v465_v6 }
 0x379   : >> { %v1107_v11 = vstv %s5971_s11  ;;  %s5972_s12 = sld [smem:[#allocation96_spill]]  ;;  %v1115_v12 = vld [vmem:[%s1114_s28] sm:$0x1]  ;;  %s5973_s26 = scvt.s32.f32 %s5964_s25 }
 0x37a   : >> { %s5974_s14 = sld [smem:[#allocation97_spill]]  ;;  %v1108_v29 = vmul.f32 %v1107_v11, %v1103_v10  ;;  %v471_v42 = vadd.f32 %v470_v22, %v459_v21 }
 0x37b   : >> { %v1119_v13 = vstv %s5973_s26  ;;  %s223_s1 = scalar_lea.vmem [#allocation6], %s5967_s15  ;;  %s5975_s8 = sld [smem:[#allocation58_spill]] }
 0x37c   : >> { %v224_v14 = vld [vmem:[%s223_s1] sm:$0x1]  ;;  %s5976_s22 = sld [smem:[#allocation59_spill]]  ;;  %v1120_v30 = vmul.f32 %v1119_v13, %v1115_v12 }
 0x37d   : >> { %s5977_s3 = sld [smem:[#allocation70_spill]]  ;;  %s861_s5 = scalar_lea.vmem [#allocation6], %s5969_s30  ;;  %v4464_v31 = vmul.f32 %v228_v4, %v224_v14 }
 0x37e   : >> { %s5978_s2 = sld [smem:[#allocation71_spill]]  ;;  %v862_v18 = vld [vmem:[%s861_s5] sm:$0x1]  ;;  %s5979_s17 = scvt.s32.f32 %s5970_s24  ;;  %v1121_v50 = vadd.f32 %v1120_v30, %v1108_v29 }
 0x37f   : >> { %s4442_s4 = scalar_select %p2160_p13, %s4376_s9, 511 }
 0x380   : >> { %v866_v19 = vstv %s5979_s17  ;;  %s632_s25 = scalar_lea.vmem [#allocation6], %s5972_s12  ;;  %s5981_s15 = scvt.s32.f32 %s5974_s14 }
 0x381   : >> { %5980 = sst [smem:[#allocation46_spill]] %s4442_s4  ;;  %v633_v23 = vld [vmem:[%s632_s25] sm:$0x1]  ;;  %s403_s24 = scalar_lea.vmem [#allocation6], %s5975_s8  ;;  %v867_v33 = vmul.f32 %v866_v19, %v862_v18 }
 0x382   : >> { %s5982_s11 = sld [smem:[#allocation178_spill]]  ;;  %v637_v24 = vstv %s5981_s15  ;;  %v404_v25 = vld [vmem:[%s403_s24] sm:$0x1]  ;;  %s5985_s26 = scvt.s32.f32 %s5976_s22 }
 0x383   : >> { %s4451_s30 = scalar_select %p2164_p0, 1, 0  ;;  %v638_v38 = vmul.f32 %v637_v24, %v633_v23  ;;  %v868_v54 = vadd.f32 %v867_v33, %v856_v32 }
 0x384   : >> { %s5984_s28 = sld [smem:[#allocation179_spill]]  ;;  %v408_v26 = vstv %s5985_s26  ;;  %s476_s1 = scalar_lea.vmem [#allocation6], %s5977_s3 }
 0x385   : >> { %5983 = sst [smem:[#allocation47_spill]] %s4451_s30  ;;  %v477_v27 = vld [vmem:[%s476_s1] sm:$0x1]  ;;  %s5986_s5 = scvt.s32.f32 %s5978_s2  ;;  %v409_v41 = vmul.f32 %v408_v26, %v404_v25  ;;  %v639_v59 = vadd.f32 %v638_v38, %v627_v37  ;;  %v4558_v38 = vadd.f32 %v4464_v31, %v4444_v20 }
 0x386   : >> { %s5987_s17 = sld [smem:[#allocation136_spill]]  ;;  %s5989_s25 = sadd.s32 1, %s4362_s0 }
 0x387   : >> { %v481_v28 = vstv %s5986_s5  ;;  %s5988_s12 = sld [smem:[#allocation137_spill]]  ;;  %s2182_s2 = sadd.s32 2, %s4362_s0  ;;  %v410_v10 = vadd.f32 %v409_v41, %v398_v36 }
 0x388   : >> { %s4462_s9 = sld [smem:[#allocation4 + %s5989_s25]]  ;;  %s1126_s22 = scalar_lea.vmem [#allocation6], %s5982_s11  ;;  %v482_v43 = vmul.f32 %v481_v28, %v477_v27 }
 0x389   : >> { %s5990_s8 = sld [smem:[#allocation98_spill]]  ;;  %v1127_v34 = vld [vmem:[%s1126_s22] sm:$0x1]  ;;  %s2194_s11 = sadd.s32 3, %s4362_s0 }
 0x38a   : >> { %s5991_s3 = scvt.s32.f32 %s5984_s28  ;;  %s5992_s15 = sld [smem:[#allocation99_spill]]  ;;  %v483_v63 = vadd.f32 %v482_v43, %v471_v42 }
 0x38b   : >> { %s5993_s24 = sld [smem:[#allocation110_spill]] }
 0x38c   : >> { %v1131_v35 = vstv %s5991_s3  ;;  %s5994_s26 = sld [smem:[#allocation111_spill]]  ;;  %s873_s1 = scalar_lea.vmem [#allocation6], %s5987_s17 }
 0x38d   : >> { %s5995_s5 = sld [smem:[#allocation112_spill]]  ;;  %v874_v39 = vld [vmem:[%s873_s1] sm:$0x1]  ;;  %s5996_s25 = scvt.s32.f32 %s5988_s12  ;;  %v1132_v51 = vmul.f32 %v1131_v35, %v1127_v34 }
 0x38e   : >> { %s5997_s14 = sld [smem:[#allocation113_spill]]  ;;  %s2206_s17 = sadd.s32 4, %s4362_s0 }
 0x38f   : >> { %v878_v40 = vstv %s5996_s25  ;;  %s4473_s16 = sld [smem:[#allocation4 + %s2182_s2]]  ;;  %s644_s22 = scalar_lea.vmem [#allocation6], %s5990_s8  ;;  %v1133_v8 = vadd.f32 %v1132_v51, %v1121_v50 }
 0x390   : >> { %s5998_s28 = sld [smem:[#allocation72_spill]]  ;;  %v645_v44 = vld [vmem:[%s644_s22] sm:$0x1]  ;;  %s5999_s3 = scvt.s32.f32 %s5992_s15  ;;  %v879_v55 = vmul.f32 %v878_v40, %v874_v39 }
 0x391   : >> { %s6000_s20 = sld [smem:[#allocation73_spill]]  ;;  %s717_s12 = scalar_lea.vmem [#allocation6], %s5993_s24 }
 0x392   : >> { %v649_v45 = vstv %s5999_s3  ;;  %s4479_s13 = sld [smem:[#allocation4 + %s2194_s11]]  ;;  %v718_v46 = vld [vmem:[%s717_s12] sm:$0x1]  ;;  %s6002_s25 = scvt.s32.f32 %s5994_s26  ;;  %v880_v11 = vadd.f32 %v879_v55, %v868_v54 }
 0x393   : >> { %s6001_s1 = sld [smem:[#allocation180_spill]]  ;;  %s729_s27 = scalar_lea.vmem [#allocation6], %s5995_s5  ;;  %v650_v60 = vmul.f32 %v649_v45, %v645_v44 }
 0x394   : >> { %s6003_s2 = sld [smem:[#allocation181_spill]]  ;;  %v722_v47 = vstv %s6002_s25  ;;  %v730_v48 = vld [vmem:[%s729_s27] sm:$0x1]  ;;  %s6004_s10 = scvt.s32.f32 %s5997_s14 }
 0x395   : >> { %s6005_s4 = sld [smem:[#allocation61_spill]]  ;;  %s2218_s11 = sadd.s32 5, %s4362_s0  ;;  %v723_v2 = vmul.f32 %v722_v47, %v718_v46  ;;  %v651_v17 = vadd.f32 %v650_v60, %v639_v59 }
 0x396   : >> { %v734_v49 = vstv %s6004_s10  ;;  %s6006_s8 = sld [smem:[#allocation138_spill]]  ;;  %s488_s3 = scalar_lea.vmem [#allocation6], %s5998_s28 }
 0x397   : >> { %s4488_s15 = sld [smem:[#allocation4 + %s2206_s17]]  ;;  %v489_v52 = vld [vmem:[%s488_s3] sm:$0x1]  ;;  %s6008_s24 = scvt.s32.f32 %s6000_s20  ;;  %v735_v3 = vmul.f32 %v734_v49, %v730_v48 }
 0x398   : >> { %s6007_s22 = sld [smem:[#allocation139_spill]]  ;;  %s2230_s17 = sadd.s32 6, %s4362_s0 }
 0x399   : >> { %v493_v53 = vstv %s6008_s24  ;;  %s6009_s26 = sld [smem:[#allocation100_spill]]  ;;  %s1138_s27 = scalar_lea.vmem [#allocation6], %s6001_s1  ;;  %v736_v25 = vadd.f32 %v735_v3, %v723_v2 }
 0x39a   : >> { %s6010_s14 = sld [smem:[#allocation101_spill]]  ;;  %v1139_v56 = vld [vmem:[%s1138_s27] sm:$0x1]  ;;  %s6011_s10 = scvt.s32.f32 %s6003_s2  ;;  %v494_v5 = vmul.f32 %v493_v53, %v489_v52 }
 0x39b   : >> { %s4497_s5 = sld [smem:[#allocation4 + %s2218_s11]]  ;;  %s6012_s12 = scvt.s32.f32 %s6005_s4 }
 0x39c   : >> { %v1143_v57 = vstv %s6011_s10  ;;  %s6013_s28 = sld [smem:[#allocation60_spill]]  ;;  %s885_s20 = scalar_lea.vmem [#allocation6], %s6006_s8  ;;  %v495_v27 = vadd.f32 %v494_v5, %v483_v63 }
 0x39d   : >> { %v420_v58 = vstv %s6012_s12  ;;  %s6014_s25 = sld [smem:[#allocation114_spill]]  ;;  %v886_v61 = vld [vmem:[%s885_s20] sm:$0x1]  ;;  %p2172_p1 = scmp.lt.s32.totalorder %s4462_s9, 511  ;;  %v1144_v9 = vmul.f32 %v1143_v57, %v1139_v56 }
 0x39e   : >> { %s6015_s3 = scvt.s32.f32 %s6007_s22  ;;  %s6016_s24 = sld [smem:[#allocation115_spill]] }
 0x39f   : >> { %p2176_p2 = scmp.gt.s32.totalorder %s4462_s9, 0  ;;  %s656_s1 = scalar_lea.vmem [#allocation6], %s6009_s26  ;;  %v1145_v30 = vadd.f32 %v1144_v9, %v1133_v8 }
 0x3a0   : >> { %v890_v62 = vstv %s6015_s3  ;;  %v657_v0 = vld [vmem:[%s656_s1] sm:$0x1]  ;;  %s6017_s2 = scvt.s32.f32 %s6010_s14  ;;  %s6018_s4 = sld [smem:[#allocation182_spill]] }
 0x3a1   : >> { %s6019_s27 = sld [smem:[#allocation183_spill]]  ;;  %v891_v12 = vmul.f32 %v890_v62, %v886_v61  ;;  %p2184_p3 = scmp.lt.s32.totalorder %s4473_s16, 511 }
 0x3a2   : >> { %v661_v1 = vstv %s6017_s2  ;;  %s4511_s8 = sld [smem:[#allocation4 + %s2230_s17]]  ;;  %s415_s22 = scalar_lea.vmem [#allocation6], %s6013_s28 }
 0x3a3   : >> { %s6020_s10 = sld [smem:[#allocation74_spill]]  ;;  %v416_v4 = vld [vmem:[%s415_s22] sm:$0x1]  ;;  %s741_s20 = scalar_lea.vmem [#allocation6], %s6014_s25  ;;  %v662_v18 = vmul.f32 %v661_v1, %v657_v0  ;;  %v892_v34 = vadd.f32 %v891_v12, %v880_v11 }
 0x3a4   : >> { %s6021_s12 = sld [smem:[#allocation75_spill]]  ;;  %v742_v6 = vld [vmem:[%s741_s20] sm:$0x1]  ;;  %s6022_s3 = scvt.s32.f32 %s6016_s24  ;;  %v421_v22 = vmul.f32 %v420_v58, %v416_v4 }
 0x3a5   : >> { %s6023_s26 = sld [smem:[#allocation140_spill]]  ;;  %p2188_p4 = scmp.gt.s32.totalorder %s4473_s16, 0  ;;  %v663_v39 = vadd.f32 %v662_v18, %v651_v17 }
 0x3a6   : >> { %v746_v7 = vstv %s6022_s3  ;;  %s6024_s14 = sld [smem:[#allocation141_spill]]  ;;  %s1150_s28 = scalar_lea.vmem [#allocation6], %s6018_s4  ;;  %v4565_v43 = vadd.f32 %v421_v22, %v410_v10 }
 0x3a7   : >> { %s4520_s1 = scalar_select %p2172_p1, %s4462_s9, 511  ;;  %v1151_v13 = vld [vmem:[%s1150_s28] sm:$0x1]  ;;  %v747_v26 = vmul.f32 %v746_v7, %v742_v6 }
 0x3a8   : >> { %s6026_s17 = sld [smem:[#allocation102_spill]]  ;;  %s6027_s2 = scvt.s32.f32 %s6019_s27 }
 0x3a9   : >> { %6025 = sst [smem:[#allocation84_spill]] %s4520_s1  ;;  %s500_s22 = scalar_lea.vmem [#allocation6], %s6020_s10  ;;  %v748_v31 = vadd.f32 %v747_v26, %v736_v25 }
 0x3aa   : >> { %s6028_s25 = sld [smem:[#allocation103_spill]]  ;;  %v1155_v14 = vstv %s6027_s2  ;;  %v501_v15 = vld [vmem:[%s500_s22] sm:$0x1]  ;;  %s6030_s20 = scvt.s32.f32 %s6021_s12 }
 0x3ab   : >> { %s4527_s24 = scalar_select %p2176_p2, 1, 0  ;;  %v1156_v32 = vmul.f32 %v1155_v14, %v1151_v13 }
 0x3ac   : >> { %v505_v16 = vstv %s6030_s20  ;;  %s6031_s3 = sld [smem:[#allocation116_spill]]  ;;  %s897_s1 = scalar_lea.vmem [#allocation6], %s6023_s26 }
 0x3ad   : >> { %6029 = sst [smem:[#allocation85_spill]] %s4527_s24  ;;  %v898_v19 = vld [vmem:[%s897_s1] sm:$0x1]  ;;  %s6033_s30 = scvt.s32.f32 %s6024_s14  ;;  %v506_v33 = vmul.f32 %v505_v16, %v501_v15  ;;  %v1157_v46 = vadd.f32 %v1156_v32, %v1145_v30 }
 0x3ae   : >> { %s6032_s11 = sld [smem:[#allocation117_spill]]  ;;  %s668_s9 = scalar_lea.vmem [#allocation6], %s6026_s17 }
 0x3af   : >> { %v902_v21 = vstv %s6033_s30  ;;  %s6034_s27 = sld [smem:[#allocation184_spill]]  ;;  %v669_v23 = vld [vmem:[%s668_s9] sm:$0x1]  ;;  %p2196_p7 = scmp.lt.s32.totalorder %s4479_s13, 511  ;;  %v4582_v52 = vadd.f32 %v506_v33, %v495_v27 }
 0x3b0   : >> { %s6035_s10 = scvt.s32.f32 %s6028_s25  ;;  %s6036_s12 = sld [smem:[#allocation185_spill]]  ;;  %v903_v35 = vmul.f32 %v902_v21, %v898_v19 }
 0x3b1   : >> { %s6037_s1 = sld [smem:[#allocation142_spill]]  ;;  %p2200_p8 = scmp.gt.s32.totalorder %s4479_s13, 0 }
 0x3b2   : >> { %v673_v24 = vstv %s6035_s10  ;;  %s753_s26 = scalar_lea.vmem [#allocation6], %s6031_s3  ;;  %s6039_s14 = sld [smem:[#allocation143_spill]]  ;;  %v904_v53 = vadd.f32 %v903_v35, %v892_v34 }
 0x3b3   : >> { %v754_v28 = vld [vmem:[%s753_s26] sm:$0x1]  ;;  %s4547_s17 = scalar_select %p2184_p3, %s4473_s16, 511  ;;  %v674_v40 = vmul.f32 %v673_v24, %v669_v23 }
 0x3b4   : >> { %s6038_s30 = scvt.s32.f32 %s6032_s11  ;;  %s6041_s28 = sld [smem:[#allocation104_spill]] }
 0x3b5   : >> { %6040 = sst [smem:[#allocation30_spill]] %s4547_s17  ;;  %s1162_s25 = scalar_lea.vmem [#allocation6], %s6034_s27  ;;  %v675_v57 = vadd.f32 %v674_v40, %v663_v39 }
 0x3b6   : >> { %v758_v29 = vstv %s6038_s30  ;;  %s6042_s2 = sld [smem:[#allocation105_spill]]  ;;  %v1163_v36 = vld [vmem:[%s1162_s25] sm:$0x1]  ;;  %s6043_s22 = scvt.s32.f32 %s6036_s12 }
 0x3b7   : >> { %s4554_s11 = scalar_select %p2188_p4, 1, 0  ;;  %v759_v45 = vmul.f32 %v758_v29, %v754_v28 }
 0x3b8   : >> { %v1167_v37 = vstv %s6043_s22  ;;  %s6045_s20 = sld [smem:[#allocation222_spill]]  ;;  %s909_s3 = scalar_lea.vmem [#allocation6], %s6037_s1 }
 0x3b9   : >> { %6044 = sst [smem:[#allocation31_spill]] %s4554_s11  ;;  %v910_v41 = vld [vmem:[%s909_s3] sm:$0x1]  ;;  %s6047_s10 = scvt.s32.f32 %s6039_s14  ;;  %v1168_v47 = vmul.f32 %v1167_v37, %v1163_v36  ;;  %v760_v4 = vadd.f32 %v759_v45, %v748_v31 }
 0x3ba   : >> { %s6046_s9 = sld [smem:[#allocation223_spill]]  ;;  %s680_s16 = scalar_lea.vmem [#allocation6], %s6041_s28 }
 0x3bb   : >> { %s6048_s26 = sld [smem:[#allocation224_spill]]  ;;  %v914_v42 = vstv %s6047_s10  ;;  %v681_v44 = vld [vmem:[%s680_s16] sm:$0x1]  ;;  %p2208_p9 = scmp.lt.s32.totalorder %s4488_s15, 511  ;;  %v1169_v5 = vadd.f32 %v1168_v47, %v1157_v46 }
 0x3bc   : >> { %s6049_s12 = sld [smem:[#allocation225_spill]]  ;;  %s6050_s30 = scvt.s32.f32 %s6042_s2  ;;  %v915_v54 = vmul.f32 %v914_v42, %v910_v41 }
 0x3bd   : >> { %s6051_s25 = sld [smem:[#allocation186_spill]]  ;;  %p2212_p10 = scmp.gt.s32.totalorder %s4488_s15, 0 }
 0x3be   : >> { %v685_v20 = vstv %s6050_s30  ;;  %s6052_s1 = sld [smem:[#allocation187_spill]]  ;;  %s1391_s14 = scalar_lea.vmem [#allocation6], %s6045_s20  ;;  %v916_v11 = vadd.f32 %v915_v54, %v904_v53 }
 0x3bf   : >> { %s6053_s22 = sld [smem:[#allocation118_spill]]  ;;  %v1392_v48 = vld [vmem:[%s1391_s14] sm:$0x1]  ;;  %v686_v58 = vmul.f32 %v685_v20, %v681_v44  ;;  %p2220_p11 = scmp.lt.s32.totalorder %s4497_s5, 511 }
 0x3c0   : >> { %s6054_s3 = scvt.s32.f32 %s6046_s9  ;;  %s6055_s10 = sld [smem:[#allocation119_spill]] }
 0x3c1   : >> { %s1403_s27 = scalar_lea.vmem [#allocation6], %s6048_s26  ;;  %s6056_s4 = sld [smem:[#allocation144_spill]]  ;;  %v687_v15 = vadd.f32 %v686_v58, %v675_v57 }
 0x3c2   : >> { %v1396_v49 = vstv %s6054_s3  ;;  %v1404_v50 = vld [vmem:[%s1403_s27] sm:$0x1]  ;;  %s6057_s28 = scvt.s32.f32 %s6049_s12  ;;  %s6058_s2 = sld [smem:[#allocation145_spill]] }
 0x3c3   : >> { %s4580_s16 = scalar_select %p2196_p7, %s4479_s13, 511  ;;  %v1397_v2 = vmul.f32 %v1396_v49, %v1392_v48 }
 0x3c4   : >> { %v1408_v51 = vstv %s6057_s28  ;;  %s6060_s20 = sld [smem:[#allocation77_spill]]  ;;  %s1174_s9 = scalar_lea.vmem [#allocation6], %s6051_s25 }
 0x3c5   : >> { %6059 = sst [smem:[#allocation48_spill]] %s4580_s16  ;;  %v1175_v55 = vld [vmem:[%s1174_s9] sm:$0x1]  ;;  %s6062_s14 = scvt.s32.f32 %s6052_s1  ;;  %v1409_v3 = vmul.f32 %v1408_v51, %v1404_v50 }
 0x3c6   : >> { %s6061_s30 = sld [smem:[#allocation106_spill]]  ;;  %s765_s12 = scalar_lea.vmem [#allocation6], %s6053_s22 }
 0x3c7   : >> { %s6063_s26 = sld [smem:[#allocation107_spill]]  ;;  %v1179_v56 = vstv %s6062_s14  ;;  %v766_v59 = vld [vmem:[%s765_s12] sm:$0x1]  ;;  %s6065_s3 = scvt.s32.f32 %s6055_s10  ;;  %v1410_v26 = vadd.f32 %v1409_v3, %v1397_v2 }
 0x3c8   : >> { %s4589_s27 = scalar_select %p2200_p8, 1, 0  ;;  %v1180_v6 = vmul.f32 %v1179_v56, %v1175_v55 }
 0x3c9   : >> { %v770_v60 = vstv %s6065_s3  ;;  %s6066_s28 = sld [smem:[#allocation226_spill]]  ;;  %s921_s16 = scalar_lea.vmem [#allocation6], %s6056_s4 }
 0x3ca   : >> { %6064 = sst [smem:[#allocation49_spill]] %s4589_s27  ;;  %v922_v61 = vld [vmem:[%s921_s16] sm:$0x1]  ;;  %s6067_s17 = scvt.s32.f32 %s6058_s2  ;;  %v771_v10 = vmul.f32 %v770_v60, %v766_v59  ;;  %v1181_v29 = vadd.f32 %v1180_v6, %v1169_v5 }
 0x3cb   : >> { %s6068_s24 = sld [smem:[#allocation227_spill]]  ;;  %s6070_s13 = scvt.s32.f32 %s6060_s20 }
 0x3cc   : >> { %v926_v62 = vstv %s6067_s17  ;;  %s6069_s1 = sld [smem:[#allocation76_spill]]  ;;  %s692_s9 = scalar_lea.vmem [#allocation6], %s6061_s30  ;;  %v772_v34 = vadd.f32 %v771_v10, %v760_v4 }
 0x3cd   : >> { %v517_v63 = vstv %s6070_s13  ;;  %v693_v0 = vld [vmem:[%s692_s9] sm:$0x1]  ;;  %s6071_s14 = scvt.s32.f32 %s6063_s26  ;;  %s6072_s22 = sld [smem:[#allocation188_spill]]  ;;  %v927_v12 = vmul.f32 %v926_v62, %v922_v61 }
 0x3ce   : >> { %s6073_s10 = sld [smem:[#allocation189_spill]]  ;;  %p2224_p12 = scmp.gt.s32.totalorder %s4497_s5, 0 }
 0x3cf   : >> { %v697_v1 = vstv %s6071_s14  ;;  %s6074_s4 = sld [smem:[#allocation120_spill]]  ;;  %s1415_s17 = scalar_lea.vmem [#allocation6], %s6066_s28  ;;  %v928_v35 = vadd.f32 %v927_v12, %v916_v11 }
 0x3d0   : >> { %v1416_v7 = vld [vmem:[%s1415_s17] sm:$0x1]  ;;  %s6076_s16 = sld [smem:[#allocation121_spill]]  ;;  %v698_v16 = vmul.f32 %v697_v1, %v693_v0  ;;  %p2232_p13 = scmp.lt.s32.totalorder %s4511_s8, 511 }
 0x3d1   : >> { %s6075_s2 = scvt.s32.f32 %s6068_s24  ;;  %s6077_s20 = sld [smem:[#allocation146_spill]] }
 0x3d2   : >> { %s4611_s30 = scalar_select %p2208_p9, %s4488_s15, 511  ;;  %v4658_v31 = vadd.f32 %v698_v16, %v687_v15 }
 0x3d3   : >> { %v1420_v8 = vstv %s6075_s2  ;;  %s512_s26 = scalar_lea.vmem [#allocation6], %s6069_s1  ;;  %s6079_s12 = sld [smem:[#allocation147_spill]] }
 0x3d4   : >> { %6078 = sst [smem:[#allocation86_spill]] %s4611_s30  ;;  %v513_v9 = vld [vmem:[%s512_s26] sm:$0x1]  ;;  %s1186_s13 = scalar_lea.vmem [#allocation6], %s6072_s22  ;;  %v1421_v27 = vmul.f32 %v1420_v8, %v1416_v7 }
 0x3d5   : >> { %s6080_s3 = sld [smem:[#allocation158_spill]]  ;;  %v1187_v13 = vld [vmem:[%s1186_s13] sm:$0x1]  ;;  %s6082_s28 = scvt.s32.f32 %s6073_s10  ;;  %v4636_v28 = vmul.f32 %v517_v63, %v513_v9 }
 0x3d6   : >> { %s6081_s9 = sld [smem:[#allocation159_spill]]  ;;  %s777_s1 = scalar_lea.vmem [#allocation6], %s6074_s4  ;;  %v1422_v47 = vadd.f32 %v1421_v27, %v1410_v26 }
 0x3d7   : >> { %s6083_s24 = sld [smem:[#allocation160_spill]]  ;;  %v1191_v14 = vstv %s6082_s28  ;;  %v778_v17 = vld [vmem:[%s777_s1] sm:$0x1]  ;;  %s6086_s2 = scvt.s32.f32 %s6076_s16 }
 0x3d8   : >> { %s4619_s14 = scalar_select %p2212_p10, 1, 0  ;;  %v1192_v30 = vmul.f32 %v1191_v14, %v1187_v13 }
 0x3d9   : >> { %s6085_s17 = sld [smem:[#allocation161_spill]]  ;;  %v782_v18 = vstv %s6086_s2  ;;  %s933_s26 = scalar_lea.vmem [#allocation6], %s6077_s20 }
 0x3da   : >> { %6084 = sst [smem:[#allocation87_spill]] %s4619_s14  ;;  %v934_v19 = vld [vmem:[%s933_s26] sm:$0x1]  ;;  %s6087_s25 = scvt.s32.f32 %s6079_s12  ;;  %v783_v40 = vmul.f32 %v782_v18, %v778_v17  ;;  %v1193_v51 = vadd.f32 %v1192_v30, %v1181_v29 }
 0x3db   : >> { %s6088_s22 = sld [smem:[#allocation228_spill]]  ;;  %s1006_s15 = scalar_lea.vmem [#allocation6], %s6080_s3 }
 0x3dc   : >> { %v938_v21 = vstv %s6087_s25  ;;  %s6089_s10 = sld [smem:[#allocation229_spill]]  ;;  %v1007_v22 = vld [vmem:[%s1006_s15] sm:$0x1]  ;;  %s6090_s28 = scvt.s32.f32 %s6081_s9  ;;  %v784_v62 = vadd.f32 %v783_v40, %v772_v34 }
 0x3dd   : >> { %s1018_s30 = scalar_lea.vmem [#allocation6], %s6083_s24  ;;  %s6091_s4 = sld [smem:[#allocation190_spill]]  ;;  %v939_v36 = vmul.f32 %v938_v21, %v934_v19  ;;  %v4715_v19 = vadd.f32 %v4636_v28, %v4582_v52 }
 0x3de   : >> { %v1011_v23 = vstv %s6090_s28  ;;  %v1019_v24 = vld [vmem:[%s1018_s30] sm:$0x1]  ;;  %s6093_s16 = sld [smem:[#allocation191_spill]]  ;;  %p2236_p0 = scmp.gt.s32.totalorder %s4511_s8, 0 }
 0x3df   : >> { %s6092_s1 = scvt.s32.f32 %s6085_s17  ;;  %s6094_s25 = sld [smem:[#allocation148_spill]]  ;;  %v1012_v44 = vmul.f32 %v1011_v23, %v1007_v22  ;;  %v940_v58 = vadd.f32 %v939_v36, %v928_v35 }
 0x3e0   : >> { %s6095_s20 = sld [smem:[#allocation149_spill]] }
 0x3e1   : >> { %v1023_v25 = vstv %s6092_s1  ;;  %s1427_s12 = scalar_lea.vmem [#allocation6], %s6088_s22  ;;  %s6098_s9 = sld [smem:[#allocation162_spill]] }
 0x3e2   : >> { %v1428_v32 = vld [vmem:[%s1427_s12] sm:$0x1]  ;;  %s6096_s3 = scvt.s32.f32 %s6089_s10  ;;  %s6099_s24 = sld [smem:[#allocation163_spill]]  ;;  %v1024_v20 = vmul.f32 %v1023_v25, %v1019_v24 }
 0x3e3   : >> { %s4644_s30 = scalar_select %p2220_p11, %s4497_s5, 511 }
 0x3e4   : >> { %v1432_v33 = vstv %s6096_s3  ;;  %s1198_s17 = scalar_lea.vmem [#allocation6], %s6091_s4  ;;  %s6100_s2 = scvt.s32.f32 %s6093_s16  ;;  %v1025_v1 = vadd.f32 %v1024_v20, %v1012_v44 }
 0x3e5   : >> { %6097 = sst [smem:[#allocation32_spill]] %s4644_s30  ;;  %v1199_v37 = vld [vmem:[%s1198_s17] sm:$0x1]  ;;  %s945_s10 = scalar_lea.vmem [#allocation6], %s6094_s25  ;;  %v1433_v48 = vmul.f32 %v1432_v33, %v1428_v32 }
 0x3e6   : >> { %v1203_v39 = vstv %s6100_s2  ;;  %s4651_s26 = scalar_select %p2224_p12, 1, 0  ;;  %v946_v41 = vld [vmem:[%s945_s10] sm:$0x1] }
 0x3e7   : >> { %s6102_s22 = sld [smem:[#allocation122_spill]]  ;;  %s6104_s28 = scvt.s32.f32 %s6095_s20  ;;  %v1204_v53 = vmul.f32 %v1203_v39, %v1199_v37  ;;  %v1434_v6 = vadd.f32 %v1433_v48, %v1422_v47 }
 0x3e8   : >> { %6101 = sst [smem:[#allocation33_spill]] %s4651_s26  ;;  %s1030_s4 = scalar_lea.vmem [#allocation6], %s6098_s9 }
 0x3e9   : >> { %s6103_s15 = sld [smem:[#allocation123_spill]]  ;;  %v950_v42 = vstv %s6104_s28  ;;  %v1031_v45 = vld [vmem:[%s1030_s4] sm:$0x1]  ;;  %s6108_s16 = scvt.s32.f32 %s6099_s24  ;;  %v1205_v9 = vadd.f32 %v1204_v53, %v1193_v51 }
 0x3ea   : >> { %s6105_s1 = sld [smem:[#allocation230_spill]]  ;;  %v951_v59 = vmul.f32 %v950_v42, %v946_v41 }
 0x3eb   : >> { %s6106_s3 = sld [smem:[#allocation231_spill]]  ;;  %v1035_v46 = vstv %s6108_s16 }
 0x3ec   : >> { %s6107_s5 = sld [smem:[#allocation108_spill]]  ;;  %v1036_v2 = vmul.f32 %v1035_v46, %v1031_v45  ;;  %v952_v15 = vadd.f32 %v951_v59, %v940_v58 }
 0x3ed   : >> { %s6109_s17 = sld [smem:[#allocation109_spill]]  ;;  %s789_s20 = scalar_lea.vmem [#allocation6], %s6102_s22 }
 0x3ee   : >> { %s6110_s25 = sld [smem:[#allocation192_spill]]  ;;  %v790_v49 = vld [vmem:[%s789_s20] sm:$0x1]  ;;  %v1037_v23 = vadd.f32 %v1036_v2, %v1025_v1 }
 0x3ef   : >> { %s6111_s2 = sld [smem:[#allocation193_spill]]  ;;  %s6112_s10 = scvt.s32.f32 %s6103_s15 }
 0x3f0   : >> { %s6113_s28 = sld [smem:[#allocation150_spill]]  ;;  %s1439_s12 = scalar_lea.vmem [#allocation6], %s6105_s1 }
 0x3f1   : >> { %v794_v50 = vstv %s6112_s10  ;;  %s6114_s13 = sld [smem:[#allocation151_spill]]  ;;  %v1440_v54 = vld [vmem:[%s1439_s12] sm:$0x1]  ;;  %s6115_s9 = scvt.s32.f32 %s6106_s3 }
 0x3f2   : >> { %s4673_s24 = scalar_select %p2232_p13, %s4511_s8, 511  ;;  %v795_v3 = vmul.f32 %v794_v50, %v790_v49 }
 0x3f3   : >> { %v1444_v55 = vstv %s6115_s9  ;;  %s704_s4 = scalar_lea.vmem [#allocation6], %s6107_s5  ;;  %s6117_s22 = scvt.s32.f32 %s6109_s17 }
 0x3f4   : >> { %6116 = sst [smem:[#allocation50_spill]] %s4673_s24  ;;  %v705_v56 = vld [vmem:[%s704_s4] sm:$0x1]  ;;  %s1210_s20 = scalar_lea.vmem [#allocation6], %s6110_s25  ;;  %v1445_v7 = vmul.f32 %v1444_v55, %v1440_v54  ;;  %v796_v25 = vadd.f32 %v795_v3, %v784_v62 }
 0x3f5   : >> { %v709_v57 = vstv %s6117_s22  ;;  %s6118_s15 = sld [smem:[#allocation164_spill]]  ;;  %v1211_v60 = vld [vmem:[%s1210_s20] sm:$0x1]  ;;  %s6120_s1 = scvt.s32.f32 %s6111_s2 }
 0x3f6   : >> { %s6119_s16 = sld [smem:[#allocation165_spill]]  ;;  %s957_s3 = scalar_lea.vmem [#allocation6], %s6113_s28  ;;  %v710_v8 = vmul.f32 %v709_v57, %v705_v56  ;;  %v1446_v52 = vadd.f32 %v1445_v7, %v1434_v6 }
 0x3f7   : >> { %v1215_v61 = vstv %s6120_s1  ;;  %s4683_s12 = scalar_select %p2236_p0, 1, 0  ;;  %v958_v63 = vld [vmem:[%s957_s3] sm:$0x1] }
 0x3f8   : >> { %s6122_s5 = scvt.s32.f32 %s6114_s13  ;;  %s6123_s10 = sld [smem:[#allocation232_spill]]  ;;  %v1216_v10 = vmul.f32 %v1215_v61, %v1211_v60  ;;  %v4735_v35 = vadd.f32 %v710_v8, %v4658_v31 }
 0x3f9   : >> { %6121 = sst [smem:[#allocation51_spill]] %s4683_s12  ;;  %s6125_s4 = sadd.s32 7, %s4362_s0 }
 0x3fa   : >> { %v962_v0 = vstv %s6122_s5  ;;  %s6124_s17 = sld [smem:[#allocation233_spill]]  ;;  %v1217_v30 = vadd.f32 %v1216_v10, %v1205_v9 }
 0x3fb   : >> { %s4691_s25 = sld [smem:[#allocation4 + %s6125_s4]]  ;;  %s1042_s8 = scalar_lea.vmem [#allocation6], %s6118_s15  ;;  %v963_v16 = vmul.f32 %v962_v0, %v958_v63 }
 0x3fc   : >> { %s6126_s2 = sld [smem:[#allocation124_spill]]  ;;  %v1043_v4 = vld [vmem:[%s1042_s8] sm:$0x1]  ;;  %s6128_s20 = scvt.s32.f32 %s6119_s16 }
 0x3fd   : >> { %s6127_s22 = sld [smem:[#allocation125_spill]]  ;;  %s2266_s4 = sadd.s32 1, %s4379_s29  ;;  %v964_v36 = vadd.f32 %v963_v16, %v952_v15 }
 0x3fe   : >> { %v1047_v5 = vstv %s6128_s20  ;;  %s6129_s13 = sld [smem:[#allocation194_spill]]  ;;  %s1451_s0 = scalar_lea.vmem [#allocation6], %s6123_s10 }
 0x3ff   : >> { %s4697_s28 = sld [smem:[#allocation5 + %s4379_s29]]  ;;  %v1452_v11 = vld [vmem:[%s1451_s0] sm:$0x1]  ;;  %s2278_s8 = sadd.s32 2, %s4379_s29  ;;  %v1048_v24 = vmul.f32 %v1047_v5, %v1043_v4 }
 0x400   : >> { %s6130_s1 = sld [smem:[#allocation195_spill]]  ;;  %s6132_s5 = scvt.s32.f32 %s6124_s17 }
 0x401   : >> { %s6131_s3 = sld [smem:[#allocation152_spill]]  ;;  %s2290_s17 = sadd.s32 3, %s4379_s29  ;;  %v1049_v41 = vadd.f32 %v1048_v24, %v1037_v23 }
 0x402   : >> { %v1456_v12 = vstv %s6132_s5  ;;  %s6133_s15 = sld [smem:[#allocation153_spill]]  ;;  %s801_s16 = scalar_lea.vmem [#allocation6], %s6126_s2 }
 0x403   : >> { %v802_v13 = vld [vmem:[%s801_s16] sm:$0x1]  ;;  %s6134_s20 = scvt.s32.f32 %s6127_s22  ;;  %s6135_s9 = sld [smem:[#allocation166_spill]]  ;;  %v1457_v28 = vmul.f32 %v1456_v12, %v1452_v11 }
 0x404   : >> { %s1222_s24 = scalar_lea.vmem [#allocation6], %s6129_s13  ;;  %s6136_s26 = sld [smem:[#allocation167_spill]] }
 0x405   : >> { %v806_v14 = vstv %s6134_s20  ;;  %v1223_v17 = vld [vmem:[%s1222_s24] sm:$0x1]  ;;  %s4710_s10 = sld [smem:[#allocation5 + %s2266_s4]]  ;;  %p2244_p1 = scmp.lt.s32.totalorder %s4691_s25, 511  ;;  %v1458_v50 = vadd.f32 %v1457_v28, %v1446_v52 }
 0x406   : >> { %s6137_s30 = scvt.s32.f32 %s6130_s1  ;;  %s6139_s0 = sld [smem:[#allocation234_spill]]  ;;  %v807_v29 = vmul.f32 %v806_v14, %v802_v13 }
 0x407   : >> { %s969_s2 = scalar_lea.vmem [#allocation6], %s6131_s3  ;;  %s6140_s13 = sld [smem:[#allocation235_spill]] }
 0x408   : >> { %v1227_v18 = vstv %s6137_s30  ;;  %v970_v21 = vld [vmem:[%s969_s2] sm:$0x1]  ;;  %s6138_s22 = scvt.s32.f32 %s6133_s15  ;;  %s4721_s24 = sld [smem:[#allocation5 + %s2278_s8]]  ;;  %v4763_v53 = vadd.f32 %v807_v29, %v796_v25 }
 0x409   : >> { %s1054_s30 = scalar_lea.vmem [#allocation6], %s6135_s9  ;;  %s6142_s4 = sld [smem:[#allocation196_spill]]  ;;  %v1228_v32 = vmul.f32 %v1227_v18, %v1223_v17 }
 0x40a   : >> { %v974_v22 = vstv %s6138_s22  ;;  %v1055_v26 = vld [vmem:[%s1054_s30] sm:$0x1]  ;;  %s6141_s1 = scvt.s32.f32 %s6136_s26  ;;  %s6143_s3 = sld [smem:[#allocation197_spill]] }
 0x40b   : >> { %s4726_s15 = sld [smem:[#allocation5 + %s2290_s17]]  ;;  %p2248_p2 = scmp.gt.s32.totalorder %s4691_s25, 0  ;;  %v975_v37 = vmul.f32 %v974_v22, %v970_v21  ;;  %v1229_v54 = vadd.f32 %v1228_v32, %v1217_v30 }
 0x40c   : >> { %v1059_v27 = vstv %s6141_s1  ;;  %s6144_s8 = sld [smem:[#allocation206_spill]]  ;;  %s1463_s20 = scalar_lea.vmem [#allocation6], %s6139_s0 }
 0x40d   : >> { %v1464_v33 = vld [vmem:[%s1463_s20] sm:$0x1]  ;;  %s6145_s2 = scvt.s32.f32 %s6140_s13  ;;  %s6146_s9 = sld [smem:[#allocation207_spill]]  ;;  %v1060_v42 = vmul.f32 %v1059_v27, %v1055_v26  ;;  %v976_v58 = vadd.f32 %v975_v37, %v964_v36 }
 0x40e   : >> { %s6147_s26 = sld [smem:[#allocation208_spill]]  ;;  %p2256_p3 = scmp.lt.s32.totalorder %s4697_s28, 511 }
 0x40f   : >> { %v1468_v34 = vstv %s6145_s2  ;;  %s6148_s22 = sld [smem:[#allocation209_spill]]  ;;  %s1234_s30 = scalar_lea.vmem [#allocation6], %s6142_s4  ;;  %v1061_v0 = vadd.f32 %v1060_v42, %v1049_v41 }
 0x410   : >> { %s6149_s17 = sld [smem:[#allocation154_spill]]  ;;  %v1235_v39 = vld [vmem:[%s1234_s30] sm:$0x1]  ;;  %s6151_s0 = scvt.s32.f32 %s6143_s3  ;;  %v1469_v51 = vmul.f32 %v1468_v34, %v1464_v33 }
 0x411   : >> { %s6150_s1 = sld [smem:[#allocation155_spill]]  ;;  %p2260_p4 = scmp.gt.s32.totalorder %s4697_s28, 0 }
 0x412   : >> { %s6152_s20 = sld [smem:[#allocation168_spill]]  ;;  %v1239_v40 = vstv %s6151_s0  ;;  %s1295_s2 = scalar_lea.vmem [#allocation6], %s6144_s8  ;;  %v1470_v4 = vadd.f32 %v1469_v51, %v1458_v50 }
 0x413   : >> { %s6153_s13 = sld [smem:[#allocation169_spill]]  ;;  %v1296_v44 = vld [vmem:[%s1295_s2] sm:$0x1]  ;;  %s6154_s5 = scvt.s32.f32 %s6146_s9  ;;  %v1240_v55 = vmul.f32 %v1239_v40, %v1235_v39 }
 0x414   : >> { %s1307_s16 = scalar_lea.vmem [#allocation6], %s6147_s26  ;;  %s6155_s12 = sld [smem:[#allocation236_spill]] }
 0x415   : >> { %v1300_v20 = vstv %s6154_s5  ;;  %v1308_v31 = vld [vmem:[%s1307_s16] sm:$0x1]  ;;  %s6156_s14 = scvt.s32.f32 %s6148_s22  ;;  %s6157_s4 = sld [smem:[#allocation237_spill]]  ;;  %v1241_v12 = vadd.f32 %v1240_v55, %v1229_v54 }
 0x416   : >> { %s4751_s3 = scalar_select %p2244_p1, %s4691_s25, 511  ;;  %v1301_v61 = vmul.f32 %v1300_v20, %v1296_v44 }
 0x417   : >> { %v1312_v45 = vstv %s6156_s14  ;;  %s981_s30 = scalar_lea.vmem [#allocation6], %s6149_s17  ;;  %s6159_s0 = scvt.s32.f32 %s6150_s1 }
 0x418   : >> { %6158 = sst [smem:[#allocation88_spill]] %s4751_s3  ;;  %v982_v46 = vld [vmem:[%s981_s30] sm:$0x1]  ;;  %s1066_s11 = scalar_lea.vmem [#allocation6], %s6152_s20  ;;  %v1313_v62 = vmul.f32 %v1312_v45, %v1308_v31 }
 0x419   : >> { %s6160_s27 = sld [smem:[#allocation198_spill]]  ;;  %v986_v47 = vstv %s6159_s0  ;;  %v1067_v48 = vld [vmem:[%s1066_s11] sm:$0x1]  ;;  %s6162_s9 = scvt.s32.f32 %s6153_s13 }
 0x41a   : >> { %s6161_s8 = sld [smem:[#allocation199_spill]]  ;;  %s1475_s16 = scalar_lea.vmem [#allocation6], %s6155_s12  ;;  %v987_v63 = vmul.f32 %v986_v47, %v982_v46  ;;  %v1314_v21 = vadd.f32 %v1313_v62, %v1301_v61 }
 0x41b   : >> { %v1071_v49 = vstv %s6162_s9  ;;  %s4761_s14 = scalar_select %p2248_p2, 1, 0  ;;  %v1476_v56 = vld [vmem:[%s1475_s16] sm:$0x1] }
 0x41c   : >> { %s6163_s5 = sld [smem:[#allocation210_spill]]  ;;  %s6164_s26 = scvt.s32.f32 %s6157_s4  ;;  %v1072_v1 = vmul.f32 %v1071_v49, %v1067_v48  ;;  %v988_v34 = vadd.f32 %v987_v63, %v976_v58 }
 0x41d   : >> { %s6165_s22 = sld [smem:[#allocation211_spill]]  ;;  %p2268_p7 = scmp.lt.s32.totalorder %s4710_s10, 511 }
 0x41e   : >> { %v1480_v57 = vstv %s6164_s26  ;;  %s6166_s1 = sld [smem:[#allocation270_spill]]  ;;  %p2272_p8 = scmp.gt.s32.totalorder %s4710_s10, 0  ;;  %v1073_v23 = vadd.f32 %v1072_v1, %v1061_v0 }
 0x41f   : >> { %s1246_s17 = scalar_lea.vmem [#allocation6], %s6160_s27  ;;  %s6168_s20 = sld [smem:[#allocation271_spill]]  ;;  %v1481_v5 = vmul.f32 %v1480_v57, %v1476_v56 }
 0x420   : >> { %v1247_v59 = vld [vmem:[%s1246_s17] sm:$0x1]  ;;  %s6167_s25 = scvt.s32.f32 %s6161_s8  ;;  %s6169_s13 = sld [smem:[#allocation272_spill]] }
 0x421   : >> { %s6170_s2 = sld [smem:[#allocation273_spill]]  ;;  %p2280_p9 = scmp.lt.s32.totalorder %s4721_s24, 511  ;;  %v1482_v29 = vadd.f32 %v1481_v5, %v1470_v4 }
 0x422   : >> { %v1251_v60 = vstv %s6167_s25  ;;  %s6171_s12 = sld [smem:[#allocation170_spill]]  ;;  %s1319_s30 = scalar_lea.vmem [#allocation6], %s6163_s5 }
 0x423   : >> { %s6172_s4 = sld [smem:[#allocation171_spill]]  ;;  %v1320_v2 = vld [vmem:[%s1319_s30] sm:$0x1]  ;;  %s6173_s27 = scvt.s32.f32 %s6165_s22  ;;  %v1252_v13 = vmul.f32 %v1251_v60, %v1247_v59 }
 0x424   : >> { %s6174_s0 = sld [smem:[#allocation238_spill]]  ;;  %s1680_s16 = scalar_lea.vmem [#allocation6], %s6166_s1 }
 0x425   : >> { %v1324_v3 = vstv %s6173_s27  ;;  %s4780_s8 = scalar_select %p2256_p3, %s4697_s28, 511  ;;  %v1681_v6 = vld [vmem:[%s1680_s16] sm:$0x1]  ;;  %v1253_v36 = vadd.f32 %v1252_v13, %v1241_v12 }
 0x426   : >> { %s6175_s9 = sld [smem:[#allocation239_spill]]  ;;  %s6177_s17 = scvt.s32.f32 %s6168_s20  ;;  %v1325_v22 = vmul.f32 %v1324_v3, %v1320_v2 }
 0x427   : >> { %s6176_s26 = sld [smem:[#allocation157_spill]]  ;;  %s1692_s11 = scalar_lea.vmem [#allocation6], %s6169_s13 }
 0x428   : >> { %s6178_s25 = sld [smem:[#allocation200_spill]]  ;;  %v1685_v7 = vstv %s6177_s17  ;;  %v1693_v8 = vld [vmem:[%s1692_s11] sm:$0x1]  ;;  %s6180_s5 = scvt.s32.f32 %s6170_s2  ;;  %v1326_v31 = vadd.f32 %v1325_v22, %v1314_v21 }
 0x429   : >> { %s6179_s3 = sld [smem:[#allocation201_spill]]  ;;  %s1078_s30 = scalar_lea.vmem [#allocation6], %s6171_s12  ;;  %v1686_v26 = vmul.f32 %v1685_v7, %v1681_v6 }
 0x42a   : >> { %v1697_v9 = vstv %s6180_s5  ;;  %s4790_s22 = scalar_select %p2260_p4, 1, 0  ;;  %v1079_v10 = vld [vmem:[%s1078_s30] sm:$0x1] }
 0x42b   : >> { %s6181_s27 = scvt.s32.f32 %s6172_s4  ;;  %s6182_s1 = sld [smem:[#allocation212_spill]]  ;;  %v1698_v27 = vmul.f32 %v1697_v9, %v1693_v8 }
 0x42c   : >> { %s6183_s20 = sld [smem:[#allocation213_spill]]  ;;  %s1487_s16 = scalar_lea.vmem [#allocation6], %s6174_s0 }
 0x42d   : >> { %v1083_v11 = vstv %s6181_s27  ;;  %v1488_v14 = vld [vmem:[%s1487_s16] sm:$0x1]  ;;  %s6184_s13 = scvt.s32.f32 %s6175_s9  ;;  %s6185_s28 = scvt.s32.f32 %s6176_s26  ;;  %v1699_v49 = vadd.f32 %v1698_v27, %v1686_v26 }
 0x42e   : >> { %s6186_s2 = sld [smem:[#allocation156_spill]]  ;;  %s1258_s17 = scalar_lea.vmem [#allocation6], %s6178_s25  ;;  %v1084_v28 = vmul.f32 %v1083_v11, %v1079_v10 }
 0x42f   : >> { %v1492_v15 = vstv %s6184_s13  ;;  %v998_v16 = vstv %s6185_s28  ;;  %v1259_v17 = vld [vmem:[%s1258_s17] sm:$0x1]  ;;  %s6187_s12 = scvt.s32.f32 %s6179_s3  ;;  %s6188_s4 = sld [smem:[#allocation274_spill]] }
 0x430   : >> { %s6189_s5 = sld [smem:[#allocation275_spill]]  ;;  %p2284_p10 = scmp.gt.s32.totalorder %s4721_s24, 0  ;;  %v1493_v30 = vmul.f32 %v1492_v15, %v1488_v14  ;;  %v1085_v51 = vadd.f32 %v1084_v28, %v1073_v23 }
 0x431   : >> { %v1263_v18 = vstv %s6187_s12  ;;  %s1331_s0 = scalar_lea.vmem [#allocation6], %s6182_s1  ;;  %s6191_s30 = sld [smem:[#allocation240_spill]] }
 0x432   : >> { %v1332_v24 = vld [vmem:[%s1331_s0] sm:$0x1]  ;;  %s6190_s9 = scvt.s32.f32 %s6183_s20  ;;  %s6192_s26 = sld [smem:[#allocation241_spill]]  ;;  %v1264_v37 = vmul.f32 %v1263_v18, %v1259_v17  ;;  %v1494_v54 = vadd.f32 %v1493_v30, %v1482_v29 }
 0x433   : >> { %s4812_s25 = scalar_select %p2268_p7, %s4710_s10, 511 }
 0x434   : >> { %v1336_v25 = vstv %s6190_s9  ;;  %s993_s3 = scalar_lea.vmem [#allocation6], %s6186_s2  ;;  %s6193_s27 = sld [smem:[#allocation172_spill]]  ;;  %v1265_v59 = vadd.f32 %v1264_v37, %v1253_v36 }
 0x435   : >> { %v994_v52 = vld [vmem:[%s993_s3] sm:$0x1]  ;;  %s6194_s16 = sld [smem:[#allocation173_spill]]  ;;  %s1704_s1 = scalar_lea.vmem [#allocation6], %s6188_s4  ;;  %v1337_v45 = vmul.f32 %v1336_v25, %v1332_v24 }
 0x436   : >> { %s6195_s13 = sld [smem:[#allocation202_spill]]  ;;  %v1705_v32 = vld [vmem:[%s1704_s1] sm:$0x1]  ;;  %s6197_s20 = scvt.s32.f32 %s6189_s5  ;;  %v999_v46 = vmul.f32 %v998_v16, %v994_v52 }
 0x437   : >> { %s6196_s28 = sld [smem:[#allocation203_spill]]  ;;  %s1499_s12 = scalar_lea.vmem [#allocation6], %s6191_s30  ;;  %v1338_v63 = vadd.f32 %v1337_v45, %v1326_v31 }
 0x438   : >> { %v1709_v33 = vstv %s6197_s20  ;;  %s4820_s17 = scalar_select %p2272_p8, 1, 0  ;;  %v1500_v39 = vld [vmem:[%s1499_s12] sm:$0x1]  ;;  %v4867_v5 = vadd.f32 %v999_v46, %v988_v34 }
 0x439   : >> { %s6198_s2 = sld [smem:[#allocation214_spill]]  ;;  %s6199_s0 = scvt.s32.f32 %s6192_s26  ;;  %v1710_v50 = vmul.f32 %v1709_v33, %v1705_v32 }
 0x43a   : >> { %s6200_s9 = sld [smem:[#allocation215_spill]]  ;;  %s2262_s3 = scvt.s32.f32 %s4790_s22 }
 0x43b   : >> { %v1504_v40 = vstv %s6199_s0  ;;  %s1090_s4 = scalar_lea.vmem [#allocation6], %s6193_s27  ;;  %s6201_s5 = scvt.s32.f32 %s6194_s16  ;;  %v1711_v8 = vadd.f32 %v1710_v50, %v1699_v49 }
 0x43c   : >> { %v1091_v41 = vld [vmem:[%s1090_s4] sm:$0x1]  ;;  %s1270_s10 = scalar_lea.vmem [#allocation6], %s6195_s13  ;;  %s6203_s20 = sld [smem:[#allocation276_spill]]  ;;  %v1505_v55 = vmul.f32 %v1504_v40, %v1500_v39 }
 0x43d   : >> { %v1095_v42 = vstv %s6201_s5  ;;  %v1271_v44 = vld [vmem:[%s1270_s10] sm:$0x1]  ;;  %s6202_s1 = scvt.s32.f32 %s6196_s28  ;;  %s6204_s11 = sld [smem:[#allocation277_spill]] }
 0x43e   : >> { %p2292_p11 = scmp.lt.s32.totalorder %s4726_s15, 511  ;;  %p2296_p12 = scmp.gt.s32.totalorder %s4726_s15, 0  ;;  %v1096_v58 = vmul.f32 %v1095_v42, %v1091_v41  ;;  %v1506_v12 = vadd.f32 %v1505_v55, %v1494_v54 }
 0x43f   : >> { %v1275_v20 = vstv %s6202_s1  ;;  %s1343_s30 = scalar_lea.vmem [#allocation6], %s6198_s2  ;;  %s6205_s26 = sld [smem:[#allocation242_spill]] }
 0x440   : >> { %v1344_v47 = vld [vmem:[%s1343_s30] sm:$0x1]  ;;  %s6206_s27 = scvt.s32.f32 %s6200_s9  ;;  %s6207_s12 = sld [smem:[#allocation243_spill]]  ;;  %v1276_v60 = vmul.f32 %v1275_v20, %v1271_v44  ;;  %v4887_v16 = vadd.f32 %v1096_v58, %v1085_v51  ;;  %v2263_v44 = vstv %s2262_s3 }
 0x441   : >> { %s4840_s16 = scalar_select %p2280_p9, %s4721_s24, 511 }
 0x442   : >> { %v1348_v48 = vstv %s6206_s27  ;;  %s1716_s13 = scalar_lea.vmem [#allocation6], %s6203_s20  ;;  %s6209_s0 = sld [smem:[#allocation216_spill]]  ;;  %v4894_v23 = vadd.f32 %v1276_v60, %v1265_v59 }
 0x443   : >> { %v1717_v56 = vld [vmem:[%s1716_s13] sm:$0x1]  ;;  %s6208_s28 = scvt.s32.f32 %s6204_s11  ;;  %s6211_s5 = sld [smem:[#allocation217_spill]]  ;;  %v1349_v0 = vmul.f32 %v1348_v48, %v1344_v47 }
 0x444   : >> { %s4847_s2 = scalar_select %p2284_p10, 1, 0 }
 0x445   : >> { %v1721_v57 = vstv %s6208_s28  ;;  %s1511_s9 = scalar_lea.vmem [#allocation6], %s6205_s26  ;;  %s6212_s1 = sadd.s32 4, %s4379_s29  ;;  %v1350_v24 = vadd.f32 %v1349_v0, %v1338_v63 }
 0x446   : >> { %v1512_v61 = vld [vmem:[%s1511_s9] sm:$0x1]  ;;  %s6210_s4 = scvt.s32.f32 %s6207_s12  ;;  %s4855_s20 = sld [smem:[#allocation5 + %s6212_s1]]  ;;  %v1722_v9 = vmul.f32 %v1721_v57, %v1717_v56 }
 0x447   : >> { %s6213_s24 = sld [smem:[#allocation204_spill]]  ;;  %s1969_s11 = scalar_lea.vmem [#allocation6], %s6709_s21 }
 0x448   : >> { %v1516_v62 = vstv %s6210_s4  ;;  %s6214_s30 = sld [smem:[#allocation205_spill]]  ;;  %v1970_v1 = vld [vmem:[%s1969_s11] sm:$0x1]  ;;  %s6215_s27 = scvt.s32.f32 %s4131_s23  ;;  %v1723_v30 = vadd.f32 %v1722_v9, %v1711_v8 }
 0x449   : >> { %s1981_s13 = scalar_lea.vmem [#allocation6], %s6711_s18  ;;  %s6216_s26 = sld [smem:[#allocation278_spill]]  ;;  %v1517_v13 = vmul.f32 %v1516_v62, %v1512_v61 }
 0x44a   : >> { %v1974_v2 = vstv %s6215_s27  ;;  %v1982_v3 = vld [vmem:[%s1981_s13] sm:$0x1]  ;;  %s6217_s12 = scvt.s32.f32 %s4137_s6  ;;  %s6218_s28 = sadd.s32 5, %s4379_s29 }
 0x44b   : >> { %s6219_s9 = sld [smem:[#allocation279_spill]]  ;;  %s1355_s1 = scalar_lea.vmem [#allocation6], %s6209_s0  ;;  %v1975_v21 = vmul.f32 %v1974_v2, %v1970_v1  ;;  %v1518_v34 = vadd.f32 %v1517_v13, %v1506_v12 }
 0x44c   : >> { %v1986_v4 = vstv %s6217_s12  ;;  %s4865_s4 = sld [smem:[#allocation5 + %s6218_s28]]  ;;  %v1356_v6 = vld [vmem:[%s1355_s1] sm:$0x1]  ;;  %s6221_s21 = scvt.s32.f32 %s6211_s5 }
 0x44d   : >> { %s6220_s10 = sld [smem:[#allocation244_spill]]  ;;  %s1282_s6 = scalar_lea.vmem [#allocation6], %s6213_s24  ;;  %v1987_v22 = vmul.f32 %v1986_v4, %v1982_v3 }
 0x44e   : >> { %v1360_v7 = vstv %s6221_s21  ;;  %s6222_s11 = sld [smem:[#allocation245_spill]]  ;;  %v1283_v10 = vld [vmem:[%s1282_s6] sm:$0x1]  ;;  %s6223_s18 = scvt.s32.f32 %s6214_s30 }
 0x44f   : >> { %s4875_s23 = scalar_select %p2292_p11, %s4726_s15, 511  ;;  %v1361_v25 = vmul.f32 %v1360_v7, %v1356_v6  ;;  %v1988_v40 = vadd.f32 %v1987_v22, %v1975_v21 }
 0x450   : >> { %v1287_v11 = vstv %s6223_s18  ;;  %s1728_s0 = scalar_lea.vmem [#allocation6], %s6216_s26  ;;  %s6225_s5 = sld [smem:[#allocation318_spill]] }
 0x451   : >> { %v1729_v14 = vld [vmem:[%s1728_s0] sm:$0x1]  ;;  %s6224_s27 = scvt.s32.f32 %s6219_s9  ;;  %s6226_s12 = sld [smem:[#allocation218_spill]]  ;;  %v4901_v52 = vmul.f32 %v1287_v11, %v1283_v10  ;;  %v1362_v45 = vadd.f32 %v1361_v25, %v1350_v24 }
 0x452   : >> { %s4885_s13 = scalar_select %p2296_p12, 1, 0 }
 0x453   : >> { %v1733_v15 = vstv %s6224_s27  ;;  %s1523_s28 = scalar_lea.vmem [#allocation6], %s6220_s10  ;;  %s6228_s1 = sld [smem:[#allocation219_spill]] }
 0x454   : >> { %v1524_v17 = vld [vmem:[%s1523_s28] sm:$0x1]  ;;  %s6227_s24 = scvt.s32.f32 %s6222_s11  ;;  %s2286_s30 = scvt.s32.f32 %s4847_s2  ;;  %v1734_v32 = vmul.f32 %v1733_v15, %v1729_v14 }
 0x455   : >> { %s2326_s26 = sadd.s32 6, %s4379_s29  ;;  %s6229_s9 = sld [smem:[#allocation221_spill]] }
 0x456   : >> { %v1528_v18 = vstv %s6227_s24  ;;  %s6230_s15 = sld [smem:[#allocation280_spill]]  ;;  %s1993_s21 = scalar_lea.vmem [#allocation6], %s6713_s19  ;;  %v1735_v57 = vadd.f32 %v1734_v32, %v1723_v30  ;;  %v2287_v6 = vstv %s2286_s30 }
 0x457   : >> { %v1994_v26 = vld [vmem:[%s1993_s21] sm:$0x1]  ;;  %s6231_s6 = scvt.s32.f32 %s6225_s5  ;;  %s6232_s10 = sld [smem:[#allocation281_spill]]  ;;  %v1529_v36 = vmul.f32 %v1528_v18, %v1524_v17 }
 0x458   : >> { %s4899_s11 = sld [smem:[#allocation5 + %s2326_s26]]  ;;  %s1367_s18 = scalar_lea.vmem [#allocation6], %s6226_s12 }
 0x459   : >> { %v1998_v27 = vstv %s6231_s6  ;;  %v1368_v28 = vld [vmem:[%s1367_s18] sm:$0x1]  ;;  %s6233_s0 = scvt.s32.f32 %s6228_s1  ;;  %p2304_p13 = scmp.lt.s32.totalorder %s4855_s20, 511  ;;  %v1530_v59 = vadd.f32 %v1529_v36, %v1518_v34 }
 0x45a   : >> { %p2308_p0 = scmp.gt.s32.totalorder %s4855_s20, 0  ;;  %s6235_s5 = sld [smem:[#allocation246_spill]]  ;;  %v1999_v41 = vmul.f32 %v1998_v27, %v1994_v26 }
 0x45b   : >> { %v1372_v29 = vstv %s6233_s0  ;;  %s6234_s19 = scvt.s32.f32 %s6229_s9  ;;  %s6237_s28 = sld [smem:[#allocation247_spill]] }
 0x45c   : >> { %s1740_s27 = scalar_lea.vmem [#allocation6], %s6230_s15  ;;  %p2316_p1 = scmp.lt.s32.totalorder %s4865_s4, 511  ;;  %v1373_v46 = vmul.f32 %v1372_v29, %v1368_v28  ;;  %v2000_v2 = vadd.f32 %v1999_v41, %v1988_v40  ;;  %v4999_v40 = vadd.f32 %v4901_v52, %v4894_v23 }
 0x45d   : >> { %v4910_v33 = vstv %s6234_s19  ;;  %v1741_v37 = vld [vmem:[%s1740_s27] sm:$0x1]  ;;  %s6236_s12 = scvt.s32.f32 %s6232_s10  ;;  %s6238_s24 = sld [smem:[#allocation319_spill]] }
 0x45e   : >> { %p2320_p2 = scmp.gt.s32.totalorder %s4865_s4, 0  ;;  %s6239_s1 = sld [smem:[#allocation320_spill]]  ;;  %v1374_v7 = vadd.f32 %v1373_v46, %v1362_v45 }
 0x45f   : >> { %v1745_v39 = vstv %s6236_s12  ;;  %s2258_s26 = scalar_lea.vmem [#allocation6], %s4780_s8  ;;  %s6240_s9 = sld [smem:[#allocation254_spill]] }
 0x460   : >> { %v2259_v42 = vld [vmem:[%s2258_s26] sm:$0x1]  ;;  %s6241_s21 = sld [smem:[#allocation255_spill]]  ;;  %s2270_s6 = scalar_lea.vmem [#allocation6], %s4812_s25  ;;  %v1746_v58 = vmul.f32 %v1745_v39, %v1741_v37 }
 0x461   : >> { %s6242_s15 = sld [smem:[#allocation256_spill]]  ;;  %v2271_v20 = vld [vmem:[%s2270_s6] sm:$0x1]  ;;  %s6243_s18 = scvt.s32.f32 %s4820_s17  ;;  %v2264_v62 = vmul.f32 %v2263_v44, %v2259_v42 }
 0x462   : >> { %s6244_s10 = sld [smem:[#allocation257_spill]]  ;;  %s1535_s19 = scalar_lea.vmem [#allocation6], %s6235_s5  ;;  %v1747_v17 = vadd.f32 %v1746_v58, %v1735_v57 }
 0x463   : >> { %v2275_v31 = vstv %s6243_s18  ;;  %s4926_s0 = scalar_select %p2304_p13, %s4855_s20, 511  ;;  %v1536_v47 = vld [vmem:[%s1535_s19] sm:$0x1] }
 0x464   : >> { %s6245_s8 = scvt.s32.f32 %s6237_s28  ;;  %s6246_s27 = sld [smem:[#allocation282_spill]]  ;;  %v2276_v63 = vmul.f32 %v2275_v31, %v2271_v20 }
 0x465   : >> { %s2005_s22 = scalar_lea.vmem [#allocation6], %s6238_s24  ;;  %s6247_s3 = sld [smem:[#allocation283_spill]] }
 0x466   : >> { %v1540_v48 = vstv %s6245_s8  ;;  %v2006_v49 = vld [vmem:[%s2005_s22] sm:$0x1]  ;;  %s6248_s25 = scvt.s32.f32 %s6239_s1  ;;  %s1584_s12 = scalar_lea.vmem [#allocation6], %s6240_s9  ;;  %v2277_v25 = vadd.f32 %v2276_v63, %v2264_v62 }
 0x467   : >> { %s4936_s17 = scalar_select %p2308_p0, 1, 0  ;;  %v1585_v51 = vld [vmem:[%s1584_s12] sm:$0x1]  ;;  %v1541_v1 = vmul.f32 %v1540_v48, %v1536_v47 }
 0x468   : >> { %v2010_v50 = vstv %s6248_s25  ;;  %s6249_s26 = scvt.s32.f32 %s6241_s21  ;;  %s6250_s6 = sld [smem:[#allocation220_spill]] }
 0x469   : >> { %s1596_s5 = scalar_lea.vmem [#allocation6], %s6242_s15  ;;  %s6251_s28 = scvt.s32.f32 %s6244_s10  ;;  %v2011_v3 = vmul.f32 %v2010_v50, %v2006_v49  ;;  %v1542_v27 = vadd.f32 %v1541_v1, %v1530_v59 }
 0x46a   : >> { %v1589_v54 = vstv %s6249_s26  ;;  %v1597_v55 = vld [vmem:[%s1596_s5] sm:$0x1]  ;;  %s2298_s24 = scvt.s32.f32 %s4885_s13  ;;  %s1752_s20 = scalar_lea.vmem [#allocation6], %s6246_s27 }
 0x46b   : >> { %v1601_v56 = vstv %s6251_s28  ;;  %v1753_v60 = vld [vmem:[%s1752_s20] sm:$0x1]  ;;  %s6252_s1 = scvt.s32.f32 %s6247_s3  ;;  %s6253_s9 = sld [smem:[#allocation321_spill]]  ;;  %v1590_v8 = vmul.f32 %v1589_v54, %v1585_v51  ;;  %v2012_v28 = vadd.f32 %v2011_v3, %v2000_v2 }
 0x46c   : >> { %p2328_p3 = scmp.lt.s32.totalorder %s4899_s11, 511  ;;  %s2338_s21 = sadd.s32 7, %s4379_s29  ;;  %v1602_v9 = vmul.f32 %v1601_v56, %v1597_v55  ;;  %v2299_v32 = vstv %s2298_s24 }
 0x46d   : >> { %v1757_v61 = vstv %s6252_s1  ;;  %s6254_s18 = sld [smem:[#allocation248_spill]]  ;;  %s2282_s8 = scalar_lea.vmem [#allocation6], %s4840_s16 }
 0x46e   : >> { %s1379_s15 = scalar_lea.vmem [#allocation6], %s6250_s6  ;;  %s6255_s10 = sld [smem:[#allocation249_spill]]  ;;  %v2283_v4 = vld [vmem:[%s2282_s8] sm:$0x1]  ;;  %v1758_v18 = vmul.f32 %v1757_v61, %v1753_v60  ;;  %v1603_v34 = vadd.f32 %v1602_v9, %v1590_v8 }
 0x46f   : >> { %v1380_v0 = vld [vmem:[%s1379_s15] sm:$0x1]  ;;  %s6256_s19 = sld [smem:[#allocation258_spill]]  ;;  %s6259_s12 = scvt.s32.f32 %s4156_s7  ;;  %v2288_v26 = vmul.f32 %v2287_v6, %v2283_v4 }
 0x470   : >> { %s6257_s27 = sld [smem:[#allocation259_spill]]  ;;  %s2310_s7 = scvt.s32.f32 %s4936_s17  ;;  %v1385_v21 = vmul.f32 %v4910_v33, %v1380_v0  ;;  %v1759_v44 = vadd.f32 %v1758_v18, %v1747_v17 }
 0x471   : >> { %s4957_s22 = scalar_select %p2316_p1, %s4865_s4, 511  ;;  %v2022_v11 = vstv %s6259_s12  ;;  %v2289_v52 = vadd.f32 %v2288_v26, %v2277_v25 }
 0x472   : >> { %s6258_s3 = sld [smem:[#allocation284_spill]]  ;;  %s2017_s25 = scalar_lea.vmem [#allocation6], %s6253_s9  ;;  %v5014_v48 = vadd.f32 %v1385_v21, %v1374_v7  ;;  %v2311_v54 = vstv %s2310_s7 }
 0x473   : >> { %v2018_v10 = vld [vmem:[%s2017_s25] sm:$0x1]  ;;  %s6260_s26 = sld [smem:[#allocation285_spill]]  ;;  %s1547_s6 = scalar_lea.vmem [#allocation6], %s6254_s18 }
 0x474   : >> { %s4964_s16 = scalar_select %p2320_p2, 1, 0  ;;  %v1548_v12 = vld [vmem:[%s1547_s6] sm:$0x1]  ;;  %v2023_v29 = vmul.f32 %v2022_v11, %v2018_v10 }
 0x475   : >> { %s6261_s2 = scvt.s32.f32 %s6255_s10  ;;  %s1608_s30 = scalar_lea.vmem [#allocation6], %s6256_s19 }
 0x476   : >> { %v1609_v14 = vld [vmem:[%s1608_s30] sm:$0x1]  ;;  %s6262_s5 = scvt.s32.f32 %s6257_s27  ;;  %p2332_p4 = scmp.gt.s32.totalorder %s4899_s11, 0  ;;  %v2024_v49 = vadd.f32 %v2023_v29, %v2012_v28 }
 0x477   : >> { %v1552_v13 = vstv %s6261_s2  ;;  %s6263_s28 = sld [smem:[#allocation322_spill]]  ;;  %s2294_s10 = scalar_lea.vmem [#allocation6], %s4875_s23 }
 0x478   : >> { %v1613_v15 = vstv %s6262_s5  ;;  %s1764_s4 = scalar_lea.vmem [#allocation6], %s6258_s3  ;;  %s6265_s1 = sld [smem:[#allocation323_spill]]  ;;  %v2295_v30 = vld [vmem:[%s2294_s10] sm:$0x1]  ;;  %v1553_v33 = vmul.f32 %v1552_v13, %v1548_v12 }
 0x479   : >> { %v1765_v22 = vld [vmem:[%s1764_s4] sm:$0x1]  ;;  %s6264_s20 = scvt.s32.f32 %s6260_s26  ;;  %s4980_s9 = sld [smem:[#allocation5 + %s2338_s21]]  ;;  %v1614_v36 = vmul.f32 %v1613_v15, %v1609_v14  ;;  %v2300_v47 = vmul.f32 %v2299_v32, %v2295_v30 }
 0x47a   : >> { %s6266_s15 = sld [smem:[#allocation260_spill]]  ;;  %s2322_s26 = scvt.s32.f32 %s4964_s16  ;;  %v5021_v55 = vadd.f32 %v1553_v33, %v1542_v27 }
 0x47b   : >> { %v1769_v24 = vstv %s6264_s20  ;;  %s6267_s18 = sld [smem:[#allocation261_spill]]  ;;  %s2350_s6 = sadd.s32 8, %s4379_s29  ;;  %v1615_v56 = vadd.f32 %v1614_v36, %v1603_v34  ;;  %v2301_v6 = vadd.f32 %v2300_v47, %v2289_v52 }
 0x47c   : >> { %s4988_s19 = scalar_select %p2328_p3, %s4899_s11, 511  ;;  %v1770_v20 = vmul.f32 %v1769_v24, %v1765_v22  ;;  %v2323_v13 = vstv %s2322_s26 }
 0x47d   : >> { %s6268_s8 = sld [smem:[#allocation250_spill]]  ;;  %s2029_s3 = scalar_lea.vmem [#allocation6], %s6263_s28 }
 0x47e   : >> { %s6269_s27 = sld [smem:[#allocation251_spill]]  ;;  %v2030_v37 = vld [vmem:[%s2029_s3] sm:$0x1]  ;;  %s6271_s25 = scvt.s32.f32 %s6265_s1  ;;  %v1771_v63 = vadd.f32 %v1770_v20, %v1759_v44 }
 0x47f   : >> { %s6270_s21 = sld [smem:[#allocation286_spill]]  ;;  %p2340_p7 = scmp.lt.s32.totalorder %s4980_s9, 511 }
 0x480   : >> { %s6272_s12 = sld [smem:[#allocation287_spill]]  ;;  %v2034_v39 = vstv %s6271_s25  ;;  %s1620_s13 = scalar_lea.vmem [#allocation6], %s6266_s15 }
 0x481   : >> { %s4995_s23 = scalar_select %p2332_p4, 1, 0  ;;  %v1621_v41 = vld [vmem:[%s1620_s13] sm:$0x1]  ;;  %v2035_v50 = vmul.f32 %v2034_v39, %v2030_v37 }
 0x482   : >> { %s6273_s24 = scvt.s32.f32 %s6267_s18  ;;  %s6276_s4 = sld [smem:[#allocation324_spill]] }
 0x483   : >> { %s1559_s2 = scalar_lea.vmem [#allocation6], %s6268_s8  ;;  %s6277_s28 = sld [smem:[#allocation325_spill]]  ;;  %v2036_v10 = vadd.f32 %v2035_v50, %v2024_v49 }
 0x484   : >> { %v1625_v42 = vstv %s6273_s24  ;;  %v1560_v31 = vld [vmem:[%s1559_s2] sm:$0x1]  ;;  %s6274_s11 = scvt.s32.f32 %s6269_s27  ;;  %s5012_s20 = sld [smem:[#allocation5 + %s2350_s6]] }
 0x485   : >> { %s1776_s30 = scalar_lea.vmem [#allocation6], %s6270_s21  ;;  %s6278_s1 = sld [smem:[#allocation262_spill]]  ;;  %v1626_v57 = vmul.f32 %v1625_v42, %v1621_v41 }
 0x486   : >> { %v1564_v45 = vstv %s6274_s11  ;;  %v1777_v46 = vld [vmem:[%s1776_s30] sm:$0x1]  ;;  %s6275_s5 = scvt.s32.f32 %s6272_s12  ;;  %s2306_s15 = scalar_lea.vmem [#allocation6], %s4926_s0 }
 0x487   : >> { %s6279_s18 = sld [smem:[#allocation263_spill]]  ;;  %v2307_v51 = vld [vmem:[%s2306_s15] sm:$0x1]  ;;  %s2334_s10 = scvt.s32.f32 %s4995_s23  ;;  %v1565_v60 = vmul.f32 %v1564_v45, %v1560_v31  ;;  %v1627_v15 = vadd.f32 %v1626_v57, %v1615_v56 }
 0x488   : >> { %v1781_v23 = vstv %s6275_s5  ;;  %s2362_s8 = sadd.s32 9, %s4379_s29  ;;  %s6280_s27 = sld [smem:[#allocation288_spill]]  ;;  %v2312_v7 = vmul.f32 %v2311_v54, %v2307_v51 }
 0x489   : >> { %s6281_s21 = sld [smem:[#allocation289_spill]]  ;;  %s2041_s3 = scalar_lea.vmem [#allocation6], %s6276_s4  ;;  %v1782_v0 = vmul.f32 %v1781_v23, %v1777_v46  ;;  %v2335_v44 = vstv %s2334_s10  ;;  %v5087_v20 = vadd.f32 %v1565_v60, %v5021_v55 }
 0x48a   : >> { %s6282_s25 = sld [smem:[#allocation302_spill]]  ;;  %v2042_v58 = vld [vmem:[%s2041_s3] sm:$0x1]  ;;  %s6283_s12 = scvt.s32.f32 %s6277_s28  ;;  %v2313_v33 = vadd.f32 %v2312_v7, %v2301_v6 }
 0x48b   : >> { %s6284_s13 = sld [smem:[#allocation303_spill]]  ;;  %p2344_p8 = scmp.gt.s32.totalorder %s4980_s9, 0  ;;  %v1783_v25 = vadd.f32 %v1782_v0, %v1771_v63 }
 0x48c   : >> { %v2046_v59 = vstv %s6283_s12  ;;  %s1632_s0 = scalar_lea.vmem [#allocation6], %s6278_s1  ;;  %s6285_s17 = sld [smem:[#allocation304_spill]] }
 0x48d   : >> { %v1633_v61 = vld [vmem:[%s1632_s0] sm:$0x1]  ;;  %s6286_s7 = scvt.s32.f32 %s6279_s18  ;;  %s6287_s24 = sld [smem:[#allocation305_spill]]  ;;  %v2047_v11 = vmul.f32 %v2046_v59, %v2042_v58 }
 0x48e   : >> { %s5031_s6 = sld [smem:[#allocation5 + %s2362_s8]]  ;;  %s2374_s2 = sadd.s32 10, %s4379_s29 }
 0x48f   : >> { %v1637_v62 = vstv %s6286_s7  ;;  %s1788_s11 = scalar_lea.vmem [#allocation6], %s6280_s27  ;;  %s6288_s30 = scvt.s32.f32 %s6281_s21  ;;  %v2048_v39 = vadd.f32 %v2047_v11, %v2036_v10 }
 0x490   : >> { %v1789_v1 = vld [vmem:[%s1788_s11] sm:$0x1]  ;;  %s6289_s5 = sld [smem:[#allocation253_spill]]  ;;  %s1873_s4 = scalar_lea.vmem [#allocation6], %s6282_s25  ;;  %v1638_v17 = vmul.f32 %v1637_v62, %v1633_v61 }
 0x491   : >> { %v1793_v2 = vstv %s6288_s30  ;;  %v1874_v3 = vld [vmem:[%s1873_s4] sm:$0x1]  ;;  %s6290_s28 = scvt.s32.f32 %s6284_s13  ;;  %s6291_s1 = sld [smem:[#allocation40_spill]] }
 0x492   : >> { %s6292_s15 = sld [smem:[#allocation41_spill]]  ;;  %s1885_s8 = scalar_lea.vmem [#allocation6], %s6285_s17  ;;  %v1794_v26 = vmul.f32 %v1793_v2, %v1789_v1  ;;  %v1639_v31 = vadd.f32 %v1638_v17, %v1627_v15 }
 0x493   : >> { %v1878_v4 = vstv %s6290_s28  ;;  %s5043_s18 = scalar_select %p2340_p7, %s4980_s9, 511  ;;  %v1886_v8 = vld [vmem:[%s1885_s8] sm:$0x1] }
 0x494   : >> { %s6293_s27 = scvt.s32.f32 %s6287_s24  ;;  %s6294_s21 = sld [smem:[#allocation264_spill]]  ;;  %v1879_v30 = vmul.f32 %v1878_v4, %v1874_v3  ;;  %v1795_v47 = vadd.f32 %v1794_v26, %v1783_v25 }
 0x495   : >> { %s6295_s3 = sld [smem:[#allocation265_spill]]  ;;  %s2318_s25 = scalar_lea.vmem [#allocation6], %s4957_s22 }
 0x496   : >> { %v1890_v9 = vstv %s6293_s27  ;;  %v2319_v12 = vld [vmem:[%s2318_s25] sm:$0x1]  ;;  %s6296_s12 = sld [smem:[#allocation291_spill]]  ;;  %s6297_s0 = scvt.s32.f32 %s6289_s5 }
 0x497   : >> { %s5053_s13 = scalar_select %p2344_p8, 1, 0  ;;  %v1891_v32 = vmul.f32 %v1890_v9, %v1886_v8  ;;  %v2324_v34 = vmul.f32 %v2323_v13, %v2319_v12 }
 0x498   : >> { %v1576_v14 = vstv %s6297_s0  ;;  %s6298_s17 = sld [smem:[#allocation252_spill]]  ;;  %s2053_s24 = scalar_lea.vmem [#allocation6], %s6291_s1 }
 0x499   : >> { %s6299_s7 = sld [smem:[#allocation290_spill]]  ;;  %v2054_v18 = vld [vmem:[%s2053_s24] sm:$0x1]  ;;  %s6300_s11 = scvt.s32.f32 %s6292_s15  ;;  %v1892_v55 = vadd.f32 %v1891_v32, %v1879_v30  ;;  %v2325_v57 = vadd.f32 %v2324_v34, %v2313_v33 }
 0x49a   : >> { %p2352_p9 = scmp.lt.s32.totalorder %s5012_s20, 511  ;;  %s2386_s22 = sadd.s32 11, %s4379_s29 }
 0x49b   : >> { %v2058_v21 = vstv %s6300_s11  ;;  %s1644_s16 = scalar_lea.vmem [#allocation6], %s6294_s21  ;;  %s6301_s9 = scvt.s32.f32 %s6295_s3 }
 0x49c   : >> { %v1645_v22 = vld [vmem:[%s1644_s16] sm:$0x1]  ;;  %s6302_s26 = sld [smem:[#allocation306_spill]]  ;;  %s6304_s5 = scvt.s32.f32 %s6296_s12  ;;  %v2059_v41 = vmul.f32 %v2058_v21, %v2054_v18 }
 0x49d   : >> { %v1649_v24 = vstv %s6301_s9  ;;  %s6303_s30 = sld [smem:[#allocation307_spill]]  ;;  %s2346_s4 = scvt.s32.f32 %s5053_s13 }
 0x49e   : >> { %v1805_v27 = vstv %s6304_s5  ;;  %p2356_p10 = scmp.gt.s32.totalorder %s5012_s20, 0  ;;  %s1571_s28 = scalar_lea.vmem [#allocation6], %s6298_s17  ;;  %v1650_v45 = vmul.f32 %v1649_v24, %v1645_v22  ;;  %v2060_v61 = vadd.f32 %v2059_v41, %v2048_v39 }
 0x49f   : >> { %v1572_v28 = vld [vmem:[%s1571_s28] sm:$0x1]  ;;  %s1800_s1 = scalar_lea.vmem [#allocation6], %s6299_s7  ;;  %s6305_s15 = sld [smem:[#allocation42_spill]]  ;;  %v2347_v0 = vstv %s2346_s4 }
 0x4a0   : >> { %v1801_v29 = vld [vmem:[%s1800_s1] sm:$0x1]  ;;  %s6306_s8 = sld [smem:[#allocation43_spill]]  ;;  %s2330_s12 = scalar_lea.vmem [#allocation6], %s4988_s19  ;;  %v5093_v52 = vmul.f32 %v1576_v14, %v1572_v28  ;;  %v5116_v1 = vadd.f32 %v1650_v45, %v1639_v31 }
 0x4a1   : >> { %s5074_s27 = scalar_select %p2352_p9, %s5012_s20, 511  ;;  %v2331_v42 = vld [vmem:[%s2330_s12] sm:$0x1]  ;;  %v1806_v49 = vmul.f32 %v1805_v27, %v1801_v29 }
 0x4a2   : >> { %s1897_s21 = scalar_lea.vmem [#allocation6], %s6302_s26  ;;  %s6308_s25 = sld [smem:[#allocation293_spill]]  ;;  %v2336_v58 = vmul.f32 %v2335_v44, %v2331_v42 }
 0x4a3   : >> { %v1898_v36 = vld [vmem:[%s1897_s21] sm:$0x1]  ;;  %s6307_s3 = scvt.s32.f32 %s6303_s30  ;;  %s6309_s0 = sld [smem:[#allocation266_spill]]  ;;  %v1807_v7 = vadd.f32 %v1806_v49, %v1795_v47 }
 0x4a4   : >> { %s5084_s17 = scalar_select %p2356_p10, 1, 0  ;;  %v2337_v17 = vadd.f32 %v2336_v58, %v2325_v57 }
 0x4a5   : >> { %v1902_v37 = vstv %s6307_s3  ;;  %s6310_s7 = sld [smem:[#allocation292_spill]]  ;;  %s2065_s24 = scalar_lea.vmem [#allocation6], %s6305_s15 }
 0x4a6   : >> { %v2066_v46 = vld [vmem:[%s2065_s24] sm:$0x1]  ;;  %s6311_s11 = scvt.s32.f32 %s6306_s8  ;;  %p2364_p11 = scmp.lt.s32.totalorder %s5031_s6, 511  ;;  %v1903_v56 = vmul.f32 %v1902_v37, %v1898_v36 }
 0x4a7   : >> { %s6312_s19 = sld [smem:[#allocation308_spill]]  ;;  %s2358_s10 = scvt.s32.f32 %s5084_s17 }
 0x4a8   : >> { %v2070_v23 = vstv %s6311_s11  ;;  %s6313_s23 = sld [smem:[#allocation309_spill]]  ;;  %s6314_s20 = scvt.s32.f32 %s6308_s25  ;;  %v1904_v14 = vadd.f32 %v1903_v56, %v1892_v55 }
 0x4a9   : >> { %p2368_p12 = scmp.gt.s32.totalorder %s5031_s6, 0  ;;  %s1656_s16 = scalar_lea.vmem [#allocation6], %s6309_s0  ;;  %v2071_v62 = vmul.f32 %v2070_v23, %v2066_v46  ;;  %v2359_v26 = vstv %s2358_s10 }
 0x4aa   : >> { %v1817_v50 = vstv %s6314_s20  ;;  %v1657_v51 = vld [vmem:[%s1656_s16] sm:$0x1]  ;;  %s6315_s26 = sld [smem:[#allocation267_spill]]  ;;  %s2342_s25 = scalar_lea.vmem [#allocation6], %s5043_s18 }
 0x4ab   : >> { %s1812_s9 = scalar_lea.vmem [#allocation6], %s6310_s7  ;;  %s6316_s30 = sld [smem:[#allocation295_spill]]  ;;  %v2343_v63 = vld [vmem:[%s2342_s25] sm:$0x1]  ;;  %v2072_v22 = vadd.f32 %v2071_v62, %v2060_v61 }
 0x4ac   : >> { %v1813_v54 = vld [vmem:[%s1812_s9] sm:$0x1]  ;;  %s6317_s5 = sld [smem:[#allocation78_spill]]  ;;  %v2348_v18 = vmul.f32 %v2347_v0, %v2343_v63  ;;  %s2354_s25 = scalar_lea.vmem [#allocation6], %s5074_s27 }
 0x4ad   : >> { %s6318_s28 = sld [smem:[#allocation79_spill]]  ;;  %s1909_s15 = scalar_lea.vmem [#allocation6], %s6312_s19  ;;  %v1818_v8 = vmul.f32 %v1817_v50, %v1813_v54  ;;  %v2355_v25 = vld [vmem:[%s2354_s25] sm:$0x1] }
 0x4ae   : >> { %s5104_s1 = scalar_select %p2364_p11, %s5031_s6, 511  ;;  %v1910_v59 = vld [vmem:[%s1909_s15] sm:$0x1]  ;;  %v2349_v45 = vadd.f32 %v2348_v18, %v2337_v17  ;;  %v2360_v46 = vmul.f32 %v2359_v26, %v2355_v25 }
 0x4af   : >> { %s6319_s8 = scvt.s32.f32 %s6313_s23  ;;  %s6320_s21 = sld [smem:[#allocation46_spill]]  ;;  %v1819_v36 = vadd.f32 %v1818_v8, %v1807_v7 }
 0x4b0   : >> { %s6321_s3 = sld [smem:[#allocation47_spill]]  ;;  %s6324_s24 = scvt.s32.f32 %s6315_s26 }
 0x4b1   : >> { %v1914_v60 = vstv %s6319_s8  ;;  %s6322_s12 = sld [smem:[#allocation84_spill]]  ;;  %s6325_s11 = scvt.s32.f32 %s6316_s30 }
 0x4b2   : >> { %s6323_s0 = sld [smem:[#allocation85_spill]]  ;;  %v1661_v2 = vstv %s6324_s24  ;;  %s2077_s23 = scalar_lea.vmem [#allocation6], %s6317_s5  ;;  %v1915_v15 = vmul.f32 %v1914_v60, %v1910_v59 }
 0x4b3   : >> { %s5114_s7 = scalar_select %p2368_p12, 1, 0  ;;  %v1829_v3 = vstv %s6325_s11  ;;  %v2078_v4 = vld [vmem:[%s2077_s23] sm:$0x1]  ;;  %v1662_v21 = vmul.f32 %v1661_v2, %v1657_v51 }
 0x4b4   : >> { %s6326_s19 = sld [smem:[#allocation294_spill]]  ;;  %s6327_s18 = scvt.s32.f32 %s6318_s28  ;;  %v1916_v31 = vadd.f32 %v1915_v15, %v1904_v14 }
 0x4b5   : >> { %s5127_s13 = sld [smem:[#allocation5 + %s2374_s2]]  ;;  %s2162_s6 = scalar_lea.vmem [#allocation6], %s6320_s21  ;;  %v1663_v61 = vadd.f32 %v1662_v21, %v5116_v1  ;;  %v2361_v1 = vadd.f32 %v2360_v46, %v2349_v45 }
 0x4b6   : >> { %v2082_v6 = vstv %s6327_s18  ;;  %v2163_v9 = vld [vmem:[%s2162_s6] sm:$0x1]  ;;  %s6328_s4 = scvt.s32.f32 %s6321_s3  ;;  %s2370_s9 = scvt.s32.f32 %s5114_s7 }
 0x4b7   : >> { %s2174_s20 = scalar_lea.vmem [#allocation6], %s6322_s12  ;;  %s5138_s26 = sld [smem:[#allocation5 + %s2386_s22]]  ;;  %v2083_v24 = vmul.f32 %v2082_v6, %v2078_v4 }
 0x4b8   : >> { %v2167_v10 = vstv %s6328_s4  ;;  %v2175_v11 = vld [vmem:[%s2174_s20] sm:$0x1]  ;;  %s6329_s16 = scvt.s32.f32 %s6323_s0  ;;  %s6330_s30 = sld [smem:[#allocation310_spill]]  ;;  %v2371_v54 = vstv %s2370_s9 }
 0x4b9   : >> { %s6331_s5 = sld [smem:[#allocation311_spill]]  ;;  %s2398_s8 = sadd.s32 12, %s4379_s29  ;;  %v2168_v32 = vmul.f32 %v2167_v10, %v2163_v9  ;;  %v2084_v49 = vadd.f32 %v2083_v24, %v2072_v22 }
 0x4ba   : >> { %v2179_v12 = vstv %s6329_s16  ;;  %s1824_s2 = scalar_lea.vmem [#allocation6], %s6326_s19  ;;  %s6332_s28 = sld [smem:[#allocation80_spill]] }
 0x4bb   : >> { %v1825_v13 = vld [vmem:[%s1824_s2] sm:$0x1]  ;;  %s6333_s15 = sld [smem:[#allocation81_spill]]  ;;  %s2410_s21 = sadd.s32 13, %s4379_s29  ;;  %v2180_v33 = vmul.f32 %v2179_v12, %v2175_v11 }
 0x4bc   : >> { %s6334_s3 = sld [smem:[#allocation269_spill]]  ;;  %s2422_s24 = sadd.s32 14, %s4379_s29  ;;  %v1830_v37 = vmul.f32 %v1829_v3, %v1825_v13 }
 0x4bd   : >> { %s6335_s22 = sld [smem:[#allocation30_spill]]  ;;  %p2376_p13 = scmp.lt.s32.totalorder %s5127_s13, 511  ;;  %v2181_v59 = vadd.f32 %v2180_v33, %v2168_v32 }
 0x4be   : >> { %s5146_s12 = sld [smem:[#allocation5 + %s2398_s8]]  ;;  %s1921_s11 = scalar_lea.vmem [#allocation6], %s6330_s30  ;;  %v1831_v62 = vadd.f32 %v1830_v37, %v1819_v36 }
 0x4bf   : >> { %s6336_s0 = sld [smem:[#allocation31_spill]]  ;;  %v1922_v27 = vld [vmem:[%s1921_s11] sm:$0x1]  ;;  %s6337_s19 = scvt.s32.f32 %s6331_s5 }
 0x4c0   : >> { %s6338_s23 = sld [smem:[#allocation296_spill]]  ;;  %s2089_s18 = scalar_lea.vmem [#allocation6], %s6332_s28 }
 0x4c1   : >> { %v1926_v28 = vstv %s6337_s19  ;;  %s6339_s6 = sld [smem:[#allocation297_spill]]  ;;  %v2090_v29 = vld [vmem:[%s2089_s18] sm:$0x1]  ;;  %s6340_s4 = scvt.s32.f32 %s6333_s15 }
 0x4c2   : >> { %s5155_s27 = sld [smem:[#allocation5 + %s2410_s21]]  ;;  %s6341_s17 = scvt.s32.f32 %s6334_s3  ;;  %v1927_v47 = vmul.f32 %v1926_v28, %v1922_v27  ;;  %v5215_v28 = vadd.f32 %v5093_v52, %v5087_v20 }
 0x4c3   : >> { %v2094_v30 = vstv %s6340_s4  ;;  %s6342_s10 = sld [smem:[#allocation268_spill]]  ;;  %s2186_s20 = scalar_lea.vmem [#allocation6], %s6335_s22 }
 0x4c4   : >> { %v1673_v34 = vstv %s6341_s17  ;;  %v2187_v39 = vld [vmem:[%s2186_s20] sm:$0x1]  ;;  %s5162_s2 = sld [smem:[#allocation5 + %s2422_s24]]  ;;  %s2434_s30 = sadd.s32 15, %s4379_s29  ;;  %v2095_v50 = vmul.f32 %v2094_v30, %v2090_v29  ;;  %v1928_v8 = vadd.f32 %v1927_v47, %v1916_v31 }
 0x4c5   : >> { %s6343_s16 = scvt.s32.f32 %s6336_s0  ;;  %s6345_s15 = sld [smem:[#allocation312_spill]] }
 0x4c6   : >> { %s1836_s5 = scalar_lea.vmem [#allocation6], %s6338_s23  ;;  %s6346_s8 = sld [smem:[#allocation313_spill]]  ;;  %v2096_v10 = vadd.f32 %v2095_v50, %v2084_v49 }
 0x4c7   : >> { %v2191_v41 = vstv %s6343_s16  ;;  %v1837_v42 = vld [vmem:[%s1836_s5] sm:$0x1]  ;;  %s6344_s28 = scvt.s32.f32 %s6339_s6  ;;  %s6347_s21 = sld [smem:[#allocation24_spill]] }
 0x4c8   : >> { %p2380_p0 = scmp.gt.s32.totalorder %s5127_s13, 0  ;;  %s6348_s3 = sld [smem:[#allocation25_spill]]  ;;  %v2192_v60 = vmul.f32 %v2191_v41, %v2187_v39 }
 0x4c9   : >> { %v1841_v44 = vstv %s6344_s28  ;;  %s1668_s25 = scalar_lea.vmem [#allocation6], %s6342_s10  ;;  %s2366_s22 = scalar_lea.vmem [#allocation6], %s5104_s1 }
 0x4ca   : >> { %v1669_v23 = vld [vmem:[%s1668_s25] sm:$0x1]  ;;  %s6349_s0 = sld [smem:[#allocation48_spill]]  ;;  %p2388_p1 = scmp.lt.s32.totalorder %s5138_s26, 511  ;;  %v1842_v63 = vmul.f32 %v1841_v44, %v1837_v42  ;;  %v2193_v18 = vadd.f32 %v2192_v60, %v2181_v59 }
 0x4cb   : >> { %v2367_v51 = vld [vmem:[%s2366_s22] sm:$0x1]  ;;  %s6350_s24 = sld [smem:[#allocation49_spill]]  ;;  %p2392_p2 = scmp.gt.s32.totalorder %s5138_s26, 0  ;;  %v1674_v3 = vmul.f32 %v1673_v34, %v1669_v23 }
 0x4cc   : >> { %s1933_s11 = scalar_lea.vmem [#allocation6], %s6345_s15  ;;  %s6351_s19 = scvt.s32.f32 %s6346_s8  ;;  %v2372_v7 = vmul.f32 %v2371_v54, %v2367_v51  ;;  %v1843_v22 = vadd.f32 %v1842_v63, %v1831_v62 }
 0x4cd   : >> { %v1934_v55 = vld [vmem:[%s1933_s11] sm:$0x1]  ;;  %s6352_s23 = sld [smem:[#allocation298_spill]]  ;;  %s2101_s18 = scalar_lea.vmem [#allocation6], %s6347_s21  ;;  %v5222_v52 = vadd.f32 %v1674_v3, %v1663_v61 }
 0x4ce   : >> { %v1938_v56 = vstv %s6351_s19  ;;  %s6353_s6 = sld [smem:[#allocation299_spill]]  ;;  %v2102_v57 = vld [vmem:[%s2101_s18] sm:$0x1]  ;;  %s6354_s4 = scvt.s32.f32 %s6348_s3  ;;  %v2373_v32 = vadd.f32 %v2372_v7, %v2361_v1  ;;  %v2450_v1 = vperm.slane %v4763_v53, 0 }
 0x4cf   : >> { %s2377_s1 = scalar_select %p2376_p13, %s5127_s13, 511  ;;  %v1939_v9 = vmul.f32 %v1938_v56, %v1934_v55  ;;  %v2447_v56 = vperm.slane %v4715_v19, 0  ;;  %v2482_v19 = vperm.slane %v4735_v35, 0 }
 0x4d0   : >> { %v2106_v58 = vstv %s6354_s4  ;;  %s2198_s7 = scalar_lea.vmem [#allocation6], %s6349_s0  ;;  %s6356_s10 = sld [smem:[#allocation314_spill]] }
 0x4d1   : >> { %v2199_v0 = vld [vmem:[%s2198_s7] sm:$0x1]  ;;  %s6355_s9 = scvt.s32.f32 %s6350_s24  ;;  %s6357_s16 = sld [smem:[#allocation315_spill]]  ;;  %v2107_v11 = vmul.f32 %v2106_v58, %v2102_v57  ;;  %v1940_v34 = vadd.f32 %v1939_v9, %v1928_v8  ;;  %v2468_v35 = vsel %vm2467_vm0, %v4558_v38, %v2447_v56  ;;  %v2453_v38 = vperm.slane %v4887_v16, 0 }
 0x4d2   : >> { %s5191_s17 = scalar_select %p2380_p0, 1, 0  ;;  %v2488_v16 = vperm.slane %v4999_v40, 0 }
 0x4d3   : >> { %v2203_v2 = vstv %s6355_s9  ;;  %s1848_s20 = scalar_lea.vmem [#allocation6], %s6352_s23  ;;  %s6359_s28 = sld [smem:[#allocation26_spill]]  ;;  %v2108_v37 = vadd.f32 %v2107_v11, %v2096_v10 }
 0x4d4   : >> { %v1849_v4 = vld [vmem:[%s1848_s20] sm:$0x1]  ;;  %s6358_s5 = scvt.s32.f32 %s6353_s6  ;;  %s6360_s15 = sld [smem:[#allocation27_spill]]  ;;  %v2204_v21 = vmul.f32 %v2203_v2, %v2199_v0 }
 0x4d5   : >> { %p2400_p3 = scmp.lt.s32.totalorder %s5146_s12, 511  ;;  %s6361_s13 = sld [smem:[#allocation86_spill]] }
 0x4d6   : >> { %v1853_v6 = vstv %s6358_s5  ;;  %s2378_s8 = scalar_lea.vmem [#allocation6], %s2377_s1  ;;  %s6362_s21 = sld [smem:[#allocation87_spill]]  ;;  %v2205_v44 = vadd.f32 %v2204_v21, %v2193_v18 }
 0x4d7   : >> { %v2379_v12 = vld [vmem:[%s2378_s8] sm:$0x1]  ;;  %s2382_s3 = scvt.s32.f32 %s5191_s17  ;;  %p2404_p4 = scmp.gt.s32.totalorder %s5146_s12, 0  ;;  %v1854_v24 = vmul.f32 %v1853_v6, %v1849_v4 }
 0x4d8   : >> { %s1945_s25 = scalar_lea.vmem [#allocation6], %s6356_s10  ;;  %s6363_s22 = scvt.s32.f32 %s6357_s16 }
 0x4d9   : >> { %v1946_v13 = vld [vmem:[%s1945_s25] sm:$0x1]  ;;  %s6364_s0 = sld [smem:[#allocation300_spill]]  ;;  %s2113_s24 = scalar_lea.vmem [#allocation6], %s6359_s28  ;;  %v2383_v27 = vstv %s2382_s3  ;;  %v1855_v45 = vadd.f32 %v1854_v24, %v1843_v22 }
 0x4da   : >> { %v1950_v14 = vstv %s6363_s22  ;;  %s6365_s11 = sld [smem:[#allocation301_spill]]  ;;  %v2114_v15 = vld [vmem:[%s2113_s24] sm:$0x1]  ;;  %s6366_s19 = scvt.s32.f32 %s6360_s15  ;;  %v2384_v33 = vmul.f32 %v2383_v27, %v2379_v12  ;;  %v2485_v12 = vperm.slane %v4867_v5, 0  ;;  %v2470_v5 = vsel %vm2469_vm1, %v2468_v35, %v2450_v1 }
 0x4db   : >> { %s2389_s23 = scalar_select %p2388_p1, %s5138_s26, 511  ;;  %v1951_v36 = vmul.f32 %v1950_v14, %v1946_v13 }
 0x4dc   : >> { %v2118_v17 = vstv %s6366_s19  ;;  %s2210_s18 = scalar_lea.vmem [#allocation6], %s6361_s13  ;;  %s6367_s6 = scvt.s32.f32 %s6362_s21  ;;  %v2385_v54 = vadd.f32 %v2384_v33, %v2373_v32 }
 0x4dd   : >> { %v2211_v25 = vld [vmem:[%s2210_s18] sm:$0x1]  ;;  %s2393_s4 = scalar_select %p2392_p2, 1, 0  ;;  %v2119_v39 = vmul.f32 %v2118_v17, %v2114_v15  ;;  %v5240_v57 = vadd.f32 %v1951_v36, %v1940_v34  ;;  %v2502_v17 = vsel %vm2467_vm0, %v4565_v43, %v2482_v19  ;;  %v2472_v36 = vsel %vm2471_vm2, %v2470_v5, %v2453_v38 }
 0x4de   : >> { %v2215_v26 = vstv %s6367_s6  ;;  %s6368_s1 = sld [smem:[#allocation44_spill]]  ;;  %p2412_p7 = scmp.lt.s32.totalorder %s5155_s27, 511  ;;  %v2503_v32 = vsel %vm2469_vm1, %v2502_v17, %v2485_v12 }
 0x4df   : >> { %s1860_s7 = scalar_lea.vmem [#allocation6], %s6364_s0  ;;  %s6370_s17 = sld [smem:[#allocation45_spill]]  ;;  %v2216_v31 = vmul.f32 %v2215_v26, %v2211_v25  ;;  %v2120_v58 = vadd.f32 %v2119_v39, %v2108_v37  ;;  %v2491_v39 = vperm.slane %v5215_v28, 0 }
 0x4e0   : >> { %v1861_v29 = vld [vmem:[%s1860_s7] sm:$0x1]  ;;  %s6369_s9 = scvt.s32.f32 %s6365_s11  ;;  %s6371_s26 = sld [smem:[#allocation32_spill]] }
 0x4e1   : >> { %s6372_s10 = sld [smem:[#allocation33_spill]]  ;;  %s2390_s20 = scalar_lea.vmem [#allocation6], %s2389_s23  ;;  %v2217_v63 = vadd.f32 %v2216_v31, %v2205_v44 }
 0x4e2   : >> { %v1865_v30 = vstv %s6369_s9  ;;  %v2391_v20 = vld [vmem:[%s2390_s20] sm:$0x1]  ;;  %s2394_s16 = scvt.s32.f32 %s2393_s4  ;;  %s6373_s5 = sld [smem:[#allocation316_spill]] }
 0x4e3   : >> { %p2416_p8 = scmp.gt.s32.totalorder %s5155_s27, 0  ;;  %s6374_s28 = sld [smem:[#allocation317_spill]]  ;;  %v1866_v46 = vmul.f32 %v1865_v30, %v1861_v29  ;;  %v2456_v30 = vperm.slane %v5014_v48, 0  ;;  %v2504_v48 = vsel %vm2471_vm2, %v2503_v32, %v2488_v16 }
 0x4e4   : >> { %s2125_s15 = scalar_lea.vmem [#allocation6], %s6368_s1  ;;  %v2395_v49 = vstv %s2394_s16  ;;  %s6377_s22 = sld [smem:[#allocation82_spill]]  ;;  %v2505_v28 = vsel %vm2473_vm3, %v2504_v48, %v2491_v39 }
 0x4e5   : >> { %v2126_v41 = vld [vmem:[%s2125_s15] sm:$0x1]  ;;  %s6375_s13 = scvt.s32.f32 %s6370_s17  ;;  %s6379_s11 = sld [smem:[#allocation83_spill]]  ;;  %v2396_v55 = vmul.f32 %v2395_v49, %v2391_v20  ;;  %v1867_v24 = vadd.f32 %v1866_v46, %v1855_v45  ;;  %v2474_v31 = vsel %vm2473_vm3, %v2472_v36, %v2456_v30 }
 0x4e6   : >> { %s2401_s8 = scalar_select %p2400_p3, %s5146_s12, 511 }
 0x4e7   : >> { %v2130_v42 = vstv %s6375_s13  ;;  %s2222_s21 = scalar_lea.vmem [#allocation6], %s6371_s26  ;;  %s6376_s3 = scvt.s32.f32 %s6372_s10  ;;  %v2397_v7 = vadd.f32 %v2396_v55, %v2385_v54  ;;  %v2494_v46 = vperm.slane %v1867_v24, 0 }
 0x4e8   : >> { %v2223_v23 = vld [vmem:[%s2222_s21] sm:$0x1]  ;;  %s2405_s25 = scalar_select %p2404_p4, 1, 0  ;;  %v2131_v59 = vmul.f32 %v2130_v42, %v2126_v41  ;;  %v2459_v42 = vperm.slane %v5222_v52, 0 }
 0x4e9   : >> { %v2227_v47 = vstv %s6376_s3  ;;  %s1957_s0 = scalar_lea.vmem [#allocation6], %s6373_s5  ;;  %s6378_s24 = scvt.s32.f32 %s6374_s28  ;;  %v2506_v56 = vsel %vm2475_vm4, %v2505_v28, %v2494_v46 }
 0x4ea   : >> { %v1958_v50 = vld [vmem:[%s1957_s0] sm:$0x1]  ;;  %p2424_p9 = scmp.lt.s32.totalorder %s5162_s2, 511  ;;  %s6380_s19 = sld [smem:[#allocation50_spill]]  ;;  %v2228_v0 = vmul.f32 %v2227_v47, %v2223_v23  ;;  %v2132_v9 = vadd.f32 %v2131_v59, %v2120_v58 }
 0x4eb   : >> { %v1962_v51 = vstv %s6378_s24  ;;  %s6381_s12 = sld [smem:[#allocation51_spill]]  ;;  %s2402_s23 = scalar_lea.vmem [#allocation6], %s2401_s8 }
 0x4ec   : >> { %v2403_v60 = vld [vmem:[%s2402_s23] sm:$0x1]  ;;  %s2406_s18 = scvt.s32.f32 %s2405_s25  ;;  %p2428_p10 = scmp.gt.s32.totalorder %s5162_s2, 0  ;;  %v1963_v2 = vmul.f32 %v1962_v51, %v1958_v50  ;;  %v2229_v14 = vadd.f32 %v2228_v0, %v2217_v63  ;;  %v2476_v50 = vsel %vm2475_vm4, %v2474_v31, %v2459_v42 }
 0x4ed   : >> { %s2137_s6 = scalar_lea.vmem [#allocation6], %s6377_s22  ;;  %s6382_s4 = scvt.s32.f32 %s6379_s11 }
 0x4ee   : >> { %v2138_v61 = vld [vmem:[%s2137_s6] sm:$0x1]  ;;  %s2413_s1 = scalar_select %p2412_p7, %s5155_s27, 511  ;;  %v2407_v6 = vstv %s2406_s18  ;;  %v1964_v37 = vadd.f32 %v1963_v2, %v5240_v57 }
 0x4ef   : >> { %v2142_v62 = vstv %s6382_s4  ;;  %s6383_s7 = sld [smem:[#allocation29_spill]]  ;;  %v2408_v8 = vmul.f32 %v2407_v6, %v2403_v60  ;;  %s6388_s13 = scvt.s32.f32 %s4761_s14 }
 0x4f0   : >> { %s2234_s9 = scalar_lea.vmem [#allocation6], %s6380_s19  ;;  %s6385_s26 = sld [smem:[#allocation28_spill]]  ;;  %v2143_v10 = vmul.f32 %v2142_v62, %v2138_v61  ;;  %v2462_v47 = vperm.slane %v1964_v37, 0 }
 0x4f1   : >> { %v2235_v3 = vld [vmem:[%s2234_s9] sm:$0x1]  ;;  %s6384_s17 = scvt.s32.f32 %s6381_s12  ;;  %s5258_s20 = sld [smem:[#allocation5 + %s2434_s30]]  ;;  %v2251_v21 = vstv %s6388_s13  ;;  %v2409_v25 = vadd.f32 %v2408_v8, %v2397_v7 }
 0x4f2   : >> { %s2417_s10 = scalar_select %p2416_p8, 1, 0  ;;  %v2144_v27 = vadd.f32 %v2143_v10, %v2132_v9  ;;  %v2478_v57 = vsel %vm2477_vm5, %v2476_v50, %v2462_v47 }
 0x4f3   : >> { %v2239_v4 = vstv %s6384_s17  ;;  %s6386_s16 = sld [smem:[#allocation88_spill]]  ;;  %s2414_s27 = scalar_lea.vmem [#allocation6], %s2413_s1 }
 0x4f4   : >> { %v2415_v53 = vld [vmem:[%s2414_s27] sm:$0x1]  ;;  %s2418_s28 = scvt.s32.f32 %s2417_s10  ;;  %v2240_v15 = vmul.f32 %v2239_v4, %v2235_v3  ;;  %s6389_s22 = sld [smem:[#allocation23_spill]] }
 0x4f5   : >> { %s6387_s5 = scvt.s32.f32 %s6383_s7 }
 0x4f6   : >> { %s2149_s15 = scalar_lea.vmem [#allocation6], %s6385_s26  ;;  %v2419_v22 = vstv %s2418_s28  ;;  %v2241_v33 = vadd.f32 %v2240_v15, %v2229_v14 }
 0x4f7   : >> { %v2154_v11 = vstv %s6387_s5  ;;  %v2150_v13 = vld [vmem:[%s2149_s15] sm:$0x1]  ;;  %s2425_s29 = scalar_select %p2424_p9, %s5162_s2, 511  ;;  %v2420_v26 = vmul.f32 %v2419_v22, %v2415_v53 }
 0x4f8   : >> { %s2429_s8 = scalar_select %p2428_p10, 1, 0  ;;  %v2155_v29 = vmul.f32 %v2154_v11, %v2150_v13 }
 0x4f9   : >> { %s2246_s30 = scalar_lea.vmem [#allocation6], %s6386_s16  ;;  %s2426_s21 = scalar_lea.vmem [#allocation6], %s2425_s29  ;;  %v2421_v20 = vadd.f32 %v2420_v26, %v2409_v25 }
 0x4fa   : >> { %v2247_v18 = vld [vmem:[%s2246_s30] sm:$0x1]  ;;  %s2430_s14 = scvt.s32.f32 %s2429_s8  ;;  %p2436_p11 = scmp.lt.s32.totalorder %s5258_s20, 511  ;;  %v2156_v44 = vadd.f32 %v2155_v29, %v2144_v27 }
 0x4fb   : >> { %v2427_v43 = vld [vmem:[%s2426_s21] sm:$0x1]  ;;  %v2252_v34 = vmul.f32 %v2251_v21, %v2247_v18  ;;  %p2440_p12 = scmp.gt.s32.totalorder %s5258_s20, 0  ;;  %s6390_s0 = sshll.u32 %s6389_s22, 3 }
 0x4fc   : >> { %v2431_v40 = vstv %s2430_s14  ;;  %s6725_s20 = smov (!%p2436_p11, %s5258_s20), 511  ;;  %v2497_v51 = vperm.slane %v2156_v44, 0  ;;  %s2510_s24 = scalar_lea.vmem [#allocation2], %s6390_s0 }
 0x4fd   : >> { %v2432_v41 = vmul.f32 %v2431_v40, %v2427_v43  ;;  %s2441_s2 = scalar_select %p2440_p12, 1, 0  ;;  %v2253_v45 = vadd.f32 %v2252_v34, %v2241_v33 }
 0x4fe   : >> { %s2438_s3 = scalar_lea.vmem [#allocation6], %s6725_s20  ;;  %v2507_v59 = vsel %vm2477_vm5, %v2506_v56, %v2497_v51  ;;  %s132_s13 = sadd.s32 1, %s6389_s22  }
 0x4ff   : >> { %v2439_v23 = vld [vmem:[%s2438_s3] sm:$0x1]  ;;  %s2442_s25 = scvt.s32.f32 %s2441_s2  ;;  %v2433_v49 = vadd.f32 %v2432_v41, %v2421_v20  ;;  %v2465_v55 = vperm.slane %v2253_v45, 0  ;;  %p129_p13 = scmp.ge.s32.totalorder %s132_s13, 16  }
 0x500   : > { %s6391_s11 = sld [smem:[#allocation17_spill]] (%p129_p13)  ;;  %v3069_v14 = vmov (%p129_p13), 1.0  }
 0x501   : >> { %v2443_v52 = vstv %s2442_s25  ;;  %v2480_v60 = vsel %vm2479_vm6, %v2478_v57, %v2465_v55  ;;  %s6392_s19 = sld [smem:[#allocation22_spill]] (%p129_p13) }
 0x502   : >> { %v2444_v54 = vmul.f32 %v2443_v52, %v2439_v23  ;;  %s6393_s12 = sld [smem:[#allocation14_spill]] (%p129_p13) }
 0x503   : > { %s6395_s4 = sld [smem:[#allocation327_spill]] (%p129_p13) }
 0x504   : >> { %v2445_v58 = vadd.f32 %v2444_v54, %v2433_v49 }
 0x506   : >> { %v2500_v61 = vperm.slane %v2445_v58, 0 }
 0x507   : > { %131 = sbr.rel (!%p129_p13) target bundleno = 39 (0x27), region = 261  ;;  %s2560_s7 = sshll.u32 (%p129_p13), %s6392_s19, 4  ;;  %s2561_s7 = int_to_ptr.vmem [resolvable:$true] %s2560_s7 }
 0x508   : >> { %v2508_v62 = vsel %vm2479_vm6, %v2507_v59, %v2500_v61  ;;  %s6396_s17 = sand.u32 (%p129_p13), 1, %s6393_s12  }
 0x509   : >> { %v2509_v63 = vmul.f32 %v2508_v62, %v2480_v60  ;;  %s2558_s1 = scalar_lea.hbm (%p129_p13), %s6395_s4, %s6391_s11  ;;  %s2550_s26 = scalar_lea.sflag (%p129_p13), [#allocation8], %s6396_s17 }
 0x50a   : > { %s2562_s9 = sshll.u32 (%p129_p13), %s2558_s1, 4  ;;  %s3006_s27 = scalar_lea.hbm (%p129_p13), %s6395_s4, 2  ;;  %s2563_s9 = int_to_ptr.hbm [resolvable:$true] %s2562_s9 }
 0x50b   : >> { %2511 = vst [vmem:[%s2510_s24] sm:$0xff] %v2509_v63  ;;  %s3000_s10 = sshra.s32 (%p129_p13), %s2563_s9, 4  ;;  %s3001_s10 = int_to_ptr.hbm [resolvable:$true] %s3000_s10 }
 0x50c   : > { %s3002_s20 = scalar_lea.hbm %s3001_s10, 1  ;;  %p3007_p3 = scmp.lt.s32.totalorder %s3001_s10, %s6395_s4 }
 0x50d   : > { %p3003_p0 = scmp.ne.s32.totalorder %s3001_s10, %s3002_s20  ;;  %p3008_p4 = scmp.lt.s32.totalorder %s3006_s27, %s3002_s20 }
 0x50f   : > { %p3004_p1 = pnand %p3003_p0, %p3134_p5  ;;  %p3009_p7 = por %p3008_p4, %p3007_p3 }
 0x511   : > { %p3005_p2 = pneg %p3004_p1 }
 0x512   : > { %v2527_v0 = vld [vmem:[#allocation2 + $0x78] sm:$0xff]  ;;  %v2526_v19 = vld [vmem:[#allocation2 + $0x70] sm:$0xff]  ;;  %v2525_v2 = vld [vmem:[#allocation2 + $0x68] sm:$0xff] }
 0x513   : > { %2528 = vmatpush.xpose.msra.mxu0 %v2527_v0  ;;  %v2524_v3 = vld [vmem:[#allocation2 + $0x60] sm:$0xff]  ;;  %v2523_v4 = vld [vmem:[#allocation2 + $0x58] sm:$0xff]  ;;  %v2522_v6 = vld [vmem:[#allocation2 + $0x50] sm:$0xff]  ;;  %p3010_p8 = pnand %p3009_p7, %p3005_p2 }
 0x514   : > { %v2521_v1 = vld [vmem:[#allocation2 + $0x48] sm:$0xff]  ;;  %v2520_v7 = vld [vmem:[#allocation2 + $0x40] sm:$0xff]  ;;  %v2519_v8 = vld [vmem:[#allocation2 + $0x38] sm:$0xff] }
 0x515   : > { %v2518_v35 = vld [vmem:[#allocation2 + $0x30] sm:$0xff]  ;;  %v2517_v9 = vld [vmem:[#allocation2 + $0x28] sm:$0xff]  ;;  %v2516_v10 = vld [vmem:[#allocation2 + $0x20] sm:$0xff] }
 0x516   : > { %v2515_v11 = vld [vmem:[#allocation2 + $0x18] sm:$0xff]  ;;  %v2514_v53 = vld [vmem:[#allocation2 + $0x10] sm:$0xff]  ;;  %v2513_v12 = vld [vmem:[#allocation2 + $0x8] sm:$0xff] }
 0x517   : > { %2529 = vmatpush.xpose.msra.mxu0 %v2526_v19  ;;  %v2512_v13 = vld [vmem:[#allocation2] sm:$0xff] }
 0x51b   : > { %2530 = vmatpush.xpose.msra.mxu0 %v2525_v2 }
 0x51f   : > { %2531 = vmatpush.xpose.msra.mxu0 %v2524_v3 }
 0x523   : > { %2532 = vmatpush.xpose.msra.mxu0 %v2523_v4 }
 0x527   : > { %2533 = vmatpush.xpose.msra.mxu0 %v2522_v6 }
 0x52b   : > { %2534 = vmatpush.xpose.msra.mxu0 %v2521_v1 }
 0x52f   : > { %2535 = vmatpush.xpose.msra.mxu0 %v2520_v7 }
 0x533   : > { %2536 = vmatpush.xpose.msra.mxu0 %v2519_v8 }
 0x537   : > { %2537 = vmatpush.xpose.msra.mxu0 %v2518_v35 }
 0x53b   : > { %2538 = vmatpush.xpose.msra.mxu0 %v2517_v9 }
 0x53f   : > { %2539 = vmatpush.xpose.msra.mxu0 %v2516_v10 }
 0x543   : > { %2540 = vmatpush.xpose.msra.mxu0 %v2515_v11 }
 0x547   : > { %2541 = vmatpush.xpose.msra.mxu0 %v2514_v53 }
 0x54b   : > { %2542 = vmatpush.xpose.msra.mxu0 %v2513_v12 }
 0x54f   : > { %2543 = vmatpush.xpose.msra.mxu0 %v2512_v13 }
 0x552   : > { %2544 = vmatmul.f32.vlgmr.msra.gmra.mxu0 %v3069_v14 }
 0x5cf   : > { %v2545_v15 = vpop.f32.mrf.mxu0 }
 0x5d0   : > { %2548 = vst [vmem:[%s6392_s19] sm:$0x1] %v2545_v15 }
 0x5d1   : > { %3013 = shalt.err (!%p3010_p8)
}
 0x5d2   : > { %2873 = dma.vmem_to_hbm [thread:$0]  (%p3134_p5), %s2561_s7, 16, %s2563_s9, %s2550_s26  }
 0x5d3 PF: > { %s6397_s29 = sld [smem:[#allocation16_spill]] }
 0x5d4   : > { %s6398_s30 = sld [smem:[#allocation13_spill]] }
 0x5d9   : > { %p2885_p9 = scmp.ge.s32.totalorder %s6397_s29, 2 }
 0x5da   : > { %s2574_s8 = sand.u32 1, %s6398_s30  }
 0x5db   : > { %p2880_p10 = pnand %p2885_p9, %p3138_p6  ;;  %s2575_s21 = scalar_lea.sflag [#allocation8], %s2574_s8 }
 0x5dd   : > { %p2881_p11 = pneg %p2880_p10 }
 0x5df   : > { %3041 = dma.done.wait (%p2881_p11), %s2575_s21, 16  }
 0x5e0   : > { %3043 = vsyncadd (%p2881_p11), %s2575_s21, 4294967280  ;;  %s6400_s22 = sld [smem:[#allocation18_spill]] }
 0x5e1   : > { %s6401_s20 = sld [smem:[#allocation14_spill]] }
 0x5e2   : > { %s6402_s21 = sld [smem:[#allocation15_spill]] }
 0x5e3   : > { %s6403_s0 = sld [smem:[#allocation19_spill]] }
 0x5e6   : > { %p27_p12 = scmp.ge.s32.totalorder %s6400_s22, 4  }
 0x5e8   :  { %29 = sbr.rel (!%p27_p12) target bundleno = 12 (0xc), region = 272 }
 0x5ed   :  { %2580 = vsyncpa [#allocation7], 1 }
 0x5ee   :  { %2582 = vsyncpa [#allocation7 + $0x1], 1 }
 0x5ef   :  { %2583 = vsyncpa [#allocation8], 1 }
 0x5f0   :  { %2585 = vsyncpa [#allocation8 + $0x1], 1 }

</bundles_post_ra>
